<compile_context>
chip_gen: v7x
topology: tpu7x:2x2x1
jax: 0.10.0
libtpu: 0.0.40
codegen_flags: <defaults>
</compile_context>

<pallas_src>
import jax
import jax.numpy as jnp
from jax.experimental import pallas as pl
from jax.experimental.pallas import tpu as pltpu


def pointnet_semseg_kernel(x_ref,
                           w1_ref, b1_ref, w2_ref, b2_ref, w3_ref, b3_ref,
                           s1wg_ref, s1wp_ref, s1b_ref,
                           s2w_ref, s2b_ref, s3w_ref, s3b_ref,
                           s4w_ref, s4b_ref,
                           out_ref):
    """One grid step = TB batch elements.  All weights resident in VMEM."""
    tb, n, c_pad = x_ref.shape
    x = x_ref[...].reshape(tb * n, c_pad)                     # (TB*N, 8) bf16

    def linear(h, w_ref, b_ref):
        # bf16 x bf16 MXU matmul with f32 accumulation, f32 bias add.
        return jnp.dot(h, w_ref[...],
                       preferred_element_type=jnp.float32) + b_ref[...]

    def relu_bf16(v):
        return jnp.maximum(v, 0.0).astype(jnp.bfloat16)

    # ---- PointNetEncoder (global_feat=False, transforms disabled) ----
    h1 = relu_bf16(linear(x, w1_ref, b1_ref))                 # (TB*N, 64)  pointfeat
    h2 = relu_bf16(linear(h1, w2_ref, b2_ref))                # (TB*N, 128)
    # Keep the dominant (TB*N, 1024) activation in bf16: rounding is monotone,
    # so max over bf16 equals bf16 of the f32 max, and the global feature is
    # fed to the MXU in bf16 anyway.  Halves the largest live buffer.
    h3 = linear(h2, w3_ref, b3_ref).astype(jnp.bfloat16)      # (TB*N, 1024)
    g = jnp.max(h3.reshape(tb, n, 1024), axis=1)              # (TB, 1024) per-elem max

    # ---- seg conv1, split form ----
    # feat = cat([global(1024), pointfeat(64)]); the global block is a single
    # row per batch element, so its matmul runs once per element and is
    # broadcast-added (bias folded in -> one VPU broadcast add) to the
    # per-point term.
    gb = jnp.dot(g, s1wg_ref[...],
                 preferred_element_type=jnp.float32) + s1b_ref[...]   # (TB, 512)
    s1_pp = jnp.dot(h1, s1wp_ref[...],
                    preferred_element_type=jnp.float32)               # (TB*N, 512)
    s1 = relu_bf16((s1_pp.reshape(tb, n, -1) + gb[:, None, :])
                   .reshape(tb * n, -1))                              # (TB*N, 512)
    s2 = relu_bf16(linear(s1, s2w_ref, s2b_ref))              # (TB*N, 256)
    s3 = relu_bf16(linear(s2, s3w_ref, s3b_ref))              # (TB*N, 128)
    logits = linear(s3, s4w_ref, s4b_ref)                     # (TB*N, Kp) f32

    # log_softmax over classes.  Padded classes carry a -1e30 bias so their
    # exp() is exactly 0 and does not perturb the normalization.
    m = jnp.max(logits, axis=-1, keepdims=True)
    z = logits - m
    lse = jnp.log(jnp.sum(jnp.exp(z), axis=-1, keepdims=True))
    out_ref[...] = (z - lse).reshape(tb, n, -1)


def _pick_tb(B, N):
    """Batch elements per grid step: aim for TB*N >= 512 MXU rows, but keep
    the parallel grid axis >= 2 steps when B allows it (v7x has 2 TCs)."""
    best = 1
    for tb in range(1, B + 1):
        if B % tb:
            continue
        if B >= 2 and (B // tb) < 2:
            continue
        best = tb
        if tb * N >= 512:
            break
    return best


def _vmem_limit_bytes():
    """Per-generation VMEM budget (~3/4 of physical, capped at 100 MiB):
    ~48 MiB on v7x (64 MiB physical), ~96 MiB on v5e/v6e (128 MiB)."""
    try:
        cap = pltpu.get_tpu_info().vmem_capacity_bytes
    except Exception:                      # fall back to the v7x-safe budget
        cap = 64 * 1024 * 1024
    return int(min(100 * 1024 * 1024, (cap * 3) // 4))


def pointnet_semseg(x, params):
    """x: (B, N, 3) float32; params: list of 7 (W[(cin,cout)], b[(cout,)]) f32."""
    B, N, c_in = x.shape
    (w1, b1), (w2, b2), (w3, b3), (sw1, sb1), (sw2, sb2), (sw3, sb3), (sw4, sb4) = params
    K = sb4.shape[0]
    Kp = ((K + 127) // 128) * 128          # lane-dense output width
    TB = _pick_tb(B, N)

    # Pad xyz channels 3 -> 8 (zero rows in w1 make this exact).
    c_pad = 8
    x_p = jnp.pad(x, ((0, 0), (0, 0), (0, c_pad - c_in))).astype(jnp.bfloat16)
    w1_p = jnp.pad(w1, ((0, c_pad - c_in), (0, 0)))

    # Split seg conv1: rows 0:1024 act on the broadcast global feature,
    # rows 1024:1088 act on the per-point features.
    sw1_g, sw1_p = sw1[:1024], sw1[1024:]

    # Pad class dim: zero weight columns, -1e30 bias for padded classes.
    sw4_p = jnp.pad(sw4, ((0, 0), (0, Kp - K)))
    sb4_p = jnp.pad(sb4, (0, Kp - K), constant_values=-1e30)

    bf = jnp.bfloat16
    args = [
        w1_p.astype(bf),  b1.reshape(1, -1),
        w2.astype(bf),    b2.reshape(1, -1),
        w3.astype(bf),    b3.reshape(1, -1),
        sw1_g.astype(bf), sw1_p.astype(bf), sb1.reshape(1, -1),
        sw2.astype(bf),   sb2.reshape(1, -1),
        sw3.astype(bf),   sb3.reshape(1, -1),
        sw4_p.astype(bf), sb4_p.reshape(1, -1),
    ]
    # Constant index_map: every weight/bias block is the full array and is
    # revisit-invariant -> single-buffer (double-buffering buys nothing and
    # would double the resident weight footprint + DMA descriptors).
    weight_specs = [
        pl.BlockSpec(a.shape, lambda bi: (0, 0), pipeline_mode=pl.Buffered(1))
        for a in args
    ]

    out = pl.pallas_call(
        pointnet_semseg_kernel,
        out_shape=jax.ShapeDtypeStruct((B, N, Kp), jnp.float32),
        grid_spec=pltpu.PrefetchScalarGridSpec(
            num_scalar_prefetch=0,
            grid=(B // TB,),
            in_specs=[pl.BlockSpec((TB, N, c_pad), lambda bi: (bi, 0, 0))]
                     + weight_specs,
            out_specs=pl.BlockSpec((TB, N, Kp), lambda bi: (bi, 0, 0)),
        ),
        compiler_params=pltpu.CompilerParams(
            dimension_semantics=("parallel",),        # batch blocks independent
            vmem_limit_bytes=_vmem_limit_bytes(),
        ),
    )(x_p, *args)
    # NOTE: a fused consumer (gather / NLL loss) could read the padded
    # (B, N, Kp) buffer directly and skip this slice, saving HBM traffic.
    return out[..., :K]


# ----------------------------- parameter setup -----------------------------

def _fold_bn(w, b, gamma, beta, mean, var, eps=1e-5):
    """Fold eval-mode BatchNorm1d into a 1x1 conv.  w: (cin,cout), b: (cout,)."""
    scale = gamma / jnp.sqrt(var + eps)
    return w * scale[None, :], (b - mean) * scale + beta


def init_params(key, cls_dim):
    # (c_in, c_out, has_bn) for: encoder conv1..3, seg conv1..4
    layer_defs = [
        (3, 64, True), (64, 128, True), (128, 1024, True),       # encoder
        (1088, 512, True), (512, 256, True), (256, 128, True),   # seg head
        (128, cls_dim, False),                                   # seg conv4
    ]
    params = []
    for (cin, cout, has_bn) in layer_defs:
        key, kw, kb, kg, kbeta, km, kv = jax.random.split(key, 7)
        bound = 1.0 / jnp.sqrt(cin)
        w = jax.random.uniform(kw, (cin, cout), jnp.float32, -bound, bound)
        b = jax.random.uniform(kb, (cout,), jnp.float32, -bound, bound)
        if has_bn:
            gamma = jax.random.uniform(kg, (cout,), jnp.float32, 0.5, 1.5)
            beta = 0.1 * jax.random.normal(kbeta, (cout,), jnp.float32)
            mean = 0.1 * jax.random.normal(km, (cout,), jnp.float32)
            var = jax.random.uniform(kv, (cout,), jnp.float32, 0.5, 1.5)
            w, b = _fold_bn(w, b, gamma, beta, mean, var)
        params.append((w, b))
    return params


# ------------------------------ pure-JAX ref --------------------------------

def ref_forward(x, params):
    """Mirrors the kernel's precision: bf16 inputs/weights, f32 accumulation."""
    (w1, b1), (w2, b2), (w3, b3), (sw1, sb1), (sw2, sb2), (sw3, sb3), (sw4, sb4) = params
    bf = jnp.bfloat16

    def mm(a, w):
        return jnp.dot(a.astype(bf), w.astype(bf),
                       preferred_element_type=jnp.float32)

    B, N, _ = x.shape
    h1 = jax.nn.relu(mm(x, w1) + b1).astype(bf)               # (B, N, 64)
    h2 = jax.nn.relu(mm(h1, w2) + b2).astype(bf)              # (B, N, 128)
    h3 = mm(h2, w3) + b3                                      # (B, N, 1024)
    g = jnp.max(h3, axis=1, keepdims=True)                    # (B, 1, 1024)
    feat = jnp.concatenate(
        [jnp.broadcast_to(g.astype(bf), (B, N, 1024)), h1], axis=-1)
    s1 = jax.nn.relu(mm(feat, sw1) + sb1).astype(bf)
    s2 = jax.nn.relu(mm(s1, sw2) + sb2).astype(bf)
    s3 = jax.nn.relu(mm(s2, sw3) + sb3).astype(bf)
    logits = mm(s3, sw4) + sb4
    return jax.nn.log_softmax(logits, axis=-1)


if __name__ == "__main__":
    B, N, CLS = 4, 128, 16      # -> TB=2 per grid step, grid extent 2

    key = jax.random.PRNGKey(0)
    key, kx = jax.random.split(key)
    x = jax.random.normal(kx, (B, N, 3), jnp.float32)   # (batch, points, xyz)
    params = init_params(key, CLS)

    out = pointnet_semseg(x, params)
    out = jax.block_until_ready(out)

    ref = ref_forward(x, params)
    assert out.shape == (B, N, CLS)
    assert jnp.allclose(out, ref, atol=1e-2, rtol=1e-2), \
        "mismatch vs bf16 pure-JAX reference"

    print("KERNEL_OK")
</pallas_src>

<mosaic_0001>
module attributes {stable_mosaic.version = 11 : i64} {
  func.func @pointnet_semseg_kernel(%arg0: i32, %arg1: memref<2x128x8xbf16, #tpu.memory_space<vmem>>, %arg2: memref<8x64xbf16, #tpu.memory_space<vmem>>, %arg3: memref<1x64xf32, #tpu.memory_space<vmem>>, %arg4: memref<64x128xbf16, #tpu.memory_space<vmem>>, %arg5: memref<1x128xf32, #tpu.memory_space<vmem>>, %arg6: memref<128x1024xbf16, #tpu.memory_space<vmem>>, %arg7: memref<1x1024xf32, #tpu.memory_space<vmem>>, %arg8: memref<1024x512xbf16, #tpu.memory_space<vmem>>, %arg9: memref<64x512xbf16, #tpu.memory_space<vmem>>, %arg10: memref<1x512xf32, #tpu.memory_space<vmem>>, %arg11: memref<512x256xbf16, #tpu.memory_space<vmem>>, %arg12: memref<1x256xf32, #tpu.memory_space<vmem>>, %arg13: memref<256x128xbf16, #tpu.memory_space<vmem>>, %arg14: memref<1x128xf32, #tpu.memory_space<vmem>>, %arg15: memref<128x128xbf16, #tpu.memory_space<vmem>>, %arg16: memref<1x128xf32, #tpu.memory_space<vmem>>, %arg17: memref<2x128x128xf32, #tpu.memory_space<vmem>>) attributes {dimension_semantics = [#tpu.dimension_semantics<parallel>], iteration_bounds = array<i64: 2>, scalar_prefetch = 0 : i64, scratch_operands = 0 : i64, tpu.core_type = #tpu.core_type<tc>, window_params = [{transform_indices = @transform_0, window_bounds = array<i64: 2, 128, 8>}, {pipeline_mode = #tpu.pipeline_mode<synchronous>, transform_indices = @transform_1, window_bounds = array<i64: 8, 64>}, {pipeline_mode = #tpu.pipeline_mode<synchronous>, transform_indices = @transform_2, window_bounds = array<i64: 1, 64>}, {pipeline_mode = #tpu.pipeline_mode<synchronous>, transform_indices = @transform_3, window_bounds = array<i64: 64, 128>}, {pipeline_mode = #tpu.pipeline_mode<synchronous>, transform_indices = @transform_4, window_bounds = array<i64: 1, 128>}, {pipeline_mode = #tpu.pipeline_mode<synchronous>, transform_indices = @transform_5, window_bounds = array<i64: 128, 1024>}, {pipeline_mode = #tpu.pipeline_mode<synchronous>, transform_indices = @transform_6, window_bounds = array<i64: 1, 1024>}, {pipeline_mode = #tpu.pipeline_mode<synchronous>, transform_indices = @transform_7, window_bounds = array<i64: 1024, 512>}, {pipeline_mode = #tpu.pipeline_mode<synchronous>, transform_indices = @transform_8, window_bounds = array<i64: 64, 512>}, {pipeline_mode = #tpu.pipeline_mode<synchronous>, transform_indices = @transform_9, window_bounds = array<i64: 1, 512>}, {pipeline_mode = #tpu.pipeline_mode<synchronous>, transform_indices = @transform_10, window_bounds = array<i64: 512, 256>}, {pipeline_mode = #tpu.pipeline_mode<synchronous>, transform_indices = @transform_11, window_bounds = array<i64: 1, 256>}, {pipeline_mode = #tpu.pipeline_mode<synchronous>, transform_indices = @transform_12, window_bounds = array<i64: 256, 128>}, {pipeline_mode = #tpu.pipeline_mode<synchronous>, transform_indices = @transform_13, window_bounds = array<i64: 1, 128>}, {pipeline_mode = #tpu.pipeline_mode<synchronous>, transform_indices = @transform_14, window_bounds = array<i64: 128, 128>}, {pipeline_mode = #tpu.pipeline_mode<synchronous>, transform_indices = @transform_15, window_bounds = array<i64: 1, 128>}, {transform_indices = @transform_16, window_bounds = array<i64: 2, 128, 128>}]} {
    %c0 = arith.constant 0 : index
    %c0_0 = arith.constant 0 : index
    %c0_1 = arith.constant 0 : index
    %0 = vector.load %arg1[%c0, %c0_0, %c0_1] : memref<2x128x8xbf16, #tpu.memory_space<vmem>>, vector<2x128x8xbf16>
    %1 = vector.shape_cast %0 : vector<2x128x8xbf16> to vector<256x8xbf16>
    %c0_2 = arith.constant 0 : index
    %c0_3 = arith.constant 0 : index
    %2 = vector.load %arg2[%c0_2, %c0_3] : memref<8x64xbf16, #tpu.memory_space<vmem>>, vector<8x64xbf16>
    %cst = arith.constant dense<0.000000e+00> : vector<256x64xf32>
    %3 = tpu.matmul %1, %2, %cst {dimension_numbers = #tpu.dot_dimension_numbers<[1], [0], [0], [1], [0, 0, 1, 1], [], []>} : vector<256x8xbf16>, vector<8x64xbf16>, vector<256x64xf32> -> vector<256x64xf32>
    %c0_4 = arith.constant 0 : index
    %c0_5 = arith.constant 0 : index
    %4 = vector.load %arg3[%c0_4, %c0_5] : memref<1x64xf32, #tpu.memory_space<vmem>>, vector<1x64xf32>
    %5 = vector.broadcast %4 : vector<1x64xf32> to vector<256x64xf32>
    %6 = arith.addf %3, %5 : vector<256x64xf32>
    %cst_6 = arith.constant 0.000000e+00 : f32
    %7 = vector.broadcast %cst_6 : f32 to vector<256x64xf32>
    %8 = arith.maximumf %6, %7 : vector<256x64xf32>
    %9 = arith.truncf %8 : vector<256x64xf32> to vector<256x64xbf16>
    %c0_7 = arith.constant 0 : index
    %c0_8 = arith.constant 0 : index
    %10 = vector.load %arg4[%c0_7, %c0_8] : memref<64x128xbf16, #tpu.memory_space<vmem>>, vector<64x128xbf16>
    %cst_9 = arith.constant dense<0.000000e+00> : vector<256x128xf32>
    %11 = tpu.matmul %9, %10, %cst_9 {dimension_numbers = #tpu.dot_dimension_numbers<[1], [0], [0], [1], [0, 0, 1, 1], [], []>} : vector<256x64xbf16>, vector<64x128xbf16>, vector<256x128xf32> -> vector<256x128xf32>
    %c0_10 = arith.constant 0 : index
    %c0_11 = arith.constant 0 : index
    %12 = vector.load %arg5[%c0_10, %c0_11] : memref<1x128xf32, #tpu.memory_space<vmem>>, vector<1x128xf32>
    %13 = vector.broadcast %12 : vector<1x128xf32> to vector<256x128xf32>
    %14 = arith.addf %11, %13 : vector<256x128xf32>
    %cst_12 = arith.constant 0.000000e+00 : f32
    %15 = vector.broadcast %cst_12 : f32 to vector<256x128xf32>
    %16 = arith.maximumf %14, %15 : vector<256x128xf32>
    %17 = arith.truncf %16 : vector<256x128xf32> to vector<256x128xbf16>
    %c0_13 = arith.constant 0 : index
    %c0_14 = arith.constant 0 : index
    %18 = vector.load %arg6[%c0_13, %c0_14] : memref<128x1024xbf16, #tpu.memory_space<vmem>>, vector<128x1024xbf16>
    %cst_15 = arith.constant dense<0.000000e+00> : vector<256x1024xf32>
    %19 = tpu.matmul %17, %18, %cst_15 {dimension_numbers = #tpu.dot_dimension_numbers<[1], [0], [0], [1], [0, 0, 1, 1], [], []>} : vector<256x128xbf16>, vector<128x1024xbf16>, vector<256x1024xf32> -> vector<256x1024xf32>
    %c0_16 = arith.constant 0 : index
    %c0_17 = arith.constant 0 : index
    %20 = vector.load %arg7[%c0_16, %c0_17] : memref<1x1024xf32, #tpu.memory_space<vmem>>, vector<1x1024xf32>
    %21 = vector.broadcast %20 : vector<1x1024xf32> to vector<256x1024xf32>
    %22 = arith.addf %19, %21 : vector<256x1024xf32>
    %23 = arith.truncf %22 : vector<256x1024xf32> to vector<256x1024xbf16>
    %24 = vector.shape_cast %23 : vector<256x1024xbf16> to vector<2x128x1024xbf16>
    %cst_18 = arith.constant dense<0xFF80> : vector<2x1024xbf16>
    %25 = vector.multi_reduction <maximumf>, %24, %cst_18 [1] : vector<2x128x1024xbf16> to vector<2x1024xbf16>
    %c0_19 = arith.constant 0 : index
    %c0_20 = arith.constant 0 : index
    %26 = vector.load %arg8[%c0_19, %c0_20] : memref<1024x512xbf16, #tpu.memory_space<vmem>>, vector<1024x512xbf16>
    %cst_21 = arith.constant dense<0.000000e+00> : vector<2x512xf32>
    %27 = tpu.matmul %25, %26, %cst_21 {dimension_numbers = #tpu.dot_dimension_numbers<[1], [0], [0], [1], [0, 0, 1, 1], [], []>} : vector<2x1024xbf16>, vector<1024x512xbf16>, vector<2x512xf32> -> vector<2x512xf32>
    %c0_22 = arith.constant 0 : index
    %c0_23 = arith.constant 0 : index
    %28 = vector.load %arg10[%c0_22, %c0_23] : memref<1x512xf32, #tpu.memory_space<vmem>>, vector<1x512xf32>
    %29 = vector.broadcast %28 : vector<1x512xf32> to vector<2x512xf32>
    %30 = arith.addf %27, %29 : vector<2x512xf32>
    %c0_24 = arith.constant 0 : index
    %c0_25 = arith.constant 0 : index
    %31 = vector.load %arg9[%c0_24, %c0_25] : memref<64x512xbf16, #tpu.memory_space<vmem>>, vector<64x512xbf16>
    %cst_26 = arith.constant dense<0.000000e+00> : vector<256x512xf32>
    %32 = tpu.matmul %9, %31, %cst_26 {dimension_numbers = #tpu.dot_dimension_numbers<[1], [0], [0], [1], [0, 0, 1, 1], [], []>} : vector<256x64xbf16>, vector<64x512xbf16>, vector<256x512xf32> -> vector<256x512xf32>
    %33 = vector.shape_cast %32 : vector<256x512xf32> to vector<2x128x512xf32>
    %34 = vector.shape_cast %30 : vector<2x512xf32> to vector<2x1x512xf32>
    %35 = vector.broadcast %34 : vector<2x1x512xf32> to vector<2x128x512xf32>
    %36 = arith.addf %33, %35 : vector<2x128x512xf32>
    %37 = vector.shape_cast %36 : vector<2x128x512xf32> to vector<256x512xf32>
    %cst_27 = arith.constant 0.000000e+00 : f32
    %38 = vector.broadcast %cst_27 : f32 to vector<256x512xf32>
    %39 = arith.maximumf %37, %38 : vector<256x512xf32>
    %40 = arith.truncf %39 : vector<256x512xf32> to vector<256x512xbf16>
    %c0_28 = arith.constant 0 : index
    %c0_29 = arith.constant 0 : index
    %41 = vector.load %arg11[%c0_28, %c0_29] : memref<512x256xbf16, #tpu.memory_space<vmem>>, vector<512x256xbf16>
    %cst_30 = arith.constant dense<0.000000e+00> : vector<256x256xf32>
    %42 = tpu.matmul %40, %41, %cst_30 {dimension_numbers = #tpu.dot_dimension_numbers<[1], [0], [0], [1], [0, 0, 1, 1], [], []>} : vector<256x512xbf16>, vector<512x256xbf16>, vector<256x256xf32> -> vector<256x256xf32>
    %c0_31 = arith.constant 0 : index
    %c0_32 = arith.constant 0 : index
    %43 = vector.load %arg12[%c0_31, %c0_32] : memref<1x256xf32, #tpu.memory_space<vmem>>, vector<1x256xf32>
    %44 = vector.broadcast %43 : vector<1x256xf32> to vector<256x256xf32>
    %45 = arith.addf %42, %44 : vector<256x256xf32>
    %cst_33 = arith.constant 0.000000e+00 : f32
    %46 = vector.broadcast %cst_33 : f32 to vector<256x256xf32>
    %47 = arith.maximumf %45, %46 : vector<256x256xf32>
    %48 = arith.truncf %47 : vector<256x256xf32> to vector<256x256xbf16>
    %c0_34 = arith.constant 0 : index
    %c0_35 = arith.constant 0 : index
    %49 = vector.load %arg13[%c0_34, %c0_35] : memref<256x128xbf16, #tpu.memory_space<vmem>>, vector<256x128xbf16>
    %cst_36 = arith.constant dense<0.000000e+00> : vector<256x128xf32>
    %50 = tpu.matmul %48, %49, %cst_36 {dimension_numbers = #tpu.dot_dimension_numbers<[1], [0], [0], [1], [0, 0, 1, 1], [], []>} : vector<256x256xbf16>, vector<256x128xbf16>, vector<256x128xf32> -> vector<256x128xf32>
    %c0_37 = arith.constant 0 : index
    %c0_38 = arith.constant 0 : index
    %51 = vector.load %arg14[%c0_37, %c0_38] : memref<1x128xf32, #tpu.memory_space<vmem>>, vector<1x128xf32>
    %52 = vector.broadcast %51 : vector<1x128xf32> to vector<256x128xf32>
    %53 = arith.addf %50, %52 : vector<256x128xf32>
    %cst_39 = arith.constant 0.000000e+00 : f32
    %54 = vector.broadcast %cst_39 : f32 to vector<256x128xf32>
    %55 = arith.maximumf %53, %54 : vector<256x128xf32>
    %56 = arith.truncf %55 : vector<256x128xf32> to vector<256x128xbf16>
    %c0_40 = arith.constant 0 : index
    %c0_41 = arith.constant 0 : index
    %57 = vector.load %arg15[%c0_40, %c0_41] : memref<128x128xbf16, #tpu.memory_space<vmem>>, vector<128x128xbf16>
    %cst_42 = arith.constant dense<0.000000e+00> : vector<256x128xf32>
    %58 = tpu.matmul %56, %57, %cst_42 {dimension_numbers = #tpu.dot_dimension_numbers<[1], [0], [0], [1], [0, 0, 1, 1], [], []>} : vector<256x128xbf16>, vector<128x128xbf16>, vector<256x128xf32> -> vector<256x128xf32>
    %c0_43 = arith.constant 0 : index
    %c0_44 = arith.constant 0 : index
    %59 = vector.load %arg16[%c0_43, %c0_44] : memref<1x128xf32, #tpu.memory_space<vmem>>, vector<1x128xf32>
    %60 = vector.broadcast %59 : vector<1x128xf32> to vector<256x128xf32>
    %61 = arith.addf %58, %60 : vector<256x128xf32>
    %cst_45 = arith.constant dense<0xFF800000> : vector<256xf32>
    %62 = vector.multi_reduction <maximumf>, %61, %cst_45 [1] : vector<256x128xf32> to vector<256xf32>
    %63 = vector.shape_cast %62 : vector<256xf32> to vector<256x1xf32>
    %64 = vector.broadcast %63 : vector<256x1xf32> to vector<256x128xf32>
    %65 = arith.subf %61, %64 : vector<256x128xf32>
    %66 = math.exp %65 : vector<256x128xf32>
    %cst_46 = arith.constant dense<0.000000e+00> : vector<256xf32>
    %67 = vector.multi_reduction <add>, %66, %cst_46 [1] : vector<256x128xf32> to vector<256xf32>
    %68 = vector.shape_cast %67 : vector<256xf32> to vector<256x1xf32>
    %69 = math.log %68 : vector<256x1xf32>
    %70 = vector.broadcast %69 : vector<256x1xf32> to vector<256x128xf32>
    %71 = arith.subf %65, %70 : vector<256x128xf32>
    %72 = vector.shape_cast %71 : vector<256x128xf32> to vector<2x128x128xf32>
    %c0_47 = arith.constant 0 : index
    %c0_48 = arith.constant 0 : index
    %c0_49 = arith.constant 0 : index
    %73 = vector.load %arg17[%c0_47, %c0_48, %c0_49] : memref<2x128x128xf32, #tpu.memory_space<vmem>>, vector<2x128x128xf32>
    tpu.vector_store %arg17[%c0_47, %c0_48, %c0_49], %72 {strides = array<i32>} : memref<2x128x128xf32, #tpu.memory_space<vmem>>, vector<2x128x128xf32>,
    return
  }
  func.func @transform_0(%arg0: i32) -> (i32, i32, i32) {
    %c0_i32 = arith.constant 0 : i32
    %c0_i32_0 = arith.constant 0 : i32
    %c0_i32_1 = arith.constant 0 : i32
    return %arg0, %c0_i32, %c0_i32_0 : i32, i32, i32
  }
  func.func @transform_1(%arg0: i32) -> (i32, i32) {
    %c0_i32 = arith.constant 0 : i32
    %c0_i32_0 = arith.constant 0 : i32
    %c0_i32_1 = arith.constant 0 : i32
    return %c0_i32, %c0_i32_0 : i32, i32
  }
  func.func @transform_2(%arg0: i32) -> (i32, i32) {
    %c0_i32 = arith.constant 0 : i32
    %c0_i32_0 = arith.constant 0 : i32
    %c0_i32_1 = arith.constant 0 : i32
    return %c0_i32, %c0_i32_0 : i32, i32
  }
  func.func @transform_3(%arg0: i32) -> (i32, i32) {
    %c0_i32 = arith.constant 0 : i32
    %c0_i32_0 = arith.constant 0 : i32
    %c0_i32_1 = arith.constant 0 : i32
    return %c0_i32, %c0_i32_0 : i32, i32
  }
  func.func @transform_4(%arg0: i32) -> (i32, i32) {
    %c0_i32 = arith.constant 0 : i32
    %c0_i32_0 = arith.constant 0 : i32
    %c0_i32_1 = arith.constant 0 : i32
    return %c0_i32, %c0_i32_0 : i32, i32
  }
  func.func @transform_5(%arg0: i32) -> (i32, i32) {
    %c0_i32 = arith.constant 0 : i32
    %c0_i32_0 = arith.constant 0 : i32
    %c0_i32_1 = arith.constant 0 : i32
    return %c0_i32, %c0_i32_0 : i32, i32
  }
  func.func @transform_6(%arg0: i32) -> (i32, i32) {
    %c0_i32 = arith.constant 0 : i32
    %c0_i32_0 = arith.constant 0 : i32
    %c0_i32_1 = arith.constant 0 : i32
    return %c0_i32, %c0_i32_0 : i32, i32
  }
  func.func @transform_7(%arg0: i32) -> (i32, i32) {
    %c0_i32 = arith.constant 0 : i32
    %c0_i32_0 = arith.constant 0 : i32
    %c0_i32_1 = arith.constant 0 : i32
    return %c0_i32, %c0_i32_0 : i32, i32
  }
  func.func @transform_8(%arg0: i32) -> (i32, i32) {
    %c0_i32 = arith.constant 0 : i32
    %c0_i32_0 = arith.constant 0 : i32
    %c0_i32_1 = arith.constant 0 : i32
    return %c0_i32, %c0_i32_0 : i32, i32
  }
  func.func @transform_9(%arg0: i32) -> (i32, i32) {
    %c0_i32 = arith.constant 0 : i32
    %c0_i32_0 = arith.constant 0 : i32
    %c0_i32_1 = arith.constant 0 : i32
    return %c0_i32, %c0_i32_0 : i32, i32
  }
  func.func @transform_10(%arg0: i32) -> (i32, i32) {
    %c0_i32 = arith.constant 0 : i32
    %c0_i32_0 = arith.constant 0 : i32
    %c0_i32_1 = arith.constant 0 : i32
    return %c0_i32, %c0_i32_0 : i32, i32
  }
  func.func @transform_11(%arg0: i32) -> (i32, i32) {
    %c0_i32 = arith.constant 0 : i32
    %c0_i32_0 = arith.constant 0 : i32
    %c0_i32_1 = arith.constant 0 : i32
    return %c0_i32, %c0_i32_0 : i32, i32
  }
  func.func @transform_12(%arg0: i32) -> (i32, i32) {
    %c0_i32 = arith.constant 0 : i32
    %c0_i32_0 = arith.constant 0 : i32
    %c0_i32_1 = arith.constant 0 : i32
    return %c0_i32, %c0_i32_0 : i32, i32
  }
  func.func @transform_13(%arg0: i32) -> (i32, i32) {
    %c0_i32 = arith.constant 0 : i32
    %c0_i32_0 = arith.constant 0 : i32
    %c0_i32_1 = arith.constant 0 : i32
    return %c0_i32, %c0_i32_0 : i32, i32
  }
  func.func @transform_14(%arg0: i32) -> (i32, i32) {
    %c0_i32 = arith.constant 0 : i32
    %c0_i32_0 = arith.constant 0 : i32
    %c0_i32_1 = arith.constant 0 : i32
    return %c0_i32, %c0_i32_0 : i32, i32
  }
  func.func @transform_15(%arg0: i32) -> (i32, i32) {
    %c0_i32 = arith.constant 0 : i32
    %c0_i32_0 = arith.constant 0 : i32
    %c0_i32_1 = arith.constant 0 : i32
    return %c0_i32, %c0_i32_0 : i32, i32
  }
  func.func @transform_16(%arg0: i32) -> (i32, i32, i32) {
    %c0_i32 = arith.constant 0 : i32
    %c0_i32_0 = arith.constant 0 : i32
    %c0_i32_1 = arith.constant 0 : i32
    return %arg0, %c0_i32, %c0_i32_0 : i32, i32, i32
  }
}

</mosaic_0001>

<bundles_post_ra>
// kernel: tpu_custom_call.1
= control target key start
LH: loop header
LB: loop body
LE: loop exit
PB: predicated region body
PF: predicated region fallthrough
CT: control target
= control target key end

     0   :  { %s12014_s0 = inlined_call_operand.vmem [shape: bf16[4,128,8], index: 0, kind: input, shape index: {}]   ;;  %s12015_s1 = inlined_call_operand.hbm [shape: bf16[8,64], index: 1, kind: input, shape index: {}]   ;;  %s12016_s2 = inlined_call_operand.vmem [shape: f32[1,64], index: 2, kind: input, shape index: {}]   ;;  %s12017_s3 = inlined_call_operand.hbm [shape: bf16[64,128], index: 3, kind: input, shape index: {}]   ;;  %s12018_s4 = inlined_call_operand.hbm [shape: f32[1,128], index: 4, kind: input, shape index: {}]   ;;  %s12019_s5 = inlined_call_operand.hbm [shape: bf16[128,1024], index: 5, kind: input, shape index: {}]   ;;  %s12020_s6 = inlined_call_operand.hbm [shape: f32[1,1024], index: 6, kind: input, shape index: {}]   ;;  %s12021_s7 = inlined_call_operand.hbm [shape: bf16[1024,512], index: 7, kind: input, shape index: {}]   ;;  %s12022_s8 = inlined_call_operand.vmem [shape: bf16[64,512], index: 8, kind: input, shape index: {}]   ;;  %s12023_s9 = inlined_call_operand.hbm [shape: f32[1,512], index: 9, kind: input, shape index: {}]   ;;  %s12024_s10 = inlined_call_operand.hbm [shape: bf16[512,256], index: 10, kind: input, shape index: {}]   ;;  %s12025_s11 = inlined_call_operand.hbm [shape: f32[1,256], index: 11, kind: input, shape index: {}]   ;;  %s12026_s12 = inlined_call_operand.vmem [shape: bf16[256,128], index: 12, kind: input, shape index: {}]   ;;  %s12027_s13 = inlined_call_operand.hbm [shape: f32[1,128], index: 13, kind: input, shape index: {}]   ;;  %s12028_s14 = inlined_call_operand.vmem [shape: bf16[128,128], index: 14, kind: input, shape index: {}]   ;;  %s12029_s15 = inlined_call_operand.vmem [shape: f32[1,128], index: 15, kind: input, shape index: {}]   ;;  %s12030_s16 = inlined_call_operand.hbm [shape: f32[4,128,128], index: 16, kind: output, shape index: {}]  }
   0x1   :  { %12052 = sst [smem:[#allocation38_spill]] %s12014_s0 }
   0x2   :  { %12053 = sst [smem:[#allocation39_spill]] %s12017_s3 }
   0x3   :  { %12054 = sst [smem:[#allocation40_spill]] %s12029_s15 }
   0x4   :  { %12055 = sst [smem:[#allocation41_spill]] %s12030_s16 }
   0x5   :  { %21 = vsyncpa [#allocation3], 0 }
   0x6   :  { %22 = vsyncpa [#allocation6], 0 }
   0x7   :  { %23 = vsyncpa [#allocation9], 0 }
   0x8   :  { %24 = vsyncpa [#allocation12], 0 }
   0x9   :  { %25 = vsyncpa [#allocation15], 0 }
   0xa   :  { %26 = vsyncpa [#allocation18], 0 }
   0xb   :  { %27 = vsyncpa [#allocation4], 0 }
   0xc   :  { %29 = vsyncpa [#allocation4 + $0x1], 0  ;;  %s10048_s21 = smov 0   ;;  %s10050_s22 = smov 0  }
   0xd   :  { %s10052_s23 = smov 0   ;;  %s10054_s24 = smov 0  }
   0xe LB: > { %12056 = sst [smem:[#allocation27_spill]] %s9926_s21  ;;  %s10069_s25 = sadd.s32 4294967295, %s9938_s24   ;;  %s9938_s24 = sphi %s10054_s24, %s12100_s24   ;;  %s9934_s23 = sphi %s10052_s23, %s12103_s23   ;;  %s9930_s22 = sphi %s10050_s22, %s12102_s22   ;;  %s9926_s21 = sphi %s10048_s21, %s12101_s21  }
   0xf   : > { %12057 = sst [smem:[#allocation28_spill]] %s9930_s22  ;;  %s7740_s26 = sadd.s32 4294967294, %s9938_s24  }
  0x10   : > { %12058 = sst [smem:[#allocation29_spill]] %s9934_s23  ;;  %s10073_s27 = sadd.s32 1, %s9938_s24  }
  0x11   : > { %12059 = sst [smem:[#allocation30_spill]] %s9938_s24  ;;  %s383_s28 = sadd.s32 1, %s9934_s23 }
  0x12   : > { %12060 = sst [smem:[#allocation31_spill]] %s10073_s27  ;;  %s380_s29 = ssub.s32 %s9938_s24, %s10073_s27 }
  0x13   : > { %p393_p0 = scmp.ne.s32.totalorder %s9934_s23, %s9930_s22  ;;  %p381_p1 = scmp.eq.s32.totalorder %s380_s29, 0 }
  0x14   : > { %p394_p2 = scmp.eq.s32.totalorder %s10069_s25, 1  ;;  %p399_p3 = scmp.ne.s32.totalorder %s9930_s22, %s9926_s21 }
  0x15   : > { %p400_p4 = scmp.eq.s32.totalorder %s7740_s26, 1  ;;  %p7741_p7 = scmp.ge.s32.totalorder %s9938_s24, 1 }
  0x16   : > { %s10084_s30 = scalar_select %p381_p1, %s9934_s23, %s383_s28  }
  0x17   : > { %p10086_p5 = por %p394_p2, %p393_p0  ;;  %p10090_p6 = por %p400_p4, %p399_p3 }
  0x18   : > { %12061 = sst [smem:[#allocation32_spill]] %s10084_s30  ;;  %p407_p8 = scmp.lt.s32.totalorder %s9938_s24, 3 }
  0x19   : > { %s12062_s0 = scalar_select %p10086_p5, 1, 0 }
  0x1a   : > { %s12064_s17 = scalar_select %p10090_p6, 1, 0 }
  0x1b   : > { %12063 = sst [smem:[#allocation33_spill]] %s12062_s0  ;;  %p12037_p9 = scmp.eq.s32.totalorder %s10069_s25, 0 }
  0x1c   : > { %12065 = sst [smem:[#allocation34_spill]] %s12064_s17  ;;  %p10097_p10 = pnand %p7741_p7, %p407_p8 }
  0x1d   : > { %s9940_s19 = smov [#allocation5]   ;;  %s9941_s28 = smov [#allocation8]  }
  0x1e   : > { %s12066_s18 = scalar_select %p10097_p10, 1, 0 }
  0x1f   : > { %s433_s20 = sshll.u32 %s9940_s19, 4  ;;  %p8786_p11 = pneg %p10097_p10  ;;  %s434_s20 = int_to_ptr.vmem [resolvable:$true] %s433_s20 }
  0x20   : > { %s457_s29 = sshll.u32 %s9941_s28, 4  ;;  %s12068_s3 = sld [smem:[#allocation39_spill]]  ;;  %s10109_s29 = int_to_ptr.vmem [resolvable:$true] %s457_s29 }
  0x21   : > { %p10105_p12 = pnand %p12037_p9, %p8786_p11 }
  0x23   : > { %p10119_p0 = pneg %p10105_p12 }
  0x26   : > { %s9572_s27 = scalar_lea.hbm %s12068_s3, 512 }
  0x27   : > { %p9573_p13 = scmp.ne.s32.totalorder %s12068_s3, %s9572_s27  ;;  %p9579_p3 = scmp.lt.u32.totalorder %s9572_s27, %s12068_s3 }
  0x29   : > { %p9575_p1 = pnand %p10119_p0, %p9573_p13 }
  0x2b   : > { %p9576_p2 = pneg %p9575_p1 }
  0x2d   : > { %p9581_p4 = pnand %p9579_p3, %p9576_p2 }
  0x2f   : > { %9584 = shalt.err (!%p9581_p4)
}
  0x30   : > { %s9585_s23 = scalar_lea.vmem %s434_s20, 512  ;;  %p9593_p9 = scmp.lt.s32.totalorder %s434_s20, %s434_s20 }
  0x31   : > { %p9586_p7 = scmp.ne.s32.totalorder %s434_s20, %s9585_s23  ;;  %p9594_p6 = scmp.lt.s32.totalorder %s9585_s23, %s9585_s23 }
  0x33   : > { %p9588_p8 = pnand %p9586_p7, %p10119_p0  ;;  %p9595_p5 = por %p9594_p6, %p9593_p9 }
  0x35   : > { %p9589_p11 = pneg %p9588_p8 }
  0x37   : > { %p9596_p10 = pnand %p9595_p5, %p9589_p11 }
  0x39   : > { %9599 = shalt.err (!%p9596_p10)
}
  0x3a   : > { %s9942_s21 = smov 64   ;;  %s9943_s30 = smov 4  }
  0x3b   : > { %8792 = dma.hbm_to_vmem [thread:$0]  (!%p10105_p12), %s12068_s3, 512, %s434_s20, [#allocation6], %s9942_s21, %s9942_s21, %s9943_s30  }
  0x3c   : > { %s9600_s16 = scalar_lea.hbm %s12019_s5, 8192 }
  0x3d   : > { %p9601_p13 = scmp.ne.s32.totalorder %s12019_s5, %s9600_s16  ;;  %p9607_p9 = scmp.lt.u32.totalorder %s9600_s16, %s12019_s5 }
  0x3f   : > { %p9603_p5 = pnand %p9601_p13, %p10119_p0 }
  0x41   : > { %p9604_p6 = pneg %p9603_p5 }
  0x43   : > { %p9609_p10 = pnand %p9607_p9, %p9604_p6 }
  0x45   : > { %9612 = shalt.err (!%p9609_p10)
}
  0x46   : > { %s9613_s20 = scalar_lea.vmem %s10109_s29, 8192  ;;  %p9621_p4 = scmp.lt.s32.totalorder %s10109_s29, %s10109_s29 }
  0x47   : > { %p9614_p1 = scmp.ne.s32.totalorder %s10109_s29, %s9613_s20  ;;  %p9622_p7 = scmp.lt.s32.totalorder %s9613_s20, %s9613_s20 }
  0x49   : > { %p9616_p2 = pnand %p9614_p1, %p10119_p0  ;;  %p9623_p8 = por %p9622_p7, %p9621_p4 }
  0x4b   : > { %p9617_p3 = pneg %p9616_p2 }
  0x4d   : > { %p9624_p11 = pnand %p9623_p8, %p9617_p3 }
  0x4f   : > { %9627 = shalt.err (!%p9624_p11)
}
  0x50   : > { %s9944_s22 = smov 512   ;;  %s9945_s15 = smov 32  }
  0x51   : > { %8798 = dma.hbm_to_vmem [thread:$0]  (!%p10105_p12), %s12019_s5, 8192, %s10109_s29, [#allocation9], %s9944_s22, %s9944_s22, %s9945_s15  }
  0x52   : > { %s9946_s21 = smov [#allocation11]   ;;  %s9628_s17 = scalar_lea.hbm %s12021_s7, 32768 }
  0x53   : > { %s481_s30 = sshll.u32 %s9946_s21, 4  ;;  %p9629_p13 = scmp.ne.s32.totalorder %s12021_s7, %s9628_s17  ;;  %s482_s30 = int_to_ptr.vmem [resolvable:$true] %s481_s30 }
  0x54   : > { %p9635_p9 = scmp.lt.u32.totalorder %s9628_s17, %s12021_s7 }
  0x55   : > { %p9631_p5 = pnand %p9629_p13, %p10119_p0 }
  0x57   : > { %p9632_p6 = pneg %p9631_p5 }
  0x59   : > { %p9637_p10 = pnand %p9635_p9, %p9632_p6 }
  0x5b   : > { %9640 = shalt.err (!%p9637_p10)
}
  0x5c   : > { %s9641_s29 = scalar_lea.vmem %s482_s30, 32768  ;;  %p9649_p4 = scmp.lt.s32.totalorder %s482_s30, %s482_s30 }
  0x5d   : > { %p9642_p1 = scmp.ne.s32.totalorder %s482_s30, %s9641_s29  ;;  %p9650_p7 = scmp.lt.s32.totalorder %s9641_s29, %s9641_s29 }
  0x5f   : > { %p9644_p2 = pnand %p9642_p1, %p10119_p0  ;;  %p9651_p8 = por %p9650_p7, %p9649_p4 }
  0x61   : > { %p9645_p3 = pneg %p9644_p2 }
  0x63   : > { %p9652_p11 = pnand %p9651_p8, %p9645_p3 }
  0x65   : > { %9655 = shalt.err (!%p9652_p11)
}
  0x66   : > { %s9947_s22 = smov 256   ;;  %s9948_s15 = smov 16  }
  0x67   : > { %8804 = dma.hbm_to_vmem [thread:$0]  (!%p10105_p12), %s12021_s7, 32768, %s482_s30, [#allocation12], %s9947_s22, %s9947_s22, %s9948_s15  }
  0x68   : > { %s9949_s0 = smov [#allocation14]   ;;  %s9656_s17 = scalar_lea.hbm %s12024_s10, 8192 }
  0x69   : > { %s508_s21 = sshll.u32 %s9949_s0, 4  ;;  %p9657_p13 = scmp.ne.s32.totalorder %s12024_s10, %s9656_s17  ;;  %s509_s21 = int_to_ptr.vmem [resolvable:$true] %s508_s21 }
  0x6a   : > { %p9663_p9 = scmp.lt.u32.totalorder %s9656_s17, %s12024_s10 }
  0x6b   : > { %p9659_p5 = pnand %p9657_p13, %p10119_p0 }
  0x6d   : > { %p9660_p6 = pneg %p9659_p5 }
  0x6f   : > { %p9665_p10 = pnand %p9663_p9, %p9660_p6 }
  0x71   : > { %9668 = shalt.err (!%p9665_p10)
}
  0x72   : > { %s9669_s30 = scalar_lea.vmem %s509_s21, 8192  ;;  %p9677_p4 = scmp.lt.s32.totalorder %s509_s21, %s509_s21 }
  0x73   : > { %p9670_p1 = scmp.ne.s32.totalorder %s509_s21, %s9669_s30  ;;  %p9678_p7 = scmp.lt.s32.totalorder %s9669_s30, %s9669_s30 }
  0x75   : > { %p9672_p2 = pnand %p9670_p1, %p10119_p0  ;;  %p9679_p8 = por %p9678_p7, %p9677_p4 }
  0x77   : > { %p9673_p3 = pneg %p9672_p2 }
  0x79   : > { %p9680_p11 = pnand %p9679_p8, %p9673_p3 }
  0x7b   : > { %9683 = shalt.err (!%p9680_p11)
}
  0x7c   : > { %s9950_s22 = smov 128   ;;  %s9951_s15 = smov 8  }
  0x7d   : > { %8810 = dma.hbm_to_vmem [thread:$0]  (!%p10105_p12), %s12024_s10, 8192, %s509_s21, [#allocation15], %s9950_s22, %s9950_s22, %s9951_s15  }
  0x7e   : > { %s9952_s0 = smov [#allocation2]   ;;  %s9953_s27 = smov [#allocation7]  }
  0x7f   : > { %s420_s24 = sshll.u32 %s9952_s0, 4  ;;  %s447_s17 = sshll.u32 %s9953_s27, 4  ;;  %s421_s24 = int_to_ptr.vmem [resolvable:$true] %s420_s24  ;;  %s10194_s17 = int_to_ptr.vmem [resolvable:$true] %s447_s17 }
  0x80   : > { %s9684_s20 = scalar_lea.hbm %s12015_s1, 64 }
  0x81   : > { %p9685_p13 = scmp.ne.s32.totalorder %s12015_s1, %s9684_s20  ;;  %p9691_p9 = scmp.lt.u32.totalorder %s9684_s20, %s12015_s1 }
  0x83   : > { %p9687_p5 = pnand %p9685_p13, %p10119_p0 }
  0x85   : > { %p9688_p6 = pneg %p9687_p5 }
  0x87   : > { %p9693_p10 = pnand %p9691_p9, %p9688_p6 }
  0x89   : > { %9696 = shalt.err (!%p9693_p10)
}
  0x8a   : > { %s9697_s22 = scalar_lea.vmem %s421_s24, 64  ;;  %p9705_p4 = scmp.lt.s32.totalorder %s421_s24, %s421_s24 }
  0x8b   : > { %p9698_p1 = scmp.ne.s32.totalorder %s421_s24, %s9697_s22  ;;  %p9706_p7 = scmp.lt.s32.totalorder %s9697_s22, %s9697_s22 }
  0x8d   : > { %p9700_p2 = pnand %p9698_p1, %p10119_p0  ;;  %p9707_p8 = por %p9706_p7, %p9705_p4 }
  0x8f   : > { %p9701_p3 = pneg %p9700_p2 }
  0x91   : > { %p9708_p11 = pnand %p9707_p8, %p9701_p3 }
  0x93   : > { %9711 = shalt.err (!%p9708_p11)
}
  0x94   : > { %8789 = dma.hbm_to_vmem [thread:$0]  (!%p10105_p12), %s12015_s1, 64, %s421_s24, [#allocation3]  }
  0x95   : > { %s9712_s28 = scalar_lea.hbm %s12018_s4, 16 }
  0x96   : > { %p9713_p13 = scmp.ne.s32.totalorder %s12018_s4, %s9712_s28  ;;  %p9719_p9 = scmp.lt.u32.totalorder %s9712_s28, %s12018_s4 }
  0x98   : > { %p9715_p5 = pnand %p9713_p13, %p10119_p0 }
  0x9a   : > { %p9716_p6 = pneg %p9715_p5 }
  0x9c   : > { %p9721_p10 = pnand %p9719_p9, %p9716_p6 }
  0x9e   : > { %9724 = shalt.err (!%p9721_p10)
}
  0x9f   : > { %s9725_s24 = scalar_lea.vmem %s10194_s17, 16  ;;  %s9732_s3 = scalar_lea.vmem %s10194_s17, 32 }
  0xa0   : > { %p9726_p1 = scmp.ne.s32.totalorder %s10194_s17, %s9725_s24  ;;  %p9733_p4 = scmp.lt.s32.totalorder %s10194_s17, %s10194_s17 }
  0xa1   : > { %p9734_p7 = scmp.lt.s32.totalorder %s9732_s3, %s9725_s24 }
  0xa2   : > { %p9728_p2 = pnand %p9726_p1, %p10119_p0 }
  0xa3   : > { %p9735_p8 = por %p9734_p7, %p9733_p4 }
  0xa4   : > { %p9729_p3 = pneg %p9728_p2 }
  0xa6   : > { %p9736_p11 = pnand %p9735_p8, %p9729_p3 }
  0xa8   : > { %9739 = shalt.err (!%p9736_p11)
}
  0xa9   : > { %8795 = dma.hbm_to_vmem [thread:$0]  (!%p10105_p12), %s12018_s4, 16, %s10194_s17, [#allocation6]  }
  0xaa   : > { %s9954_s15 = smov [#allocation10]   ;;  %s9955_s0 = smov [#allocation13]  }
  0xab   : > { %s471_s16 = sshll.u32 %s9954_s15, 4  ;;  %s498_s27 = sshll.u32 %s9955_s0, 4  ;;  %s472_s16 = int_to_ptr.vmem [resolvable:$true] %s471_s16  ;;  %s10238_s27 = int_to_ptr.vmem [resolvable:$true] %s498_s27 }
  0xac   : > { %s9740_s20 = scalar_lea.hbm %s12020_s6, 128 }
  0xad   : > { %p9741_p13 = scmp.ne.s32.totalorder %s12020_s6, %s9740_s20  ;;  %p9747_p9 = scmp.lt.u32.totalorder %s9740_s20, %s12020_s6 }
  0xaf   : > { %p9743_p5 = pnand %p9741_p13, %p10119_p0 }
  0xb1   : > { %p9744_p6 = pneg %p9743_p5 }
  0xb3   : > { %p9749_p10 = pnand %p9747_p9, %p9744_p6 }
  0xb5   : > { %9752 = shalt.err (!%p9749_p10)
}
  0xb6   : > { %s9753_s3 = scalar_lea.vmem %s472_s16, 128  ;;  %p9761_p4 = scmp.lt.s32.totalorder %s472_s16, %s472_s16 }
  0xb7   : > { %p9754_p1 = scmp.ne.s32.totalorder %s472_s16, %s9753_s3  ;;  %p9762_p7 = scmp.lt.s32.totalorder %s9753_s3, %s9753_s3 }
  0xb9   : > { %p9756_p2 = pnand %p9754_p1, %p10119_p0  ;;  %p9763_p8 = por %p9762_p7, %p9761_p4 }
  0xbb   : > { %p9757_p3 = pneg %p9756_p2 }
  0xbd   : > { %p9764_p11 = pnand %p9763_p8, %p9757_p3 }
  0xbf   : > { %9767 = shalt.err (!%p9764_p11)
}
  0xc0   : > { %8801 = dma.hbm_to_vmem [thread:$0]  (!%p10105_p12), %s12020_s6, 128, %s472_s16, [#allocation9]  }
  0xc1   : > { %s9768_s28 = scalar_lea.hbm %s12023_s9, 64 }
  0xc2   : > { %p9769_p13 = scmp.ne.s32.totalorder %s12023_s9, %s9768_s28  ;;  %p9775_p9 = scmp.lt.u32.totalorder %s9768_s28, %s12023_s9 }
  0xc4   : > { %p9771_p5 = pnand %p9769_p13, %p10119_p0 }
  0xc6   : > { %p9772_p6 = pneg %p9771_p5 }
  0xc8   : > { %p9777_p10 = pnand %p9775_p9, %p9772_p6 }
  0xca   : > { %9780 = shalt.err (!%p9777_p10)
}
  0xcb   : > { %s9781_s16 = scalar_lea.vmem %s10238_s27, 64  ;;  %p9789_p4 = scmp.lt.s32.totalorder %s10238_s27, %s10238_s27 }
  0xcc   : > { %p9782_p1 = scmp.ne.s32.totalorder %s10238_s27, %s9781_s16  ;;  %p9790_p7 = scmp.lt.s32.totalorder %s9781_s16, %s9781_s16 }
  0xce   : > { %p9784_p2 = pnand %p9782_p1, %p10119_p0  ;;  %p9791_p8 = por %p9790_p7, %p9789_p4 }
  0xd0   : > { %p9785_p3 = pneg %p9784_p2 }
  0xd2   : > { %p9792_p11 = pnand %p9791_p8, %p9785_p3 }
  0xd4   : > { %9795 = shalt.err (!%p9792_p11)
}
  0xd5   : > { %8807 = dma.hbm_to_vmem [thread:$0]  (!%p10105_p12), %s12023_s9, 64, %s10238_s27, [#allocation12]  }
  0xd6   : > { %s9956_s3 = smov [#allocation16]   ;;  %s9957_s22 = smov [#allocation17]  }
  0xd7   : > { %s522_s21 = sshll.u32 %s9956_s3, 4  ;;  %s536_s15 = sshll.u32 %s9957_s22, 4  ;;  %s523_s21 = int_to_ptr.vmem [resolvable:$true] %s522_s21  ;;  %s10281_s15 = int_to_ptr.vmem [resolvable:$true] %s536_s15 }
  0xd8   : > { %s9796_s23 = scalar_lea.hbm %s12025_s11, 32 }
  0xd9   : > { %p9797_p13 = scmp.ne.s32.totalorder %s12025_s11, %s9796_s23  ;;  %p9803_p9 = scmp.lt.u32.totalorder %s9796_s23, %s12025_s11 }
  0xdb   : > { %p9799_p5 = pnand %p9797_p13, %p10119_p0 }
  0xdd   : > { %p9800_p6 = pneg %p9799_p5 }
  0xdf   : > { %p9805_p10 = pnand %p9803_p9, %p9800_p6 }
  0xe1   : > { %9808 = shalt.err (!%p9805_p10)
}
  0xe2   : > { %s9809_s16 = scalar_lea.vmem %s523_s21, 32  ;;  %p9817_p4 = scmp.lt.s32.totalorder %s523_s21, %s523_s21 }
  0xe3   : > { %p9810_p1 = scmp.ne.s32.totalorder %s523_s21, %s9809_s16  ;;  %p9818_p7 = scmp.lt.s32.totalorder %s9809_s16, %s9809_s16 }
  0xe5   : > { %p9812_p2 = pnand %p9810_p1, %p10119_p0  ;;  %p9819_p8 = por %p9818_p7, %p9817_p4 }
  0xe7   : > { %p9813_p3 = pneg %p9812_p2 }
  0xe9   : > { %p9820_p11 = pnand %p9819_p8, %p9813_p3 }
  0xeb   : > { %9823 = shalt.err (!%p9820_p11)
}
  0xec   : > { %8813 = dma.hbm_to_vmem [thread:$0]  (!%p10105_p12), %s12025_s11, 32, %s523_s21, [#allocation15]  }
  0xed   : > { %s9824_s0 = scalar_lea.hbm %s12027_s13, 16 }
  0xee   : > { %p9825_p13 = scmp.ne.s32.totalorder %s12027_s13, %s9824_s0  ;;  %p9831_p9 = scmp.lt.u32.totalorder %s9824_s0, %s12027_s13 }
  0xf0   : > { %p9827_p5 = pnand %p9825_p13, %p10119_p0 }
  0xf2   : > { %p9828_p6 = pneg %p9827_p5 }
  0xf4   : > { %p9833_p10 = pnand %p9831_p9, %p9828_p6 }
  0xf6   : > { %9836 = shalt.err (!%p9833_p10)
}
  0xf7   : > { %s9837_s21 = scalar_lea.vmem %s10281_s15, 16  ;;  %s9844_s30 = scalar_lea.vmem %s10281_s15, 32 }
  0xf8   : > { %p9838_p1 = scmp.ne.s32.totalorder %s10281_s15, %s9837_s21  ;;  %p9845_p4 = scmp.lt.s32.totalorder %s10281_s15, %s10281_s15 }
  0xf9   : > { %p9846_p7 = scmp.lt.s32.totalorder %s9844_s30, %s9837_s21 }
  0xfa   : > { %p9840_p2 = pnand %p9838_p1, %p10119_p0 }
  0xfb   : > { %p9847_p8 = por %p9846_p7, %p9845_p4 }
  0xfc   : > { %p9841_p3 = pneg %p9840_p2 }
  0xfe   : > { %p9848_p11 = pnand %p9847_p8, %p9841_p3 }
 0x100   : > { %9851 = shalt.err (!%p9848_p11)
}
 0x101   : > { %8816 = dma.hbm_to_vmem [thread:$0]  (!%p10105_p12), %s12027_s13, 16, %s10281_s15, [#allocation18]  }
 0x102   : > { %p12070_p13 = scmp.ne.s32.totalorder %s12066_s18, 0 }
 0x104   : > { %565 = sbr.rel (%p12070_p13) target bundleno = 2775 (0xad7), region = 84 }
 0x10b   : > { %p12071_p0 = scmp.eq.s32.totalorder %s10069_s25, 0 }
 0x10d   : > { %9897 = dma.done.wait (%p12071_p0), [#allocation3], 64   ;;  %p12072_p5 = pmov %p12071_p0 }
 0x10e   : > { %p12073_p6 = pmov %p12071_p0 }
 0x10f   : > { %9899 = vsyncadd (%p12072_p5), [#allocation3], 4294967232 }
 0x110   : > { %9901 = dma.done.wait (%p12073_p6), [#allocation6], 528   ;;  %p12074_p9 = pmov %p12071_p0 }
 0x111   : > { %p12075_p10 = pmov %p12071_p0 }
 0x112   : > { %9903 = vsyncadd (%p12074_p9), [#allocation6], 4294966768 }
 0x113   : > { %9905 = dma.done.wait (%p12075_p10), [#allocation9], 8320   ;;  %p12076_p12 = pmov %p12071_p0 }
 0x114   : > { %p12077_p1 = pmov %p12071_p0 }
 0x115   : > { %9907 = vsyncadd (%p12076_p12), [#allocation9], 4294958976 }
 0x116   : > { %9909 = dma.done.wait (%p12077_p1), [#allocation12], 32832   ;;  %p12078_p2 = pmov %p12071_p0 }
 0x117   : > { %p12079_p3 = pmov %p12071_p0 }
 0x118   : > { %9911 = vsyncadd (%p12078_p2), [#allocation12], 4294934464 }
 0x119   : > { %9913 = dma.done.wait (%p12079_p3), [#allocation15], 8224   ;;  %p12080_p4 = pmov %p12071_p0 }
 0x11a   : > { %p12081_p7 = pmov %p12071_p0 }
 0x11b   : > { %9915 = vsyncadd (%p12080_p4), [#allocation15], 4294959072 }
 0x11c   : > { %9917 = dma.done.wait (%p12081_p7), [#allocation18], 16   ;;  %p12082_p8 = pmov %p12071_p0 }
 0x11d   : > { %s7765_s18 = sshll.u32 %s10069_s25, 1  ;;  %vm830_vm0 = vcmask 1043456   ;;  %s12083_s24 = sld [smem:[#allocation38_spill]]  ;;  %vm781_vm1 = vcmask 64512   ;;  %v693_v0 = vld [vmem:[#allocation2] sm:$0xf] }
 0x11e   : > { %9919 = vsyncadd (%p12082_p8), [#allocation18], 4294967280  ;;  %p653_p11 = scmp.lt.s32.totalorder %s7765_s18, 3  ;;  %8742 = vmatprep.subr.msk.bf16.mxu0 %vm830_vm0, %v693_v0  ;;  %v832_v1 = vsel %vm830_vm0, %v693_v0, 0  ;;  %8743 = vmatprep.subr.msk.bf16.mxu1 %vm830_vm0, %v693_v0  ;;  %v8912_v13 = vld [vmem:[#allocation5] sm:$0xff]   ;;  %v8913_v15 = vld [vmem:[#allocation5 + $0x8] sm:$0xff]  }
 0x11f   : > { %8463 = vmatpush3.bf16.msra.mxu0 %v832_v1  ;;  %8585 = vmatpush3.bf16.msra.mxu1 %v832_v1  ;;  %v8914_v16 = vld [vmem:[#allocation5 + $0x10] sm:$0xff]   ;;  %v8915_v21 = vld [vmem:[#allocation5 + $0x18] sm:$0xff]   ;;  %v1340_v22 = vld [vmem:[#allocation8] sm:$0xff]  ;;  %vm1082_vm2 = vcmask 523264   ;;  %vm3248_vm3 = vcmask 1041409   ;;  %s12092_s3 = sld [smem:[#allocation28_spill]] }
 0x120   : > { %s12105_s18 = smov (!%p653_p11, %s7765_s18), 3  ;;  %8496 = vmatprep.subr.bf16.mxu1 %v8912_v13  ;;  %v1344_v23 = vld [vmem:[#allocation8 + $0x20] sm:$0xff]  ;;  %v10389_v24 = vld [vmem:[#allocation8 + $0x8] sm:$0xff]  ;;  %v10400_v50 = vld [vmem:[%s12016_s2] ss:$0 sm:$0xff]  ;;  %s12093_s23 = sld [smem:[#allocation33_spill]] }
 0x121   : > { %s8286_s26 = sshll.u32 %s12105_s18, 6  ;;  %v7822_v25 = vcombine.low %v1340_v22, %v1344_v23  ;;  %v7823_v26 = vcombine.high %v1340_v22, %v1344_v23  ;;  %v10391_v27 = vld [vmem:[#allocation8 + $0x28] sm:$0xff]  ;;  %v1348_v28 = vld [vmem:[#allocation8 + $0x40] sm:$0xff]  ;;  %s8288_s20 = sshll.u32 %s10069_s25, 12 }
 0x122   : > { %v1352_v29 = vld [vmem:[#allocation8 + $0x60] sm:$0xff]  ;;  %v7824_v30 = vcombine.low %v10389_v24, %v10391_v27  ;;  %v7825_v31 = vcombine.high %v10389_v24, %v10391_v27  ;;  %v1349_v63 = vld [vmem:[#allocation8 + $0x48] sm:$0xff]  ;;  %s12094_s27 = sld [smem:[#allocation41_spill]] }
 0x123   : > { %s10355_s17 = scalar_lea.vmem %s12083_s24, %s8286_s26  ;;  %v7831_v32 = vcombine.high %v1348_v28, %v1352_v29  ;;  %v1356_v33 = vld [vmem:[#allocation8 + $0x80] sm:$0xff]  ;;  %1766 = vmatprep.subr.bf16.mxu0 %v7823_v26  ;;  %v7830_v35 = vcombine.low %v1348_v28, %v1352_v29  ;;  %v1353_v0 = vld [vmem:[#allocation8 + $0x68] sm:$0xff]  ;;  %s9960_s26 = smov [#allocation19]  }
 0x124   : > { %v8896_v2 = vld [vmem:[%s10355_s17] sm:$0xff]   ;;  %v8897_v3 = vld [vmem:[%s10355_s17 + $0x8] sm:$0xff]   ;;  %v8898_v4 = vld [vmem:[%s10355_s17 + $0x10] sm:$0xff]   ;;  %v7832_v29 = vcombine.low %v1349_v63, %v1353_v0  ;;  %s9856_s19 = sshll.u32 %s9960_s26, 4  ;;  %s9857_s19 = int_to_ptr.vmem [resolvable:$false] %s9856_s19 }
 0x125   : > { %8464 = vmatprep.mubr.msk.bf16.mxu0 %vm781_vm1, %v8896_v2  ;;  %v8899_v5 = vld [vmem:[%s10355_s17 + $0x18] sm:$0xff]   ;;  %v8900_v6 = vld [vmem:[%s10355_s17 + $0x20] sm:$0xff]   ;;  %v8905_v8 = vld [vmem:[%s10355_s17 + $0x48] sm:$0xff]   ;;  %s649_s22 = sand.u32 1, %s12092_s3   ;;  %s9858_s15 = scalar_lea.vmem %s9857_s19, 8192 }
 0x126   : > { %8465 = vmatmul.mubr.msk.bf16.vlgmr.msra.gmra.mrb[0].mxu0 %vm781_vm1, %v8897_v3  ;;  %v8904_v7 = vld [vmem:[%s10355_s17 + $0x40] sm:$0xff]   ;;  %v8906_v9 = vld [vmem:[%s10355_s17 + $0x50] sm:$0xff]   ;;  %v8901_v10 = vld [vmem:[%s10355_s17 + $0x28] sm:$0xff]   ;;  %s7764_s0 = sshll.u32 %s649_s22, 8  ;;  %s11973_s25 = scalar_lea.sflag [#allocation4], %s649_s22 }
 0x127   : > { %8468 = vmatprep.mubr.msk.bf16.mxu0 %vm781_vm1, %v8898_v4  ;;  %8480 = vmatprep.mubr.msk.bf16.mxu1 %vm781_vm1, %v8904_v7  ;;  %v8907_v11 = vld [vmem:[%s10355_s17 + $0x58] sm:$0xff]   ;;  %v8908_v12 = vld [vmem:[%s10355_s17 + $0x60] sm:$0xff]   ;;  %v8902_v14 = vld [vmem:[%s10355_s17 + $0x30] sm:$0xff]   ;;  %s11897_s28 = scalar_lea.vmem [#allocation19], %s7764_s0  ;;  %p12095_p0 = scmp.ne.s32.totalorder %s12093_s23, 0 }
 0x128   : > { %8481 = vmatmul.mubr.msk.bf16.vlgmr.msra.gmra.mrb[0].mxu1 %vm781_vm1, %v8905_v8  ;;  %v8909_v17 = vld [vmem:[%s10355_s17 + $0x68] sm:$0xff]   ;;  %v8903_v18 = vld [vmem:[%s10355_s17 + $0x38] sm:$0xff]   ;;  %v8910_v19 = vld [vmem:[%s10355_s17 + $0x70] sm:$0xff]   ;;  %1767 = vmatpush1.bf16.msra.mxu0 %v7822_v25  ;;  %s7580_s29 = sshll.u32 %s11897_s28, 4  ;;  %s11964_s16 = scalar_lea.hbm %s12094_s27, %s8288_s20  ;;  %s11966_s29 = int_to_ptr.vmem [resolvable:$true] %s7580_s29 }
 0x129   : > { %8484 = vmatprep.mubr.msk.bf16.mxu1 %vm781_vm1, %v8906_v9  ;;  %8497 = vmatpush3.bf16.msra.mxu1 %v8912_v13  ;;  %v8911_v20 = vld [vmem:[%s10355_s17 + $0x78] sm:$0xff]   ;;  %v1360_v34 = vld [vmem:[#allocation8 + $0xa0] sm:$0xff]  ;;  %s12091_s17 = sld [smem:[#allocation40_spill]]  ;;  %s9852_s18 = scalar_lea.vmem %s11966_s29, 4096 }
 0x12a   : > { %8498 = vmatprep.subr.bf16.mxu1 %v8913_v15  ;;  %1768 = vmatprep.subr.bf16.mxu0 %v7831_v32  ;;  %v7839_v36 = vcombine.high %v1356_v33, %v1360_v34  ;;  %v1364_v37 = vld [vmem:[#allocation8 + $0xc0] sm:$0xff]  ;;  %v7838_v39 = vcombine.low %v1356_v33, %v1360_v34  ;;  %p9853_p13 = scmp.ne.s32.totalorder %s11966_s29, %s9852_s18  ;;  %p9859_p9 = scmp.lt.s32.totalorder %s11966_s29, %s9857_s19 }
 0x12b   : > { %v1368_v38 = vld [vmem:[#allocation8 + $0xe0] sm:$0xff]  ;;  %p9860_p10 = scmp.lt.s32.totalorder %s9858_s15, %s9852_s18 }
 0x12c   : > { %1769 = vmatpush1.bf16.msra.mxu0 %v7830_v35  ;;  %v7847_v40 = vcombine.high %v1364_v37, %v1368_v38  ;;  %v1372_v41 = vld [vmem:[#allocation8 + $0x100] sm:$0xff]  ;;  %v7846_v43 = vcombine.low %v1364_v37, %v1368_v38  ;;  %v1369_v37 = vld [vmem:[#allocation8 + $0xe8] sm:$0xff]  ;;  %p9854_p5 = pnand %p9853_p13, %p12095_p0 }
 0x12d   : > { %8499 = vmatpush3.bf16.msra.mxu1 %v8913_v15  ;;  %1770 = vmatprep.subr.bf16.mxu0 %v7839_v36  ;;  %v1376_v42 = vld [vmem:[#allocation8 + $0x120] sm:$0xff]  ;;  %v1365_v36 = vld [vmem:[#allocation8 + $0xc8] sm:$0xff]  ;;  %p9861_p12 = por %p9860_p10, %p9859_p9 }
 0x12e   : > { %8469 = vmatmul.mubr.msk.bf16.gmra.mrb[4].mxu0 %vm781_vm1, %v8899_v5  ;;  %8500 = vmatprep.subr.bf16.mxu1 %v8914_v16  ;;  %v7855_v44 = vcombine.high %v1372_v41, %v1376_v42  ;;  %v1380_v45 = vld [vmem:[#allocation8 + $0x140] sm:$0xff]  ;;  %v7854_v47 = vcombine.low %v1372_v41, %v1376_v42  ;;  %p9855_p6 = pneg %p9854_p5 }
 0x12f   : > { %8472 = vmatprep.mubr.msk.bf16.mxu0 %vm781_vm1, %v8900_v6  ;;  %v1384_v46 = vld [vmem:[#allocation8 + $0x160] sm:$0xff] }
 0x130   : > { %8485 = vmatmul.mubr.msk.bf16.gmra.mrb[4].mxu1 %vm781_vm1, %v8907_v11  ;;  %1771 = vmatpush1.bf16.msra.mxu0 %v7838_v39  ;;  %v7863_v48 = vcombine.high %v1380_v45, %v1384_v46  ;;  %v7862_v49 = vcombine.low %v1380_v45, %v1384_v46  ;;  %v7833_v11 = vcombine.high %v1349_v63, %v1353_v0  ;;  %p9862_p1 = pnand %p9861_p12, %p9855_p6 }
 0x131   : > { %8488 = vmatprep.mubr.msk.bf16.mxu1 %vm781_vm1, %v8908_v12  ;;  %8501 = vmatpush3.bf16.msra.mxu1 %v8914_v16  ;;  %v7848_v0 = vcombine.low %v1365_v36, %v1369_v37 }
 0x132   : > { %8502 = vmatprep.subr.bf16.mxu1 %v8915_v21  ;;  %1772 = vmatprep.subr.bf16.mxu0 %v7847_v40 }
 0x134   : > { %1773 = vmatpush1.bf16.msra.mxu0 %v7846_v43 }
 0x135   : > { %8503 = vmatpush3.bf16.msra.mxu1 %v8915_v21  ;;  %1774 = vmatprep.subr.bf16.mxu0 %v7855_v44 }
 0x136   : > { %8473 = vmatmul.mubr.msk.bf16.gmra.mrb[8].mxu0 %vm781_vm1, %v8901_v10  ;;  %1959 = vmatprep.subr.bf16.mxu1 %v7825_v31 }
 0x137   : > { %8476 = vmatprep.mubr.msk.bf16.mxu0 %vm781_vm1, %v8902_v14 }
 0x138   : > { %8489 = vmatmul.mubr.msk.bf16.gmra.mrb[8].mxu1 %vm781_vm1, %v8909_v17  ;;  %1775 = vmatpush1.bf16.msra.mxu0 %v7854_v47  ;;  %v1357_v17 = vld [vmem:[#allocation8 + $0x88] sm:$0xff]  ;;  %v7849_v47 = vcombine.high %v1365_v36, %v1369_v37 }
 0x139   : > { %8492 = vmatprep.mubr.msk.bf16.mxu1 %vm781_vm1, %v8910_v19  ;;  %1776 = vmatprep.subr.bf16.mxu0 %v7863_v48 }
 0x13c   : > { %1777 = vmatpush1.bf16.msra.mxu0 %v7862_v49 }
 0x13e   : > { %8477 = vmatmul.mubr.msk.bf16.gmra.mrb[12].mxu0 %vm781_vm1, %v8903_v18  ;;  %v1361_v18 = vld [vmem:[#allocation8 + $0xa8] sm:$0xff] }
 0x13f   : > { %v7841_v33 = vcombine.high %v1357_v17, %v1361_v18 }
 0x140   : > { %8493 = vmatmul.mubr.msk.bf16.gmra.mrb[12].mxu1 %vm781_vm1, %v8911_v20 }
 0x1f9   : > { %v8466_v51 = vpop.f32.mrb[0].mxu0 }
 0x1fa   : > { %v877_v52 = vadd.f32 %v8466_v51, %v10400_v50  ;;  %v868_v53 = vpop.f32.mrb[1].mxu0 }
 0x1fb   : > { %v869_v54 = vadd.f32 %v10400_v50, %v868_v53  ;;  %v8467_v55 = vpop.f32.mrb[2].mxu0  ;;  %v8482_v2 = vpop.f32.mrb[0].mxu1 }
 0x1fc   : > { %v880_v56 = vadd.f32 %v8467_v55, %v10400_v50  ;;  %v871_v57 = vpop.f32.mrb[3].mxu0  ;;  %v997_v59 = vmax.f32 %v877_v52, 0.0  ;;  %v941_v5 = vadd.f32 %v8482_v2, %v10400_v50  ;;  %v932_v6 = vpop.f32.mrb[1].mxu1  ;;  %v1377_v55 = vld [vmem:[#allocation8 + $0x128] sm:$0xff] }
 0x1fd   : > { %v872_v58 = vadd.f32 %v10400_v50, %v871_v57  ;;  %v995_v61 = vmax.f32 %v869_v54, 0.0  ;;  %v933_v9 = vadd.f32 %v10400_v50, %v932_v6  ;;  %v8483_v10 = vpop.f32.mrb[2].mxu1  ;;  %v1373_v54 = vld [vmem:[#allocation8 + $0x108] sm:$0xff] }
 0x1fe   : > { %v998_v60 = vmax.f32 %v880_v56, 0.0  ;;  %v1013_v14 = vmax.f32 %v941_v5, 0.0  ;;  %v944_v15 = vadd.f32 %v8483_v10, %v10400_v50  ;;  %v935_v16 = vpop.f32.mrb[3].mxu1  ;;  %v7857_v5 = vcombine.high %v1373_v54, %v1377_v55 }
 0x1ff   : > { %v996_v62 = vmax.f32 %v872_v58, 0.0  ;;  %v1011_v22 = vmax.f32 %v933_v9, 0.0  ;;  %v936_v23 = vadd.f32 %v10400_v50, %v935_v16  ;;  %v1385_v9 = vld [vmem:[#allocation8 + $0x168] sm:$0xff] }
 0x200   : > { %v10406_v1 = vpack.c.bf16 %v998_v60, %v997_v59  ;;  %v1014_v28 = vmax.f32 %v944_v15, 0.0 }
 0x201   : > { %v8470_v3 = vpop.f32.mrb[4].mxu0  ;;  %v10408_v4 = vpack.c.bf16 %v996_v62, %v995_v61  ;;  %v1012_v32 = vmax.f32 %v936_v23, 0.0 }
 0x202   : > { %v893_v7 = vadd.f32 %v8470_v3, %v10400_v50  ;;  %v884_v8 = vpop.f32.mrb[5].mxu0  ;;  %v10425_v35 = vpack.c.bf16 %v1014_v28, %v1013_v14 }
 0x203   : > { %v885_v12 = vadd.f32 %v10400_v50, %v884_v8  ;;  %8504 = vmatprep.mubr.msk.bf16.mxu1 %vm1082_vm2, %v10408_v4  ;;  %v8471_v13 = vpop.f32.mrb[6].mxu0  ;;  %v10429_v39 = vpack.c.bf16 %v1012_v32, %v1011_v22  ;;  %v8486_v40 = vpop.f32.mrb[4].mxu1  ;;  %v1381_v8 = vld [vmem:[#allocation8 + $0x148] sm:$0xff] }
 0x204   : > { %v1001_v19 = vmax.f32 %v893_v7, 0.0  ;;  %v896_v20 = vadd.f32 %v8471_v13, %v10400_v50  ;;  %8505 = vmatmul.mubr.msk.bf16.vlgmr.msra.gmra.mrb[16].mxu1 %vm1082_vm2, %v10406_v1  ;;  %v887_v21 = vpop.f32.mrb[7].mxu0  ;;  %v957_v24 = vadd.f32 %v8486_v40, %v10400_v50  ;;  %v948_v27 = vpop.f32.mrb[5].mxu1  ;;  %v7865_v22 = vcombine.high %v1381_v8, %v1385_v9 }
 0x205   : > { %v999_v25 = vmax.f32 %v885_v12, 0.0  ;;  %v888_v26 = vadd.f32 %v10400_v50, %v887_v21  ;;  %1960 = vmatpush1.bf16.msra.mxu1 %v7824_v30  ;;  %v7840_v30 = vcombine.low %v1357_v17, %v1361_v18  ;;  %v949_v45 = vadd.f32 %v10400_v50, %v948_v27  ;;  %v8487_v46 = vpop.f32.mrb[6].mxu1 }
 0x206   : > { %v1002_v31 = vmax.f32 %v896_v20, 0.0  ;;  %1961 = vmatprep.subr.bf16.mxu1 %v7833_v11  ;;  %v1017_v51 = vmax.f32 %v957_v24, 0.0  ;;  %v960_v52 = vadd.f32 %v8487_v46, %v10400_v50  ;;  %v951_v53 = vpop.f32.mrb[7].mxu1  ;;  %v7856_v17 = vcombine.low %v1373_v54, %v1377_v55 }
 0x207   : > { %v1000_v34 = vmax.f32 %v888_v26, 0.0  ;;  %v1015_v59 = vmax.f32 %v949_v45, 0.0  ;;  %v952_v60 = vadd.f32 %v10400_v50, %v951_v53  ;;  %v7864_v24 = vcombine.low %v1381_v8, %v1385_v9  ;;  %v1396_v9 = vld [vmem:[#allocation8 + $0x1c0] sm:$0xff] }
 0x208   : > { %v10427_v38 = vpack.c.bf16 %v1002_v31, %v1001_v19  ;;  %v1018_v63 = vmax.f32 %v960_v52, 0.0 }
 0x209   : > { %v10431_v41 = vpack.c.bf16 %v1000_v34, %v999_v25  ;;  %v8474_v42 = vpop.f32.mrb[8].mxu0  ;;  %1962 = vmatpush1.bf16.msra.mxu1 %v7832_v29  ;;  %v1016_v3 = vmax.f32 %v952_v60, 0.0 }
 0x20a   : > { %v909_v43 = vadd.f32 %v8474_v42, %v10400_v50  ;;  %v900_v44 = vpop.f32.mrb[9].mxu0  ;;  %1963 = vmatprep.subr.bf16.mxu1 %v7841_v33  ;;  %v10445_v7 = vpack.c.bf16 %v1018_v63, %v1017_v51  ;;  %v1392_v63 = vld [vmem:[#allocation8 + $0x1a0] sm:$0xff] }
 0x20b   : > { %8508 = vmatprep.mubr.msk.bf16.mxu1 %vm1082_vm2, %v10431_v41  ;;  %v901_v48 = vadd.f32 %v10400_v50, %v900_v44  ;;  %v8475_v49 = vpop.f32.mrb[10].mxu0  ;;  %v10449_v11 = vpack.c.bf16 %v1016_v3, %v1015_v59  ;;  %v8490_v12 = vpop.f32.mrb[8].mxu1  ;;  %v1393_v3 = vld [vmem:[#allocation8 + $0x1a8] sm:$0xff] }
 0x20c   : > { %8509 = vmatmul.mubr.msk.bf16.gmra.mrb[20].mxu1 %vm1082_vm2, %v10427_v38  ;;  %v1005_v56 = vmax.f32 %v909_v43, 0.0  ;;  %v912_v57 = vadd.f32 %v8475_v49, %v10400_v50  ;;  %v903_v58 = vpop.f32.mrb[11].mxu0  ;;  %v973_v15 = vadd.f32 %v8490_v12, %v10400_v50  ;;  %v964_v16 = vpop.f32.mrb[9].mxu1  ;;  %v1400_v12 = vld [vmem:[#allocation8 + $0x1e0] sm:$0xff] }
 0x20d   : > { %v1003_v61 = vmax.f32 %v901_v48, 0.0  ;;  %v904_v62 = vadd.f32 %v10400_v50, %v903_v58  ;;  %1964 = vmatpush1.bf16.msra.mxu1 %v7840_v30  ;;  %v965_v20 = vadd.f32 %v10400_v50, %v964_v16  ;;  %v8491_v21 = vpop.f32.mrb[10].mxu1  ;;  %v1401_v16 = vld [vmem:[#allocation8 + $0x1e8] sm:$0xff] }
 0x20e   : > { %v1006_v2 = vmax.f32 %v912_v57, 0.0  ;;  %1965 = vmatprep.subr.bf16.mxu1 %v7849_v47  ;;  %v1021_v26 = vmax.f32 %v973_v15, 0.0  ;;  %v976_v28 = vadd.f32 %v8491_v21, %v10400_v50  ;;  %v967_v29 = vpop.f32.mrb[11].mxu1  ;;  %v7879_v15 = vcombine.high %v1396_v9, %v1400_v12  ;;  %v1342_v21 = vld [vmem:[#allocation8 + $0x10] sm:$0xff] }
 0x20f   : > { %v1004_v6 = vmax.f32 %v904_v62, 0.0  ;;  %v1019_v34 = vmax.f32 %v965_v20, 0.0  ;;  %v968_v36 = vadd.f32 %v10400_v50, %v967_v29  ;;  %v12045_v20 = vmov 0  }
 0x210   : > { %v10447_v10 = vpack.c.bf16 %v1006_v2, %v1005_v56  ;;  %v1022_v42 = vmax.f32 %v976_v28, 0.0  ;;  %1798 = vmatprep.mubr.bf16.mxu0 %v12045_v20  ;;  %v1347_v28 = vld [vmem:[#allocation8 + $0x38] sm:$0xff] }
 0x211   : > { %v10451_v13 = vpack.c.bf16 %v1004_v6, %v1003_v61  ;;  %v8478_v14 = vpop.f32.mrb[12].mxu0  ;;  %1966 = vmatpush1.bf16.msra.mxu1 %v7848_v0  ;;  %v1020_v30 = vmax.f32 %v968_v36, 0.0  ;;  %v1389_v0 = vld [vmem:[#allocation8 + $0x188] sm:$0xff] }
 0x212   : > { %v925_v18 = vadd.f32 %v8478_v14, %v10400_v50  ;;  %v916_v19 = vpop.f32.mrb[13].mxu0  ;;  %1967 = vmatprep.subr.bf16.mxu1 %v7857_v5  ;;  %v10465_v44 = vpack.c.bf16 %v1022_v42, %v1021_v26  ;;  %v7872_v6 = vcombine.low %v1389_v0, %v1393_v3  ;;  %v7873_v8 = vcombine.high %v1389_v0, %v1393_v3  ;;  %v1397_v14 = vld [vmem:[#allocation8 + $0x1c8] sm:$0xff]  ;;  %v1343_v26 = vld [vmem:[#allocation8 + $0x18] sm:$0xff] }
 0x213   : > { %8512 = vmatprep.mubr.msk.bf16.mxu1 %vm1082_vm2, %v10451_v13  ;;  %v917_v23 = vadd.f32 %v10400_v50, %v916_v19  ;;  %v8479_v25 = vpop.f32.mrb[14].mxu0  ;;  %v10469_v46 = vpack.c.bf16 %v1020_v30, %v1019_v34  ;;  %v8494_v47 = vpop.f32.mrb[12].mxu1  ;;  %v7881_v19 = vcombine.high %v1397_v14, %v1401_v16  ;;  %v7828_v29 = vcombine.low %v1343_v26, %v1347_v28 }
 0x214   : > { %8513 = vmatmul.mubr.msk.bf16.gmra.mrb[24].mxu1 %vm1082_vm2, %v10447_v10  ;;  %v1009_v31 = vmax.f32 %v925_v18, 0.0  ;;  %v928_v32 = vadd.f32 %v8479_v25, %v10400_v50  ;;  %v919_v33 = vpop.f32.mrb[15].mxu0  ;;  %v989_v49 = vadd.f32 %v8494_v47, %v10400_v50  ;;  %v980_v51 = vpop.f32.mrb[13].mxu1  ;;  %v7880_v18 = vcombine.low %v1397_v14, %v1401_v16  ;;  %v1350_v47 = vld [vmem:[#allocation8 + $0x50] sm:$0xff] }
 0x215   : > { %v1007_v37 = vmax.f32 %v917_v23, 0.0  ;;  %v920_v40 = vadd.f32 %v10400_v50, %v919_v33  ;;  %1968 = vmatpush1.bf16.msra.mxu1 %v7856_v17  ;;  %v981_v52 = vadd.f32 %v10400_v50, %v980_v51  ;;  %v8495_v53 = vpop.f32.mrb[14].mxu1  ;;  %v7878_v17 = vcombine.low %v1396_v9, %v1400_v12 }
 0x216   : > { %v1010_v27 = vmax.f32 %v928_v32, 0.0  ;;  %1969 = vmatprep.subr.bf16.mxu1 %v7865_v22  ;;  %v1025_v54 = vmax.f32 %v989_v49, 0.0  ;;  %v992_v55 = vadd.f32 %v8495_v53, %v10400_v50  ;;  %v983_v56 = vpop.f32.mrb[15].mxu1  ;;  %v1346_v22 = vld [vmem:[#allocation8 + $0x30] sm:$0xff]  ;;  %v10503_v32 = vld [vmem:[#allocation7] ss:$0 sm:$0xff] }
 0x217   : > { %v1008_v43 = vmax.f32 %v920_v40, 0.0  ;;  %v1023_v57 = vmax.f32 %v981_v52, 0.0  ;;  %v984_v58 = vadd.f32 %v10400_v50, %v983_v56  ;;  %v1388_v50 = vld [vmem:[#allocation8 + $0x180] sm:$0xff]  ;;  %v7826_v23 = vcombine.low %v1342_v21, %v1346_v22  ;;  %v1354_v49 = vld [vmem:[#allocation8 + $0x70] sm:$0xff] }
 0x218   : > { %v10467_v45 = vpack.c.bf16 %v1010_v27, %v1009_v31  ;;  %v1026_v59 = vmax.f32 %v992_v55, 0.0  ;;  %v7871_v2 = vcombine.high %v1388_v50, %v1392_v63  ;;  %v7870_v5 = vcombine.low %v1388_v50, %v1392_v63  ;;  %v1355_v55 = vld [vmem:[#allocation8 + $0x78] sm:$0xff]  ;;  %v1358_v50 = vld [vmem:[#allocation8 + $0x90] sm:$0xff] }
 0x219   : > { %v10471_v48 = vpack.c.bf16 %v1008_v43, %v1007_v37  ;;  %1970 = vmatpush1.bf16.msra.mxu1 %v7864_v24  ;;  %v1024_v60 = vmax.f32 %v984_v58, 0.0  ;;  %v7827_v25 = vcombine.high %v1342_v21, %v1346_v22  ;;  %v7829_v31 = vcombine.high %v1343_v26, %v1347_v28  ;;  %v1362_v63 = vld [vmem:[#allocation8 + $0xb0] sm:$0xff]  ;;  %v1367_v26 = vld [vmem:[#allocation8 + $0xd8] sm:$0xff] }
 0x21a   : > { %v10483_v61 = vpack.c.bf16 %v1026_v59, %v1025_v54  ;;  %1778 = vmatprep.subr.bf16.mxu0 %v7871_v2  ;;  %1971 = vmatprep.subr.bf16.mxu1 %v7873_v8  ;;  %v1351_v54 = vld [vmem:[#allocation8 + $0x58] sm:$0xff]  ;;  %v7835_v58 = vcombine.high %v1350_v47, %v1354_v49  ;;  %v7834_v9 = vcombine.low %v1350_v47, %v1354_v49  ;;  %v1366_v22 = vld [vmem:[#allocation8 + $0xd0] sm:$0xff] }
 0x21b   : > { %8516 = vmatprep.mubr.msk.bf16.mxu1 %vm1082_vm2, %v10471_v48  ;;  %v10485_v62 = vpack.c.bf16 %v1024_v60, %v1023_v57  ;;  %1779 = vmatpush1.bf16.msra.mxu0 %v7870_v5  ;;  %v7837_v3 = vcombine.high %v1351_v54, %v1355_v55  ;;  %v1371_v28 = vld [vmem:[#allocation8 + $0xf8] sm:$0xff] }
 0x21c   : > { %8517 = vmatmul.mubr.msk.bf16.gmra.mrb[28].mxu1 %vm1082_vm2, %v10467_v45  ;;  %1780 = vmatprep.subr.bf16.mxu0 %v7879_v15  ;;  %v7843_v15 = vcombine.high %v1358_v50, %v1362_v63  ;;  %v7853_v47 = vcombine.high %v1367_v26, %v1371_v28 }
 0x21d   : > { %8520 = vmatprep.mubr.msk.bf16.mxu1 %vm1082_vm2, %v10429_v39  ;;  %1972 = vmatpush1.bf16.msra.mxu1 %v7872_v6 }
 0x21e   : > { %1973 = vmatprep.subr.bf16.mxu1 %v7881_v19  ;;  %v1363_v19 = vld [vmem:[#allocation8 + $0xb8] sm:$0xff] }
 0x21f   : > { %1781 = vmatpush1.bf16.msra.mxu0 %v7878_v17  ;;  %v7836_v17 = vcombine.low %v1351_v54, %v1355_v55 }
 0x220   : > { %2152 = vmatprep.subr.bf16.mxu0 %v7827_v25 }
 0x221   : > { %1974 = vmatpush1.bf16.msra.mxu1 %v7880_v18  ;;  %v1359_v18 = vld [vmem:[#allocation8 + $0x98] sm:$0xff] }
 0x222   : > { %2345 = vmatprep.subr.bf16.mxu1 %v7829_v31 }
 0x224   : > { %8521 = vmatmul.mubr.msk.bf16.gmra.mrb[32].mxu1 %vm1082_vm2, %v10425_v35 }
 0x225   : > { %8524 = vmatprep.mubr.msk.bf16.mxu1 %vm1082_vm2, %v10449_v11 }
 0x22c   : > { %8525 = vmatmul.mubr.msk.bf16.gmra.mrb[36].mxu1 %vm1082_vm2, %v10445_v7 }
 0x22d   : > { %8528 = vmatprep.mubr.msk.bf16.mxu1 %vm1082_vm2, %v10469_v46 }
 0x234   : > { %8529 = vmatmul.mubr.msk.bf16.gmra.mrb[40].mxu1 %vm1082_vm2, %v10465_v44 }
 0x235   : > { %8532 = vmatprep.mubr.msk.bf16.mxu1 %vm1082_vm2, %v10485_v62 }
 0x23c   : > { %8533 = vmatmul.mubr.msk.bf16.gmra.mrb[44].mxu1 %vm1082_vm2, %v10483_v61 }
 0x23d   : > { %1991 = vmatprep.mubr.bf16.mxu1 %v12045_v20 }
 0x2d7   : > { %v8506_v33 = vpop.f32.mrb[16].mxu1 }
 0x2d8   : > { %v1174_v34 = vadd.f32 %v8506_v33, %v10503_v32  ;;  %v1165_v36 = vpop.f32.mrb[17].mxu1 }
 0x2d9   : > { %v1166_v37 = vadd.f32 %v10503_v32, %v1165_v36  ;;  %v8507_v40 = vpop.f32.mrb[18].mxu1  ;;  %v7845_v36 = vcombine.high %v1359_v18, %v1363_v19 }
 0x2da   : > { %v1177_v42 = vadd.f32 %v8507_v40, %v10503_v32  ;;  %v1168_v24 = vpop.f32.mrb[19].mxu1  ;;  %v1294_v30 = vmax.f32 %v1174_v34, 0.0  ;;  %v7842_v34 = vcombine.low %v1358_v50, %v1362_v63  ;;  %v1375_v50 = vld [vmem:[#allocation8 + $0x118] sm:$0xff] }
 0x2db   : > { %v1169_v27 = vadd.f32 %v10503_v32, %v1168_v24  ;;  %v1292_v51 = vmax.f32 %v1166_v37, 0.0  ;;  %v1379_v63 = vld [vmem:[#allocation8 + $0x138] sm:$0xff] }
 0x2dc   : > { %v1295_v43 = vmax.f32 %v1177_v42, 0.0  ;;  %v7844_v42 = vcombine.low %v1359_v18, %v1363_v19  ;;  %v7860_v19 = vcombine.low %v1375_v50, %v1379_v63 }
 0x2dd   : > { %v1293_v52 = vmax.f32 %v1169_v27, 0.0 }
 0x2de   : > { %v10509_v53 = vpack.c.bf16 %v1295_v43, %v1294_v30  ;;  %v1374_v30 = vld [vmem:[#allocation8 + $0x110] sm:$0xff] }
 0x2df   : > { %v10511_v56 = vpack.c.bf16 %v1293_v52, %v1292_v51  ;;  %v8510_v57 = vpop.f32.mrb[20].mxu1  ;;  %v1378_v43 = vld [vmem:[#allocation8 + $0x130] sm:$0xff] }
 0x2e0   : > { %v1190_v59 = vadd.f32 %v8510_v57, %v10503_v32  ;;  %v1181_v60 = vpop.f32.mrb[21].mxu1 }
 0x2e1   : > { %v1182_v0 = vadd.f32 %v10503_v32, %v1181_v60  ;;  %1799 = vmatmul.mubr.bf16.vlgmr.msra.gmra.mrb[16].mxu0 %v10511_v56  ;;  %1992 = vmatmul.mubr.bf16.vlgmr.msra.gmra.mrb[48].mxu1 %v10511_v56  ;;  %v8511_v2 = vpop.f32.mrb[22].mxu1  ;;  %v7852_v60 = vcombine.low %v1367_v26, %v1371_v28  ;;  %v1394_v26 = vld [vmem:[#allocation8 + $0x1b0] sm:$0xff] }
 0x2e2   : > { %v1298_v5 = vmax.f32 %v1190_v59, 0.0  ;;  %2153 = vmatpush1.bf16.msra.mxu0 %v7826_v23  ;;  %v1193_v6 = vadd.f32 %v8511_v2, %v10503_v32  ;;  %v1184_v8 = vpop.f32.mrb[23].mxu1  ;;  %1808 = vmatprep.mubr.bf16.mxu0 %v12045_v20  ;;  %v1370_v23 = vld [vmem:[#allocation8 + $0xf0] sm:$0xff]  ;;  %v7859_v59 = vcombine.high %v1374_v30, %v1378_v43 }
 0x2e3   : > { %v1296_v12 = vmax.f32 %v1182_v0, 0.0  ;;  %v1185_v14 = vadd.f32 %v10503_v32, %v1184_v8  ;;  %2001 = vmatprep.mubr.bf16.mxu1 %v12045_v20  ;;  %2154 = vmatprep.subr.bf16.mxu0 %v7835_v58  ;;  %v7851_v40 = vcombine.high %v1366_v22, %v1370_v23  ;;  %v7850_v57 = vcombine.low %v1366_v22, %v1370_v23  ;;  %v1382_v2 = vld [vmem:[#allocation8 + $0x150] sm:$0xff]  ;;  %v1387_v8 = vld [vmem:[#allocation8 + $0x178] sm:$0xff] }
 0x2e4   : > { %v1299_v16 = vmax.f32 %v1193_v6, 0.0  ;;  %2346 = vmatpush1.bf16.msra.mxu1 %v7828_v29  ;;  %v1383_v6 = vld [vmem:[#allocation8 + $0x158] sm:$0xff]  ;;  %v1390_v23 = vld [vmem:[#allocation8 + $0x190] sm:$0xff] }
 0x2e5   : > { %v1297_v21 = vmax.f32 %v1185_v14, 0.0  ;;  %2347 = vmatprep.subr.bf16.mxu1 %v7837_v3  ;;  %v1386_v3 = vld [vmem:[#allocation8 + $0x170] sm:$0xff]  ;;  %v7858_v14 = vcombine.low %v1374_v30, %v1378_v43  ;;  %v7869_v28 = vcombine.high %v1383_v6, %v1387_v8  ;;  %v1391_v30 = vld [vmem:[#allocation8 + $0x198] sm:$0xff] }
 0x2e6   : > { %v10521_v25 = vpack.c.bf16 %v1299_v16, %v1298_v5  ;;  %2155 = vmatpush1.bf16.msra.mxu0 %v7834_v9  ;;  %v7867_v18 = vcombine.high %v1382_v2, %v1386_v3  ;;  %v1395_v43 = vld [vmem:[#allocation8 + $0x1b8] sm:$0xff] }
 0x2e7   : > { %v10523_v31 = vpack.c.bf16 %v1297_v21, %v1296_v12  ;;  %v8514_v33 = vpop.f32.mrb[24].mxu1  ;;  %2156 = vmatprep.subr.bf16.mxu0 %v7843_v15  ;;  %v7861_v15 = vcombine.high %v1375_v50, %v1379_v63 }
 0x2e8   : > { %v1206_v29 = vadd.f32 %v8514_v33, %v10503_v32  ;;  %v1197_v37 = vpop.f32.mrb[25].mxu1  ;;  %2348 = vmatpush1.bf16.msra.mxu1 %v7836_v17 }
 0x2e9   : > { %1809 = vmatmul.mubr.bf16.gmra.mrb[20].mxu0 %v10509_v53  ;;  %2002 = vmatmul.mubr.bf16.gmra.mrb[52].mxu1 %v10509_v53  ;;  %v1198_v24 = vadd.f32 %v10503_v32, %v1197_v37  ;;  %v8515_v27 = vpop.f32.mrb[26].mxu1 }
 0x2ea   : > { %v1302_v49 = vmax.f32 %v1206_v29, 0.0  ;;  %1818 = vmatprep.mubr.bf16.mxu0 %v12045_v20  ;;  %2011 = vmatprep.mubr.bf16.mxu1 %v12045_v20  ;;  %v1209_v51 = vadd.f32 %v8515_v27, %v10503_v32  ;;  %v1200_v52 = vpop.f32.mrb[27].mxu1  ;;  %v7868_v27 = vcombine.low %v1383_v6, %v1387_v8 }
 0x2eb   : > { %v1300_v54 = vmax.f32 %v1198_v24, 0.0  ;;  %v1201_v55 = vadd.f32 %v10503_v32, %v1200_v52  ;;  %2157 = vmatpush1.bf16.msra.mxu0 %v7842_v34  ;;  %2349 = vmatprep.subr.bf16.mxu1 %v7845_v36  ;;  %v7875_v24 = vcombine.high %v1390_v23, %v1394_v26 }
 0x2ec   : > { %v1303_v58 = vmax.f32 %v1209_v51, 0.0  ;;  %2158 = vmatprep.subr.bf16.mxu0 %v7851_v40  ;;  %2350 = vmatpush1.bf16.msra.mxu1 %v7844_v42  ;;  %v7866_v40 = vcombine.low %v1382_v2, %v1386_v3  ;;  %v1402_v51 = vld [vmem:[#allocation8 + $0x1f0] sm:$0xff]  ;;  %v7876_v2 = vcombine.low %v1391_v30, %v1395_v43 }
 0x2ed   : > { %v1301_v0 = vmax.f32 %v1201_v55, 0.0  ;;  %2351 = vmatprep.subr.bf16.mxu1 %v7853_v47  ;;  %v1403_v55 = vld [vmem:[#allocation8 + $0x1f8] sm:$0xff] }
 0x2ee   : > { %v10533_v5 = vpack.c.bf16 %v1303_v58, %v1302_v49  ;;  %v1398_v49 = vld [vmem:[#allocation8 + $0x1d0] sm:$0xff] }
 0x2ef   : > { %v10535_v9 = vpack.c.bf16 %v1301_v0, %v1300_v54  ;;  %v8518_v12 = vpop.f32.mrb[28].mxu1  ;;  %2159 = vmatpush1.bf16.msra.mxu0 %v7850_v57  ;;  %v1399_v54 = vld [vmem:[#allocation8 + $0x1d8] sm:$0xff]  ;;  %v7883_v0 = vcombine.high %v1398_v49, %v1402_v51 }
 0x2f0   : > { %v1222_v16 = vadd.f32 %v8518_v12, %v10503_v32  ;;  %v1213_v17 = vpop.f32.mrb[29].mxu1  ;;  %2160 = vmatprep.subr.bf16.mxu0 %v7859_v59  ;;  %2352 = vmatpush1.bf16.msra.mxu1 %v7852_v60  ;;  %v7874_v59 = vcombine.low %v1390_v23, %v1394_v26  ;;  %v7877_v60 = vcombine.high %v1391_v30, %v1395_v43 }
 0x2f1   : > { %1819 = vmatmul.mubr.bf16.gmra.mrb[24].mxu0 %v10523_v31  ;;  %2012 = vmatmul.mubr.bf16.gmra.mrb[56].mxu1 %v10523_v31  ;;  %v1214_v21 = vadd.f32 %v10503_v32, %v1213_v17  ;;  %v8519_v22 = vpop.f32.mrb[30].mxu1  ;;  %v7885_v8 = vcombine.high %v1399_v54, %v1403_v55 }
 0x2f2   : > { %1828 = vmatprep.mubr.bf16.mxu0 %v12045_v20  ;;  %2021 = vmatprep.mubr.bf16.mxu1 %v12045_v20  ;;  %v1306_v33 = vmax.f32 %v1222_v16, 0.0  ;;  %v1225_v34 = vadd.f32 %v8519_v22, %v10503_v32  ;;  %v1216_v36 = vpop.f32.mrb[31].mxu1 }
 0x2f3   : > { %v1304_v29 = vmax.f32 %v1214_v21, 0.0  ;;  %v1217_v37 = vadd.f32 %v10503_v32, %v1216_v36  ;;  %2161 = vmatpush1.bf16.msra.mxu0 %v7858_v14  ;;  %2353 = vmatprep.subr.bf16.mxu1 %v7861_v15  ;;  %v7884_v21 = vcombine.low %v1399_v54, %v1403_v55 }
 0x2f4   : > { %v1307_v42 = vmax.f32 %v1225_v34, 0.0  ;;  %2162 = vmatprep.subr.bf16.mxu0 %v7867_v18  ;;  %2354 = vmatpush1.bf16.msra.mxu1 %v7860_v19  ;;  %v7882_v18 = vcombine.low %v1398_v49, %v1402_v51 }
 0x2f5   : > { %v1305_v47 = vmax.f32 %v1217_v37, 0.0  ;;  %2355 = vmatprep.subr.bf16.mxu1 %v7869_v28 }
 0x2f6   : > { %v10545_v52 = vpack.c.bf16 %v1307_v42, %v1306_v33 }
 0x2f7   : > { %v10547_v57 = vpack.c.bf16 %v1305_v47, %v1304_v29  ;;  %v8522_v58 = vpop.f32.mrb[32].mxu1  ;;  %2163 = vmatpush1.bf16.msra.mxu0 %v7866_v40 }
 0x2f8   : > { %v1238_v50 = vadd.f32 %v8522_v58, %v10503_v32  ;;  %v1229_v63 = vpop.f32.mrb[33].mxu1  ;;  %2164 = vmatprep.subr.bf16.mxu0 %v7875_v24  ;;  %2356 = vmatpush1.bf16.msra.mxu1 %v7868_v27 }
 0x2f9   : > { %1829 = vmatmul.mubr.bf16.gmra.mrb[28].mxu0 %v10521_v25  ;;  %2022 = vmatmul.mubr.bf16.gmra.mrb[60].mxu1 %v10521_v25  ;;  %v1230_v3 = vadd.f32 %v10503_v32, %v1229_v63  ;;  %v8523_v6 = vpop.f32.mrb[34].mxu1 }
 0x2fa   : > { %1838 = vmatprep.mubr.bf16.mxu0 %v12045_v20  ;;  %2031 = vmatprep.mubr.bf16.mxu1 %v12045_v20  ;;  %v1310_v12 = vmax.f32 %v1238_v50, 0.0  ;;  %v1241_v14 = vadd.f32 %v8523_v6, %v10503_v32  ;;  %v1232_v15 = vpop.f32.mrb[35].mxu1 }
 0x2fb   : > { %v1308_v16 = vmax.f32 %v1230_v3, 0.0  ;;  %v1233_v17 = vadd.f32 %v10503_v32, %v1232_v15  ;;  %2165 = vmatpush1.bf16.msra.mxu0 %v7874_v59  ;;  %2357 = vmatprep.subr.bf16.mxu1 %v7877_v60 }
 0x2fc   : > { %v1311_v19 = vmax.f32 %v1241_v14, 0.0  ;;  %2166 = vmatprep.subr.bf16.mxu0 %v7883_v0  ;;  %2358 = vmatpush1.bf16.msra.mxu1 %v7876_v2 }
 0x2fd   : > { %v1309_v22 = vmax.f32 %v1233_v17, 0.0  ;;  %2359 = vmatprep.subr.bf16.mxu1 %v7885_v8 }
 0x2fe   : > { %v10557_v23 = vpack.c.bf16 %v1311_v19, %v1310_v12 }
 0x2ff   : > { %v10559_v26 = vpack.c.bf16 %v1309_v22, %v1308_v16  ;;  %v8526_v28 = vpop.f32.mrb[36].mxu1  ;;  %2167 = vmatpush1.bf16.msra.mxu0 %v7882_v18 }
 0x300   : > { %v1254_v33 = vadd.f32 %v8526_v28, %v10503_v32  ;;  %v1245_v34 = vpop.f32.mrb[37].mxu1  ;;  %2360 = vmatpush1.bf16.msra.mxu1 %v7884_v21 }
 0x301   : > { %1839 = vmatmul.mubr.bf16.gmra.mrb[32].mxu0 %v10535_v9  ;;  %2032 = vmatmul.mubr.bf16.gmra.mrb[64].mxu1 %v10535_v9  ;;  %v1246_v36 = vadd.f32 %v10503_v32, %v1245_v34  ;;  %v8527_v29 = vpop.f32.mrb[38].mxu1 }
 0x302   : > { %1848 = vmatprep.mubr.bf16.mxu0 %v12045_v20  ;;  %2041 = vmatprep.mubr.bf16.mxu1 %v12045_v20  ;;  %v1314_v37 = vmax.f32 %v1254_v33, 0.0  ;;  %v1257_v40 = vadd.f32 %v8527_v29, %v10503_v32  ;;  %v1248_v42 = vpop.f32.mrb[39].mxu1 }
 0x303   : > { %v1312_v24 = vmax.f32 %v1246_v36, 0.0  ;;  %v1249_v27 = vadd.f32 %v10503_v32, %v1248_v42  ;;  %v8916_v42 = vld [vmem:[#allocation11] ss:$16 sps:$4 sm:$0xff]  }
 0x304   : > { %v1315_v30 = vmax.f32 %v1257_v40, 0.0  ;;  %v8921_v40 = vld [vmem:[#allocation11 + $0xc] ss:$16 sps:$4 sm:$0xff]  }
 0x305   : > { %v1313_v43 = vmax.f32 %v1249_v27, 0.0  ;;  %4717 = vmatprep.subr.bf16.mxu1 %v8921_v40  ;;  %v8924_v27 = vld [vmem:[#allocation11 + $0x24] ss:$16 sps:$4 sm:$0xff]   ;;  %v8975_v40 = vld [vmem:[#allocation11 + $0x12c] ss:$16 sps:$4 sm:$0xff]  }
 0x306   : > { %v10569_v47 = vpack.c.bf16 %v1315_v30, %v1314_v37  ;;  %v8927_v30 = vld [vmem:[#allocation11 + $0x2c] ss:$16 sps:$4 sm:$0xff]  }
 0x307   : > { %v10571_v49 = vpack.c.bf16 %v1313_v43, %v1312_v24  ;;  %v8530_v51 = vpop.f32.mrb[40].mxu1  ;;  %v8919_v24 = vld [vmem:[#allocation11 + $0x8] ss:$16 sps:$4 sm:$0xff]   ;;  %v8922_v43 = vld [vmem:[#allocation11 + $0x20] ss:$16 sps:$4 sm:$0xff]  }
 0x308   : > { %v1270_v54 = vadd.f32 %v8530_v51, %v10503_v32  ;;  %v1261_v55 = vpop.f32.mrb[41].mxu1  ;;  %v8925_v51 = vld [vmem:[#allocation11 + $0x28] ss:$16 sps:$4 sm:$0xff]  }
 0x309   : > { %1849 = vmatmul.mubr.bf16.gmra.mrb[36].mxu0 %v10533_v5  ;;  %2042 = vmatmul.mubr.bf16.gmra.mrb[68].mxu1 %v10533_v5  ;;  %v1262_v58 = vadd.f32 %v10503_v32, %v1261_v55  ;;  %v8531_v59 = vpop.f32.mrb[42].mxu1  ;;  %v8933_v55 = vld [vmem:[#allocation11 + $0x4c] ss:$16 sps:$4 sm:$0xff]  }
 0x30a   : > { %1858 = vmatprep.mubr.bf16.mxu0 %v12045_v20  ;;  %2051 = vmatprep.mubr.bf16.mxu1 %v12045_v20  ;;  %v1318_v60 = vmax.f32 %v1270_v54, 0.0  ;;  %v1273_v50 = vadd.f32 %v8531_v59, %v10503_v32  ;;  %v1264_v63 = vpop.f32.mrb[43].mxu1  ;;  %v8930_v54 = vld [vmem:[#allocation11 + $0x44] ss:$16 sps:$4 sm:$0xff]   ;;  %v8931_v59 = vld [vmem:[#allocation11 + $0x48] ss:$16 sps:$4 sm:$0xff]  }
 0x30b   : > { %v1316_v0 = vmax.f32 %v1262_v58, 0.0  ;;  %v1265_v2 = vadd.f32 %v10503_v32, %v1264_v63  ;;  %v8928_v58 = vld [vmem:[#allocation11 + $0x40] ss:$16 sps:$4 sm:$0xff]   ;;  %v8939_v63 = vld [vmem:[#allocation11 + $0x6c] ss:$16 sps:$4 sm:$0xff]  }
 0x30c   : > { %v1319_v3 = vmax.f32 %v1273_v50, 0.0  ;;  %v8937_v50 = vld [vmem:[#allocation11 + $0x68] ss:$16 sps:$4 sm:$0xff]  }
 0x30d   : > { %v1317_v6 = vmax.f32 %v1265_v2, 0.0  ;;  %v8940_v2 = vld [vmem:[#allocation11 + $0x80] ss:$16 sps:$4 sm:$0xff]  }
 0x30e   : > { %v10581_v8 = vpack.c.bf16 %v1319_v3, %v1318_v60  ;;  %v8936_v60 = vld [vmem:[#allocation11 + $0x64] ss:$16 sps:$4 sm:$0xff]   ;;  %v8946_v3 = vld [vmem:[#allocation11 + $0xa0] ss:$16 sps:$4 sm:$0xff]  }
 0x30f   : > { %v10583_v12 = vpack.c.bf16 %v1317_v6, %v1316_v0  ;;  %v8534_v14 = vpop.f32.mrb[44].mxu1  ;;  %v8942_v0 = vld [vmem:[#allocation11 + $0x84] ss:$16 sps:$4 sm:$0xff]  }
 0x310   : > { %v1286_v15 = vadd.f32 %v8534_v14, %v10503_v32  ;;  %v1277_v16 = vpop.f32.mrb[45].mxu1  ;;  %v8948_v6 = vld [vmem:[#allocation11 + $0xa4] ss:$16 sps:$4 sm:$0xff]  }
 0x311   : > { %1859 = vmatmul.mubr.bf16.gmra.mrb[40].mxu0 %v10547_v57  ;;  %2052 = vmatmul.mubr.bf16.gmra.mrb[72].mxu1 %v10547_v57  ;;  %v1278_v17 = vadd.f32 %v10503_v32, %v1277_v16  ;;  %v8535_v18 = vpop.f32.mrb[46].mxu1  ;;  %v8954_v14 = vld [vmem:[#allocation11 + $0xc4] ss:$16 sps:$4 sm:$0xff]   ;;  %v8957_v16 = vld [vmem:[#allocation11 + $0xcc] ss:$16 sps:$4 sm:$0xff]  }
 0x312   : > { %1868 = vmatprep.mubr.bf16.mxu0 %v12045_v20  ;;  %2061 = vmatprep.mubr.bf16.mxu1 %v12045_v20  ;;  %v1322_v19 = vmax.f32 %v1286_v15, 0.0  ;;  %v1289_v21 = vadd.f32 %v8535_v18, %v10503_v32  ;;  %v1280_v22 = vpop.f32.mrb[47].mxu1  ;;  %v8952_v15 = vld [vmem:[#allocation11 + $0xc0] ss:$16 sps:$4 sm:$0xff]   ;;  %v8955_v18 = vld [vmem:[#allocation11 + $0xc8] ss:$16 sps:$4 sm:$0xff]  }
 0x313   : > { %v1320_v28 = vmax.f32 %v1278_v17, 0.0  ;;  %v1281_v33 = vadd.f32 %v10503_v32, %v1280_v22  ;;  %v8918_v32 = vld [vmem:[#allocation11 + $0x4] ss:$16 sps:$4 sm:$0xff]   ;;  %v8961_v22 = vld [vmem:[#allocation11 + $0xe8] ss:$16 sps:$4 sm:$0xff]  }
 0x314   : > { %v1323_v34 = vmax.f32 %v1289_v21, 0.0  ;;  %4553 = vmatprep.subr.bf16.mxu0 %v8918_v32  ;;  %v8960_v17 = vld [vmem:[#allocation11 + $0xe4] ss:$16 sps:$4 sm:$0xff]   ;;  %v8973_v32 = vld [vmem:[#allocation11 + $0x128] ss:$16 sps:$4 sm:$0xff]  }
 0x315   : > { %v1321_v36 = vmax.f32 %v1281_v33, 0.0  ;;  %v8966_v21 = vld [vmem:[#allocation11 + $0x104] ss:$16 sps:$4 sm:$0xff]   ;;  %v8969_v33 = vld [vmem:[#allocation11 + $0x10c] ss:$16 sps:$4 sm:$0xff]  }
 0x316   : > { %v10593_v29 = vpack.c.bf16 %v1323_v34, %v1322_v19  ;;  %v8963_v19 = vld [vmem:[#allocation11 + $0xec] ss:$16 sps:$4 sm:$0xff]   ;;  %v8972_v34 = vld [vmem:[#allocation11 + $0x124] ss:$16 sps:$4 sm:$0xff]  }
 0x317   : > { %v10595_v37 = vpack.c.bf16 %v1321_v36, %v1320_v28  ;;  %v8964_v28 = vld [vmem:[#allocation11 + $0x100] ss:$16 sps:$4 sm:$0xff]   ;;  %v8967_v36 = vld [vmem:[#allocation11 + $0x108] ss:$16 sps:$4 sm:$0xff]  }
 0x319   : > { %1869 = vmatmul.mubr.bf16.gmra.mrb[44].mxu0 %v10545_v52  ;;  %2062 = vmatmul.mubr.bf16.gmra.mrb[76].mxu1 %v10545_v52 }
 0x31a   : > { %1878 = vmatprep.mubr.bf16.mxu0 %v12045_v20  ;;  %2071 = vmatprep.mubr.bf16.mxu1 %v12045_v20 }
 0x321   : > { %1879 = vmatmul.mubr.bf16.gmra.mrb[48].mxu0 %v10559_v26  ;;  %2072 = vmatmul.mubr.bf16.gmra.mrb[80].mxu1 %v10559_v26 }
 0x322   : > { %1888 = vmatprep.mubr.bf16.mxu0 %v12045_v20  ;;  %2081 = vmatprep.mubr.bf16.mxu1 %v12045_v20 }
 0x329   : > { %1889 = vmatmul.mubr.bf16.gmra.mrb[52].mxu0 %v10557_v23  ;;  %2082 = vmatmul.mubr.bf16.gmra.mrb[84].mxu1 %v10557_v23 }
 0x32a   : > { %1898 = vmatprep.mubr.bf16.mxu0 %v12045_v20  ;;  %2091 = vmatprep.mubr.bf16.mxu1 %v12045_v20 }
 0x331   : > { %1899 = vmatmul.mubr.bf16.gmra.mrb[56].mxu0 %v10571_v49  ;;  %2092 = vmatmul.mubr.bf16.gmra.mrb[88].mxu1 %v10571_v49 }
 0x332   : > { %1908 = vmatprep.mubr.bf16.mxu0 %v12045_v20  ;;  %2101 = vmatprep.mubr.bf16.mxu1 %v12045_v20 }
 0x339   : > { %1909 = vmatmul.mubr.bf16.gmra.mrb[60].mxu0 %v10569_v47  ;;  %2102 = vmatmul.mubr.bf16.gmra.mrb[92].mxu1 %v10569_v47 }
 0x33a   : > { %1918 = vmatprep.mubr.bf16.mxu0 %v12045_v20  ;;  %2111 = vmatprep.mubr.bf16.mxu1 %v12045_v20 }
 0x341   : > { %1919 = vmatmul.mubr.bf16.gmra.mrb[64].mxu0 %v10583_v12  ;;  %2112 = vmatmul.mubr.bf16.gmra.mrb[96].mxu1 %v10583_v12 }
 0x342   : > { %1928 = vmatprep.mubr.bf16.mxu0 %v12045_v20  ;;  %2121 = vmatprep.mubr.bf16.mxu1 %v12045_v20 }
 0x349   : > { %1929 = vmatmul.mubr.bf16.gmra.mrb[68].mxu0 %v10581_v8  ;;  %2122 = vmatmul.mubr.bf16.gmra.mrb[100].mxu1 %v10581_v8 }
 0x34a   : > { %1938 = vmatprep.mubr.bf16.mxu0 %v12045_v20  ;;  %2131 = vmatprep.mubr.bf16.mxu1 %v12045_v20 }
 0x351   : > { %1939 = vmatmul.mubr.bf16.gmra.mrb[72].mxu0 %v10595_v37  ;;  %2132 = vmatmul.mubr.bf16.gmra.mrb[104].mxu1 %v10595_v37 }
 0x352   : > { %1948 = vmatprep.mubr.bf16.mxu0 %v12045_v20  ;;  %2141 = vmatprep.mubr.bf16.mxu1 %v12045_v20 }
 0x359   : > { %1949 = vmatmul.mubr.bf16.gmra.mrb[76].mxu0 %v10593_v29  ;;  %2142 = vmatmul.mubr.bf16.gmra.mrb[108].mxu1 %v10593_v29 }
 0x35a   : > { %2184 = vmatprep.mubr.bf16.mxu0 %v12045_v20  ;;  %2377 = vmatprep.mubr.bf16.mxu1 %v12045_v20 }
 0x361   : > { %2185 = vmatmul.mubr.bf16.vlgmr.msra.gmra.mrb[80].mxu0 %v10511_v56  ;;  %2378 = vmatmul.mubr.bf16.vlgmr.msra.gmra.mrb[112].mxu1 %v10511_v56  ;;  %v8934_v56 = vld [vmem:[#allocation11 + $0x60] ss:$16 sps:$4 sm:$0xff]  }
 0x362   : > { %2194 = vmatprep.mubr.bf16.mxu0 %v12045_v20  ;;  %2387 = vmatprep.mubr.bf16.mxu1 %v12045_v20 }
 0x363   : > { %4554 = vmatpush1.bf16.msra.mxu0 %v8916_v42  ;;  %4718 = vmatpush1.bf16.msra.mxu1 %v8919_v24  ;;  %v8978_v42 = vld [vmem:[#allocation11 + $0x144] ss:$16 sps:$4 sm:$0xff]   ;;  %v8976_v24 = vld [vmem:[#allocation11 + $0x140] ss:$16 sps:$4 sm:$0xff]  }
 0x364   : > { %4555 = vmatprep.subr.bf16.mxu0 %v8924_v27  ;;  %4719 = vmatprep.subr.bf16.mxu1 %v8927_v30  ;;  %v8981_v27 = vld [vmem:[#allocation11 + $0x14c] ss:$16 sps:$4 sm:$0xff]   ;;  %v8984_v30 = vld [vmem:[#allocation11 + $0x164] ss:$16 sps:$4 sm:$0xff]  }
 0x367   : > { %4556 = vmatpush1.bf16.msra.mxu0 %v8922_v43  ;;  %4720 = vmatpush1.bf16.msra.mxu1 %v8925_v51  ;;  %v1406_v43 = vlaneseq  ;;  %v8982_v51 = vld [vmem:[#allocation11 + $0x160] ss:$16 sps:$4 sm:$0xff]  }
 0x368   : > { %4557 = vmatprep.subr.bf16.mxu0 %v8930_v54  ;;  %4721 = vmatprep.subr.bf16.mxu1 %v8933_v55  ;;  %v8985_v54 = vld [vmem:[#allocation11 + $0x168] ss:$16 sps:$4 sm:$0xff]   ;;  %v8987_v55 = vld [vmem:[#allocation11 + $0x16c] ss:$16 sps:$4 sm:$0xff]  }
 0x369   : > { %2195 = vmatmul.mubr.bf16.gmra.mrb[84].mxu0 %v10509_v53  ;;  %2388 = vmatmul.mubr.bf16.gmra.mrb[116].mxu1 %v10509_v53  ;;  %v8945_v53 = vld [vmem:[#allocation11 + $0x8c] ss:$16 sps:$4 sm:$0xff]  }
 0x36a   : > { %2204 = vmatprep.mubr.bf16.mxu0 %v12045_v20  ;;  %2397 = vmatprep.mubr.bf16.mxu1 %v12045_v20 }
 0x36b   : > { %4558 = vmatpush1.bf16.msra.mxu0 %v8928_v58  ;;  %4722 = vmatpush1.bf16.msra.mxu1 %v8931_v59  ;;  %v8990_v58 = vld [vmem:[#allocation11 + $0x184] ss:$16 sps:$4 sm:$0xff]  }
 0x36c   : > { %4559 = vmatprep.subr.bf16.mxu0 %v8936_v60  ;;  %4723 = vmatprep.subr.bf16.mxu1 %v8939_v63 }
 0x36f   : > { %4560 = vmatpush1.bf16.msra.mxu0 %v8934_v56  ;;  %4724 = vmatpush1.bf16.msra.mxu1 %v8937_v50  ;;  %v8988_v56 = vld [vmem:[#allocation11 + $0x180] ss:$16 sps:$4 sm:$0xff]  }
 0x370   : > { %4561 = vmatprep.subr.bf16.mxu0 %v8942_v0  ;;  %4725 = vmatprep.subr.bf16.mxu1 %v8945_v53 }
 0x371   : > { %2205 = vmatmul.mubr.bf16.gmra.mrb[88].mxu0 %v10523_v31  ;;  %2398 = vmatmul.mubr.bf16.gmra.mrb[120].mxu1 %v10523_v31  ;;  %v8943_v31 = vld [vmem:[#allocation11 + $0x88] ss:$16 sps:$4 sm:$0xff]  }
 0x372   : > { %2214 = vmatprep.mubr.bf16.mxu0 %v12045_v20  ;;  %2407 = vmatprep.mubr.bf16.mxu1 %v12045_v20 }
 0x373   : > { %4562 = vmatpush1.bf16.msra.mxu0 %v8940_v2  ;;  %4726 = vmatpush1.bf16.msra.mxu1 %v8943_v31 }
 0x374   : > { %4563 = vmatprep.subr.bf16.mxu0 %v8948_v6 }
 0x377   : > { %4564 = vmatpush1.bf16.msra.mxu0 %v8946_v3 }
 0x378   : > { %4565 = vmatprep.subr.bf16.mxu0 %v8954_v14 }
 0x379   : > { %2215 = vmatmul.mubr.bf16.gmra.mrb[92].mxu0 %v10521_v25  ;;  %2408 = vmatmul.mubr.bf16.gmra.mrb[124].mxu1 %v10521_v25  ;;  %v8951_v25 = vld [vmem:[#allocation11 + $0xac] ss:$16 sps:$4 sm:$0xff]  }
 0x37a   : > { %2224 = vmatprep.mubr.bf16.mxu0 %v12045_v20  ;;  %2417 = vmatprep.mubr.bf16.mxu1 %v12045_v20 }
 0x37b   : > { %4727 = vmatprep.subr.bf16.mxu1 %v8951_v25  ;;  %4566 = vmatpush1.bf16.msra.mxu0 %v8952_v15 }
 0x37c   : > { %4567 = vmatprep.subr.bf16.mxu0 %v8960_v17 }
 0x381   : > { %2225 = vmatmul.mubr.bf16.gmra.mrb[96].mxu0 %v10535_v9  ;;  %2418 = vmatmul.mubr.bf16.gmra.mrb[128].mxu1 %v10535_v9  ;;  %v8949_v9 = vld [vmem:[#allocation11 + $0xa8] ss:$16 sps:$4 sm:$0xff]  }
 0x382   : > { %2234 = vmatprep.mubr.bf16.mxu0 %v12045_v20  ;;  %2427 = vmatprep.mubr.bf16.mxu1 %v12045_v20 }
 0x383   : > { %4728 = vmatpush1.bf16.msra.mxu1 %v8949_v9 }
 0x384   : > { %4729 = vmatprep.subr.bf16.mxu1 %v8957_v16 }
 0x387   : > { %4730 = vmatpush1.bf16.msra.mxu1 %v8955_v18 }
 0x388   : > { %4731 = vmatprep.subr.bf16.mxu1 %v8963_v19 }
 0x389   : > { %2235 = vmatmul.mubr.bf16.gmra.mrb[100].mxu0 %v10533_v5  ;;  %2428 = vmatmul.mubr.bf16.gmra.mrb[132].mxu1 %v10533_v5  ;;  %v8958_v5 = vld [vmem:[#allocation11 + $0xe0] ss:$16 sps:$4 sm:$0xff]  }
 0x38a   : > { %2244 = vmatprep.mubr.bf16.mxu0 %v12045_v20  ;;  %2437 = vmatprep.mubr.bf16.mxu1 %v12045_v20 }
 0x38b   : > { %4568 = vmatpush1.bf16.msra.mxu0 %v8958_v5  ;;  %4732 = vmatpush1.bf16.msra.mxu1 %v8961_v22 }
 0x38c   : > { %4569 = vmatprep.subr.bf16.mxu0 %v8966_v21  ;;  %4733 = vmatprep.subr.bf16.mxu1 %v8969_v33 }
 0x38f   : > { %4570 = vmatpush1.bf16.msra.mxu0 %v8964_v28  ;;  %4734 = vmatpush1.bf16.msra.mxu1 %v8967_v36 }
 0x390   : > { %4571 = vmatprep.subr.bf16.mxu0 %v8972_v34  ;;  %4735 = vmatprep.subr.bf16.mxu1 %v8975_v40 }
 0x391   : > { %2245 = vmatmul.mubr.bf16.gmra.mrb[104].mxu0 %v10547_v57  ;;  %2438 = vmatmul.mubr.bf16.gmra.mrb[136].mxu1 %v10547_v57  ;;  %v8970_v57 = vld [vmem:[#allocation11 + $0x120] ss:$16 sps:$4 sm:$0xff]  }
 0x392   : > { %2254 = vmatprep.mubr.bf16.mxu0 %v12045_v20  ;;  %2447 = vmatprep.mubr.bf16.mxu1 %v12045_v20 }
 0x393   : > { %4572 = vmatpush1.bf16.msra.mxu0 %v8970_v57  ;;  %4736 = vmatpush1.bf16.msra.mxu1 %v8973_v32 }
 0x394   : > { %4573 = vmatprep.subr.bf16.mxu0 %v8978_v42  ;;  %4737 = vmatprep.subr.bf16.mxu1 %v8981_v27  ;;  %v8993_v27 = vld [vmem:[#allocation11 + $0x18c] ss:$16 sps:$4 sm:$0xff]  }
 0x397   : > { %4574 = vmatpush1.bf16.msra.mxu0 %v8976_v24 }
 0x398   : > { %4575 = vmatprep.subr.bf16.mxu0 %v8984_v30 }
 0x399   : > { %2255 = vmatmul.mubr.bf16.gmra.mrb[108].mxu0 %v10545_v52  ;;  %2448 = vmatmul.mubr.bf16.gmra.mrb[140].mxu1 %v10545_v52  ;;  %v8979_v52 = vld [vmem:[#allocation11 + $0x148] ss:$16 sps:$4 sm:$0xff]  }
 0x39a   : > { %2264 = vmatprep.mubr.bf16.mxu0 %v12045_v20  ;;  %2457 = vmatprep.mubr.bf16.mxu1 %v12045_v20 }
 0x39b   : > { %4738 = vmatpush1.bf16.msra.mxu1 %v8979_v52  ;;  %4576 = vmatpush1.bf16.msra.mxu0 %v8982_v51  ;;  %v8991_v51 = vld [vmem:[#allocation11 + $0x188] ss:$16 sps:$4 sm:$0xff]  }
 0x39c   : > { %4739 = vmatprep.subr.bf16.mxu1 %v8987_v55  ;;  %4577 = vmatprep.subr.bf16.mxu0 %v8990_v58 }
 0x39f   : > { %4740 = vmatpush1.bf16.msra.mxu1 %v8985_v54  ;;  %4578 = vmatpush1.bf16.msra.mxu0 %v8988_v56 }
 0x3a0   : > { %4741 = vmatprep.subr.bf16.mxu1 %v8993_v27  ;;  %v9002_v27 = vld [vmem:[#allocation11 + $0x1c4] ss:$16 sps:$4 sm:$0xff]  }
 0x3a1   : > { %2265 = vmatmul.mubr.bf16.gmra.mrb[112].mxu0 %v10559_v26  ;;  %2458 = vmatmul.mubr.bf16.gmra.mrb[144].mxu1 %v10559_v26  ;;  %v10673_v26 = vshrl.u32 %v1406_v43, 7 }
 0x3a2   : > { %2274 = vmatprep.mubr.bf16.mxu0 %v12045_v20  ;;  %2467 = vmatprep.mubr.bf16.mxu1 %v12045_v20 }
 0x3a3   : > { %12084 = vst [vmem:[#allocation35_spill] sm:$0xff] %v10673_v26  ;;  %v10676_v59 = vsub.s32 0, %v10673_v26  ;;  %v10679_v60 = vsub.s32 2, %v10673_v26  ;;  %v10684_v50 = vsub.s32 1, %v10673_v26  ;;  %v10687_v63 = vsub.s32 3, %v10673_v26  ;;  %4742 = vmatpush1.bf16.msra.mxu1 %v8991_v51 }
 0x3a5   : > { %12085 = vst [vmem:[#allocation36_spill] sm:$0xff] %v10684_v50  ;;  %12086 = vst [vmem:[#allocation37_spill] sm:$0xff] %v10687_v63 }
 0x3a9   : > { %2275 = vmatmul.mubr.bf16.gmra.mrb[116].mxu0 %v10557_v23  ;;  %2468 = vmatmul.mubr.bf16.gmra.mrb[148].mxu1 %v10557_v23  ;;  %v10681_v23 = vld [vmem:[#allocation10] sm:$0xff] }
 0x3aa   : > { %2284 = vmatprep.mubr.bf16.mxu0 %v12045_v20  ;;  %2477 = vmatprep.mubr.bf16.mxu1 %v12045_v20  ;;  %v10695_v0 = vrot.slane %v10681_v23, %v10676_v59  ;;  %v10699_v2 = vrot.slane %v10681_v23, %v10679_v60  ;;  %v10703_v3 = vrot.slane %v10681_v23, %v10684_v50 }
 0x3b1   : > { %2285 = vmatmul.mubr.bf16.gmra.mrb[120].mxu0 %v10571_v49  ;;  %2478 = vmatmul.mubr.bf16.gmra.mrb[152].mxu1 %v10571_v49  ;;  %v10707_v49 = vrot.slane %v10681_v23, %v10687_v63 }
 0x3b2   : > { %2294 = vmatprep.mubr.bf16.mxu0 %v12045_v20  ;;  %2487 = vmatprep.mubr.bf16.mxu1 %v12045_v20 }
 0x3b4   : > { %v1800_v53 = vpop.f32.mrb[16].mxu0  ;;  %v1993_v31 = vpop.f32.mrb[48].mxu1 }
 0x3b5   : > { %v1802_v6 = vpop.f32.mrb[17].mxu0  ;;  %v1995_v25 = vpop.f32.mrb[49].mxu1  ;;  %v1801_v15 = vadd.f32 %v1800_v53, %v10695_v0  ;;  %v1994_v16 = vadd.f32 %v1993_v31, %v10699_v2 }
 0x3b6   : > { %v1804_v14 = vpop.f32.mrb[18].mxu0  ;;  %v1997_v9 = vpop.f32.mrb[50].mxu1  ;;  %v1803_v21 = vadd.f32 %v1802_v6, %v10703_v3  ;;  %v1996_v22 = vadd.f32 %v1995_v25, %v10707_v49 }
 0x3b7   : > { %v1805_v17 = vadd.f32 %v1804_v14, %v10695_v0  ;;  %v1998_v18 = vadd.f32 %v1997_v9, %v10699_v2  ;;  %v1806_v5 = vpop.f32.mrb[19].mxu0  ;;  %v1999_v19 = vpop.f32.mrb[51].mxu1 }
 0x3b8   : > { %v1807_v28 = vadd.f32 %v1806_v5, %v10703_v3  ;;  %v2000_v33 = vadd.f32 %v1999_v19, %v10707_v49  ;;  %v8994_v19 = vld [vmem:[#allocation11 + $0x1a0] ss:$16 sps:$4 sm:$0xff]  }
 0x3b9   : > { %v2540_v34 = vpack.c.bf16 %v1998_v18, %v1994_v16  ;;  %2295 = vmatmul.mubr.bf16.gmra.mrb[124].mxu0 %v10569_v47  ;;  %2488 = vmatmul.mubr.bf16.gmra.mrb[156].mxu1 %v10569_v47  ;;  %v2538_v36 = vpack.c.bf16 %v1805_v17, %v1801_v15  ;;  %v8996_v16 = vld [vmem:[#allocation11 + $0x1a4] ss:$16 sps:$4 sm:$0xff]   ;;  %v8999_v17 = vld [vmem:[#allocation11 + $0x1ac] ss:$16 sps:$4 sm:$0xff]  }
 0x3ba   : > { %v2541_v57 = vpack.c.bf16 %v2000_v33, %v1996_v22  ;;  %v2539_v32 = vpack.c.bf16 %v1807_v28, %v1803_v21  ;;  %2304 = vmatprep.mubr.bf16.mxu0 %v12045_v20  ;;  %2497 = vmatprep.mubr.bf16.mxu1 %v12045_v20  ;;  %v8997_v21 = vld [vmem:[#allocation11 + $0x1a8] ss:$16 sps:$4 sm:$0xff]  }
 0x3bb   : > { %4579 = vmatprep.subr.bf16.mxu0 %v8996_v16  ;;  %4743 = vmatprep.subr.bf16.mxu1 %v8999_v17  ;;  %v9011_v16 = vld [vmem:[#allocation11 + $0x1ec] ss:$16 sps:$4 sm:$0xff]  }
 0x3bc   : > { %v1810_v40 = vpop.f32.mrb[20].mxu0  ;;  %v2003_v42 = vpop.f32.mrb[52].mxu1  ;;  %4580 = vmatpush1.bf16.msra.mxu0 %v8994_v19  ;;  %4744 = vmatpush1.bf16.msra.mxu1 %v8997_v21 }
 0x3bd   : > { %v1812_v24 = vpop.f32.mrb[21].mxu0  ;;  %v2005_v52 = vpop.f32.mrb[53].mxu1  ;;  %v1811_v54 = vadd.f32 %v1810_v40, %v10695_v0  ;;  %v2004_v55 = vadd.f32 %v2003_v42, %v10699_v2  ;;  %4581 = vmatprep.subr.bf16.mxu0 %v9002_v27 }
 0x3be   : > { %v1814_v30 = vpop.f32.mrb[22].mxu0  ;;  %v2007_v43 = vpop.f32.mrb[54].mxu1  ;;  %v1813_v31 = vadd.f32 %v1812_v24, %v10703_v3  ;;  %v2006_v6 = vadd.f32 %v2005_v52, %v10707_v49 }
 0x3bf   : > { %v1815_v47 = vadd.f32 %v1814_v30, %v10695_v0  ;;  %v2008_v58 = vadd.f32 %v2007_v43, %v10699_v2  ;;  %v1816_v56 = vpop.f32.mrb[23].mxu0  ;;  %v2009_v53 = vpop.f32.mrb[55].mxu1  ;;  %v9005_v30 = vld [vmem:[#allocation11 + $0x1cc] ss:$16 sps:$4 sm:$0xff]  }
 0x3c0   : > { %v1817_v25 = vadd.f32 %v1816_v56, %v10703_v3  ;;  %v2010_v14 = vadd.f32 %v2009_v53, %v10707_v49  ;;  %4745 = vmatprep.subr.bf16.mxu1 %v9005_v30  ;;  %v9008_v53 = vld [vmem:[#allocation11 + $0x1e4] ss:$16 sps:$4 sm:$0xff]  }
 0x3c1   : > { %v2546_v9 = vpack.c.bf16 %v1815_v47, %v1811_v54  ;;  %v2548_v15 = vpack.c.bf16 %v2008_v58, %v2004_v55  ;;  %2305 = vmatmul.mubr.bf16.gmra.mrb[128].mxu0 %v10583_v12  ;;  %2498 = vmatmul.mubr.bf16.gmra.mrb[160].mxu1 %v10583_v12  ;;  %v9014_v30 = vld [vmem:[#allocation11 + $0x204] ss:$16 sps:$4 sm:$0xff]  }
 0x3c2   : > { %v2547_v18 = vpack.c.bf16 %v1817_v25, %v1813_v31  ;;  %v2549_v5 = vpack.c.bf16 %v2010_v14, %v2006_v6  ;;  %2314 = vmatprep.mubr.bf16.mxu0 %v12045_v20  ;;  %2507 = vmatprep.mubr.bf16.mxu1 %v12045_v20  ;;  %v9006_v14 = vld [vmem:[#allocation11 + $0x1e0] ss:$16 sps:$4 sm:$0xff]  }
 0x3c3   : > { %v2666_v22 = vmax.bf16 %v2546_v9, %v2538_v36  ;;  %v2700_v28 = vmax.bf16 %v2548_v15, %v2540_v34  ;;  %v9000_v36 = vld [vmem:[#allocation11 + $0x1c0] ss:$16 sps:$4 sm:$0xff]   ;;  %v9003_v34 = vld [vmem:[#allocation11 + $0x1c8] ss:$16 sps:$4 sm:$0xff]  }
 0x3c4   : > { %v2683_v33 = vmax.bf16 %v2547_v18, %v2539_v32  ;;  %v2717_v40 = vmax.bf16 %v2549_v5, %v2541_v57  ;;  %v1820_v42 = vpop.f32.mrb[24].mxu0  ;;  %v2013_v24 = vpop.f32.mrb[56].mxu1  ;;  %4582 = vmatpush1.bf16.msra.mxu0 %v9000_v36  ;;  %4746 = vmatpush1.bf16.msra.mxu1 %v9003_v34  ;;  %v9009_v5 = vld [vmem:[#allocation11 + $0x1e8] ss:$16 sps:$4 sm:$0xff]  }
 0x3c5   : > { %v1822_v12 = vpop.f32.mrb[25].mxu0  ;;  %v2015_v52 = vpop.f32.mrb[57].mxu1  ;;  %v1821_v43 = vadd.f32 %v1820_v42, %v10695_v0  ;;  %v2014_v51 = vadd.f32 %v2013_v24, %v10699_v2  ;;  %4583 = vmatprep.subr.bf16.mxu0 %v9008_v53  ;;  %4747 = vmatprep.subr.bf16.mxu1 %v9011_v16 }
 0x3c6   : > { %v1824_v54 = vpop.f32.mrb[26].mxu0  ;;  %v2017_v55 = vpop.f32.mrb[58].mxu1  ;;  %v1823_v47 = vadd.f32 %v1822_v12, %v10703_v3  ;;  %v2016_v31 = vadd.f32 %v2015_v52, %v10707_v49 }
 0x3c7   : > { %v1825_v57 = vadd.f32 %v1824_v54, %v10695_v0  ;;  %v2018_v32 = vadd.f32 %v2017_v55, %v10699_v2  ;;  %v1826_v58 = vpop.f32.mrb[27].mxu0  ;;  %v2019_v56 = vpop.f32.mrb[59].mxu1 }
 0x3c8   : > { %v1827_v6 = vadd.f32 %v1826_v58, %v10703_v3  ;;  %v2020_v25 = vadd.f32 %v2019_v56, %v10707_v49  ;;  %4584 = vmatpush1.bf16.msra.mxu0 %v9006_v14  ;;  %4748 = vmatpush1.bf16.msra.mxu1 %v9009_v5 }
 0x3c9   : > { %v2554_v9 = vpack.c.bf16 %v1825_v57, %v1821_v43  ;;  %v2556_v15 = vpack.c.bf16 %v2018_v32, %v2014_v51  ;;  %2315 = vmatmul.mubr.bf16.gmra.mrb[132].mxu0 %v10581_v8  ;;  %2508 = vmatmul.mubr.bf16.gmra.mrb[164].mxu1 %v10581_v8  ;;  %v9017_v43 = vld [vmem:[#allocation11 + $0x20c] ss:$16 sps:$4 sm:$0xff]  }
 0x3ca   : > { %v2555_v17 = vpack.c.bf16 %v1827_v6, %v1823_v47  ;;  %v2557_v18 = vpack.c.bf16 %v2020_v25, %v2016_v31  ;;  %2324 = vmatprep.mubr.bf16.mxu0 %v12045_v20  ;;  %2517 = vmatprep.mubr.bf16.mxu1 %v12045_v20 }
 0x3cb   : > { %v2667_v19 = vmax.bf16 %v2666_v22, %v2554_v9  ;;  %v2701_v21 = vmax.bf16 %v2700_v28, %v2556_v15  ;;  %4594 = vmatprep.subr.bf16.mxu0 %v9014_v30  ;;  %4758 = vmatprep.subr.bf16.mxu1 %v9017_v43 }
 0x3cc   : > { %v2684_v42 = vmax.bf16 %v2683_v33, %v2555_v17  ;;  %v2718_v24 = vmax.bf16 %v2717_v40, %v2557_v18  ;;  %v1830_v12 = vpop.f32.mrb[28].mxu0  ;;  %v2023_v52 = vpop.f32.mrb[60].mxu1 }
 0x3cd   : > { %v1832_v27 = vpop.f32.mrb[29].mxu0  ;;  %v2025_v8 = vpop.f32.mrb[61].mxu1  ;;  %v1831_v51 = vadd.f32 %v1830_v12, %v10695_v0  ;;  %v2024_v36 = vadd.f32 %v2023_v52, %v10699_v2 }
 0x3ce   : > { %v1834_v54 = vpop.f32.mrb[30].mxu0  ;;  %v2027_v55 = vpop.f32.mrb[62].mxu1  ;;  %v1833_v34 = vadd.f32 %v1832_v27, %v10703_v3  ;;  %v2026_v47 = vadd.f32 %v2025_v8, %v10707_v49 }
 0x3cf   : > { %v1835_v22 = vadd.f32 %v1834_v54, %v10695_v0  ;;  %v2028_v28 = vadd.f32 %v2027_v55, %v10699_v2  ;;  %v1836_v33 = vpop.f32.mrb[31].mxu0  ;;  %v2029_v40 = vpop.f32.mrb[63].mxu1 }
 0x3d0   : > { %v1837_v57 = vadd.f32 %v1836_v33, %v10703_v3  ;;  %v2030_v32 = vadd.f32 %v2029_v40, %v10707_v49 }
 0x3d1   : > { %v2562_v58 = vpack.c.bf16 %v1835_v22, %v1831_v51  ;;  %v2564_v56 = vpack.c.bf16 %v2028_v28, %v2024_v36  ;;  %2325 = vmatmul.mubr.bf16.gmra.mrb[136].mxu0 %v10595_v37  ;;  %2518 = vmatmul.mubr.bf16.gmra.mrb[168].mxu1 %v10595_v37 }
 0x3d2   : > { %v2563_v53 = vpack.c.bf16 %v1837_v57, %v1833_v34  ;;  %v2565_v31 = vpack.c.bf16 %v2030_v32, %v2026_v47  ;;  %2334 = vmatprep.mubr.bf16.mxu0 %v12045_v20  ;;  %2527 = vmatprep.mubr.bf16.mxu1 %v12045_v20 }
 0x3d3   : > { %v2668_v6 = vmax.bf16 %v2667_v19, %v2562_v58  ;;  %v2702_v25 = vmax.bf16 %v2701_v21, %v2564_v56 }
 0x3d4   : > { %v2685_v14 = vmax.bf16 %v2684_v42, %v2563_v53  ;;  %v2719_v9 = vmax.bf16 %v2718_v24, %v2565_v31  ;;  %v1840_v15 = vpop.f32.mrb[32].mxu0  ;;  %v2033_v16 = vpop.f32.mrb[64].mxu1 }
 0x3d5   : > { %v1842_v17 = vpop.f32.mrb[33].mxu0  ;;  %v2035_v18 = vpop.f32.mrb[65].mxu1  ;;  %v1841_v52 = vadd.f32 %v1840_v15, %v10695_v0  ;;  %v2034_v37 = vadd.f32 %v2033_v16, %v10699_v2 }
 0x3d6   : > { %v1844_v5 = vpop.f32.mrb[34].mxu0  ;;  %v2037_v12 = vpop.f32.mrb[66].mxu1  ;;  %v1843_v19 = vadd.f32 %v1842_v17, %v10703_v3  ;;  %v2036_v21 = vadd.f32 %v2035_v18, %v10707_v49 }
 0x3d7   : > { %v1845_v27 = vadd.f32 %v1844_v5, %v10695_v0  ;;  %v2038_v8 = vadd.f32 %v2037_v12, %v10699_v2  ;;  %v1846_v30 = vpop.f32.mrb[35].mxu0  ;;  %v2039_v43 = vpop.f32.mrb[67].mxu1 }
 0x3d8   : > { %v1847_v42 = vadd.f32 %v1846_v30, %v10703_v3  ;;  %v2040_v24 = vadd.f32 %v2039_v43, %v10707_v49 }
 0x3d9   : > { %v2570_v51 = vpack.c.bf16 %v1845_v27, %v1841_v52  ;;  %v2572_v54 = vpack.c.bf16 %v2038_v8, %v2034_v37  ;;  %2335 = vmatmul.mubr.bf16.gmra.mrb[140].mxu0 %v10593_v29  ;;  %2528 = vmatmul.mubr.bf16.gmra.mrb[172].mxu1 %v10593_v29 }
 0x3da   : > { %v2571_v55 = vpack.c.bf16 %v1847_v42, %v1843_v19  ;;  %v2573_v36 = vpack.c.bf16 %v2040_v24, %v2036_v21 }
 0x3db   : > { %v2669_v22 = vmax.bf16 %v2668_v6, %v2570_v51  ;;  %v2703_v28 = vmax.bf16 %v2702_v25, %v2572_v54 }
 0x3dc   : > { %v2686_v33 = vmax.bf16 %v2685_v14, %v2571_v55  ;;  %v2720_v40 = vmax.bf16 %v2719_v9, %v2573_v36  ;;  %v1850_v34 = vpop.f32.mrb[36].mxu0  ;;  %v2043_v47 = vpop.f32.mrb[68].mxu1 }
 0x3dd   : > { %v1852_v57 = vpop.f32.mrb[37].mxu0  ;;  %v2045_v32 = vpop.f32.mrb[69].mxu1  ;;  %v1851_v53 = vadd.f32 %v1850_v34, %v10695_v0  ;;  %v2044_v31 = vadd.f32 %v2043_v47, %v10699_v2 }
 0x3de   : > { %v1854_v58 = vpop.f32.mrb[38].mxu0  ;;  %v2047_v56 = vpop.f32.mrb[70].mxu1  ;;  %v1853_v6 = vadd.f32 %v1852_v57, %v10703_v3  ;;  %v2046_v25 = vadd.f32 %v2045_v32, %v10707_v49 }
 0x3df   : > { %v1855_v15 = vadd.f32 %v1854_v58, %v10695_v0  ;;  %v2048_v29 = vadd.f32 %v2047_v56, %v10699_v2  ;;  %v1856_v16 = vpop.f32.mrb[39].mxu0  ;;  %v2049_v17 = vpop.f32.mrb[71].mxu1 }
 0x3e0   : > { %v1857_v14 = vadd.f32 %v1856_v16, %v10703_v3  ;;  %v2050_v9 = vadd.f32 %v2049_v17, %v10707_v49 }
 0x3e1   : > { %v2578_v18 = vpack.c.bf16 %v1855_v15, %v1851_v53  ;;  %v2580_v5 = vpack.c.bf16 %v2048_v29, %v2044_v31 }
 0x3e2   : > { %v2579_v12 = vpack.c.bf16 %v1857_v14, %v1853_v6  ;;  %v2581_v52 = vpack.c.bf16 %v2050_v9, %v2046_v25 }
 0x3e3   : > { %v2670_v37 = vmax.bf16 %v2669_v22, %v2578_v18  ;;  %v2704_v27 = vmax.bf16 %v2703_v28, %v2580_v5 }
 0x3e4   : > { %v2687_v8 = vmax.bf16 %v2686_v33, %v2579_v12  ;;  %v2721_v30 = vmax.bf16 %v2720_v40, %v2581_v52  ;;  %v1860_v43 = vpop.f32.mrb[40].mxu0  ;;  %v2053_v19 = vpop.f32.mrb[72].mxu1 }
 0x3e5   : > { %v1862_v21 = vpop.f32.mrb[41].mxu0  ;;  %v2055_v42 = vpop.f32.mrb[73].mxu1  ;;  %v1861_v54 = vadd.f32 %v1860_v43, %v10695_v0  ;;  %v2054_v55 = vadd.f32 %v2053_v19, %v10699_v2 }
 0x3e6   : > { %v1864_v24 = vpop.f32.mrb[42].mxu0  ;;  %v2057_v51 = vpop.f32.mrb[74].mxu1  ;;  %v1863_v22 = vadd.f32 %v1862_v21, %v10703_v3  ;;  %v2056_v28 = vadd.f32 %v2055_v42, %v10707_v49 }
 0x3e7   : > { %v1865_v36 = vadd.f32 %v1864_v24, %v10695_v0  ;;  %v2058_v34 = vadd.f32 %v2057_v51, %v10699_v2  ;;  %v1866_v47 = vpop.f32.mrb[43].mxu0  ;;  %v2059_v57 = vpop.f32.mrb[75].mxu1 }
 0x3e8   : > { %v1867_v33 = vadd.f32 %v1866_v47, %v10703_v3  ;;  %v2060_v40 = vadd.f32 %v2059_v57, %v10707_v49 }
 0x3e9   : > { %v2586_v32 = vpack.c.bf16 %v1865_v36, %v1861_v54  ;;  %v2588_v58 = vpack.c.bf16 %v2058_v34, %v2054_v55 }
 0x3ea   : > { %v2587_v56 = vpack.c.bf16 %v1867_v33, %v1863_v22  ;;  %v2589_v53 = vpack.c.bf16 %v2060_v40, %v2056_v28 }
 0x3eb   : > { %v2671_v31 = vmax.bf16 %v2670_v37, %v2586_v32  ;;  %v2705_v15 = vmax.bf16 %v2704_v27, %v2588_v58 }
 0x3ec   : > { %v2688_v29 = vmax.bf16 %v2687_v8, %v2587_v56  ;;  %v2722_v16 = vmax.bf16 %v2721_v30, %v2589_v53  ;;  %v1870_v17 = vpop.f32.mrb[44].mxu0  ;;  %v2063_v6 = vpop.f32.mrb[76].mxu1 }
 0x3ed   : > { %v1872_v25 = vpop.f32.mrb[45].mxu0  ;;  %v2065_v14 = vpop.f32.mrb[77].mxu1  ;;  %v1871_v5 = vadd.f32 %v1870_v17, %v10695_v0  ;;  %v2064_v12 = vadd.f32 %v2063_v6, %v10699_v2 }
 0x3ee   : > { %v1874_v9 = vpop.f32.mrb[46].mxu0  ;;  %v2067_v18 = vpop.f32.mrb[78].mxu1  ;;  %v1873_v37 = vadd.f32 %v1872_v25, %v10703_v3  ;;  %v2066_v27 = vadd.f32 %v2065_v14, %v10707_v49 }
 0x3ef   : > { %v1875_v52 = vadd.f32 %v1874_v9, %v10695_v0  ;;  %v2068_v43 = vadd.f32 %v2067_v18, %v10699_v2  ;;  %v1876_v19 = vpop.f32.mrb[47].mxu0  ;;  %v2069_v21 = vpop.f32.mrb[79].mxu1 }
 0x3f0   : > { %v1877_v8 = vadd.f32 %v1876_v19, %v10703_v3  ;;  %v2070_v30 = vadd.f32 %v2069_v21, %v10707_v49 }
 0x3f1   : > { %v2594_v42 = vpack.c.bf16 %v1875_v52, %v1871_v5  ;;  %v2596_v24 = vpack.c.bf16 %v2068_v43, %v2064_v12 }
 0x3f2   : > { %v2595_v51 = vpack.c.bf16 %v1877_v8, %v1873_v37  ;;  %v2597_v54 = vpack.c.bf16 %v2070_v30, %v2066_v27 }
 0x3f3   : > { %v10791_v55 = vmax.bf16 %v2671_v31, %v2594_v42  ;;  %v10793_v36 = vmax.bf16 %v2705_v15, %v2596_v24 }
 0x3f4   : > { %v10795_v34 = vmax.bf16 %v2688_v29, %v2595_v51  ;;  %v10797_v47 = vmax.bf16 %v2722_v16, %v2597_v54  ;;  %v1880_v57 = vpop.f32.mrb[48].mxu0  ;;  %v2073_v22 = vpop.f32.mrb[80].mxu1 }
 0x3f5   : > { %v1882_v28 = vpop.f32.mrb[49].mxu0  ;;  %v2075_v33 = vpop.f32.mrb[81].mxu1  ;;  %v1881_v53 = vadd.f32 %v1880_v57, %v10695_v0  ;;  %v2074_v17 = vadd.f32 %v2073_v22, %v10699_v2 }
 0x3f6   : > { %v1884_v40 = vpop.f32.mrb[50].mxu0  ;;  %v2077_v32 = vpop.f32.mrb[82].mxu1  ;;  %v1883_v29 = vadd.f32 %v1882_v28, %v10703_v3  ;;  %v2076_v16 = vadd.f32 %v2075_v33, %v10707_v49 }
 0x3f7   : > { %v1886_v58 = vpop.f32.mrb[51].mxu0  ;;  %v2079_v56 = vpop.f32.mrb[83].mxu1  ;;  %v1885_v31 = vadd.f32 %v1884_v40, %v10695_v0  ;;  %v2078_v15 = vadd.f32 %v2077_v32, %v10699_v2 }
 0x3f8   : > { %v1887_v6 = vadd.f32 %v1886_v58, %v10703_v3  ;;  %v2080_v25 = vadd.f32 %v2079_v56, %v10707_v49 }
 0x3f9   : > { %v2602_v14 = vpack.c.bf16 %v1885_v31, %v1881_v53  ;;  %v2604_v9 = vpack.c.bf16 %v2078_v15, %v2074_v17 }
 0x3fa   : > { %v2603_v18 = vpack.c.bf16 %v1887_v6, %v1883_v29  ;;  %v2605_v5 = vpack.c.bf16 %v2080_v25, %v2076_v16 }
 0x3fc   : > { %v1890_v12 = vpop.f32.mrb[52].mxu0  ;;  %v2083_v52 = vpop.f32.mrb[84].mxu1 }
 0x3fd   : > { %v1892_v43 = vpop.f32.mrb[53].mxu0  ;;  %v2085_v19 = vpop.f32.mrb[85].mxu1  ;;  %v1891_v27 = vadd.f32 %v1890_v12, %v10695_v0  ;;  %v2084_v8 = vadd.f32 %v2083_v52, %v10699_v2 }
 0x3fe   : > { %v1894_v21 = vpop.f32.mrb[54].mxu0  ;;  %v2087_v37 = vpop.f32.mrb[86].mxu1  ;;  %v1893_v54 = vadd.f32 %v1892_v43, %v10703_v3  ;;  %v2086_v57 = vadd.f32 %v2085_v19, %v10707_v49 }
 0x3ff   : > { %v1895_v30 = vadd.f32 %v1894_v21, %v10695_v0  ;;  %v2088_v42 = vadd.f32 %v2087_v37, %v10699_v2  ;;  %v1896_v24 = vpop.f32.mrb[55].mxu0  ;;  %v2089_v51 = vpop.f32.mrb[87].mxu1 }
 0x400   : > { %v1897_v22 = vadd.f32 %v1896_v24, %v10703_v3  ;;  %v2090_v28 = vadd.f32 %v2089_v51, %v10707_v49 }
 0x401   : > { %v2610_v33 = vpack.c.bf16 %v1895_v30, %v1891_v27  ;;  %v2612_v40 = vpack.c.bf16 %v2088_v42, %v2084_v8 }
 0x402   : > { %v2611_v32 = vpack.c.bf16 %v1897_v22, %v1893_v54  ;;  %v2613_v58 = vpack.c.bf16 %v2090_v28, %v2086_v57 }
 0x403   : > { %v2802_v56 = vmax.bf16 %v2610_v33, %v2602_v14  ;;  %v2836_v53 = vmax.bf16 %v2612_v40, %v2604_v9  ;;  %v2673_v40 = vunpack.i.l.bf16 %v10791_v55 }
 0x404   : > { %v2819_v17 = vmax.bf16 %v2611_v32, %v2603_v18  ;;  %v2853_v31 = vmax.bf16 %v2613_v58, %v2605_v5  ;;  %v1900_v15 = vpop.f32.mrb[56].mxu0  ;;  %v2093_v29 = vpop.f32.mrb[88].mxu1  ;;  %v2674_v32 = vunpack.i.h.bf16 %v10791_v55  ;;  %v2707_v58 = vunpack.i.l.bf16 %v10793_v36 }
 0x405   : > { %v1902_v16 = vpop.f32.mrb[57].mxu0  ;;  %v2095_v6 = vpop.f32.mrb[89].mxu1  ;;  %v1901_v52 = vadd.f32 %v1900_v15, %v10695_v0  ;;  %v2094_v43 = vadd.f32 %v2093_v29, %v10699_v2  ;;  %v2708_v15 = vunpack.i.h.bf16 %v10793_v36 }
 0x406   : > { %v1904_v25 = vpop.f32.mrb[58].mxu0  ;;  %v2097_v12 = vpop.f32.mrb[90].mxu1  ;;  %v1903_v14 = vadd.f32 %v1902_v16, %v10703_v3  ;;  %v2096_v9 = vadd.f32 %v2095_v6, %v10707_v49  ;;  %v2690_v6 = vunpack.i.l.bf16 %v10795_v34 }
 0x407   : > { %v1905_v19 = vadd.f32 %v1904_v25, %v10695_v0  ;;  %v2098_v21 = vadd.f32 %v2097_v12, %v10699_v2  ;;  %v1906_v37 = vpop.f32.mrb[59].mxu0  ;;  %v2099_v27 = vpop.f32.mrb[91].mxu1  ;;  %v2691_v25 = vunpack.i.h.bf16 %v10795_v34 }
 0x408   : > { %v1907_v18 = vadd.f32 %v1906_v37, %v10703_v3  ;;  %v2100_v5 = vadd.f32 %v2099_v27, %v10707_v49  ;;  %v2675_v27 = vmax.f32 %v2673_v40, %v2674_v32 }
 0x409   : > { %v2618_v8 = vpack.c.bf16 %v1905_v19, %v1901_v52  ;;  %v2620_v30 = vpack.c.bf16 %v2098_v21, %v2094_v43 }
 0x40a   : > { %v2619_v42 = vpack.c.bf16 %v1907_v18, %v1903_v14  ;;  %v2621_v24 = vpack.c.bf16 %v2100_v5, %v2096_v9  ;;  %v2709_v14 = vmax.f32 %v2707_v58, %v2708_v15  ;;  %v2692_v5 = vmax.f32 %v2690_v6, %v2691_v25 }
 0x40b   : > { %v2803_v51 = vmax.bf16 %v2802_v56, %v2618_v8  ;;  %v2837_v54 = vmax.bf16 %v2836_v53, %v2620_v30  ;;  %v2724_v56 = vunpack.i.l.bf16 %v10797_v47  ;;  %v2725_v53 = vunpack.i.h.bf16 %v10797_v47 }
 0x40c   : > { %v2820_v57 = vmax.bf16 %v2819_v17, %v2619_v42  ;;  %v2854_v22 = vmax.bf16 %v2853_v31, %v2621_v24  ;;  %v1910_v28 = vpop.f32.mrb[60].mxu0  ;;  %v2103_v33 = vpop.f32.mrb[92].mxu1  ;;  %v2676_v20 = vrot.slane %v2675_v27, 4  ;;  %v2693_v50 = vrot.slane %v2692_v5, 4 }
 0x40d   : > { %v1912_v29 = vpop.f32.mrb[61].mxu0  ;;  %v2105_v16 = vpop.f32.mrb[93].mxu1  ;;  %v1911_v12 = vadd.f32 %v1910_v28, %v10695_v0  ;;  %v2104_v55 = vadd.f32 %v2103_v33, %v10699_v2  ;;  %v2726_v8 = vmax.f32 %v2724_v56, %v2725_v53 }
 0x40e   : > { %v1914_v17 = vpop.f32.mrb[62].mxu0  ;;  %v2107_v31 = vpop.f32.mrb[94].mxu1  ;;  %v1913_v21 = vadd.f32 %v1912_v29, %v10703_v3  ;;  %v2106_v34 = vadd.f32 %v2105_v16, %v10707_v49  ;;  %v2710_v16 = vrot.slane %v2709_v14, 4 }
 0x40f   : > { %v1915_v52 = vadd.f32 %v1914_v17, %v10695_v0  ;;  %v2108_v36 = vadd.f32 %v2107_v31, %v10699_v2  ;;  %v1916_v43 = vpop.f32.mrb[63].mxu0  ;;  %v2109_v19 = vpop.f32.mrb[95].mxu1 }
 0x410   : > { %v1917_v37 = vadd.f32 %v1916_v43, %v10703_v3  ;;  %v2110_v47 = vadd.f32 %v2109_v19, %v10707_v49  ;;  %v2727_v19 = vrot.slane %v2726_v8, 4 }
 0x411   : > { %v2626_v9 = vpack.c.bf16 %v1915_v52, %v1911_v12  ;;  %v2628_v18 = vpack.c.bf16 %v2108_v36, %v2104_v55  ;;  %v2677_v12 = vmax.f32 %v2675_v27, %v2676_v20  ;;  %v2711_v55 = vmax.f32 %v2709_v14, %v2710_v16 }
 0x412   : > { %v2627_v30 = vpack.c.bf16 %v1917_v37, %v1913_v21  ;;  %v2629_v42 = vpack.c.bf16 %v2110_v47, %v2106_v34  ;;  %v2694_v21 = vmax.f32 %v2692_v5, %v2693_v50  ;;  %v2728_v34 = vmax.f32 %v2726_v8, %v2727_v19 }
 0x413   : > { %v2804_v24 = vmax.bf16 %v2803_v51, %v2626_v9  ;;  %v2838_v28 = vmax.bf16 %v2837_v54, %v2628_v18 }
 0x414   : > { %v2821_v33 = vmax.bf16 %v2820_v57, %v2627_v30  ;;  %v2855_v17 = vmax.bf16 %v2854_v22, %v2629_v42  ;;  %v1920_v31 = vpop.f32.mrb[64].mxu0  ;;  %v2113_v29 = vpop.f32.mrb[96].mxu1  ;;  %v2729_v27 = vrot.slane %v2728_v34, 2 }
 0x415   : > { %v1922_v63 = vpop.f32.mrb[65].mxu0  ;;  %v2115_v43 = vpop.f32.mrb[97].mxu1  ;;  %v1921_v58 = vadd.f32 %v1920_v31, %v10695_v0  ;;  %v2114_v15 = vadd.f32 %v2113_v29, %v10699_v2  ;;  %v2678_v29 = vrot.slane %v2677_v12, 2 }
 0x416   : > { %v1924_v40 = vpop.f32.mrb[66].mxu0  ;;  %v2117_v32 = vpop.f32.mrb[98].mxu1  ;;  %v1923_v22 = vadd.f32 %v1922_v63, %v10703_v3  ;;  %v2116_v25 = vadd.f32 %v2115_v43, %v10707_v49  ;;  %v2712_v43 = vrot.slane %v2711_v55, 2 }
 0x417   : > { %v1925_v6 = vadd.f32 %v1924_v40, %v10695_v0  ;;  %v2118_v51 = vadd.f32 %v2117_v32, %v10699_v2  ;;  %v1926_v54 = vpop.f32.mrb[67].mxu0  ;;  %v2119_v57 = vpop.f32.mrb[99].mxu1 }
 0x418   : > { %v1927_v56 = vadd.f32 %v1926_v54, %v10703_v3  ;;  %v2120_v53 = vadd.f32 %v2119_v57, %v10707_v49  ;;  %v2695_v54 = vrot.slane %v2694_v21, 2 }
 0x419   : > { %v2634_v52 = vpack.c.bf16 %v1925_v6, %v1921_v58  ;;  %v2636_v36 = vpack.c.bf16 %v2118_v51, %v2114_v15  ;;  %v2679_v58 = vmax.f32 %v2677_v12, %v2678_v29  ;;  %v2713_v51 = vmax.f32 %v2711_v55, %v2712_v43 }
 0x41a   : > { %v2635_v37 = vpack.c.bf16 %v1927_v56, %v1923_v22  ;;  %v2637_v47 = vpack.c.bf16 %v2120_v53, %v2116_v25  ;;  %v2696_v56 = vmax.f32 %v2694_v21, %v2695_v54  ;;  %v2730_v53 = vmax.f32 %v2728_v34, %v2729_v27 }
 0x41b   : > { %v2805_v9 = vmax.bf16 %v2804_v24, %v2634_v52  ;;  %v2839_v18 = vmax.bf16 %v2838_v28, %v2636_v36 }
 0x41c   : > { %v2822_v30 = vmax.bf16 %v2821_v33, %v2635_v37  ;;  %v2856_v42 = vmax.bf16 %v2855_v17, %v2637_v47  ;;  %v1930_v31 = vpop.f32.mrb[68].mxu0  ;;  %v2123_v63 = vpop.f32.mrb[100].mxu1  ;;  %v2697_v12 = vrot.slane %v2696_v56, 1  ;;  %v2731_v29 = vrot.slane %v2730_v53, 1 }
 0x41d   : > { %v1932_v40 = vpop.f32.mrb[69].mxu0  ;;  %v2125_v32 = vpop.f32.mrb[101].mxu1  ;;  %v1931_v14 = vadd.f32 %v1930_v31, %v10695_v0  ;;  %v2124_v50 = vadd.f32 %v2123_v63, %v10699_v2 }
 0x41e   : > { %v1934_v57 = vpop.f32.mrb[70].mxu0  ;;  %v2127_v20 = vpop.f32.mrb[102].mxu1  ;;  %v1933_v33 = vadd.f32 %v1932_v40, %v10703_v3  ;;  %v2126_v17 = vadd.f32 %v2125_v32, %v10707_v49  ;;  %v2680_v40 = vrot.slane %v2679_v58, 1 }
 0x41f   : > { %v1935_v5 = vadd.f32 %v1934_v57, %v10695_v0  ;;  %v2128_v8 = vadd.f32 %v2127_v20, %v10699_v2  ;;  %v1936_v24 = vpop.f32.mrb[71].mxu0  ;;  %v2129_v28 = vpop.f32.mrb[103].mxu1  ;;  %v2714_v20 = vrot.slane %v2713_v51, 1 }
 0x420   : > { %v1937_v16 = vadd.f32 %v1936_v24, %v10703_v3  ;;  %v2130_v19 = vadd.f32 %v2129_v28, %v10707_v49 }
 0x421   : > { %v2642_v15 = vpack.c.bf16 %v1935_v5, %v1931_v14  ;;  %v2644_v6 = vpack.c.bf16 %v2128_v8, %v2124_v50  ;;  %v2681_v14 = vmax.f32 %v2679_v58, %v2680_v40  ;;  %v2715_v8 = vmax.f32 %v2713_v51, %v2714_v20 }
 0x422   : > { %v2643_v22 = vpack.c.bf16 %v1937_v16, %v1933_v33  ;;  %v2645_v25 = vpack.c.bf16 %v2130_v19, %v2126_v17  ;;  %v2698_v16 = vmax.f32 %v2696_v56, %v2697_v12  ;;  %v2732_v19 = vmax.f32 %v2730_v53, %v2731_v29 }
 0x423   : > { %v2806_v52 = vmax.bf16 %v2805_v9, %v2642_v15  ;;  %v2840_v36 = vmax.bf16 %v2839_v18, %v2644_v6  ;;  %v1428_v58 = vsub.s32 5, %v10673_v26  ;;  %v1436_v51 = vsub.s32 7, %v10673_v26 }
 0x424   : > { %v2823_v37 = vmax.bf16 %v2822_v30, %v2643_v22  ;;  %v2857_v47 = vmax.bf16 %v2856_v42, %v2645_v25  ;;  %v1940_v31 = vpop.f32.mrb[72].mxu0  ;;  %v2133_v63 = vpop.f32.mrb[104].mxu1  ;;  %v2682_v40 = vpack.i.bf16 %v2681_v14, %v2681_v14  ;;  %v2699_v53 = vpack.i.bf16 %v2698_v16, %v2698_v16 }
 0x425   : > { %v1942_v32 = vpop.f32.mrb[73].mxu0  ;;  %v2135_v57 = vpop.f32.mrb[105].mxu1  ;;  %v1941_v55 = vadd.f32 %v1940_v31, %v10695_v0  ;;  %v2134_v43 = vadd.f32 %v2133_v63, %v10699_v2  ;;  %v10882_v14 = vrot.slane %v10681_v23, %v1428_v58 }
 0x426   : > { %v1944_v24 = vpop.f32.mrb[74].mxu0  ;;  %v2137_v28 = vpop.f32.mrb[106].mxu1  ;;  %v1943_v30 = vadd.f32 %v1942_v32, %v10703_v3  ;;  %v2136_v42 = vadd.f32 %v2135_v57, %v10707_v49 }
 0x427   : > { %v1945_v21 = vadd.f32 %v1944_v24, %v10695_v0  ;;  %v2138_v34 = vadd.f32 %v2137_v28, %v10699_v2  ;;  %v1946_v9 = vpop.f32.mrb[75].mxu0  ;;  %v2139_v18 = vpop.f32.mrb[107].mxu1  ;;  %v1424_v24 = vsub.s32 4, %v10673_v26  ;;  %v1432_v28 = vsub.s32 6, %v10673_v26 }
 0x428   : > { %v1947_v54 = vadd.f32 %v1946_v9, %v10703_v3  ;;  %v2140_v27 = vadd.f32 %v2139_v18, %v10707_v49 }
 0x429   : > { %v2650_v50 = vpack.c.bf16 %v1945_v21, %v1941_v55  ;;  %v2652_v5 = vpack.c.bf16 %v2138_v34, %v2134_v43 }
 0x42a   : > { %v2651_v33 = vpack.c.bf16 %v1947_v54, %v1943_v30  ;;  %v2653_v17 = vpack.c.bf16 %v2140_v27, %v2136_v42  ;;  %v10876_v54 = vrot.slane %v10681_v23, %v1424_v24  ;;  %v10879_v27 = vrot.slane %v10681_v23, %v1432_v28 }
 0x42b   : > { %v2807_v15 = vmax.bf16 %v2806_v52, %v2650_v50  ;;  %v2841_v6 = vmax.bf16 %v2840_v36, %v2652_v5  ;;  %v2733_v52 = vpack.i.bf16 %v2732_v19, %v2732_v19  ;;  %v2716_v36 = vpack.i.bf16 %v2715_v8, %v2715_v8 }
 0x42c   : > { %v2824_v22 = vmax.bf16 %v2823_v37, %v2651_v33  ;;  %v2858_v25 = vmax.bf16 %v2857_v47, %v2653_v17  ;;  %v1950_v31 = vpop.f32.mrb[76].mxu0  ;;  %v2143_v63 = vpop.f32.mrb[108].mxu1  ;;  %v10885_v50 = vrot.slane %v10681_v23, %v1436_v51  ;;  %v10887_v5 = vunpack.c.l.b16 %v2682_v40 }
 0x42d   : > { %v1952_v32 = vpop.f32.mrb[77].mxu0  ;;  %v2145_v57 = vpop.f32.mrb[109].mxu1  ;;  %v1951_v37 = vadd.f32 %v1950_v31, %v10695_v0  ;;  %v2144_v47 = vadd.f32 %v2143_v63, %v10699_v2  ;;  %v10889_v8 = vunpack.c.l.b16 %v2716_v36  ;;  %v10891_v31 = vunpack.c.l.b16 %v2699_v53 }
 0x42e   : > { %v1954_v20 = vpop.f32.mrb[78].mxu0  ;;  %v2147_v56 = vpop.f32.mrb[110].mxu1  ;;  %v1953_v21 = vadd.f32 %v1952_v32, %v10703_v3  ;;  %v2146_v34 = vadd.f32 %v2145_v57, %v10707_v49  ;;  %v10893_v63 = vunpack.c.l.b16 %v2733_v52 }
 0x42f   : > { %v1955_v12 = vadd.f32 %v1954_v20, %v10695_v0  ;;  %v2148_v29 = vadd.f32 %v2147_v56, %v10699_v2  ;;  %v1956_v55 = vpop.f32.mrb[79].mxu0  ;;  %v2149_v43 = vpop.f32.mrb[111].mxu1 }
 0x430   : > { %v1957_v9 = vadd.f32 %v1956_v55, %v10703_v3  ;;  %v2150_v18 = vadd.f32 %v2149_v43, %v10707_v49 }
 0x431   : > { %v2658_v30 = vpack.c.bf16 %v1955_v12, %v1951_v37  ;;  %v2660_v42 = vpack.c.bf16 %v2148_v29, %v2144_v47 }
 0x432   : > { %v2659_v0 = vpack.c.bf16 %v1957_v9, %v1953_v21  ;;  %v2661_v2 = vpack.c.bf16 %v2150_v18, %v2146_v34 }
 0x433   : > { %v2808_v3 = vmax.bf16 %v2807_v15, %v2658_v30  ;;  %v2842_v49 = vmax.bf16 %v2841_v6, %v2660_v42 }
 0x434   : > { %v2825_v33 = vmax.bf16 %v2824_v22, %v2659_v0  ;;  %v2859_v17 = vmax.bf16 %v2858_v25, %v2661_v2  ;;  %v2186_v16 = vpop.f32.mrb[80].mxu0  ;;  %v2379_v19 = vpop.f32.mrb[112].mxu1 }
 0x435   : > { %v2809_v32 = vunpack.i.l.bf16 %v2808_v3  ;;  %v2810_v57 = vunpack.i.h.bf16 %v2808_v3  ;;  %v2843_v24 = vunpack.i.l.bf16 %v2842_v49  ;;  %v2844_v28 = vunpack.i.h.bf16 %v2842_v49  ;;  %v2188_v23 = vpop.f32.mrb[81].mxu0  ;;  %v2381_v58 = vpop.f32.mrb[113].mxu1 }
 0x436   : > { %v2826_v51 = vunpack.i.l.bf16 %v2825_v33  ;;  %v2827_v40 = vunpack.i.h.bf16 %v2825_v33  ;;  %v2860_v15 = vunpack.i.l.bf16 %v2859_v17  ;;  %v2861_v6 = vunpack.i.h.bf16 %v2859_v17  ;;  %v2190_v20 = vpop.f32.mrb[82].mxu0  ;;  %v2383_v56 = vpop.f32.mrb[114].mxu1 }
 0x437   : > { %v2811_v22 = vmax.f32 %v2809_v32, %v2810_v57  ;;  %v2845_v25 = vmax.f32 %v2843_v24, %v2844_v28  ;;  %v2187_v36 = vadd.f32 %v2186_v16, %v10876_v54  ;;  %v2380_v53 = vadd.f32 %v2379_v19, %v10879_v27  ;;  %v2192_v52 = vpop.f32.mrb[83].mxu0  ;;  %v2385_v37 = vpop.f32.mrb[115].mxu1 }
 0x438   : > { %v2828_v47 = vmax.f32 %v2826_v51, %v2827_v40  ;;  %v2862_v12 = vmax.f32 %v2860_v15, %v2861_v6  ;;  %v2189_v29 = vadd.f32 %v2188_v23, %v10882_v14  ;;  %v2382_v55 = vadd.f32 %v2381_v58, %v10885_v50 }
 0x439   : > { %v2812_v43 = vrot.slane %v2811_v22, 4  ;;  %v2846_v21 = vrot.slane %v2845_v25, 4  ;;  %v2191_v34 = vadd.f32 %v2190_v20, %v10876_v54  ;;  %v2384_v9 = vadd.f32 %v2383_v56, %v10879_v27 }
 0x43a   : > { %v2829_v18 = vrot.slane %v2828_v47, 4  ;;  %v2863_v30 = vrot.slane %v2862_v12, 4  ;;  %v2193_v42 = vadd.f32 %v2192_v52, %v10882_v14  ;;  %v2386_v0 = vadd.f32 %v2385_v37, %v10885_v50 }
 0x43b   : > { %v2813_v2 = vmax.f32 %v2811_v22, %v2812_v43  ;;  %v2847_v3 = vmax.f32 %v2845_v25, %v2846_v21  ;;  %v2542_v49 = vpack.c.bf16 %v2191_v34, %v2187_v36  ;;  %v2544_v33 = vpack.c.bf16 %v2384_v9, %v2380_v53 }
 0x43c   : > { %v2830_v17 = vmax.f32 %v2828_v47, %v2829_v18  ;;  %v2864_v16 = vmax.f32 %v2862_v12, %v2863_v30  ;;  %v2543_v19 = vpack.c.bf16 %v2193_v42, %v2189_v29  ;;  %v2545_v32 = vpack.c.bf16 %v2386_v0, %v2382_v55  ;;  %v2196_v57 = vpop.f32.mrb[84].mxu0  ;;  %v2389_v24 = vpop.f32.mrb[116].mxu1 }
 0x43d   : > { %v2814_v28 = vrot.slane %v2813_v2, 2  ;;  %v2848_v23 = vrot.slane %v2847_v3, 2  ;;  %v2197_v58 = vadd.f32 %v2196_v57, %v10876_v54  ;;  %v2390_v51 = vadd.f32 %v2389_v24, %v10879_v27  ;;  %v2198_v40 = vpop.f32.mrb[85].mxu0  ;;  %v2391_v15 = vpop.f32.mrb[117].mxu1 }
 0x43e   : > { %v2831_v6 = vrot.slane %v2830_v17, 2  ;;  %v2865_v20 = vrot.slane %v2864_v16, 2  ;;  %v2199_v56 = vadd.f32 %v2198_v40, %v10882_v14  ;;  %v2392_v22 = vadd.f32 %v2391_v15, %v10885_v50  ;;  %v2200_v25 = vpop.f32.mrb[86].mxu0  ;;  %v2393_v36 = vpop.f32.mrb[118].mxu1 }
 0x43f   : > { %v2815_v53 = vmax.f32 %v2813_v2, %v2814_v28  ;;  %v2849_v52 = vmax.f32 %v2847_v3, %v2848_v23  ;;  %v2201_v37 = vadd.f32 %v2200_v25, %v10876_v54  ;;  %v2394_v47 = vadd.f32 %v2393_v36, %v10879_v27  ;;  %v2202_v12 = vpop.f32.mrb[87].mxu0  ;;  %v2395_v29 = vpop.f32.mrb[119].mxu1 }
 0x440   : > { %v2203_v55 = vadd.f32 %v2202_v12, %v10882_v14  ;;  %v2396_v43 = vadd.f32 %v2395_v29, %v10885_v50  ;;  %v2832_v21 = vmax.f32 %v2830_v17, %v2831_v6  ;;  %v2866_v34 = vmax.f32 %v2864_v16, %v2865_v20 }
 0x441   : > { %v2816_v9 = vrot.slane %v2815_v53, 1  ;;  %v2850_v18 = vrot.slane %v2849_v52, 1  ;;  %v2550_v30 = vpack.c.bf16 %v2201_v37, %v2197_v58  ;;  %v2552_v42 = vpack.c.bf16 %v2394_v47, %v2390_v51 }
 0x442   : > { %v2551_v0 = vpack.c.bf16 %v2203_v55, %v2199_v56  ;;  %v2553_v57 = vpack.c.bf16 %v2396_v43, %v2392_v22  ;;  %v2833_v2 = vrot.slane %v2832_v21, 1  ;;  %v2867_v3 = vrot.slane %v2866_v34, 1 }
 0x443   : > { %v2817_v24 = vmax.f32 %v2815_v53, %v2816_v9  ;;  %v2734_v28 = vmax.bf16 %v2550_v30, %v2542_v49  ;;  %v2768_v23 = vmax.bf16 %v2552_v42, %v2544_v33  ;;  %v2851_v40 = vmax.f32 %v2849_v52, %v2850_v18 }
 0x444   : > { %v2751_v15 = vmax.bf16 %v2551_v0, %v2543_v19  ;;  %v2785_v25 = vmax.bf16 %v2553_v57, %v2545_v32  ;;  %v2206_v36 = vpop.f32.mrb[88].mxu0  ;;  %v2399_v12 = vpop.f32.mrb[120].mxu1  ;;  %v2834_v26 = vmax.f32 %v2832_v21, %v2833_v2  ;;  %v2868_v29 = vmax.f32 %v2866_v34, %v2867_v3 }
 0x445   : > { %v2818_v17 = vpack.i.bf16 %v2817_v24, %v2817_v24  ;;  %v2207_v16 = vadd.f32 %v2206_v36, %v10876_v54  ;;  %v2400_v58 = vadd.f32 %v2399_v12, %v10879_v27  ;;  %v2208_v51 = vpop.f32.mrb[89].mxu0  ;;  %v2401_v6 = vpop.f32.mrb[121].mxu1  ;;  %v2852_v20 = vpack.i.bf16 %v2851_v40, %v2851_v40  ;;  %v9012_v12 = vld [vmem:[#allocation11 + $0x200] ss:$16 sps:$4 sm:$0xff]  }
 0x446   : > { %v2209_v56 = vadd.f32 %v2208_v51, %v10882_v14  ;;  %v2402_v49 = vadd.f32 %v2401_v6, %v10885_v50  ;;  %v2210_v33 = vpop.f32.mrb[90].mxu0  ;;  %v2403_v22 = vpop.f32.mrb[122].mxu1  ;;  %v2835_v19 = vpack.i.bf16 %v2834_v26, %v2834_v26  ;;  %v2869_v32 = vpack.i.bf16 %v2868_v29, %v2868_v29  ;;  %v9015_v29 = vld [vmem:[#allocation11 + $0x208] ss:$16 sps:$4 sm:$0xff]  }
 0x447   : > { %v3240_v53 = vunpack.c.l.b16 %v2818_v17  ;;  %v2211_v52 = vadd.f32 %v2210_v33, %v10876_v54  ;;  %v2404_v37 = vadd.f32 %v2403_v22, %v10879_v27  ;;  %v2212_v47 = vpop.f32.mrb[91].mxu0  ;;  %v2405_v55 = vpop.f32.mrb[123].mxu1  ;;  %v3242_v43 = vunpack.c.l.b16 %v2852_v20 }
 0x448   : > { %v2213_v21 = vadd.f32 %v2212_v47, %v10882_v14  ;;  %v2406_v34 = vadd.f32 %v2405_v55, %v10885_v50  ;;  %v3241_v9 = vunpack.c.l.b16 %v2835_v19  ;;  %v3243_v18 = vunpack.c.l.b16 %v2869_v32 }
 0x449   : > { %v2558_v30 = vpack.c.bf16 %v2211_v52, %v2207_v16  ;;  %v2560_v42 = vpack.c.bf16 %v2404_v37, %v2400_v58  ;;  %v3249_v26 = vsel %vm3248_vm3, %v3240_v53, %v10887_v5  ;;  %v10923_v0 = vsel %vm3248_vm3, %v3242_v43, %v10889_v8  ;;  %v9018_v53 = vld [vmem:[#allocation11 + $0x220] ss:$16 sps:$4 sm:$0xff]   ;;  %v9021_v52 = vld [vmem:[#allocation11 + $0x228] ss:$16 sps:$4 sm:$0xff]   ;;  %v9026_v43 = vld [vmem:[#allocation11 + $0x244] ss:$16 sps:$4 sm:$0xff]  }
 0x44a   : > { %v2559_v57 = vpack.c.bf16 %v2213_v21, %v2209_v56  ;;  %v2561_v2 = vpack.c.bf16 %v2406_v34, %v2402_v49  ;;  %v3250_v3 = vsel %vm3248_vm3, %v3241_v9, %v10891_v31  ;;  %v3252_v17 = vsel %vm3248_vm3, %v3243_v18, %v10893_v63  ;;  %v9020_v56 = vld [vmem:[#allocation11 + $0x224] ss:$16 sps:$4 sm:$0xff]   ;;  %v9023_v49 = vld [vmem:[#allocation11 + $0x22c] ss:$16 sps:$4 sm:$0xff]  }
 0x44b   : > { %v2735_v24 = vmax.bf16 %v2734_v28, %v2558_v30  ;;  %v2769_v40 = vmax.bf16 %v2768_v23, %v2560_v42  ;;  %v3258_v36 = vpack.c.b16 %v3250_v3, %v3250_v3  ;;  %v3257_v6 = vpack.c.b16 %v3249_v26, %v3249_v26  ;;  %v9029_v21 = vld [vmem:[#allocation11 + $0x24c] ss:$16 sps:$4 sm:$0xff]  }
 0x44c   : > { %v2752_v16 = vmax.bf16 %v2751_v15, %v2559_v57  ;;  %v2786_v58 = vmax.bf16 %v2785_v25, %v2561_v2  ;;  %v2216_v5 = vpop.f32.mrb[92].mxu0  ;;  %v2409_v51 = vpop.f32.mrb[124].mxu1  ;;  %v3260_v63 = vpack.c.b16 %v3252_v17, %v3252_v17  ;;  %v9024_v57 = vld [vmem:[#allocation11 + $0x240] ss:$16 sps:$4 sm:$0xff]   ;;  %v9027_v2 = vld [vmem:[#allocation11 + $0x248] ss:$16 sps:$4 sm:$0xff]  }
 0x44d   : > { %v2218_v8 = vpop.f32.mrb[93].mxu0  ;;  %v2411_v20 = vpop.f32.mrb[125].mxu1  ;;  %4585 = vmatprep.mubr.bf16.mxu0 %v3258_v36  ;;  %4749 = vmatprep.mubr.bf16.mxu1 %v3258_v36  ;;  %v2217_v31 = vadd.f32 %v2216_v5, %v10876_v54  ;;  %v2410_v28 = vadd.f32 %v2409_v51, %v10879_v27  ;;  %v9032_v17 = vld [vmem:[#allocation11 + $0x264] ss:$16 sps:$4 sm:$0xff]   ;;  %v9035_v5 = vld [vmem:[#allocation11 + $0x26c] ss:$16 sps:$4 sm:$0xff]  }
 0x44e   : > { %v2220_v23 = vpop.f32.mrb[94].mxu0  ;;  %v2413_v33 = vpop.f32.mrb[126].mxu1  ;;  %4586 = vmatmul.mubr.bf16.vlgmr.msra.gmra.mrb[144].mxu0 %v3257_v6  ;;  %4750 = vmatmul.mubr.bf16.vlgmr.msra.gmra.mrb[176].mxu1 %v3257_v6  ;;  %v2219_v15 = vadd.f32 %v2218_v8, %v10882_v14  ;;  %v2412_v37 = vadd.f32 %v2411_v20, %v10885_v50 }
 0x44f   : > { %v2221_v25 = vadd.f32 %v2220_v23, %v10876_v54  ;;  %v2414_v22 = vadd.f32 %v2413_v33, %v10879_v27  ;;  %4595 = vmatpush1.bf16.msra.mxu0 %v9012_v12  ;;  %4759 = vmatpush1.bf16.msra.mxu1 %v9015_v29  ;;  %v2222_v19 = vpop.f32.mrb[95].mxu0  ;;  %v2415_v32 = vpop.f32.mrb[127].mxu1  ;;  %v9033_v23 = vld [vmem:[#allocation11 + $0x268] ss:$16 sps:$4 sm:$0xff]  }
 0x450   : > { %v2223_v47 = vadd.f32 %v2222_v19, %v10882_v14  ;;  %v2416_v55 = vadd.f32 %v2415_v32, %v10885_v50  ;;  %4626 = vmatprep.mubr.bf16.mxu0 %v3260_v63  ;;  %4790 = vmatprep.mubr.bf16.mxu1 %v3260_v63 }
 0x451   : > { %v2566_v34 = vpack.c.bf16 %v2221_v25, %v2217_v31  ;;  %v2568_v9 = vpack.c.bf16 %v2414_v22, %v2410_v28  ;;  %4596 = vmatprep.subr.bf16.mxu0 %v9020_v56  ;;  %4760 = vmatprep.subr.bf16.mxu1 %v9023_v49  ;;  %v9030_v28 = vld [vmem:[#allocation11 + $0x260] ss:$16 sps:$4 sm:$0xff]   ;;  %v9038_v25 = vld [vmem:[#allocation11 + $0x284] ss:$16 sps:$4 sm:$0xff]   ;;  %v9041_v22 = vld [vmem:[#allocation11 + $0x28c] ss:$16 sps:$4 sm:$0xff]  }
 0x452   : > { %v2567_v18 = vpack.c.bf16 %v2223_v47, %v2219_v15  ;;  %v2569_v30 = vpack.c.bf16 %v2416_v55, %v2412_v37  ;;  %v9036_v55 = vld [vmem:[#allocation11 + $0x280] ss:$16 sps:$4 sm:$0xff]  }
 0x453   : > { %v2736_v42 = vmax.bf16 %v2735_v24, %v2566_v34  ;;  %v2770_v26 = vmax.bf16 %v2769_v40, %v2568_v9  ;;  %4597 = vmatpush1.bf16.msra.mxu0 %v9018_v53  ;;  %4761 = vmatpush1.bf16.msra.mxu1 %v9021_v52 }
 0x454   : > { %v2753_v3 = vmax.bf16 %v2752_v16, %v2567_v18  ;;  %v2787_v36 = vmax.bf16 %v2786_v58, %v2569_v30  ;;  %v2226_v12 = vpop.f32.mrb[96].mxu0  ;;  %v2419_v29 = vpop.f32.mrb[128].mxu1  ;;  %4598 = vmatprep.subr.bf16.mxu0 %v9026_v43  ;;  %4762 = vmatprep.subr.bf16.mxu1 %v9029_v21  ;;  %v9039_v43 = vld [vmem:[#allocation11 + $0x288] ss:$16 sps:$4 sm:$0xff]   ;;  %v9044_v30 = vld [vmem:[#allocation11 + $0x2a4] ss:$16 sps:$4 sm:$0xff]  }
 0x455   : > { %v2228_v51 = vpop.f32.mrb[97].mxu0  ;;  %v2421_v6 = vpop.f32.mrb[129].mxu1  ;;  %v2227_v8 = vadd.f32 %v2226_v12, %v10876_v54  ;;  %v2420_v20 = vadd.f32 %v2419_v29, %v10879_v27 }
 0x456   : > { %v2230_v24 = vpop.f32.mrb[98].mxu0  ;;  %v2423_v40 = vpop.f32.mrb[130].mxu1  ;;  %v2229_v56 = vadd.f32 %v2228_v51, %v10882_v14  ;;  %v2422_v33 = vadd.f32 %v2421_v6, %v10885_v50 }
 0x457   : > { %v2231_v49 = vadd.f32 %v2230_v24, %v10876_v54  ;;  %v2424_v16 = vadd.f32 %v2423_v40, %v10879_v27  ;;  %4599 = vmatpush1.bf16.msra.mxu0 %v9024_v57  ;;  %4763 = vmatpush1.bf16.msra.mxu1 %v9027_v2  ;;  %v2232_v58 = vpop.f32.mrb[99].mxu0  ;;  %v2425_v31 = vpop.f32.mrb[131].mxu1  ;;  %v9047_v57 = vld [vmem:[#allocation11 + $0x2ac] ss:$16 sps:$4 sm:$0xff]  }
 0x458   : > { %v2233_v63 = vadd.f32 %v2232_v58, %v10882_v14  ;;  %v2426_v15 = vadd.f32 %v2425_v31, %v10885_v50  ;;  %4600 = vmatprep.subr.bf16.mxu0 %v9032_v17  ;;  %4764 = vmatprep.subr.bf16.mxu1 %v9035_v5 }
 0x459   : > { %v2574_v19 = vpack.c.bf16 %v2231_v49, %v2227_v8  ;;  %v2576_v32 = vpack.c.bf16 %v2424_v16, %v2420_v20  ;;  %v9042_v8 = vld [vmem:[#allocation11 + $0x2a0] ss:$16 sps:$4 sm:$0xff]   ;;  %v9045_v20 = vld [vmem:[#allocation11 + $0x2a8] ss:$16 sps:$4 sm:$0xff]   ;;  %v9050_v49 = vld [vmem:[#allocation11 + $0x2c4] ss:$16 sps:$4 sm:$0xff]  }
 0x45a   : > { %v2575_v53 = vpack.c.bf16 %v2233_v63, %v2229_v56  ;;  %v2577_v52 = vpack.c.bf16 %v2426_v15, %v2422_v33  ;;  %v9053_v16 = vld [vmem:[#allocation11 + $0x2cc] ss:$16 sps:$4 sm:$0xff]   ;;  %v9048_v15 = vld [vmem:[#allocation11 + $0x2c0] ss:$16 sps:$4 sm:$0xff]  }
 0x45b   : > { %v2737_v37 = vmax.bf16 %v2736_v42, %v2574_v19  ;;  %v2771_v47 = vmax.bf16 %v2770_v26, %v2576_v32  ;;  %4601 = vmatpush1.bf16.msra.mxu0 %v9030_v28  ;;  %4765 = vmatpush1.bf16.msra.mxu1 %v9033_v23 }
 0x45c   : > { %v2754_v21 = vmax.bf16 %v2753_v3, %v2575_v53  ;;  %v2788_v34 = vmax.bf16 %v2787_v36, %v2577_v52  ;;  %v2236_v9 = vpop.f32.mrb[100].mxu0  ;;  %v2429_v18 = vpop.f32.mrb[132].mxu1  ;;  %4602 = vmatprep.subr.bf16.mxu0 %v9038_v25  ;;  %4766 = vmatprep.subr.bf16.mxu1 %v9041_v22  ;;  %v9051_v25 = vld [vmem:[#allocation11 + $0x2c8] ss:$16 sps:$4 sm:$0xff]   ;;  %v9056_v52 = vld [vmem:[#allocation11 + $0x2e4] ss:$16 sps:$4 sm:$0xff]  }
 0x45d   : > { %v2238_v2 = vpop.f32.mrb[101].mxu0  ;;  %v2431_v12 = vpop.f32.mrb[133].mxu1  ;;  %v2237_v29 = vadd.f32 %v2236_v9, %v10876_v54  ;;  %v2430_v17 = vadd.f32 %v2429_v18, %v10879_v27 }
 0x45e   : > { %v2240_v42 = vpop.f32.mrb[102].mxu0  ;;  %v2433_v26 = vpop.f32.mrb[134].mxu1  ;;  %v2239_v5 = vadd.f32 %v2238_v2, %v10882_v14  ;;  %v2432_v24 = vadd.f32 %v2431_v12, %v10885_v50 }
 0x45f   : > { %v2241_v51 = vadd.f32 %v2240_v42, %v10876_v54  ;;  %v2434_v3 = vadd.f32 %v2433_v26, %v10879_v27  ;;  %4603 = vmatpush1.bf16.msra.mxu0 %v9036_v55  ;;  %4767 = vmatpush1.bf16.msra.mxu1 %v9039_v43  ;;  %v2242_v36 = vpop.f32.mrb[103].mxu0  ;;  %v2435_v6 = vpop.f32.mrb[135].mxu1  ;;  %v9059_v55 = vld [vmem:[#allocation11 + $0x2ec] ss:$16 sps:$4 sm:$0xff]  }
 0x460   : > { %v2243_v40 = vadd.f32 %v2242_v36, %v10882_v14  ;;  %v2436_v56 = vadd.f32 %v2435_v6, %v10885_v50  ;;  %4604 = vmatprep.subr.bf16.mxu0 %v9044_v30  ;;  %4768 = vmatprep.subr.bf16.mxu1 %v9047_v57 }
 0x461   : > { %v2582_v58 = vpack.c.bf16 %v2241_v51, %v2237_v29  ;;  %v2584_v31 = vpack.c.bf16 %v2434_v3, %v2430_v17  ;;  %v9054_v29 = vld [vmem:[#allocation11 + $0x2e0] ss:$16 sps:$4 sm:$0xff]   ;;  %v9057_v17 = vld [vmem:[#allocation11 + $0x2e8] ss:$16 sps:$4 sm:$0xff]   ;;  %v9062_v51 = vld [vmem:[#allocation11 + $0x304] ss:$16 sps:$4 sm:$0xff]  }
 0x462   : > { %v2583_v28 = vpack.c.bf16 %v2243_v40, %v2239_v5  ;;  %v2585_v23 = vpack.c.bf16 %v2436_v56, %v2432_v24  ;;  %v9065_v3 = vld [vmem:[#allocation11 + $0x30c] ss:$16 sps:$4 sm:$0xff]   ;;  %v9060_v56 = vld [vmem:[#allocation11 + $0x300] ss:$16 sps:$4 sm:$0xff]  }
 0x463   : > { %v2738_v33 = vmax.bf16 %v2737_v37, %v2582_v58  ;;  %v2772_v63 = vmax.bf16 %v2771_v47, %v2584_v31  ;;  %4605 = vmatpush1.bf16.msra.mxu0 %v9042_v8  ;;  %4769 = vmatpush1.bf16.msra.mxu1 %v9045_v20 }
 0x464   : > { %v2755_v22 = vmax.bf16 %v2754_v21, %v2583_v28  ;;  %v2789_v19 = vmax.bf16 %v2788_v34, %v2585_v23  ;;  %v2246_v32 = vpop.f32.mrb[104].mxu0  ;;  %v2439_v53 = vpop.f32.mrb[136].mxu1  ;;  %4606 = vmatprep.subr.bf16.mxu0 %v9050_v49  ;;  %4770 = vmatprep.subr.bf16.mxu1 %v9053_v16  ;;  %v9063_v49 = vld [vmem:[#allocation11 + $0x308] ss:$16 sps:$4 sm:$0xff]   ;;  %v9068_v23 = vld [vmem:[#allocation11 + $0x324] ss:$16 sps:$4 sm:$0xff]  }
 0x465   : > { %v2248_v43 = vpop.f32.mrb[105].mxu0  ;;  %v2441_v9 = vpop.f32.mrb[137].mxu1  ;;  %v2247_v18 = vadd.f32 %v2246_v32, %v10876_v54  ;;  %v2440_v30 = vadd.f32 %v2439_v53, %v10879_v27 }
 0x466   : > { %v2250_v37 = vpop.f32.mrb[106].mxu0  ;;  %v2443_v47 = vpop.f32.mrb[138].mxu1  ;;  %v2249_v57 = vadd.f32 %v2248_v43, %v10882_v14  ;;  %v2442_v42 = vadd.f32 %v2441_v9, %v10885_v50 }
 0x467   : > { %v2251_v2 = vadd.f32 %v2250_v37, %v10876_v54  ;;  %v2444_v21 = vadd.f32 %v2443_v47, %v10879_v27  ;;  %4607 = vmatpush1.bf16.msra.mxu0 %v9048_v15  ;;  %4771 = vmatpush1.bf16.msra.mxu1 %v9051_v25  ;;  %v2252_v34 = vpop.f32.mrb[107].mxu0  ;;  %v2445_v12 = vpop.f32.mrb[139].mxu1  ;;  %v9071_v15 = vld [vmem:[#allocation11 + $0x32c] ss:$16 sps:$4 sm:$0xff]  }
 0x468   : > { %v2253_v26 = vadd.f32 %v2252_v34, %v10882_v14  ;;  %v2446_v5 = vadd.f32 %v2445_v12, %v10885_v50  ;;  %4608 = vmatprep.subr.bf16.mxu0 %v9056_v52  ;;  %4772 = vmatprep.subr.bf16.mxu1 %v9059_v55 }
 0x469   : > { %v2590_v36 = vpack.c.bf16 %v2251_v2, %v2247_v18  ;;  %v2592_v6 = vpack.c.bf16 %v2444_v21, %v2440_v30  ;;  %v9066_v18 = vld [vmem:[#allocation11 + $0x320] ss:$16 sps:$4 sm:$0xff]   ;;  %v9069_v30 = vld [vmem:[#allocation11 + $0x328] ss:$16 sps:$4 sm:$0xff]   ;;  %v9074_v2 = vld [vmem:[#allocation11 + $0x344] ss:$16 sps:$4 sm:$0xff]  }
 0x46a   : > { %v2591_v8 = vpack.c.bf16 %v2253_v26, %v2249_v57  ;;  %v2593_v20 = vpack.c.bf16 %v2446_v5, %v2442_v42  ;;  %v9077_v21 = vld [vmem:[#allocation11 + $0x34c] ss:$16 sps:$4 sm:$0xff]   ;;  %v9072_v5 = vld [vmem:[#allocation11 + $0x340] ss:$16 sps:$4 sm:$0xff]  }
 0x46b   : > { %v2739_v24 = vmax.bf16 %v2738_v33, %v2590_v36  ;;  %v2773_v40 = vmax.bf16 %v2772_v63, %v2592_v6  ;;  %4609 = vmatpush1.bf16.msra.mxu0 %v9054_v29  ;;  %4773 = vmatpush1.bf16.msra.mxu1 %v9057_v17 }
 0x46c   : > { %v2756_v16 = vmax.bf16 %v2755_v22, %v2591_v8  ;;  %v2790_v58 = vmax.bf16 %v2789_v19, %v2593_v20  ;;  %v2256_v31 = vpop.f32.mrb[108].mxu0  ;;  %v2449_v28 = vpop.f32.mrb[140].mxu1  ;;  %4610 = vmatprep.subr.bf16.mxu0 %v9062_v51  ;;  %4774 = vmatprep.subr.bf16.mxu1 %v9065_v3  ;;  %v9075_v8 = vld [vmem:[#allocation11 + $0x348] ss:$16 sps:$4 sm:$0xff]  }
 0x46d   : > { %v2258_v25 = vpop.f32.mrb[109].mxu0  ;;  %v2451_v32 = vpop.f32.mrb[141].mxu1  ;;  %v2257_v53 = vadd.f32 %v2256_v31, %v10876_v54  ;;  %v2450_v52 = vadd.f32 %v2449_v28, %v10879_v27  ;;  %v9083_v31 = vld [vmem:[#allocation11 + $0x36c] ss:$16 sps:$4 sm:$0xff]  }
 0x46e   : > { %v2260_v33 = vpop.f32.mrb[110].mxu0  ;;  %v2453_v63 = vpop.f32.mrb[142].mxu1  ;;  %v2259_v55 = vadd.f32 %v2258_v25, %v10882_v14  ;;  %v2452_v37 = vadd.f32 %v2451_v32, %v10885_v50 }
 0x46f   : > { %v2261_v43 = vadd.f32 %v2260_v33, %v10876_v54  ;;  %v2454_v22 = vadd.f32 %v2453_v63, %v10879_v27  ;;  %4611 = vmatpush1.bf16.msra.mxu0 %v9060_v56  ;;  %4775 = vmatpush1.bf16.msra.mxu1 %v9063_v49  ;;  %v2262_v19 = vpop.f32.mrb[111].mxu0  ;;  %v2455_v9 = vpop.f32.mrb[143].mxu1  ;;  %v9080_v49 = vld [vmem:[#allocation11 + $0x364] ss:$16 sps:$4 sm:$0xff]   ;;  %v9089_v33 = vld [vmem:[#allocation11 + $0x38c] ss:$16 sps:$4 sm:$0xff]  }
 0x470   : > { %v2263_v47 = vadd.f32 %v2262_v19, %v10882_v14  ;;  %v2456_v57 = vadd.f32 %v2455_v9, %v10885_v50  ;;  %4612 = vmatprep.subr.bf16.mxu0 %v9068_v23  ;;  %4776 = vmatprep.subr.bf16.mxu1 %v9071_v15  ;;  %v9078_v15 = vld [vmem:[#allocation11 + $0x360] ss:$16 sps:$4 sm:$0xff]  }
 0x471   : > { %v2598_v34 = vpack.c.bf16 %v2261_v43, %v2257_v53  ;;  %v2600_v12 = vpack.c.bf16 %v2454_v22, %v2450_v52  ;;  %v9086_v52 = vld [vmem:[#allocation11 + $0x384] ss:$16 sps:$4 sm:$0xff]  }
 0x472   : > { %v2599_v29 = vpack.c.bf16 %v2263_v47, %v2259_v55  ;;  %v2601_v17 = vpack.c.bf16 %v2456_v57, %v2452_v37 }
 0x473   : > { %v10969_v42 = vmax.bf16 %v2739_v24, %v2598_v34  ;;  %v10971_v26 = vmax.bf16 %v2773_v40, %v2600_v12  ;;  %4613 = vmatpush1.bf16.msra.mxu0 %v9066_v18  ;;  %4777 = vmatpush1.bf16.msra.mxu1 %v9069_v30  ;;  %v9084_v18 = vld [vmem:[#allocation11 + $0x380] ss:$16 sps:$4 sm:$0xff]  }
 0x474   : > { %v10973_v51 = vmax.bf16 %v2756_v16, %v2599_v29  ;;  %v10975_v3 = vmax.bf16 %v2790_v58, %v2601_v17  ;;  %v2266_v36 = vpop.f32.mrb[112].mxu0  ;;  %v2459_v6 = vpop.f32.mrb[144].mxu1  ;;  %4614 = vmatprep.subr.bf16.mxu0 %v9074_v2  ;;  %4778 = vmatprep.subr.bf16.mxu1 %v9077_v21  ;;  %v9081_v58 = vld [vmem:[#allocation11 + $0x368] ss:$16 sps:$4 sm:$0xff]   ;;  %v9092_v21 = vld [vmem:[#allocation11 + $0x3a4] ss:$16 sps:$4 sm:$0xff]  }
 0x475   : > { %v2268_v20 = vpop.f32.mrb[113].mxu0  ;;  %v2461_v56 = vpop.f32.mrb[145].mxu1  ;;  %v2267_v16 = vadd.f32 %v2266_v36, %v10876_v54  ;;  %v2460_v25 = vadd.f32 %v2459_v6, %v10879_v27  ;;  %v9087_v2 = vld [vmem:[#allocation11 + $0x388] ss:$16 sps:$4 sm:$0xff]   ;;  %v9095_v29 = vld [vmem:[#allocation11 + $0x3ac] ss:$16 sps:$4 sm:$0xff]  }
 0x476   : > { %v2270_v24 = vpop.f32.mrb[114].mxu0  ;;  %v2463_v28 = vpop.f32.mrb[146].mxu1  ;;  %v2269_v63 = vadd.f32 %v2268_v20, %v10882_v14  ;;  %v2462_v55 = vadd.f32 %v2461_v56, %v10885_v50 }
 0x477   : > { %4615 = vmatpush1.bf16.msra.mxu0 %v9072_v5  ;;  %v2272_v40 = vpop.f32.mrb[115].mxu0  ;;  %v2465_v23 = vpop.f32.mrb[147].mxu1  ;;  %4779 = vmatpush1.bf16.msra.mxu1 %v9075_v8  ;;  %v2271_v32 = vadd.f32 %v2270_v24, %v10876_v54  ;;  %v2464_v53 = vadd.f32 %v2463_v28, %v10879_v27  ;;  %v9090_v24 = vld [vmem:[#allocation11 + $0x3a0] ss:$16 sps:$4 sm:$0xff]  }
 0x478   : > { %4616 = vmatprep.subr.bf16.mxu0 %v9080_v49  ;;  %4780 = vmatprep.subr.bf16.mxu1 %v9083_v31  ;;  %v2273_v43 = vadd.f32 %v2272_v40, %v10882_v14  ;;  %v2466_v22 = vadd.f32 %v2465_v23, %v10885_v50 }
 0x479   : > { %v2606_v19 = vpack.c.bf16 %v2271_v32, %v2267_v16  ;;  %v2608_v9 = vpack.c.bf16 %v2464_v53, %v2460_v25  ;;  %v9098_v16 = vld [vmem:[#allocation11 + $0x3c4] ss:$16 sps:$4 sm:$0xff]   ;;  %v9101_v32 = vld [vmem:[#allocation11 + $0x3cc] ss:$16 sps:$4 sm:$0xff]  }
 0x47a   : > { %v2607_v30 = vpack.c.bf16 %v2273_v43, %v2269_v63  ;;  %v2609_v37 = vpack.c.bf16 %v2466_v22, %v2462_v55  ;;  %v9096_v55 = vld [vmem:[#allocation11 + $0x3c0] ss:$16 sps:$4 sm:$0xff]  }
 0x47b   : > { %4617 = vmatpush1.bf16.msra.mxu0 %v9078_v15  ;;  %4781 = vmatpush1.bf16.msra.mxu1 %v9081_v58  ;;  %v9093_v15 = vld [vmem:[#allocation11 + $0x3a8] ss:$16 sps:$4 sm:$0xff]  }
 0x47c   : > { %v2276_v47 = vpop.f32.mrb[116].mxu0  ;;  %v2469_v57 = vpop.f32.mrb[148].mxu1  ;;  %4618 = vmatprep.subr.bf16.mxu0 %v9086_v52  ;;  %4782 = vmatprep.subr.bf16.mxu1 %v9089_v33 }
 0x47d   : > { %v2278_v34 = vpop.f32.mrb[117].mxu0  ;;  %v2471_v12 = vpop.f32.mrb[149].mxu1  ;;  %v2277_v17 = vadd.f32 %v2276_v47, %v10876_v54  ;;  %v2470_v6 = vadd.f32 %v2469_v57, %v10879_v27  ;;  %v9099_v57 = vld [vmem:[#allocation11 + $0x3c8] ss:$16 sps:$4 sm:$0xff]  }
 0x47e   : > { %v2280_v5 = vpop.f32.mrb[118].mxu0  ;;  %v2473_v36 = vpop.f32.mrb[150].mxu1  ;;  %v2279_v8 = vadd.f32 %v2278_v34, %v10882_v14  ;;  %v2472_v28 = vadd.f32 %v2471_v12, %v10885_v50  ;;  %v9107_v12 = vld [vmem:[#allocation11 + $0x3ec] ss:$16 sps:$4 sm:$0xff]  }
 0x47f   : > { %v2281_v20 = vadd.f32 %v2280_v5, %v10876_v54  ;;  %v2474_v56 = vadd.f32 %v2473_v36, %v10879_v27  ;;  %4619 = vmatpush1.bf16.msra.mxu0 %v9084_v18  ;;  %v2282_v49 = vpop.f32.mrb[119].mxu0  ;;  %v2475_v31 = vpop.f32.mrb[151].mxu1  ;;  %4783 = vmatpush1.bf16.msra.mxu1 %v9087_v2  ;;  %v9104_v2 = vld [vmem:[#allocation11 + $0x3e4] ss:$16 sps:$4 sm:$0xff]  }
 0x480   : > { %v2283_v40 = vadd.f32 %v2282_v49, %v10882_v14  ;;  %v2476_v23 = vadd.f32 %v2475_v31, %v10885_v50  ;;  %4620 = vmatprep.subr.bf16.mxu0 %v9092_v21  ;;  %4784 = vmatprep.subr.bf16.mxu1 %v9095_v29  ;;  %v9105_v31 = vld [vmem:[#allocation11 + $0x3e8] ss:$16 sps:$4 sm:$0xff]  }
 0x481   : > { %v2614_v58 = vpack.c.bf16 %v2281_v20, %v2277_v17  ;;  %v2616_v25 = vpack.c.bf16 %v2474_v56, %v2470_v6 }
 0x482   : > { %v2615_v53 = vpack.c.bf16 %v2283_v40, %v2279_v8  ;;  %v2617_v52 = vpack.c.bf16 %v2476_v23, %v2472_v28  ;;  %v9102_v8 = vld [vmem:[#allocation11 + $0x3e0] ss:$16 sps:$4 sm:$0xff]   ;;  %v9113_v23 = vld [vmem:[#allocation11 + $0x40c] ss:$16 sps:$4 sm:$0xff]  }
 0x483   : > { %v2870_v33 = vmax.bf16 %v2614_v58, %v2606_v19  ;;  %v2904_v63 = vmax.bf16 %v2616_v25, %v2608_v9  ;;  %4621 = vmatpush1.bf16.msra.mxu0 %v9090_v24  ;;  %4785 = vmatpush1.bf16.msra.mxu1 %v9093_v15  ;;  %v9110_v24 = vld [vmem:[#allocation11 + $0x404] ss:$16 sps:$4 sm:$0xff]  }
 0x484   : > { %v2887_v43 = vmax.bf16 %v2615_v53, %v2607_v30  ;;  %v2921_v22 = vmax.bf16 %v2617_v52, %v2609_v37  ;;  %v2286_v18 = vpop.f32.mrb[120].mxu0  ;;  %v2479_v47 = vpop.f32.mrb[152].mxu1  ;;  %4622 = vmatprep.subr.bf16.mxu0 %v9098_v16  ;;  %4786 = vmatprep.subr.bf16.mxu1 %v9101_v32  ;;  %v9108_v32 = vld [vmem:[#allocation11 + $0x400] ss:$16 sps:$4 sm:$0xff]  }
 0x485   : > { %v2288_v21 = vpop.f32.mrb[121].mxu0  ;;  %v2481_v34 = vpop.f32.mrb[153].mxu1  ;;  %v2287_v29 = vadd.f32 %v2286_v18, %v10876_v54  ;;  %v2480_v19 = vadd.f32 %v2479_v47, %v10879_v27  ;;  %v3259_v47 = vpack.c.b16 %v10923_v0, %v10923_v0 }
 0x486   : > { %v2290_v17 = vpop.f32.mrb[122].mxu0  ;;  %v2483_v5 = vpop.f32.mrb[154].mxu1  ;;  %v2289_v9 = vadd.f32 %v2288_v21, %v10882_v14  ;;  %v2482_v20 = vadd.f32 %v2481_v34, %v10885_v50 }
 0x487   : > { %v2291_v30 = vadd.f32 %v2290_v17, %v10876_v54  ;;  %v2484_v37 = vadd.f32 %v2483_v5, %v10879_v27  ;;  %4623 = vmatpush1.bf16.msra.mxu0 %v9096_v55  ;;  %v2292_v36 = vpop.f32.mrb[123].mxu0  ;;  %v2485_v6 = vpop.f32.mrb[155].mxu1  ;;  %4787 = vmatpush1.bf16.msra.mxu1 %v9099_v57  ;;  %v9111_v57 = vld [vmem:[#allocation11 + $0x408] ss:$16 sps:$4 sm:$0xff]  }
 0x488   : > { %v2293_v56 = vadd.f32 %v2292_v36, %v10882_v14  ;;  %v2486_v49 = vadd.f32 %v2485_v6, %v10885_v50  ;;  %4624 = vmatprep.subr.bf16.mxu0 %v9104_v2  ;;  %4788 = vmatprep.subr.bf16.mxu1 %v9107_v12  ;;  %v9116_v2 = vld [vmem:[#allocation11 + $0x424] ss:$16 sps:$4 sm:$0xff]   ;;  %v9119_v12 = vld [vmem:[#allocation11 + $0x42c] ss:$16 sps:$4 sm:$0xff]   ;;  %v9117_v6 = vld [vmem:[#allocation11 + $0x428] ss:$16 sps:$4 sm:$0xff]  }
 0x489   : > { %v2622_v28 = vpack.c.bf16 %v2291_v30, %v2287_v29  ;;  %v2624_v40 = vpack.c.bf16 %v2484_v37, %v2480_v19 }
 0x48a   : > { %v2623_v15 = vpack.c.bf16 %v2293_v56, %v2289_v9  ;;  %v2625_v16 = vpack.c.bf16 %v2486_v49, %v2482_v20  ;;  %v9114_v9 = vld [vmem:[#allocation11 + $0x420] ss:$16 sps:$4 sm:$0xff]   ;;  %v9125_v49 = vld [vmem:[#allocation11 + $0x44c] ss:$16 sps:$4 sm:$0xff]  }
 0x48b   : > { %v2871_v58 = vmax.bf16 %v2870_v33, %v2622_v28  ;;  %v2905_v25 = vmax.bf16 %v2904_v63, %v2624_v40  ;;  %4625 = vmatpush1.bf16.msra.mxu0 %v9102_v8  ;;  %4789 = vmatpush1.bf16.msra.mxu1 %v9105_v31  ;;  %v9122_v8 = vld [vmem:[#allocation11 + $0x444] ss:$16 sps:$4 sm:$0xff]  }
 0x48c   : > { %v2888_v53 = vmax.bf16 %v2887_v43, %v2623_v15  ;;  %v2922_v52 = vmax.bf16 %v2921_v22, %v2625_v16  ;;  %v2296_v55 = vpop.f32.mrb[124].mxu0  ;;  %v2489_v18 = vpop.f32.mrb[156].mxu1  ;;  %4635 = vmatprep.subr.bf16.mxu0 %v9110_v24  ;;  %4799 = vmatprep.subr.bf16.mxu1 %v9113_v23  ;;  %v9120_v23 = vld [vmem:[#allocation11 + $0x440] ss:$16 sps:$4 sm:$0xff]  }
 0x48d   : > { %v2298_v21 = vpop.f32.mrb[125].mxu0  ;;  %v2491_v34 = vpop.f32.mrb[157].mxu1  ;;  %v2297_v33 = vadd.f32 %v2296_v55, %v10876_v54  ;;  %v2490_v63 = vadd.f32 %v2489_v18, %v10879_v27  ;;  %v9123_v18 = vld [vmem:[#allocation11 + $0x448] ss:$16 sps:$4 sm:$0xff]  }
 0x48e   : > { %4627 = vmatmul.mubr.bf16.vlgmr.msra.gmra.mrb[144].mxu0 %v3259_v47  ;;  %v2300_v43 = vpop.f32.mrb[126].mxu0  ;;  %v2493_v22 = vpop.f32.mrb[158].mxu1  ;;  %v2299_v29 = vadd.f32 %v2298_v21, %v10882_v14  ;;  %4791 = vmatmul.mubr.bf16.vlgmr.msra.gmra.mrb[176].mxu1 %v3259_v47  ;;  %v2492_v30 = vadd.f32 %v2491_v34, %v10885_v50  ;;  %v9128_v47 = vld [vmem:[#allocation11 + $0x464] ss:$16 sps:$4 sm:$0xff]   ;;  %v9131_v21 = vld [vmem:[#allocation11 + $0x46c] ss:$16 sps:$4 sm:$0xff]  }
 0x48f   : > { %v2301_v17 = vadd.f32 %v2300_v43, %v10876_v54  ;;  %v2494_v0 = vadd.f32 %v2493_v22, %v10879_v27  ;;  %4636 = vmatpush1.bf16.msra.mxu0 %v9108_v32  ;;  %v2302_v5 = vpop.f32.mrb[127].mxu0  ;;  %v2495_v19 = vpop.f32.mrb[159].mxu1  ;;  %4800 = vmatpush1.bf16.msra.mxu1 %v9111_v57  ;;  %v9126_v22 = vld [vmem:[#allocation11 + $0x460] ss:$16 sps:$4 sm:$0xff]  }
 0x490   : > { %v2303_v37 = vadd.f32 %v2302_v5, %v10882_v14  ;;  %v2496_v36 = vadd.f32 %v2495_v19, %v10885_v50  ;;  %4637 = vmatprep.subr.bf16.mxu0 %v9116_v2  ;;  %4801 = vmatprep.subr.bf16.mxu1 %v9119_v12  ;;  %v9129_v5 = vld [vmem:[#allocation11 + $0x468] ss:$16 sps:$4 sm:$0xff]   ;;  %v9134_v19 = vld [vmem:[#allocation11 + $0x484] ss:$16 sps:$4 sm:$0xff]  }
 0x491   : > { %v2630_v20 = vpack.c.bf16 %v2301_v17, %v2297_v33  ;;  %v2632_v56 = vpack.c.bf16 %v2494_v0, %v2490_v63 }
 0x492   : > { %v2631_v31 = vpack.c.bf16 %v2303_v37, %v2299_v29  ;;  %v2633_v24 = vpack.c.bf16 %v2496_v36, %v2492_v30  ;;  %v9137_v37 = vld [vmem:[#allocation11 + $0x48c] ss:$16 sps:$4 sm:$0xff]  }
 0x493   : > { %v2872_v28 = vmax.bf16 %v2871_v58, %v2630_v20  ;;  %v2906_v40 = vmax.bf16 %v2905_v25, %v2632_v56  ;;  %4638 = vmatpush1.bf16.msra.mxu0 %v9114_v9  ;;  %4802 = vmatpush1.bf16.msra.mxu1 %v9117_v6  ;;  %v9132_v56 = vld [vmem:[#allocation11 + $0x480] ss:$16 sps:$4 sm:$0xff]  }
 0x494   : > { %v2889_v15 = vmax.bf16 %v2888_v53, %v2631_v31  ;;  %v2923_v16 = vmax.bf16 %v2922_v52, %v2633_v24  ;;  %v2306_v32 = vpop.f32.mrb[128].mxu0  ;;  %v2499_v55 = vpop.f32.mrb[160].mxu1  ;;  %4639 = vmatprep.subr.bf16.mxu0 %v9122_v8  ;;  %4803 = vmatprep.subr.bf16.mxu1 %v9125_v49 }
 0x495   : > { %v2308_v57 = vpop.f32.mrb[129].mxu0  ;;  %v2501_v2 = vpop.f32.mrb[161].mxu1  ;;  %v2307_v34 = vadd.f32 %v2306_v32, %v10876_v54  ;;  %v2500_v58 = vadd.f32 %v2499_v55, %v10879_v27  ;;  %v9135_v32 = vld [vmem:[#allocation11 + $0x488] ss:$16 sps:$4 sm:$0xff]   ;;  %v9140_v55 = vld [vmem:[#allocation11 + $0x4a4] ss:$16 sps:$4 sm:$0xff]  }
 0x496   : > { %v2310_v12 = vpop.f32.mrb[130].mxu0  ;;  %v2503_v33 = vpop.f32.mrb[162].mxu1  ;;  %v2309_v25 = vadd.f32 %v2308_v57, %v10882_v14  ;;  %v2502_v29 = vadd.f32 %v2501_v2, %v10885_v50  ;;  %v9143_v57 = vld [vmem:[#allocation11 + $0x4ac] ss:$16 sps:$4 sm:$0xff]   ;;  %v2741_v2 = vunpack.i.l.bf16 %v10969_v42 }
 0x497   : > { %v2311_v53 = vadd.f32 %v2310_v12, %v10876_v54  ;;  %v2504_v52 = vadd.f32 %v2503_v33, %v10879_v27  ;;  %4640 = vmatpush1.bf16.msra.mxu0 %v9120_v23  ;;  %v2312_v63 = vpop.f32.mrb[131].mxu0  ;;  %v2505_v43 = vpop.f32.mrb[163].mxu1  ;;  %4804 = vmatpush1.bf16.msra.mxu1 %v9123_v18 }
 0x498   : > { %v2313_v17 = vadd.f32 %v2312_v63, %v10882_v14  ;;  %v2506_v0 = vadd.f32 %v2505_v43, %v10885_v50  ;;  %4641 = vmatprep.subr.bf16.mxu0 %v9128_v47  ;;  %4805 = vmatprep.subr.bf16.mxu1 %v9131_v21  ;;  %v2742_v21 = vunpack.i.h.bf16 %v10969_v42  ;;  %v2776_v42 = vunpack.i.h.bf16 %v10971_v26 }
 0x499   : > { %v2638_v9 = vpack.c.bf16 %v2311_v53, %v2307_v34  ;;  %v2640_v30 = vpack.c.bf16 %v2504_v52, %v2500_v58  ;;  %v9138_v52 = vld [vmem:[#allocation11 + $0x4a0] ss:$16 sps:$4 sm:$0xff]  }
 0x49a   : > { %v2639_v36 = vpack.c.bf16 %v2313_v17, %v2309_v25  ;;  %v2641_v6 = vpack.c.bf16 %v2506_v0, %v2502_v29  ;;  %v9141_v29 = vld [vmem:[#allocation11 + $0x4a8] ss:$16 sps:$4 sm:$0xff]   ;;  %v9146_v17 = vld [vmem:[#allocation11 + $0x4c4] ss:$16 sps:$4 sm:$0xff]   ;;  %v2758_v0 = vunpack.i.l.bf16 %v10973_v51 }
 0x49b   : > { %v2873_v8 = vmax.bf16 %v2872_v28, %v2638_v9  ;;  %v2907_v20 = vmax.bf16 %v2906_v40, %v2640_v30  ;;  %4642 = vmatpush1.bf16.msra.mxu0 %v9126_v22  ;;  %4806 = vmatpush1.bf16.msra.mxu1 %v9129_v5  ;;  %v2775_v28 = vunpack.i.l.bf16 %v10971_v26  ;;  %v2759_v5 = vunpack.i.h.bf16 %v10973_v51  ;;  %v9149_v30 = vld [vmem:[#allocation11 + $0x4cc] ss:$16 sps:$4 sm:$0xff]  }
 0x49c   : > { %v2890_v49 = vmax.bf16 %v2889_v15, %v2639_v36  ;;  %v2924_v31 = vmax.bf16 %v2923_v16, %v2641_v6  ;;  %v2316_v24 = vpop.f32.mrb[132].mxu0  ;;  %v2509_v23 = vpop.f32.mrb[164].mxu1  ;;  %4643 = vmatprep.subr.bf16.mxu0 %v9134_v19  ;;  %4807 = vmatprep.subr.bf16.mxu1 %v9137_v37  ;;  %v2792_v26 = vunpack.i.l.bf16 %v10975_v3  ;;  %v2793_v37 = vunpack.i.h.bf16 %v10975_v3  ;;  %v9155_v3 = vld [vmem:[#allocation11 + $0x4ec] ss:$16 sps:$4 sm:$0xff]  }
 0x49d   : > { %v2318_v18 = vpop.f32.mrb[133].mxu0  ;;  %v2511_v47 = vpop.f32.mrb[165].mxu1  ;;  %v2317_v40 = vadd.f32 %v2316_v24, %v10876_v54  ;;  %v2510_v34 = vadd.f32 %v2509_v23, %v10879_v27  ;;  %v9144_v23 = vld [vmem:[#allocation11 + $0x4c0] ss:$16 sps:$4 sm:$0xff]  }
 0x49e   : > { %v2320_v15 = vpop.f32.mrb[134].mxu0  ;;  %v2513_v16 = vpop.f32.mrb[166].mxu1  ;;  %v2319_v12 = vadd.f32 %v2318_v18, %v10882_v14  ;;  %v2512_v63 = vadd.f32 %v2511_v47, %v10885_v50 }
 0x49f   : > { %v2321_v33 = vadd.f32 %v2320_v15, %v10876_v54  ;;  %v2514_v58 = vadd.f32 %v2513_v16, %v10879_v27  ;;  %4644 = vmatpush1.bf16.msra.mxu0 %v9132_v56  ;;  %v2322_v25 = vpop.f32.mrb[135].mxu0  ;;  %v2515_v53 = vpop.f32.mrb[167].mxu1  ;;  %4808 = vmatpush1.bf16.msra.mxu1 %v9135_v32  ;;  %v2743_v32 = vmax.f32 %v2741_v2, %v2742_v21 }
 0x4a0   : > { %v2323_v43 = vadd.f32 %v2322_v25, %v10882_v14  ;;  %v2516_v22 = vadd.f32 %v2515_v53, %v10885_v50  ;;  %4645 = vmatprep.subr.bf16.mxu0 %v9140_v55  ;;  %4809 = vmatprep.subr.bf16.mxu1 %v9143_v57  ;;  %v9152_v57 = vld [vmem:[#allocation11 + $0x4e4] ss:$16 sps:$4 sm:$0xff]   ;;  %v2777_v15 = vmax.f32 %v2775_v28, %v2776_v42  ;;  %v9150_v53 = vld [vmem:[#allocation11 + $0x4e0] ss:$16 sps:$4 sm:$0xff]  }
 0x4a1   : > { %v2646_v19 = vpack.c.bf16 %v2321_v33, %v2317_v40  ;;  %v2648_v9 = vpack.c.bf16 %v2514_v58, %v2510_v34  ;;  %v9147_v40 = vld [vmem:[#allocation11 + $0x4c8] ss:$16 sps:$4 sm:$0xff]   ;;  %v2794_v33 = vmax.f32 %v2792_v26, %v2793_v37 }
 0x4a2   : > { %v2647_v36 = vpack.c.bf16 %v2323_v43, %v2319_v12  ;;  %v2649_v6 = vpack.c.bf16 %v2516_v22, %v2512_v63  ;;  %v2760_v12 = vmax.f32 %v2758_v0, %v2759_v5  ;;  %v9153_v22 = vld [vmem:[#allocation11 + $0x4e8] ss:$16 sps:$4 sm:$0xff]  }
 0x4a3   : > { %v2874_v56 = vmax.bf16 %v2873_v8, %v2646_v19  ;;  %v2908_v24 = vmax.bf16 %v2907_v20, %v2648_v9  ;;  %4646 = vmatpush1.bf16.msra.mxu0 %v9138_v52  ;;  %4810 = vmatpush1.bf16.msra.mxu1 %v9141_v29  ;;  %v2744_v52 = vrot.slane %v2743_v32, 4  ;;  %v9158_v29 = vld [vmem:[#allocation11 + $0x504] ss:$16 sps:$4 sm:$0xff]   ;;  %v9161_v19 = vld [vmem:[#allocation11 + $0x50c] ss:$16 sps:$4 sm:$0xff]  }
 0x4a4   : > { %v2891_v55 = vmax.bf16 %v2890_v49, %v2647_v36  ;;  %v2925_v18 = vmax.bf16 %v2924_v31, %v2649_v6  ;;  %v2326_v47 = vpop.f32.mrb[136].mxu0  ;;  %v2519_v51 = vpop.f32.mrb[168].mxu1  ;;  %4647 = vmatprep.subr.bf16.mxu0 %v9146_v17  ;;  %4811 = vmatprep.subr.bf16.mxu1 %v9149_v30  ;;  %v2778_v17 = vrot.slane %v2777_v15, 4  ;;  %v2761_v9 = vrot.slane %v2760_v12, 4 }
 0x4a5   : > { %v2328_v16 = vpop.f32.mrb[137].mxu0  ;;  %v2521_v34 = vpop.f32.mrb[169].mxu1  ;;  %v2327_v8 = vadd.f32 %v2326_v47, %v10876_v54  ;;  %v2520_v49 = vadd.f32 %v2519_v51, %v10879_v27  ;;  %v2795_v30 = vrot.slane %v2794_v33, 4  ;;  %v2745_v47 = vmax.f32 %v2743_v32, %v2744_v52  ;;  %v9162_v52 = vld [vmem:[#allocation11 + $0x520] ss:$16 sps:$4 sm:$0xff]  }
 0x4a6   : > { %v2330_v20 = vpop.f32.mrb[138].mxu0  ;;  %v2523_v58 = vpop.f32.mrb[170].mxu1  ;;  %v2329_v31 = vadd.f32 %v2328_v16, %v10882_v14  ;;  %v2522_v42 = vadd.f32 %v2521_v34, %v10885_v50  ;;  %v9159_v34 = vld [vmem:[#allocation11 + $0x508] ss:$16 sps:$4 sm:$0xff]  }
 0x4a7   : > { %v2331_v2 = vadd.f32 %v2330_v20, %v10876_v54  ;;  %v2524_v21 = vadd.f32 %v2523_v58, %v10879_v27  ;;  %4648 = vmatpush1.bf16.msra.mxu0 %v9144_v23  ;;  %v2332_v28 = vpop.f32.mrb[139].mxu0  ;;  %v2525_v25 = vpop.f32.mrb[171].mxu1  ;;  %4812 = vmatpush1.bf16.msra.mxu1 %v9147_v40  ;;  %v9156_v23 = vld [vmem:[#allocation11 + $0x500] ss:$16 sps:$4 sm:$0xff]   ;;  %v9167_v58 = vld [vmem:[#allocation11 + $0x52c] ss:$16 sps:$4 sm:$0xff]  }
 0x4a8   : > { %v2333_v63 = vadd.f32 %v2332_v28, %v10882_v14  ;;  %v2526_v43 = vadd.f32 %v2525_v25, %v10885_v50  ;;  %4649 = vmatprep.subr.bf16.mxu0 %v9152_v57  ;;  %4813 = vmatprep.subr.bf16.mxu1 %v9155_v3 }
 0x4a9   : > { %v2654_v0 = vpack.c.bf16 %v2331_v2, %v2327_v8  ;;  %v2656_v5 = vpack.c.bf16 %v2524_v21, %v2520_v49  ;;  %v9164_v8 = vld [vmem:[#allocation11 + $0x524] ss:$16 sps:$4 sm:$0xff]   ;;  %v2779_v49 = vmax.f32 %v2777_v15, %v2778_v17  ;;  %v2796_v2 = vmax.f32 %v2794_v33, %v2795_v30  ;;  %v9168_v30 = vld [vmem:[#allocation11 + $0x540] ss:$16 sps:$4 sm:$0xff]  }
 0x4aa   : > { %v2655_v26 = vpack.c.bf16 %v2333_v63, %v2329_v31  ;;  %v2657_v37 = vpack.c.bf16 %v2526_v43, %v2522_v42  ;;  %v2762_v31 = vmax.f32 %v2760_v12, %v2761_v9  ;;  %v2746_v42 = vrot.slane %v2745_v47, 2  ;;  %v9165_v63 = vld [vmem:[#allocation11 + $0x528] ss:$16 sps:$4 sm:$0xff]   ;;  %v9170_v43 = vld [vmem:[#allocation11 + $0x544] ss:$16 sps:$4 sm:$0xff]  }
 0x4ab   : > { %v2875_v36 = vmax.bf16 %v2874_v56, %v2654_v0  ;;  %v2909_v6 = vmax.bf16 %v2908_v24, %v2656_v5  ;;  %4650 = vmatpush1.bf16.msra.mxu0 %v9150_v53  ;;  %4814 = vmatpush1.bf16.msra.mxu1 %v9153_v22  ;;  %v2780_v0 = vrot.slane %v2779_v49, 2 }
 0x4ac   : > { %v2892_v51 = vmax.bf16 %v2891_v55, %v2655_v26  ;;  %v2926_v40 = vmax.bf16 %v2925_v18, %v2657_v37  ;;  %v2336_v57 = vpop.f32.mrb[140].mxu0  ;;  %v2529_v16 = vpop.f32.mrb[172].mxu1  ;;  %4651 = vmatprep.subr.bf16.mxu0 %v9158_v29  ;;  %4815 = vmatprep.subr.bf16.mxu1 %v9161_v19  ;;  %v2763_v5 = vrot.slane %v2762_v31, 2  ;;  %v2747_v26 = vmax.f32 %v2745_v47, %v2746_v42  ;;  %v9185_v42 = vld [vmem:[#allocation11 + $0x58c] ss:$16 sps:$4 sm:$0xff]  }
 0x4ad   : > { %v2338_v20 = vpop.f32.mrb[141].mxu0  ;;  %v2531_v3 = vpop.f32.mrb[173].mxu1  ;;  %v2337_v56 = vadd.f32 %v2336_v57, %v10876_v54  ;;  %v2530_v32 = vadd.f32 %v2529_v16, %v10879_v27  ;;  %v2797_v37 = vrot.slane %v2796_v2, 2  ;;  %v9176_v57 = vld [vmem:[#allocation11 + $0x564] ss:$16 sps:$4 sm:$0xff]  }
 0x4ae   : > { %v2340_v24 = vpop.f32.mrb[142].mxu0  ;;  %v2533_v21 = vpop.f32.mrb[174].mxu1  ;;  %v2339_v55 = vadd.f32 %v2338_v20, %v10882_v14  ;;  %v2532_v15 = vadd.f32 %v2531_v3, %v10885_v50  ;;  %v9179_v3 = vld [vmem:[#allocation11 + $0x56c] ss:$16 sps:$4 sm:$0xff]  }
 0x4af   : > { %v2341_v18 = vadd.f32 %v2340_v24, %v10876_v54  ;;  %v2534_v28 = vadd.f32 %v2533_v21, %v10879_v27  ;;  %4652 = vmatpush1.bf16.msra.mxu0 %v9156_v23  ;;  %v2342_v25 = vpop.f32.mrb[143].mxu0  ;;  %v2535_v53 = vpop.f32.mrb[175].mxu1  ;;  %4816 = vmatpush1.bf16.msra.mxu1 %v9159_v34  ;;  %v9173_v54 = vld [vmem:[#allocation11 + $0x54c] ss:$16 sps:$4 sm:$0xff]   ;;  %v2781_v24 = vmax.f32 %v2779_v49, %v2780_v0 }
 0x4b0   : > { %v2343_v12 = vadd.f32 %v2342_v25, %v10882_v14  ;;  %v2536_v33 = vadd.f32 %v2535_v53, %v10885_v50  ;;  %4653 = vmatprep.subr.bf16.mxu0 %v9164_v8  ;;  %4817 = vmatprep.subr.bf16.mxu1 %v9167_v58  ;;  %v9171_v50 = vld [vmem:[#allocation11 + $0x548] ss:$16 sps:$4 sm:$0xff]   ;;  %v2798_v25 = vmax.f32 %v2796_v2, %v2797_v37 }
 0x4b1   : > { %v2662_v22 = vpack.c.bf16 %v2341_v18, %v2337_v56  ;;  %v2664_v29 = vpack.c.bf16 %v2534_v28, %v2530_v32  ;;  %v9177_v18 = vld [vmem:[#allocation11 + $0x568] ss:$16 sps:$4 sm:$0xff]   ;;  %v9182_v28 = vld [vmem:[#allocation11 + $0x584] ss:$16 sps:$4 sm:$0xff]   ;;  %v2782_v49 = vrot.slane %v2781_v24, 1 }
 0x4b2   : > { %v2663_v27 = vpack.c.bf16 %v2343_v12, %v2339_v55  ;;  %v2665_v17 = vpack.c.bf16 %v2536_v33, %v2532_v15  ;;  %v2748_v15 = vrot.slane %v2747_v26, 1  ;;  %v2799_v2 = vrot.slane %v2798_v25, 1 }
 0x4b3   : > { %v2876_v19 = vmax.bf16 %v2875_v36, %v2662_v22  ;;  %v2910_v9 = vmax.bf16 %v2909_v6, %v2664_v29  ;;  %4654 = vmatpush1.bf16.msra.mxu0 %v9162_v52  ;;  %4818 = vmatpush1.bf16.msra.mxu1 %v9165_v63  ;;  %v9180_v22 = vld [vmem:[#allocation11 + $0x580] ss:$16 sps:$4 sm:$0xff]  }
 0x4b4   : > { %v2893_v14 = vmax.bf16 %v2892_v51, %v2663_v27  ;;  %v2927_v23 = vmax.bf16 %v2926_v40, %v2665_v17  ;;  %4655 = vmatprep.subr.bf16.mxu0 %v9170_v43  ;;  %4819 = vmatprep.subr.bf16.mxu1 %v9173_v54  ;;  %v9174_v51 = vld [vmem:[#allocation11 + $0x560] ss:$16 sps:$4 sm:$0xff]   ;;  %v2764_v40 = vmax.f32 %v2762_v31, %v2763_v5  ;;  %v9183_v27 = vld [vmem:[#allocation11 + $0x588] ss:$16 sps:$4 sm:$0xff]   ;;  %v9188_v17 = vld [vmem:[#allocation11 + $0x5a4] ss:$16 sps:$4 sm:$0xff]  }
 0x4b5   : > { %v2877_v16 = vunpack.i.l.bf16 %v2876_v19  ;;  %v2878_v34 = vunpack.i.h.bf16 %v2876_v19  ;;  %v2911_v8 = vunpack.i.l.bf16 %v2910_v9  ;;  %v2912_v20 = vunpack.i.h.bf16 %v2910_v9  ;;  %v9191_v19 = vld [vmem:[#allocation11 + $0x5ac] ss:$16 sps:$4 sm:$0xff]  }
 0x4b6   : > { %v2894_v58 = vunpack.i.l.bf16 %v2893_v14  ;;  %v2895_v56 = vunpack.i.h.bf16 %v2893_v14  ;;  %v2928_v36 = vunpack.i.l.bf16 %v2927_v23  ;;  %v2929_v6 = vunpack.i.h.bf16 %v2927_v23 }
 0x4b7   : > { %v2879_v21 = vmax.f32 %v2877_v16, %v2878_v34  ;;  %v2913_v47 = vmax.f32 %v2911_v8, %v2912_v20  ;;  %4656 = vmatpush1.bf16.msra.mxu0 %v9168_v30  ;;  %4820 = vmatpush1.bf16.msra.mxu1 %v9171_v50  ;;  %v2765_v31 = vrot.slane %v2764_v40, 1  ;;  %v2749_v37 = vmax.f32 %v2747_v26, %v2748_v15  ;;  %v9186_v50 = vld [vmem:[#allocation11 + $0x5a0] ss:$16 sps:$4 sm:$0xff]   ;;  %v9189_v34 = vld [vmem:[#allocation11 + $0x5a8] ss:$16 sps:$4 sm:$0xff]  }
 0x4b8   : > { %v2896_v32 = vmax.f32 %v2894_v58, %v2895_v56  ;;  %v2930_v55 = vmax.f32 %v2928_v36, %v2929_v6  ;;  %4657 = vmatprep.subr.bf16.mxu0 %v9176_v57  ;;  %4821 = vmatprep.subr.bf16.mxu1 %v9179_v3  ;;  %v2783_v16 = vmax.f32 %v2781_v24, %v2782_v49  ;;  %v9194_v8 = vld [vmem:[#allocation11 + $0x5c4] ss:$16 sps:$4 sm:$0xff]   ;;  %v9197_v6 = vld [vmem:[#allocation11 + $0x5cc] ss:$16 sps:$4 sm:$0xff]  }
 0x4b9   : > { %v2880_v53 = vrot.slane %v2879_v21, 4  ;;  %v2914_v52 = vrot.slane %v2913_v47, 4  ;;  %v2766_v57 = vmax.f32 %v2764_v40, %v2765_v31  ;;  %v2800_v3 = vmax.f32 %v2798_v25, %v2799_v2  ;;  %v9206_v2 = vld [vmem:[#allocation11 + $0x604] ss:$16 sps:$4 sm:$0xff]  }
 0x4ba   : > { %v2897_v12 = vrot.slane %v2896_v32, 4  ;;  %v2931_v33 = vrot.slane %v2930_v55, 4  ;;  %v2784_v40 = vpack.i.bf16 %v2783_v16, %v2783_v16 }
 0x4bb   : > { %v2881_v63 = vmax.f32 %v2879_v21, %v2880_v53  ;;  %v2915_v43 = vmax.f32 %v2913_v47, %v2914_v52  ;;  %4658 = vmatpush1.bf16.msra.mxu0 %v9174_v51  ;;  %4822 = vmatpush1.bf16.msra.mxu1 %v9177_v18  ;;  %v2750_v47 = vpack.i.bf16 %v2749_v37, %v2749_v37  ;;  %v9192_v51 = vld [vmem:[#allocation11 + $0x5c0] ss:$16 sps:$4 sm:$0xff]   ;;  %v9195_v18 = vld [vmem:[#allocation11 + $0x5c8] ss:$16 sps:$4 sm:$0xff]   ;;  %v9209_v37 = vld [vmem:[#allocation11 + $0x60c] ss:$16 sps:$4 sm:$0xff]  }
 0x4bc   : > { %v2898_v29 = vmax.f32 %v2896_v32, %v2897_v12  ;;  %v2932_v54 = vmax.f32 %v2930_v55, %v2931_v33  ;;  %4659 = vmatprep.subr.bf16.mxu0 %v9182_v28  ;;  %4823 = vmatprep.subr.bf16.mxu1 %v9185_v42  ;;  %v2767_v32 = vpack.i.bf16 %v2766_v57, %v2766_v57  ;;  %v9200_v28 = vld [vmem:[#allocation11 + $0x5e4] ss:$16 sps:$4 sm:$0xff]   ;;  %v9203_v42 = vld [vmem:[#allocation11 + $0x5ec] ss:$16 sps:$4 sm:$0xff]   ;;  %v3238_v31 = vunpack.c.l.b16 %v2784_v40  ;;  %v9207_v57 = vld [vmem:[#allocation11 + $0x608] ss:$16 sps:$4 sm:$0xff]  }
 0x4bd   : > { %v2882_v0 = vrot.slane %v2881_v63, 2  ;;  %v2916_v5 = vrot.slane %v2915_v43, 2  ;;  %v2801_v25 = vpack.i.bf16 %v2800_v3, %v2800_v3  ;;  %v9210_v3 = vld [vmem:[#allocation11 + $0x620] ss:$16 sps:$4 sm:$0xff]   ;;  %v9233_v40 = vld [vmem:[#allocation11 + $0x68c] ss:$16 sps:$4 sm:$0xff]  }
 0x4be   : > { %v2899_v9 = vrot.slane %v2898_v29, 2  ;;  %v2933_v30 = vrot.slane %v2932_v54, 2 }
 0x4bf   : > { %v2883_v14 = vmax.f32 %v2881_v63, %v2882_v0  ;;  %v2917_v23 = vmax.f32 %v2915_v43, %v2916_v5  ;;  %4660 = vmatpush1.bf16.msra.mxu0 %v9180_v22  ;;  %4824 = vmatpush1.bf16.msra.mxu1 %v9183_v27  ;;  %v9198_v63 = vld [vmem:[#allocation11 + $0x5e0] ss:$16 sps:$4 sm:$0xff]   ;;  %v3236_v43 = vunpack.c.l.b16 %v2750_v47  ;;  %v3237_v27 = vunpack.c.l.b16 %v2767_v32  ;;  %v9224_v47 = vld [vmem:[#allocation11 + $0x664] ss:$16 sps:$4 sm:$0xff]   ;;  %v9225_v32 = vld [vmem:[#allocation11 + $0x668] ss:$16 sps:$4 sm:$0xff]  }
 0x4c0   : > { %4661 = vmatprep.subr.bf16.mxu0 %v9188_v17  ;;  %v2900_v20 = vmax.f32 %v2898_v29, %v2899_v9  ;;  %v2934_v58 = vmax.f32 %v2932_v54, %v2933_v30  ;;  %4825 = vmatprep.subr.bf16.mxu1 %v9191_v19  ;;  %v9201_v54 = vld [vmem:[#allocation11 + $0x5e8] ss:$16 sps:$4 sm:$0xff]   ;;  %v3239_v0 = vunpack.c.l.b16 %v2801_v25  ;;  %v9234_v25 = vld [vmem:[#allocation11 + $0x6a0] ss:$16 sps:$4 sm:$0xff]  }
 0x4c1   : > { %v2884_v56 = vrot.slane %v2883_v14, 1  ;;  %v2918_v36 = vrot.slane %v2917_v23, 1 }
 0x4c2   : > { %v2901_v21 = vrot.slane %v2900_v20, 1  ;;  %v2935_v26 = vrot.slane %v2934_v58, 1 }
 0x4c3   : > { %4662 = vmatpush1.bf16.msra.mxu0 %v9186_v50  ;;  %v2885_v55 = vmax.f32 %v2883_v14, %v2884_v56  ;;  %v2919_v24 = vmax.f32 %v2917_v23, %v2918_v36  ;;  %4826 = vmatpush1.bf16.msra.mxu1 %v9189_v34  ;;  %v9204_v50 = vld [vmem:[#allocation11 + $0x600] ss:$16 sps:$4 sm:$0xff]   ;;  %v9212_v34 = vld [vmem:[#allocation11 + $0x624] ss:$16 sps:$4 sm:$0xff]   ;;  %v9221_v36 = vld [vmem:[#allocation11 + $0x64c] ss:$16 sps:$4 sm:$0xff]  }
 0x4c4   : > { %4663 = vmatprep.subr.bf16.mxu0 %v9194_v8  ;;  %v2902_v53 = vmax.f32 %v2900_v20, %v2901_v21  ;;  %v2936_v52 = vmax.f32 %v2934_v58, %v2935_v26  ;;  %4827 = vmatprep.subr.bf16.mxu1 %v9197_v6  ;;  %v9215_v20 = vld [vmem:[#allocation11 + $0x62c] ss:$16 sps:$4 sm:$0xff]   ;;  %v9213_v58 = vld [vmem:[#allocation11 + $0x628] ss:$16 sps:$4 sm:$0xff]   ;;  %v9218_v56 = vld [vmem:[#allocation11 + $0x644] ss:$16 sps:$4 sm:$0xff]  }
 0x4c5   : > { %v2886_v15 = vpack.i.bf16 %v2885_v55, %v2885_v55  ;;  %v2920_v12 = vpack.i.bf16 %v2919_v24, %v2919_v24  ;;  %v9216_v6 = vld [vmem:[#allocation11 + $0x640] ss:$16 sps:$4 sm:$0xff]   ;;  %v9219_v21 = vld [vmem:[#allocation11 + $0x648] ss:$16 sps:$4 sm:$0xff]   ;;  %v9227_v26 = vld [vmem:[#allocation11 + $0x66c] ss:$16 sps:$4 sm:$0xff]  }
 0x4c6   : > { %v2903_v33 = vpack.i.bf16 %v2902_v53, %v2902_v53  ;;  %v2937_v49 = vpack.i.bf16 %v2936_v52, %v2936_v52  ;;  %v9230_v55 = vld [vmem:[#allocation11 + $0x684] ss:$16 sps:$4 sm:$0xff]   ;;  %v9228_v24 = vld [vmem:[#allocation11 + $0x680] ss:$16 sps:$4 sm:$0xff]   ;;  %v9239_v53 = vld [vmem:[#allocation11 + $0x6ac] ss:$16 sps:$4 sm:$0xff]  }
 0x4c7   : > { %4664 = vmatpush1.bf16.msra.mxu0 %v9192_v51  ;;  %v3244_v22 = vunpack.c.l.b16 %v2886_v15  ;;  %v3246_v29 = vunpack.c.l.b16 %v2920_v12  ;;  %4828 = vmatpush1.bf16.msra.mxu1 %v9195_v18  ;;  %v9222_v51 = vld [vmem:[#allocation11 + $0x660] ss:$16 sps:$4 sm:$0xff]   ;;  %v9231_v18 = vld [vmem:[#allocation11 + $0x688] ss:$16 sps:$4 sm:$0xff]   ;;  %v9245_v15 = vld [vmem:[#allocation11 + $0x6cc] ss:$16 sps:$4 sm:$0xff]  }
 0x4c8   : > { %4665 = vmatprep.subr.bf16.mxu0 %v9200_v28  ;;  %v3245_v17 = vunpack.c.l.b16 %v2903_v33  ;;  %v3247_v5 = vunpack.c.l.b16 %v2937_v49  ;;  %4829 = vmatprep.subr.bf16.mxu1 %v9203_v42  ;;  %v9236_v28 = vld [vmem:[#allocation11 + $0x6a4] ss:$16 sps:$4 sm:$0xff]   ;;  %v9237_v52 = vld [vmem:[#allocation11 + $0x6a8] ss:$16 sps:$4 sm:$0xff]   ;;  %v9240_v12 = vld [vmem:[#allocation11 + $0x6c0] ss:$16 sps:$4 sm:$0xff]  }
 0x4c9   : > { %v3253_v19 = vsel %vm3248_vm3, %v3244_v22, %v3236_v43  ;;  %v11053_v9 = vsel %vm3248_vm3, %v3246_v29, %v3238_v31  ;;  %v9242_v42 = vld [vmem:[#allocation11 + $0x6c4] ss:$16 sps:$4 sm:$0xff]   ;;  %v9243_v33 = vld [vmem:[#allocation11 + $0x6c8] ss:$16 sps:$4 sm:$0xff]   ;;  %v9246_v43 = vld [vmem:[#allocation11 + $0x6e0] ss:$16 sps:$4 sm:$0xff]  }
 0x4ca   : > { %v3254_v30 = vsel %vm3248_vm3, %v3245_v17, %v3237_v27  ;;  %v3256_v14 = vsel %vm3248_vm3, %v3247_v5, %v3239_v0  ;;  %v3261_v16 = vpack.c.b16 %v3253_v19, %v3253_v19  ;;  %v9248_v49 = vld [vmem:[#allocation11 + $0x6e4] ss:$16 sps:$4 sm:$0xff]   ;;  %v9249_v22 = vld [vmem:[#allocation11 + $0x6e8] ss:$16 sps:$4 sm:$0xff]   ;;  %v9257_v29 = vld [vmem:[#allocation11 + $0x70c] ss:$16 sps:$4 sm:$0xff]  }
 0x4cb   : > { %4666 = vmatpush1.bf16.msra.mxu0 %v9198_v63  ;;  %v3262_v23 = vpack.c.b16 %v3254_v30, %v3254_v30  ;;  %4830 = vmatpush1.bf16.msra.mxu1 %v9201_v54  ;;  %v3264_v8 = vpack.c.b16 %v3256_v14, %v3256_v14  ;;  %v9251_v63 = vld [vmem:[#allocation11 + $0x6ec] ss:$16 sps:$4 sm:$0xff]   ;;  %v9254_v31 = vld [vmem:[#allocation11 + $0x704] ss:$16 sps:$4 sm:$0xff]   ;;  %v9252_v54 = vld [vmem:[#allocation11 + $0x700] ss:$16 sps:$4 sm:$0xff]  }
 0x4cc   : > { %4676 = vmatprep.subr.bf16.mxu0 %v9206_v2  ;;  %4840 = vmatprep.subr.bf16.mxu1 %v9209_v37  ;;  %v9255_v27 = vld [vmem:[#allocation11 + $0x708] ss:$16 sps:$4 sm:$0xff]   ;;  %v9260_v17 = vld [vmem:[#allocation11 + $0x724] ss:$16 sps:$4 sm:$0xff]   ;;  %v9263_v2 = vld [vmem:[#allocation11 + $0x72c] ss:$16 sps:$4 sm:$0xff]  }
 0x4cd   : > { %4667 = vmatprep.mubr.bf16.mxu0 %v3262_v23  ;;  %4831 = vmatprep.mubr.bf16.mxu1 %v3262_v23  ;;  %v9258_v0 = vld [vmem:[#allocation11 + $0x720] ss:$16 sps:$4 sm:$0xff]   ;;  %v9261_v5 = vld [vmem:[#allocation11 + $0x728] ss:$16 sps:$4 sm:$0xff]   ;;  %v9266_v19 = vld [vmem:[#allocation11 + $0x744] ss:$16 sps:$4 sm:$0xff]  }
 0x4ce   : > { %4668 = vmatmul.mubr.bf16.vlgmr.msra.gmra.mrb[144].mxu0 %v3261_v16  ;;  %4832 = vmatmul.mubr.bf16.vlgmr.msra.gmra.mrb[176].mxu1 %v3261_v16  ;;  %v9269_v30 = vld [vmem:[#allocation11 + $0x74c] ss:$16 sps:$4 sm:$0xff]   ;;  %v9264_v37 = vld [vmem:[#allocation11 + $0x740] ss:$16 sps:$4 sm:$0xff]   ;;  %v9267_v14 = vld [vmem:[#allocation11 + $0x748] ss:$16 sps:$4 sm:$0xff]  }
 0x4cf   : > { %4677 = vmatpush1.bf16.msra.mxu0 %v9204_v50  ;;  %4841 = vmatpush1.bf16.msra.mxu1 %v9207_v57  ;;  %v9272_v23 = vld [vmem:[#allocation11 + $0x764] ss:$16 sps:$4 sm:$0xff]   ;;  %v9275_v50 = vld [vmem:[#allocation11 + $0x76c] ss:$16 sps:$4 sm:$0xff]   ;;  %v9270_v57 = vld [vmem:[#allocation11 + $0x760] ss:$16 sps:$4 sm:$0xff]  }
 0x4d0   : > { %4708 = vmatprep.mubr.bf16.mxu0 %v3264_v8  ;;  %4872 = vmatprep.mubr.bf16.mxu1 %v3264_v8  ;;  %v9273_v16 = vld [vmem:[#allocation11 + $0x768] ss:$16 sps:$4 sm:$0xff]   ;;  %v9281_v8 = vld [vmem:[#allocation11 + $0x78c] ss:$16 sps:$4 sm:$0xff]  }
 0x4d1   : > { %4678 = vmatprep.subr.bf16.mxu0 %v9212_v34  ;;  %4842 = vmatprep.subr.bf16.mxu1 %v9215_v20  ;;  %v9278_v34 = vld [vmem:[#allocation11 + $0x784] ss:$16 sps:$4 sm:$0xff]   ;;  %v9276_v20 = vld [vmem:[#allocation11 + $0x780] ss:$16 sps:$4 sm:$0xff]  }
 0x4d3   : > { %4679 = vmatpush1.bf16.msra.mxu0 %v9210_v3  ;;  %4843 = vmatpush1.bf16.msra.mxu1 %v9213_v58  ;;  %v9279_v3 = vld [vmem:[#allocation11 + $0x788] ss:$16 sps:$4 sm:$0xff]   ;;  %v9284_v58 = vld [vmem:[#allocation11 + $0x7a4] ss:$16 sps:$4 sm:$0xff]  }
 0x4d4   : > { %4680 = vmatprep.subr.bf16.mxu0 %v9218_v56  ;;  %4844 = vmatprep.subr.bf16.mxu1 %v9221_v36  ;;  %v9287_v56 = vld [vmem:[#allocation11 + $0x7ac] ss:$16 sps:$4 sm:$0xff]   ;;  %v9282_v36 = vld [vmem:[#allocation11 + $0x7a0] ss:$16 sps:$4 sm:$0xff]  }
 0x4d7   : > { %4681 = vmatpush1.bf16.msra.mxu0 %v9216_v6  ;;  %4845 = vmatpush1.bf16.msra.mxu1 %v9219_v21  ;;  %v9285_v6 = vld [vmem:[#allocation11 + $0x7a8] ss:$16 sps:$4 sm:$0xff]   ;;  %v9290_v21 = vld [vmem:[#allocation11 + $0x7c4] ss:$16 sps:$4 sm:$0xff]  }
 0x4d8   : > { %4682 = vmatprep.subr.bf16.mxu0 %v9224_v47  ;;  %4846 = vmatprep.subr.bf16.mxu1 %v9227_v26  ;;  %v9293_v47 = vld [vmem:[#allocation11 + $0x7cc] ss:$16 sps:$4 sm:$0xff]   ;;  %v9288_v26 = vld [vmem:[#allocation11 + $0x7c0] ss:$16 sps:$4 sm:$0xff]  }
 0x4db   : > { %4683 = vmatpush1.bf16.msra.mxu0 %v9222_v51  ;;  %4847 = vmatpush1.bf16.msra.mxu1 %v9225_v32  ;;  %v9291_v51 = vld [vmem:[#allocation11 + $0x7c8] ss:$16 sps:$4 sm:$0xff]   ;;  %v9296_v32 = vld [vmem:[#allocation11 + $0x7e4] ss:$16 sps:$4 sm:$0xff]  }
 0x4dc   : > { %4684 = vmatprep.subr.bf16.mxu0 %v9230_v55  ;;  %4848 = vmatprep.subr.bf16.mxu1 %v9233_v40  ;;  %v9299_v55 = vld [vmem:[#allocation11 + $0x7ec] ss:$16 sps:$4 sm:$0xff]   ;;  %v9294_v40 = vld [vmem:[#allocation11 + $0x7e0] ss:$16 sps:$4 sm:$0xff]  }
 0x4df   : > { %4685 = vmatpush1.bf16.msra.mxu0 %v9228_v24  ;;  %4849 = vmatpush1.bf16.msra.mxu1 %v9231_v18  ;;  %v9297_v24 = vld [vmem:[#allocation11 + $0x7e8] ss:$16 sps:$4 sm:$0xff]  }
 0x4e0   : > { %4686 = vmatprep.subr.bf16.mxu0 %v9236_v28  ;;  %4850 = vmatprep.subr.bf16.mxu1 %v9239_v53  ;;  %v9302_v18 = vld [vmem:[%s12022_s8 + $0x4] ss:$16 sps:$4 sm:$0xff]   ;;  %v9305_v28 = vld [vmem:[%s12022_s8 + $0xc] ss:$16 sps:$4 sm:$0xff]   ;;  %v9300_v53 = vld [vmem:[%s12022_s8] ss:$16 sps:$4 sm:$0xff]  }
 0x4e3   : > { %4687 = vmatpush1.bf16.msra.mxu0 %v9234_v25  ;;  %4851 = vmatpush1.bf16.msra.mxu1 %v9237_v52  ;;  %v3263_v25 = vpack.c.b16 %v11053_v9, %v11053_v9  ;;  %v9303_v52 = vld [vmem:[%s12022_s8 + $0x8] ss:$16 sps:$4 sm:$0xff]   ;;  %v9306_v9 = vld [vmem:[%s12022_s8 + $0x20] ss:$16 sps:$4 sm:$0xff]  }
 0x4e4   : > { %4688 = vmatprep.subr.bf16.mxu0 %v9242_v42  ;;  %4852 = vmatprep.subr.bf16.mxu1 %v9245_v15  ;;  %v9308_v42 = vld [vmem:[%s12022_s8 + $0x24] ss:$16 sps:$4 sm:$0xff]   ;;  %v9311_v15 = vld [vmem:[%s12022_s8 + $0x2c] ss:$16 sps:$4 sm:$0xff]  }
 0x4e7   : > { %4689 = vmatpush1.bf16.msra.mxu0 %v9240_v12  ;;  %4853 = vmatpush1.bf16.msra.mxu1 %v9243_v33  ;;  %v9309_v12 = vld [vmem:[%s12022_s8 + $0x28] ss:$16 sps:$4 sm:$0xff]   ;;  %v9314_v33 = vld [vmem:[%s12022_s8 + $0x44] ss:$16 sps:$4 sm:$0xff]  }
 0x4e8   : > { %4690 = vmatprep.subr.bf16.mxu0 %v9248_v49  ;;  %4854 = vmatprep.subr.bf16.mxu1 %v9251_v63  ;;  %v9317_v49 = vld [vmem:[%s12022_s8 + $0x4c] ss:$16 sps:$4 sm:$0xff]   ;;  %v12087_v63 = vmov 0  }
 0x4eb   : > { %4691 = vmatpush1.bf16.msra.mxu0 %v9246_v43  ;;  %4855 = vmatpush1.bf16.msra.mxu1 %v9249_v22  ;;  %v9312_v43 = vld [vmem:[%s12022_s8 + $0x40] ss:$16 sps:$4 sm:$0xff]   ;;  %v9315_v22 = vld [vmem:[%s12022_s8 + $0x48] ss:$16 sps:$4 sm:$0xff]  }
 0x4ec   : > { %4692 = vmatprep.subr.bf16.mxu0 %v9254_v31  ;;  %4856 = vmatprep.subr.bf16.mxu1 %v9257_v29  ;;  %v9320_v31 = vld [vmem:[%s12022_s8 + $0x64] ss:$16 sps:$4 sm:$0xff]   ;;  %v9323_v29 = vld [vmem:[%s12022_s8 + $0x6c] ss:$16 sps:$4 sm:$0xff]  }
 0x4ef   : > { %4693 = vmatpush1.bf16.msra.mxu0 %v9252_v54  ;;  %4857 = vmatpush1.bf16.msra.mxu1 %v9255_v27  ;;  %v9318_v54 = vld [vmem:[%s12022_s8 + $0x60] ss:$16 sps:$4 sm:$0xff]   ;;  %v9321_v27 = vld [vmem:[%s12022_s8 + $0x68] ss:$16 sps:$4 sm:$0xff]  }
 0x4f0   : > { %4694 = vmatprep.subr.bf16.mxu0 %v9260_v17  ;;  %4858 = vmatprep.subr.bf16.mxu1 %v9263_v2  ;;  %v9326_v17 = vld [vmem:[#allocation14 + $0x4] ss:$8 sps:$4 sm:$0xff]   ;;  %v9324_v2 = vld [vmem:[#allocation14] ss:$8 sps:$4 sm:$0xff]  }
 0x4f3   : > { %4695 = vmatpush1.bf16.msra.mxu0 %v9258_v0  ;;  %4859 = vmatpush1.bf16.msra.mxu1 %v9261_v5  ;;  %v9329_v0 = vld [vmem:[#allocation14 + $0x14] ss:$8 sps:$4 sm:$0xff]   ;;  %v9327_v5 = vld [vmem:[#allocation14 + $0x10] ss:$8 sps:$4 sm:$0xff]  }
 0x4f4   : > { %4696 = vmatprep.subr.bf16.mxu0 %v9266_v19  ;;  %4860 = vmatprep.subr.bf16.mxu1 %v9269_v30  ;;  %v9332_v19 = vld [vmem:[#allocation14 + $0x24] ss:$8 sps:$4 sm:$0xff]   ;;  %v9330_v30 = vld [vmem:[#allocation14 + $0x20] ss:$8 sps:$4 sm:$0xff]  }
 0x4f7   : > { %4697 = vmatpush1.bf16.msra.mxu0 %v9264_v37  ;;  %4861 = vmatpush1.bf16.msra.mxu1 %v9267_v14  ;;  %v9335_v37 = vld [vmem:[#allocation14 + $0x34] ss:$8 sps:$4 sm:$0xff]   ;;  %v9338_v14 = vld [vmem:[#allocation14 + $0x44] ss:$8 sps:$4 sm:$0xff]  }
 0x4f8   : > { %4698 = vmatprep.subr.bf16.mxu0 %v9272_v23  ;;  %4862 = vmatprep.subr.bf16.mxu1 %v9275_v50  ;;  %v9336_v23 = vld [vmem:[#allocation14 + $0x40] ss:$8 sps:$4 sm:$0xff]   ;;  %v9341_v50 = vld [vmem:[#allocation14 + $0x54] ss:$8 sps:$4 sm:$0xff]  }
 0x4fb   : > { %4699 = vmatpush1.bf16.msra.mxu0 %v9270_v57  ;;  %4863 = vmatpush1.bf16.msra.mxu1 %v9273_v16  ;;  %v9344_v57 = vld [vmem:[#allocation14 + $0x64] ss:$8 sps:$4 sm:$0xff]   ;;  %v9342_v16 = vld [vmem:[#allocation14 + $0x60] ss:$8 sps:$4 sm:$0xff]  }
 0x4fc   : > { %4700 = vmatprep.subr.bf16.mxu0 %v9278_v34  ;;  %4864 = vmatprep.subr.bf16.mxu1 %v9281_v8  ;;  %v9347_v34 = vld [vmem:[#allocation14 + $0x74] ss:$8 sps:$4 sm:$0xff]   ;;  %v9350_v8 = vld [vmem:[#allocation14 + $0x84] ss:$8 sps:$4 sm:$0xff]  }
 0x4ff   : > { %4701 = vmatpush1.bf16.msra.mxu0 %v9276_v20  ;;  %4865 = vmatpush1.bf16.msra.mxu1 %v9279_v3  ;;  %v9348_v20 = vld [vmem:[#allocation14 + $0x80] ss:$8 sps:$4 sm:$0xff]   ;;  %v9353_v3 = vld [vmem:[#allocation14 + $0x94] ss:$8 sps:$4 sm:$0xff]  }
 0x500   : > { %4702 = vmatprep.subr.bf16.mxu0 %v9284_v58  ;;  %4866 = vmatprep.subr.bf16.mxu1 %v9287_v56  ;;  %v9356_v58 = vld [vmem:[#allocation14 + $0xa4] ss:$8 sps:$4 sm:$0xff]   ;;  %v9354_v56 = vld [vmem:[#allocation14 + $0xa0] ss:$8 sps:$4 sm:$0xff]  }
 0x503   : > { %4703 = vmatpush1.bf16.msra.mxu0 %v9282_v36  ;;  %4867 = vmatpush1.bf16.msra.mxu1 %v9285_v6  ;;  %v9359_v36 = vld [vmem:[#allocation14 + $0xb4] ss:$8 sps:$4 sm:$0xff]   ;;  %v9362_v6 = vld [vmem:[#allocation14 + $0xc4] ss:$8 sps:$4 sm:$0xff]  }
 0x504   : > { %4704 = vmatprep.subr.bf16.mxu0 %v9290_v21  ;;  %4868 = vmatprep.subr.bf16.mxu1 %v9293_v47  ;;  %v9360_v21 = vld [vmem:[#allocation14 + $0xc0] ss:$8 sps:$4 sm:$0xff]  }
 0x507   : > { %4705 = vmatpush1.bf16.msra.mxu0 %v9288_v26  ;;  %4869 = vmatpush1.bf16.msra.mxu1 %v9291_v51 }
 0x508   : > { %4706 = vmatprep.subr.bf16.mxu0 %v9296_v32  ;;  %4870 = vmatprep.subr.bf16.mxu1 %v9299_v55  ;;  %v12088_v32 = vld [vmem:[#allocation36_spill] sm:$0xff] }
 0x50b   : > { %4707 = vmatpush1.bf16.msra.mxu0 %v9294_v40  ;;  %4871 = vmatpush1.bf16.msra.mxu1 %v9297_v24  ;;  %v12089_v40 = vld [vmem:[#allocation37_spill] sm:$0xff] }
 0x50c   : > { %4977 = vmatprep.subr.bf16.mxu0 %v9302_v18  ;;  %5170 = vmatprep.subr.bf16.mxu1 %v9305_v28 }
 0x50e   : > { %4709 = vmatmul.mubr.bf16.vlgmr.msra.gmra.mrb[144].mxu0 %v3263_v25  ;;  %4873 = vmatmul.mubr.bf16.vlgmr.msra.gmra.mrb[176].mxu1 %v3263_v25 }
 0x50f   : > { %4978 = vmatpush1.bf16.msra.mxu0 %v9300_v53  ;;  %5171 = vmatpush1.bf16.msra.mxu1 %v9303_v52 }
 0x510   : > { %4979 = vmatprep.subr.bf16.mxu0 %v9308_v42  ;;  %5172 = vmatprep.subr.bf16.mxu1 %v9311_v15  ;;  %v12090_v15 = vld [vmem:[#allocation35_spill] sm:$0xff] }
 0x511   : > { %5009 = vmatprep.mubr.bf16.mxu0 %v12087_v63  ;;  %5202 = vmatprep.mubr.bf16.mxu1 %v12087_v63 }
 0x513   : > { %4980 = vmatpush1.bf16.msra.mxu0 %v9306_v9  ;;  %5173 = vmatpush1.bf16.msra.mxu1 %v9309_v12 }
 0x514   : > { %4981 = vmatprep.subr.bf16.mxu0 %v9314_v33  ;;  %5174 = vmatprep.subr.bf16.mxu1 %v9317_v49 }
 0x517   : > { %4982 = vmatpush1.bf16.msra.mxu0 %v9312_v43  ;;  %5175 = vmatpush1.bf16.msra.mxu1 %v9315_v22 }
 0x518   : > { %4983 = vmatprep.subr.bf16.mxu0 %v9320_v31  ;;  %5176 = vmatprep.subr.bf16.mxu1 %v9323_v29 }
 0x51b   : > { %4984 = vmatpush1.bf16.msra.mxu0 %v9318_v54  ;;  %5177 = vmatpush1.bf16.msra.mxu1 %v9321_v27 }
 0x51c   : > { %6155 = vmatprep.subr.bf16.mxu0 %v9326_v17 }
 0x51e   : > { %8158 = vmatmul.mubr.msk.bf16.vlgmr.msra.gmra.mrb[148].mxu0 %vm1082_vm2, %v10408_v4  ;;  %8174 = vmatmul.mubr.msk.bf16.vlgmr.msra.gmra.mrb[180].mxu1 %vm1082_vm2, %v10408_v4  ;;  %v9333_v4 = vld [vmem:[#allocation14 + $0x30] ss:$8 sps:$4 sm:$0xff]  }
 0x51f   : > { %5019 = vmatprep.mubr.bf16.mxu0 %v12087_v63  ;;  %5212 = vmatprep.mubr.bf16.mxu1 %v12087_v63 }
 0x520   : > { %6156 = vmatpush1.bf16.msra.mxu0 %v9324_v2 }
 0x521   : > { %6157 = vmatprep.subr.bf16.mxu0 %v9329_v0 }
 0x524   : > { %6158 = vmatpush1.bf16.msra.mxu0 %v9327_v5 }
 0x525   : > { %6159 = vmatprep.subr.bf16.mxu0 %v9332_v19 }
 0x526   : > { %8159 = vmatmul.mubr.msk.bf16.gmra.mrb[152].mxu0 %vm1082_vm2, %v10406_v1  ;;  %8175 = vmatmul.mubr.msk.bf16.gmra.mrb[184].mxu1 %vm1082_vm2, %v10406_v1  ;;  %v9339_v1 = vld [vmem:[#allocation14 + $0x50] ss:$8 sps:$4 sm:$0xff]  }
 0x527   : > { %5029 = vmatprep.mubr.bf16.mxu0 %v12087_v63  ;;  %5222 = vmatprep.mubr.bf16.mxu1 %v12087_v63 }
 0x528   : > { %6160 = vmatpush1.bf16.msra.mxu0 %v9330_v30 }
 0x529   : > { %6161 = vmatprep.subr.bf16.mxu0 %v9335_v37 }
 0x52c   : > { %6162 = vmatpush1.bf16.msra.mxu0 %v9333_v4 }
 0x52d   : > { %6163 = vmatprep.subr.bf16.mxu0 %v9338_v14 }
 0x52e   : > { %8160 = vmatmul.mubr.msk.bf16.gmra.mrb[156].mxu0 %vm1082_vm2, %v10431_v41  ;;  %8176 = vmatmul.mubr.msk.bf16.gmra.mrb[188].mxu1 %vm1082_vm2, %v10431_v41  ;;  %v9345_v41 = vld [vmem:[#allocation14 + $0x70] ss:$8 sps:$4 sm:$0xff]  }
 0x52f   : > { %5039 = vmatprep.mubr.bf16.mxu0 %v12087_v63  ;;  %5232 = vmatprep.mubr.bf16.mxu1 %v12087_v63 }
 0x530   : > { %6164 = vmatpush1.bf16.msra.mxu0 %v9336_v23 }
 0x531   : > { %6165 = vmatprep.subr.bf16.mxu0 %v9341_v50 }
 0x534   : > { %6166 = vmatpush1.bf16.msra.mxu0 %v9339_v1 }
 0x535   : > { %6167 = vmatprep.subr.bf16.mxu0 %v9344_v57 }
 0x536   : > { %8161 = vmatmul.mubr.msk.bf16.gmra.mrb[160].mxu0 %vm1082_vm2, %v10427_v38  ;;  %8177 = vmatmul.mubr.msk.bf16.gmra.mrb[192].mxu1 %vm1082_vm2, %v10427_v38  ;;  %v9351_v38 = vld [vmem:[#allocation14 + $0x90] ss:$8 sps:$4 sm:$0xff]  }
 0x537   : > { %5049 = vmatprep.mubr.bf16.mxu0 %v12087_v63  ;;  %5242 = vmatprep.mubr.bf16.mxu1 %v12087_v63 }
 0x538   : > { %6168 = vmatpush1.bf16.msra.mxu0 %v9342_v16 }
 0x539   : > { %6169 = vmatprep.subr.bf16.mxu0 %v9347_v34 }
 0x53c   : > { %6170 = vmatpush1.bf16.msra.mxu0 %v9345_v41 }
 0x53d   : > { %6171 = vmatprep.subr.bf16.mxu0 %v9350_v8 }
 0x53e   : > { %8162 = vmatmul.mubr.msk.bf16.gmra.mrb[164].mxu0 %vm1082_vm2, %v10451_v13  ;;  %8178 = vmatmul.mubr.msk.bf16.gmra.mrb[196].mxu1 %vm1082_vm2, %v10451_v13  ;;  %v9357_v13 = vld [vmem:[#allocation14 + $0xb0] ss:$8 sps:$4 sm:$0xff]  }
 0x53f   : > { %5059 = vmatprep.mubr.bf16.mxu0 %v12087_v63  ;;  %5252 = vmatprep.mubr.bf16.mxu1 %v12087_v63 }
 0x540   : > { %6172 = vmatpush1.bf16.msra.mxu0 %v9348_v20 }
 0x541   : > { %6173 = vmatprep.subr.bf16.mxu0 %v9353_v3 }
 0x544   : > { %6174 = vmatpush1.bf16.msra.mxu0 %v9351_v38 }
 0x545   : > { %6175 = vmatprep.subr.bf16.mxu0 %v9356_v58 }
 0x546   : > { %8163 = vmatmul.mubr.msk.bf16.gmra.mrb[168].mxu0 %vm1082_vm2, %v10447_v10  ;;  %8179 = vmatmul.mubr.msk.bf16.gmra.mrb[200].mxu1 %vm1082_vm2, %v10447_v10  ;;  %v9365_v10 = vld [vmem:[#allocation14 + $0xd4] ss:$8 sps:$4 sm:$0xff]  }
 0x547   : > { %5069 = vmatprep.mubr.bf16.mxu0 %v12087_v63  ;;  %5262 = vmatprep.mubr.bf16.mxu1 %v12087_v63 }
 0x548   : > { %6176 = vmatpush1.bf16.msra.mxu0 %v9354_v56 }
 0x549   : > { %6177 = vmatprep.subr.bf16.mxu0 %v9359_v36 }
 0x54c   : > { %6178 = vmatpush1.bf16.msra.mxu0 %v9357_v13 }
 0x54d   : > { %6179 = vmatprep.subr.bf16.mxu0 %v9362_v6 }
 0x54e   : > { %8164 = vmatmul.mubr.msk.bf16.gmra.mrb[172].mxu0 %vm1082_vm2, %v10471_v48  ;;  %8180 = vmatmul.mubr.msk.bf16.gmra.mrb[204].mxu1 %vm1082_vm2, %v10471_v48  ;;  %v9369_v48 = vld [vmem:[#allocation14 + $0xf0] ss:$8 sps:$4 sm:$0xff]  }
 0x54f   : > { %5079 = vmatprep.mubr.bf16.mxu0 %v12087_v63  ;;  %5272 = vmatprep.mubr.bf16.mxu1 %v12087_v63 }
 0x550   : > { %6180 = vmatpush1.bf16.msra.mxu0 %v9360_v21 }
 0x551   : > { %6181 = vmatprep.subr.bf16.mxu0 %v9365_v10 }
 0x556   : > { %8165 = vmatmul.mubr.msk.bf16.gmra.mrb[176].mxu0 %vm1082_vm2, %v10467_v45  ;;  %8181 = vmatmul.mubr.msk.bf16.gmra.mrb[208].mxu1 %vm1082_vm2, %v10467_v45  ;;  %v9368_v45 = vld [vmem:[#allocation14 + $0xe4] ss:$8 sps:$4 sm:$0xff]  }
 0x557   : > { %5089 = vmatprep.mubr.bf16.mxu0 %v12087_v63  ;;  %5282 = vmatprep.mubr.bf16.mxu1 %v12087_v63 }
 0x55e   : > { %8166 = vmatmul.mubr.msk.bf16.gmra.mrb[180].mxu0 %vm1082_vm2, %v10429_v39  ;;  %8182 = vmatmul.mubr.msk.bf16.gmra.mrb[212].mxu1 %vm1082_vm2, %v10429_v39  ;;  %v9363_v39 = vld [vmem:[#allocation14 + $0xd0] ss:$8 sps:$4 sm:$0xff]  }
 0x55f   : > { %5099 = vmatprep.mubr.bf16.mxu0 %v12087_v63  ;;  %5292 = vmatprep.mubr.bf16.mxu1 %v12087_v63 }
 0x560   : > { %6182 = vmatpush1.bf16.msra.mxu0 %v9363_v39 }
 0x561   : > { %6183 = vmatprep.subr.bf16.mxu0 %v9368_v45 }
 0x566   : > { %8167 = vmatmul.mubr.msk.bf16.gmra.mrb[184].mxu0 %vm1082_vm2, %v10425_v35  ;;  %8183 = vmatmul.mubr.msk.bf16.gmra.mrb[216].mxu1 %vm1082_vm2, %v10425_v35  ;;  %v9366_v35 = vld [vmem:[#allocation14 + $0xe0] ss:$8 sps:$4 sm:$0xff]  }
 0x567   : > { %5109 = vmatprep.mubr.bf16.mxu0 %v12087_v63  ;;  %5302 = vmatprep.mubr.bf16.mxu1 %v12087_v63 }
 0x568   : > { %6184 = vmatpush1.bf16.msra.mxu0 %v9366_v35 }
 0x56e   : > { %8168 = vmatmul.mubr.msk.bf16.gmra.mrb[188].mxu0 %vm1082_vm2, %v10449_v11  ;;  %8184 = vmatmul.mubr.msk.bf16.gmra.mrb[220].mxu1 %vm1082_vm2, %v10449_v11  ;;  %v9371_v11 = vld [vmem:[#allocation14 + $0xf4] ss:$8 sps:$4 sm:$0xff]  }
 0x56f   : > { %5119 = vmatprep.mubr.bf16.mxu0 %v12087_v63  ;;  %5312 = vmatprep.mubr.bf16.mxu1 %v12087_v63 }
 0x570   : > { %6185 = vmatprep.subr.bf16.mxu0 %v9371_v11 }
 0x571   : > { %6186 = vmatpush1.bf16.msra.mxu0 %v9369_v48 }
 0x576   : > { %8169 = vmatmul.mubr.msk.bf16.gmra.mrb[192].mxu0 %vm1082_vm2, %v10445_v7  ;;  %8185 = vmatmul.mubr.msk.bf16.gmra.mrb[224].mxu1 %vm1082_vm2, %v10445_v7  ;;  %v9374_v7 = vld [vmem:[#allocation14 + $0x104] ss:$8 sps:$4 sm:$0xff]  }
 0x577   : > { %5129 = vmatprep.mubr.bf16.mxu0 %v12087_v63  ;;  %5322 = vmatprep.mubr.bf16.mxu1 %v12087_v63 }
 0x578   : > { %6348 = vmatprep.subr.bf16.mxu0 %v9374_v7 }
 0x57e   : > { %8170 = vmatmul.mubr.msk.bf16.gmra.mrb[196].mxu0 %vm1082_vm2, %v10469_v46  ;;  %8186 = vmatmul.mubr.msk.bf16.gmra.mrb[228].mxu1 %vm1082_vm2, %v10469_v46  ;;  %v9959_v46 = vmov 1966171168  }
 0x57f   : > { %5139 = vmatprep.mubr.bf16.mxu0 %v12087_v63  ;;  %5332 = vmatprep.mubr.bf16.mxu1 %v12087_v63  ;;  %v5370_v47 = vunpack.c.l.s4 %v9959_v46 }
 0x586   : > { %8171 = vmatmul.mubr.msk.bf16.gmra.mrb[200].mxu0 %vm1082_vm2, %v10465_v44  ;;  %8187 = vmatmul.mubr.msk.bf16.gmra.mrb[232].mxu1 %vm1082_vm2, %v10465_v44  ;;  %v3194_v44 = vld [vmem:[#allocation13] sm:$0xf] }
 0x587   : > { %5149 = vmatprep.mubr.bf16.mxu0 %v12087_v63  ;;  %5342 = vmatprep.mubr.bf16.mxu1 %v12087_v63  ;;  %v3199_v26 = vrot.slane %v3194_v44, %v10676_v59  ;;  %v3207_v51 = vrot.slane %v3194_v44, %v10679_v60  ;;  %v3203_v55 = vrot.slane %v3194_v44, %v12088_v32 }
 0x588   : > { %v3211_v24 = vrot.slane %v3194_v44, %v12089_v40 }
 0x58e   : > { %8172 = vmatmul.mubr.msk.bf16.gmra.mrb[204].mxu0 %vm1082_vm2, %v10485_v62  ;;  %8188 = vmatmul.mubr.msk.bf16.gmra.mrb[236].mxu1 %vm1082_vm2, %v10485_v62  ;;  %v5371_v62 = vunpack.c.0.s8 %v5370_v47  ;;  %v9372_v47 = vld [vmem:[#allocation14 + $0x100] ss:$8 sps:$4 sm:$0xff]  }
 0x58f   : > { %5159 = vmatprep.mubr.bf16.mxu0 %v12087_v63  ;;  %5352 = vmatprep.mubr.bf16.mxu1 %v12087_v63 }
 0x596   : > { %8173 = vmatmul.mubr.msk.bf16.gmra.mrb[208].mxu0 %vm1082_vm2, %v10483_v61  ;;  %8189 = vmatmul.mubr.msk.bf16.gmra.mrb[240].mxu1 %vm1082_vm2, %v10483_v61  ;;  %v5374_v61 = vsub.s32 %v5371_v62, %v12090_v15 }
 0x5e1   : > { %v4710_v18 = vpop.f32.mrb[144].mxu0  ;;  %v4874_v53 = vpop.f32.mrb[176].mxu1 }
 0x5e2   : > { %v8586_v28 = vadd.f32 %v4710_v18, %v3199_v26  ;;  %v4712_v25 = vpop.f32.mrb[145].mxu0  ;;  %v8588_v52 = vadd.f32 %v4874_v53, %v3207_v51  ;;  %v4876_v9 = vpop.f32.mrb[177].mxu1 }
 0x5e3   : > { %v8587_v42 = vadd.f32 %v4712_v25, %v3203_v55  ;;  %v4714_v12 = vpop.f32.mrb[146].mxu0  ;;  %v8589_v33 = vadd.f32 %v4876_v9, %v3211_v24  ;;  %v4878_v49 = vpop.f32.mrb[178].mxu1  ;;  %v9377_v24 = vld [vmem:[#allocation14 + $0x114] ss:$8 sps:$4 sm:$0xff]  }
 0x5e4   : > { %v4715_v63 = vpop.f32.mrb[147].mxu0  ;;  %v4879_v22 = vpop.f32.mrb[179].mxu1  ;;  %v9375_v49 = vld [vmem:[#allocation14 + $0x110] ss:$8 sps:$4 sm:$0xff]  }
 0x5e5   : > { %v5367_v43 = vcombine.low %v8586_v28, %v8587_v42  ;;  %v5368_v31 = vcombine.low %v8588_v52, %v8589_v33 }
 0x5e7   : > { %v5375_v29 = vrot.slane %v5367_v43, %v5374_v61  ;;  %v5382_v54 = vrot.slane %v5368_v31, %v5374_v61  ;;  %v9380_v31 = vld [vmem:[#allocation14 + $0x124] ss:$8 sps:$4 sm:$0xff]  }
 0x5e9   : > { %v5383_v27 = vcombine.low %v5375_v29, %v5382_v54  ;;  %v5384_v17 = vcombine.high %v5375_v29, %v5382_v54 }
 0x5eb   : > { %v5391_v2 = vrot.slane %v5383_v27, %v5374_v61  ;;  %v11208_v0 = vrot.slane %v5384_v17, %v5374_v61 }
 0x5ed   : > { %v11211_v5 = vrot.slane %v5391_v2, %v10676_v59  ;;  %v11214_v19 = vrot.slane %v5391_v2, %v12088_v32  ;;  %v11217_v30 = vrot.slane %v5391_v2, %v10679_v60  ;;  %v11220_v4 = vrot.slane %v5391_v2, %v12089_v40 }
 0x5f1   : > { %v5011_v37 = vpop.f32.mrb[148].mxu0  ;;  %v5204_v23 = vpop.f32.mrb[180].mxu1 }
 0x5f2   : > { %v5439_v14 = vadd.f32 %v11211_v5, %v5011_v37  ;;  %v5013_v50 = vpop.f32.mrb[149].mxu0  ;;  %v5441_v1 = vadd.f32 %v11217_v30, %v5204_v23  ;;  %v5206_v16 = vpop.f32.mrb[181].mxu1 }
 0x5f3   : > { %v5440_v57 = vadd.f32 %v11214_v19, %v5013_v50  ;;  %v5015_v34 = vpop.f32.mrb[150].mxu0  ;;  %v5442_v41 = vadd.f32 %v11220_v4, %v5206_v16  ;;  %v5208_v20 = vpop.f32.mrb[182].mxu1 }
 0x5f4   : > { %v5443_v8 = vadd.f32 %v11211_v5, %v5015_v34  ;;  %v5017_v3 = vpop.f32.mrb[151].mxu0  ;;  %v5445_v38 = vadd.f32 %v11217_v30, %v5208_v20  ;;  %v5210_v56 = vpop.f32.mrb[183].mxu1  ;;  %v5567_v36 = vmax.f32 %v5439_v14, 0.0  ;;  %v5569_v21 = vmax.f32 %v5441_v1, 0.0  ;;  %v9383_v20 = vld [vmem:[#allocation14 + $0x134] ss:$8 sps:$4 sm:$0xff]  }
 0x5f5   : > { %v5444_v58 = vadd.f32 %v11214_v19, %v5017_v3  ;;  %v5446_v6 = vadd.f32 %v11220_v4, %v5210_v56  ;;  %v5568_v39 = vmax.f32 %v5440_v57, 0.0  ;;  %v5570_v35 = vmax.f32 %v5442_v41, 0.0  ;;  %v9378_v57 = vld [vmem:[#allocation14 + $0x120] ss:$8 sps:$4 sm:$0xff]  }
 0x5f6   : > { %v5571_v13 = vmax.f32 %v5443_v8, 0.0  ;;  %v5573_v10 = vmax.f32 %v5445_v38, 0.0 }
 0x5f7   : > { %v5572_v45 = vmax.f32 %v5444_v58, 0.0  ;;  %v5574_v48 = vmax.f32 %v5446_v6, 0.0 }
 0x5f8   : > { %v5695_v11 = vpack.c.bf16 %v5571_v13, %v5567_v36  ;;  %v11230_v7 = vpack.c.bf16 %v5573_v10, %v5569_v21 }
 0x5f9   : > { %v5696_v44 = vpack.c.bf16 %v5572_v45, %v5568_v39  ;;  %v5021_v46 = vpop.f32.mrb[152].mxu0  ;;  %v11232_v26 = vpack.c.bf16 %v5574_v48, %v5570_v35  ;;  %v5214_v55 = vpop.f32.mrb[184].mxu1  ;;  %v9381_v35 = vld [vmem:[#allocation14 + $0x130] ss:$8 sps:$4 sm:$0xff]  }
 0x5fa   : > { %v5447_v51 = vadd.f32 %v11211_v5, %v5021_v46  ;;  %v5023_v62 = vpop.f32.mrb[153].mxu0  ;;  %v5449_v18 = vadd.f32 %v11217_v30, %v5214_v55  ;;  %v5216_v53 = vpop.f32.mrb[185].mxu1  ;;  %v9386_v46 = vld [vmem:[#allocation14 + $0x144] ss:$8 sps:$4 sm:$0xff]  }
 0x5fb   : > { %v5448_v28 = vadd.f32 %v11214_v19, %v5023_v62  ;;  %v5025_v25 = vpop.f32.mrb[154].mxu0  ;;  %6187 = vmatprep.mubr.bf16.mxu0 %v5696_v44  ;;  %v5450_v52 = vadd.f32 %v11220_v4, %v5216_v53  ;;  %v5218_v15 = vpop.f32.mrb[186].mxu1 }
 0x5fc   : > { %v5451_v42 = vadd.f32 %v11211_v5, %v5025_v25  ;;  %v5027_v61 = vpop.f32.mrb[155].mxu0  ;;  %6188 = vmatmul.mubr.bf16.vlgmr.msra.gmra.mrb[212].mxu0 %v5695_v11  ;;  %v5453_v9 = vadd.f32 %v11217_v30, %v5218_v15  ;;  %v5220_v33 = vpop.f32.mrb[187].mxu1  ;;  %v5575_v63 = vmax.f32 %v5447_v51, 0.0  ;;  %v5577_v29 = vmax.f32 %v5449_v18, 0.0 }
 0x5fd   : > { %v5452_v12 = vadd.f32 %v11214_v19, %v5027_v61  ;;  %6349 = vmatpush1.bf16.msra.mxu0 %v9372_v47  ;;  %v5454_v22 = vadd.f32 %v11220_v4, %v5220_v33  ;;  %v5576_v54 = vmax.f32 %v5448_v28, 0.0  ;;  %v5578_v2 = vmax.f32 %v5450_v52, 0.0  ;;  %v9389_v33 = vld [vmem:[#allocation14 + $0x154] ss:$8 sps:$4 sm:$0xff]  }
 0x5fe   : > { %v5579_v43 = vmax.f32 %v5451_v42, 0.0  ;;  %6350 = vmatprep.subr.bf16.mxu0 %v9377_v24  ;;  %v5581_v27 = vmax.f32 %v5453_v9, 0.0  ;;  %v9384_v42 = vld [vmem:[#allocation14 + $0x140] ss:$8 sps:$4 sm:$0xff]  }
 0x5ff   : > { %v5580_v17 = vmax.f32 %v5452_v12, 0.0  ;;  %v5582_v14 = vmax.f32 %v5454_v22, 0.0 }
 0x600   : > { %v5699_v37 = vpack.c.bf16 %v5579_v43, %v5575_v63  ;;  %v11242_v23 = vpack.c.bf16 %v5581_v27, %v5577_v29 }
 0x601   : > { %v5700_v50 = vpack.c.bf16 %v5580_v17, %v5576_v54  ;;  %v5031_v1 = vpop.f32.mrb[156].mxu0  ;;  %6351 = vmatpush1.bf16.msra.mxu0 %v9375_v49  ;;  %v11244_v16 = vpack.c.bf16 %v5582_v14, %v5578_v2  ;;  %v5224_v41 = vpop.f32.mrb[188].mxu1  ;;  %v9387_v14 = vld [vmem:[#allocation14 + $0x150] ss:$8 sps:$4 sm:$0xff]  }
 0x602   : > { %v5455_v34 = vadd.f32 %v11211_v5, %v5031_v1  ;;  %v5033_v8 = vpop.f32.mrb[157].mxu0  ;;  %6352 = vmatprep.subr.bf16.mxu0 %v9380_v31  ;;  %v5457_v3 = vadd.f32 %v11217_v30, %v5224_v41  ;;  %v5226_v58 = vpop.f32.mrb[189].mxu1 }
 0x603   : > { %v5456_v38 = vadd.f32 %v11214_v19, %v5033_v8  ;;  %v5035_v56 = vpop.f32.mrb[158].mxu0  ;;  %6197 = vmatprep.mubr.bf16.mxu0 %v5700_v50  ;;  %v5458_v36 = vadd.f32 %v11220_v4, %v5226_v58  ;;  %v5228_v6 = vpop.f32.mrb[190].mxu1 }
 0x604   : > { %v5459_v13 = vadd.f32 %v11211_v5, %v5035_v56  ;;  %v5037_v21 = vpop.f32.mrb[159].mxu0  ;;  %6198 = vmatmul.mubr.bf16.gmra.mrb[216].mxu0 %v5699_v37  ;;  %v5461_v39 = vadd.f32 %v11217_v30, %v5228_v6  ;;  %v5230_v45 = vpop.f32.mrb[191].mxu1  ;;  %v5583_v11 = vmax.f32 %v5455_v34, 0.0  ;;  %v5585_v47 = vmax.f32 %v5457_v3, 0.0  ;;  %v9392_v34 = vld [vmem:[#allocation14 + $0x164] ss:$8 sps:$4 sm:$0xff]  }
 0x605   : > { %v5460_v10 = vadd.f32 %v11214_v19, %v5037_v21  ;;  %6353 = vmatpush1.bf16.msra.mxu0 %v9378_v57  ;;  %v5462_v44 = vadd.f32 %v11220_v4, %v5230_v45  ;;  %v5584_v51 = vmax.f32 %v5456_v38, 0.0  ;;  %v5586_v24 = vmax.f32 %v5458_v36, 0.0  ;;  %v9390_v21 = vld [vmem:[#allocation14 + $0x160] ss:$8 sps:$4 sm:$0xff]  }
 0x606   : > { %v5587_v48 = vmax.f32 %v5459_v13, 0.0  ;;  %6354 = vmatprep.subr.bf16.mxu0 %v9383_v20  ;;  %v5589_v55 = vmax.f32 %v5461_v39, 0.0 }
 0x607   : > { %v5588_v62 = vmax.f32 %v5460_v10, 0.0  ;;  %v5590_v28 = vmax.f32 %v5462_v44, 0.0 }
 0x608   : > { %v5703_v18 = vpack.c.bf16 %v5587_v48, %v5583_v11  ;;  %v11254_v53 = vpack.c.bf16 %v5589_v55, %v5585_v47  ;;  %v9395_v11 = vld [vmem:[#allocation14 + $0x174] ss:$8 sps:$4 sm:$0xff]  }
 0x609   : > { %v5704_v25 = vpack.c.bf16 %v5588_v62, %v5584_v51  ;;  %v5041_v52 = vpop.f32.mrb[160].mxu0  ;;  %6355 = vmatpush1.bf16.msra.mxu0 %v9381_v35  ;;  %v11256_v15 = vpack.c.bf16 %v5590_v28, %v5586_v24  ;;  %v5234_v9 = vpop.f32.mrb[192].mxu1 }
 0x60a   : > { %v5463_v61 = vadd.f32 %v11211_v5, %v5041_v52  ;;  %v5043_v12 = vpop.f32.mrb[161].mxu0  ;;  %6356 = vmatprep.subr.bf16.mxu0 %v9386_v46  ;;  %v5465_v49 = vadd.f32 %v11217_v30, %v5234_v9  ;;  %v5236_v43 = vpop.f32.mrb[193].mxu1  ;;  %v9393_v52 = vld [vmem:[#allocation14 + $0x170] ss:$8 sps:$4 sm:$0xff]  }
 0x60b   : > { %v5464_v63 = vadd.f32 %v11214_v19, %v5043_v12  ;;  %v5045_v22 = vpop.f32.mrb[162].mxu0  ;;  %6207 = vmatprep.mubr.bf16.mxu0 %v5704_v25  ;;  %v5466_v31 = vadd.f32 %v11220_v4, %v5236_v43  ;;  %v5238_v54 = vpop.f32.mrb[194].mxu1  ;;  %v9398_v12 = vld [vmem:[#allocation14 + $0x184] ss:$8 sps:$4 sm:$0xff]  }
 0x60c   : > { %v5467_v29 = vadd.f32 %v11211_v5, %v5045_v22  ;;  %v5047_v27 = vpop.f32.mrb[163].mxu0  ;;  %6208 = vmatmul.mubr.bf16.gmra.mrb[220].mxu0 %v5703_v18  ;;  %v5469_v17 = vadd.f32 %v11217_v30, %v5238_v54  ;;  %v5240_v37 = vpop.f32.mrb[195].mxu1  ;;  %v5591_v50 = vmax.f32 %v5463_v61, 0.0  ;;  %v5593_v41 = vmax.f32 %v5465_v49, 0.0 }
 0x60d   : > { %v5468_v2 = vadd.f32 %v11214_v19, %v5047_v27  ;;  %6357 = vmatpush1.bf16.msra.mxu0 %v9384_v42  ;;  %v5470_v57 = vadd.f32 %v11220_v4, %v5240_v37  ;;  %v5592_v8 = vmax.f32 %v5464_v63, 0.0  ;;  %v5594_v38 = vmax.f32 %v5466_v31, 0.0 }
 0x60e   : > { %v5595_v1 = vmax.f32 %v5467_v29, 0.0  ;;  %6358 = vmatprep.subr.bf16.mxu0 %v9389_v33  ;;  %v5597_v20 = vmax.f32 %v5469_v17, 0.0 }
 0x60f   : > { %v5596_v3 = vmax.f32 %v5468_v2, 0.0  ;;  %v5598_v56 = vmax.f32 %v5470_v57, 0.0  ;;  %v9396_v2 = vld [vmem:[#allocation14 + $0x180] ss:$8 sps:$4 sm:$0xff]   ;;  %v9401_v57 = vld [vmem:[#allocation14 + $0x194] ss:$8 sps:$4 sm:$0xff]  }
 0x610   : > { %v5707_v58 = vpack.c.bf16 %v5595_v1, %v5591_v50  ;;  %v11266_v36 = vpack.c.bf16 %v5597_v20, %v5593_v41 }
 0x611   : > { %v5708_v13 = vpack.c.bf16 %v5596_v3, %v5592_v8  ;;  %v5051_v6 = vpop.f32.mrb[164].mxu0  ;;  %6359 = vmatpush1.bf16.msra.mxu0 %v9387_v14  ;;  %v11268_v39 = vpack.c.bf16 %v5598_v56, %v5594_v38  ;;  %v5244_v45 = vpop.f32.mrb[196].mxu1 }
 0x612   : > { %v5471_v10 = vadd.f32 %v11211_v5, %v5051_v6  ;;  %v5053_v35 = vpop.f32.mrb[165].mxu0  ;;  %6360 = vmatprep.subr.bf16.mxu0 %v9392_v34  ;;  %v5473_v48 = vadd.f32 %v11217_v30, %v5244_v45  ;;  %v5246_v46 = vpop.f32.mrb[197].mxu1 }
 0x613   : > { %v5472_v44 = vadd.f32 %v11214_v19, %v5053_v35  ;;  %v5055_v47 = vpop.f32.mrb[166].mxu0  ;;  %6217 = vmatprep.mubr.bf16.mxu0 %v5708_v13  ;;  %v5474_v51 = vadd.f32 %v11220_v4, %v5246_v46  ;;  %v5248_v62 = vpop.f32.mrb[198].mxu1 }
 0x614   : > { %v5475_v55 = vadd.f32 %v11211_v5, %v5055_v47  ;;  %v5057_v24 = vpop.f32.mrb[167].mxu0  ;;  %6218 = vmatmul.mubr.bf16.gmra.mrb[224].mxu0 %v5707_v58  ;;  %v5477_v18 = vadd.f32 %v11217_v30, %v5248_v62  ;;  %v5250_v25 = vpop.f32.mrb[199].mxu1  ;;  %v5599_v42 = vmax.f32 %v5471_v10, 0.0  ;;  %v5601_v33 = vmax.f32 %v5473_v48, 0.0  ;;  %v9399_v10 = vld [vmem:[#allocation14 + $0x190] ss:$8 sps:$4 sm:$0xff]  }
 0x615   : > { %v5476_v28 = vadd.f32 %v11214_v19, %v5057_v24  ;;  %6361 = vmatpush1.bf16.msra.mxu0 %v9390_v21  ;;  %v5478_v9 = vadd.f32 %v11220_v4, %v5250_v25  ;;  %v5600_v49 = vmax.f32 %v5472_v44, 0.0  ;;  %v5602_v22 = vmax.f32 %v5474_v51, 0.0  ;;  %v9404_v48 = vld [vmem:[#allocation14 + $0x1a4] ss:$8 sps:$4 sm:$0xff]  }
 0x616   : > { %v5603_v61 = vmax.f32 %v5475_v55, 0.0  ;;  %6362 = vmatprep.subr.bf16.mxu0 %v9395_v11  ;;  %v5605_v63 = vmax.f32 %v5477_v18, 0.0 }
 0x617   : > { %v5604_v43 = vmax.f32 %v5476_v28, 0.0  ;;  %v5606_v29 = vmax.f32 %v5478_v9, 0.0 }
 0x618   : > { %v5711_v31 = vpack.c.bf16 %v5603_v61, %v5599_v42  ;;  %v11278_v54 = vpack.c.bf16 %v5605_v63, %v5601_v33  ;;  %v9407_v33 = vld [vmem:[#allocation14 + $0x1b4] ss:$8 sps:$4 sm:$0xff]  }
 0x619   : > { %v5712_v27 = vpack.c.bf16 %v5604_v43, %v5600_v49  ;;  %v5061_v17 = vpop.f32.mrb[168].mxu0  ;;  %6363 = vmatpush1.bf16.msra.mxu0 %v9393_v52  ;;  %v11280_v37 = vpack.c.bf16 %v5606_v29, %v5602_v22  ;;  %v5254_v50 = vpop.f32.mrb[200].mxu1  ;;  %v9402_v52 = vld [vmem:[#allocation14 + $0x1a0] ss:$8 sps:$4 sm:$0xff]  }
 0x61a   : > { %v5479_v14 = vadd.f32 %v11211_v5, %v5061_v17  ;;  %v5063_v1 = vpop.f32.mrb[169].mxu0  ;;  %6364 = vmatprep.subr.bf16.mxu0 %v9398_v12  ;;  %v5481_v34 = vadd.f32 %v11217_v30, %v5254_v50  ;;  %v5256_v8 = vpop.f32.mrb[201].mxu1 }
 0x61b   : > { %v5480_v41 = vadd.f32 %v11214_v19, %v5063_v1  ;;  %v5065_v20 = vpop.f32.mrb[170].mxu0  ;;  %6227 = vmatprep.mubr.bf16.mxu0 %v5712_v27  ;;  %v5482_v3 = vadd.f32 %v11220_v4, %v5256_v8  ;;  %v5258_v58 = vpop.f32.mrb[202].mxu1  ;;  %v9405_v1 = vld [vmem:[#allocation14 + $0x1b0] ss:$8 sps:$4 sm:$0xff]   ;;  %v9410_v8 = vld [vmem:[#allocation14 + $0x1c4] ss:$8 sps:$4 sm:$0xff]  }
 0x61c   : > { %v5483_v38 = vadd.f32 %v11211_v5, %v5065_v20  ;;  %v5067_v56 = vpop.f32.mrb[171].mxu0  ;;  %6228 = vmatmul.mubr.bf16.gmra.mrb[228].mxu0 %v5711_v31  ;;  %v5485_v13 = vadd.f32 %v11217_v30, %v5258_v58  ;;  %v5260_v21 = vpop.f32.mrb[203].mxu1  ;;  %v5607_v45 = vmax.f32 %v5479_v14, 0.0  ;;  %v5609_v44 = vmax.f32 %v5481_v34, 0.0 }
 0x61d   : > { %v5484_v6 = vadd.f32 %v11214_v19, %v5067_v56  ;;  %6365 = vmatpush1.bf16.msra.mxu0 %v9396_v2  ;;  %v5486_v11 = vadd.f32 %v11220_v4, %v5260_v21  ;;  %v5608_v46 = vmax.f32 %v5480_v41, 0.0  ;;  %v5610_v55 = vmax.f32 %v5482_v3, 0.0 }
 0x61e   : > { %v5611_v35 = vmax.f32 %v5483_v38, 0.0  ;;  %6366 = vmatprep.subr.bf16.mxu0 %v9401_v57  ;;  %v5613_v47 = vmax.f32 %v5485_v13, 0.0 }
 0x61f   : > { %v5612_v51 = vmax.f32 %v5484_v6, 0.0  ;;  %v5614_v24 = vmax.f32 %v5486_v11, 0.0 }
 0x620   : > { %v5715_v62 = vpack.c.bf16 %v5611_v35, %v5607_v45  ;;  %v11290_v18 = vpack.c.bf16 %v5613_v47, %v5609_v44  ;;  %v9408_v35 = vld [vmem:[#allocation14 + $0x1c0] ss:$8 sps:$4 sm:$0xff]   ;;  %v9413_v47 = vld [vmem:[#allocation14 + $0x1d4] ss:$8 sps:$4 sm:$0xff]  }
 0x621   : > { %v5716_v28 = vpack.c.bf16 %v5612_v51, %v5608_v46  ;;  %v5071_v25 = vpop.f32.mrb[172].mxu0  ;;  %6367 = vmatpush1.bf16.msra.mxu0 %v9399_v10  ;;  %v11292_v42 = vpack.c.bf16 %v5614_v24, %v5610_v55  ;;  %v5264_v9 = vpop.f32.mrb[204].mxu1 }
 0x622   : > { %v5487_v61 = vadd.f32 %v11211_v5, %v5071_v25  ;;  %v5073_v12 = vpop.f32.mrb[173].mxu0  ;;  %6368 = vmatprep.subr.bf16.mxu0 %v9404_v48  ;;  %v5489_v49 = vadd.f32 %v11217_v30, %v5264_v9  ;;  %v5266_v43 = vpop.f32.mrb[205].mxu1 }
 0x623   : > { %v5488_v63 = vadd.f32 %v11214_v19, %v5073_v12  ;;  %v5075_v22 = vpop.f32.mrb[174].mxu0  ;;  %6237 = vmatprep.mubr.bf16.mxu0 %v5716_v28  ;;  %v5490_v31 = vadd.f32 %v11220_v4, %v5266_v43  ;;  %v5268_v27 = vpop.f32.mrb[206].mxu1 }
 0x624   : > { %v5491_v29 = vadd.f32 %v11211_v5, %v5075_v22  ;;  %v5077_v17 = vpop.f32.mrb[175].mxu0  ;;  %6238 = vmatmul.mubr.bf16.gmra.mrb[232].mxu0 %v5715_v62  ;;  %v5493_v2 = vadd.f32 %v11217_v30, %v5268_v27  ;;  %v5270_v50 = vpop.f32.mrb[207].mxu1  ;;  %v5615_v57 = vmax.f32 %v5487_v61, 0.0  ;;  %v5617_v20 = vmax.f32 %v5489_v49, 0.0  ;;  %v9411_v49 = vld [vmem:[#allocation14 + $0x1d0] ss:$8 sps:$4 sm:$0xff]  }
 0x625   : > { %v5492_v14 = vadd.f32 %v11214_v19, %v5077_v17  ;;  %6369 = vmatpush1.bf16.msra.mxu0 %v9402_v52  ;;  %v5494_v41 = vadd.f32 %v11220_v4, %v5270_v50  ;;  %v5616_v3 = vmax.f32 %v5488_v63, 0.0  ;;  %v5618_v56 = vmax.f32 %v5490_v31, 0.0  ;;  %v9416_v31 = vld [vmem:[#allocation14 + $0x1e4] ss:$8 sps:$4 sm:$0xff]  }
 0x626   : > { %v5619_v34 = vmax.f32 %v5491_v29, 0.0  ;;  %6370 = vmatprep.subr.bf16.mxu0 %v9407_v33  ;;  %v5621_v38 = vmax.f32 %v5493_v2, 0.0  ;;  %v11316_v2 = vrot.slane %v11208_v0, %v10676_v59  ;;  %v11320_v50 = vrot.slane %v11208_v0, %v12088_v32 }
 0x627   : > { %v5620_v58 = vmax.f32 %v5492_v14, 0.0  ;;  %v5622_v6 = vmax.f32 %v5494_v41, 0.0  ;;  %v9414_v41 = vld [vmem:[#allocation14 + $0x1e0] ss:$8 sps:$4 sm:$0xff]  }
 0x628   : > { %v5719_v13 = vpack.c.bf16 %v5619_v34, %v5615_v57  ;;  %v11302_v21 = vpack.c.bf16 %v5621_v38, %v5617_v20 }
 0x629   : > { %v5720_v10 = vpack.c.bf16 %v5620_v58, %v5616_v3  ;;  %v5081_v45 = vpop.f32.mrb[176].mxu0  ;;  %6371 = vmatpush1.bf16.msra.mxu0 %v9405_v1  ;;  %v11304_v11 = vpack.c.bf16 %v5622_v6, %v5618_v56  ;;  %v5274_v44 = vpop.f32.mrb[208].mxu1  ;;  %v9419_v56 = vld [vmem:[#allocation14 + $0x1f4] ss:$8 sps:$4 sm:$0xff]  }
 0x62a   : > { %v5495_v48 = vadd.f32 %v11211_v5, %v5081_v45  ;;  %v5083_v46 = vpop.f32.mrb[177].mxu0  ;;  %6372 = vmatprep.subr.bf16.mxu0 %v9410_v8  ;;  %v5497_v51 = vadd.f32 %v11217_v30, %v5274_v44  ;;  %v5276_v62 = vpop.f32.mrb[209].mxu1  ;;  %v11330_v8 = vrot.slane %v11208_v0, %v12089_v40 }
 0x62b   : > { %v5496_v55 = vadd.f32 %v11214_v19, %v5083_v46  ;;  %v5085_v24 = vpop.f32.mrb[178].mxu0  ;;  %6247 = vmatprep.mubr.bf16.mxu0 %v5720_v10  ;;  %v5498_v28 = vadd.f32 %v11220_v4, %v5276_v62  ;;  %v5278_v52 = vpop.f32.mrb[210].mxu1 }
 0x62c   : > { %v5499_v25 = vadd.f32 %v11211_v5, %v5085_v24  ;;  %v5087_v61 = vpop.f32.mrb[179].mxu0  ;;  %6248 = vmatmul.mubr.bf16.gmra.mrb[236].mxu0 %v5719_v13  ;;  %v5501_v9 = vadd.f32 %v11217_v30, %v5278_v52  ;;  %v5280_v33 = vpop.f32.mrb[211].mxu1  ;;  %v5623_v63 = vmax.f32 %v5495_v48, 0.0  ;;  %v5625_v29 = vmax.f32 %v5497_v51, 0.0 }
 0x62d   : > { %v5500_v12 = vadd.f32 %v11214_v19, %v5087_v61  ;;  %6373 = vmatpush1.bf16.msra.mxu0 %v9408_v35  ;;  %v5502_v22 = vadd.f32 %v11220_v4, %v5280_v33  ;;  %v5624_v27 = vmax.f32 %v5496_v55, 0.0  ;;  %v5626_v30 = vmax.f32 %v5498_v28, 0.0 }
 0x62e   : > { %v5627_v43 = vmax.f32 %v5499_v25, 0.0  ;;  %6374 = vmatprep.subr.bf16.mxu0 %v9413_v47  ;;  %v5629_v17 = vmax.f32 %v5501_v9, 0.0  ;;  %v11324_v4 = vrot.slane %v11208_v0, %v10679_v60  ;;  %v9417_v47 = vld [vmem:[#allocation14 + $0x1f0] ss:$8 sps:$4 sm:$0xff]  }
 0x62f   : > { %v5628_v5 = vmax.f32 %v5500_v12, 0.0  ;;  %v5630_v19 = vmax.f32 %v5502_v22, 0.0 }
 0x630   : > { %v5723_v14 = vpack.c.bf16 %v5627_v43, %v5623_v63  ;;  %v11326_v1 = vpack.c.bf16 %v5629_v17, %v5625_v29 }
 0x631   : > { %v5724_v57 = vpack.c.bf16 %v5628_v5, %v5624_v27  ;;  %v5091_v34 = vpop.f32.mrb[180].mxu0  ;;  %6375 = vmatpush1.bf16.msra.mxu0 %v9411_v49  ;;  %v11332_v20 = vpack.c.bf16 %v5630_v19, %v5626_v30  ;;  %v5284_v38 = vpop.f32.mrb[212].mxu1 }
 0x632   : > { %v5503_v3 = vadd.f32 %v11316_v2, %v5091_v34  ;;  %v5093_v58 = vpop.f32.mrb[181].mxu0  ;;  %6376 = vmatprep.subr.bf16.mxu0 %v9416_v31  ;;  %v5505_v60 = vadd.f32 %v11324_v4, %v5284_v38  ;;  %v5286_v6 = vpop.f32.mrb[213].mxu1 }
 0x633   : > { %v5504_v13 = vadd.f32 %v11320_v50, %v5093_v58  ;;  %v5095_v10 = vpop.f32.mrb[182].mxu0  ;;  %6257 = vmatprep.mubr.bf16.mxu0 %v5724_v57  ;;  %v5506_v45 = vadd.f32 %v11330_v8, %v5286_v6  ;;  %v5288_v0 = vpop.f32.mrb[214].mxu1 }
 0x634   : > { %v5507_v40 = vadd.f32 %v11316_v2, %v5095_v10  ;;  %v5097_v35 = vpop.f32.mrb[183].mxu0  ;;  %6258 = vmatmul.mubr.bf16.gmra.mrb[240].mxu0 %v5723_v14  ;;  %v5509_v48 = vadd.f32 %v11324_v4, %v5288_v0  ;;  %v5290_v46 = vpop.f32.mrb[215].mxu1  ;;  %v5631_v51 = vmax.f32 %v5503_v3, 0.0  ;;  %v5633_v24 = vmax.f32 %v5505_v60, 0.0 }
 0x635   : > { %v5508_v44 = vadd.f32 %v11320_v50, %v5097_v35  ;;  %6377 = vmatpush1.bf16.msra.mxu0 %v9414_v41  ;;  %v5510_v62 = vadd.f32 %v11330_v8, %v5290_v46  ;;  %v5632_v28 = vmax.f32 %v5504_v13, 0.0  ;;  %v5634_v61 = vmax.f32 %v5506_v45, 0.0 }
 0x636   : > { %v5635_v55 = vmax.f32 %v5507_v40, 0.0  ;;  %6378 = vmatprep.subr.bf16.mxu0 %v9419_v56  ;;  %v5637_v25 = vmax.f32 %v5509_v48, 0.0 }
 0x637   : > { %v5636_v52 = vmax.f32 %v5508_v44, 0.0  ;;  %v5638_v12 = vmax.f32 %v5510_v62, 0.0 }
 0x638   : > { %v5727_v9 = vpack.c.bf16 %v5635_v55, %v5631_v51  ;;  %v11342_v33 = vpack.c.bf16 %v5637_v25, %v5633_v24 }
 0x639   : > { %v5728_v49 = vpack.c.bf16 %v5636_v52, %v5632_v28  ;;  %v5101_v63 = vpop.f32.mrb[184].mxu0  ;;  %6379 = vmatpush1.bf16.msra.mxu0 %v9417_v47  ;;  %v11344_v43 = vpack.c.bf16 %v5638_v12, %v5634_v61  ;;  %v5294_v31 = vpop.f32.mrb[216].mxu1 }
 0x63a   : > { %v5511_v22 = vadd.f32 %v11316_v2, %v5101_v63  ;;  %v5103_v29 = vpop.f32.mrb[185].mxu0  ;;  %v5513_v27 = vadd.f32 %v11324_v4, %v5294_v31  ;;  %v5296_v5 = vpop.f32.mrb[217].mxu1 }
 0x63b   : > { %v5512_v17 = vadd.f32 %v11320_v50, %v5103_v29  ;;  %v5105_v30 = vpop.f32.mrb[186].mxu0  ;;  %6267 = vmatprep.mubr.bf16.mxu0 %v5728_v49  ;;  %v5514_v14 = vadd.f32 %v11330_v8, %v5296_v5  ;;  %v5298_v57 = vpop.f32.mrb[218].mxu1 }
 0x63c   : > { %v5515_v19 = vadd.f32 %v11316_v2, %v5105_v30  ;;  %v5107_v34 = vpop.f32.mrb[187].mxu0  ;;  %6268 = vmatmul.mubr.bf16.gmra.mrb[244].mxu0 %v5727_v9  ;;  %v5517_v41 = vadd.f32 %v11324_v4, %v5298_v57  ;;  %v5300_v38 = vpop.f32.mrb[219].mxu1  ;;  %v5639_v58 = vmax.f32 %v5511_v22, 0.0  ;;  %v5641_v13 = vmax.f32 %v5513_v27, 0.0 }
 0x63d   : > { %v5516_v3 = vadd.f32 %v11320_v50, %v5107_v34  ;;  %v5518_v60 = vadd.f32 %v11330_v8, %v5300_v38  ;;  %v5640_v6 = vmax.f32 %v5512_v17, 0.0  ;;  %v5642_v40 = vmax.f32 %v5514_v14, 0.0 }
 0x63e   : > { %v5643_v56 = vmax.f32 %v5515_v19, 0.0  ;;  %v5645_v10 = vmax.f32 %v5517_v41, 0.0 }
 0x63f   : > { %v5644_v45 = vmax.f32 %v5516_v3, 0.0  ;;  %v5646_v35 = vmax.f32 %v5518_v60, 0.0 }
 0x640   : > { %v5731_v0 = vpack.c.bf16 %v5643_v56, %v5639_v58  ;;  %v11354_v48 = vpack.c.bf16 %v5645_v10, %v5641_v13 }
 0x641   : > { %v5732_v44 = vpack.c.bf16 %v5644_v45, %v5640_v6  ;;  %v5111_v46 = vpop.f32.mrb[188].mxu0  ;;  %v11356_v47 = vpack.c.bf16 %v5646_v35, %v5642_v40  ;;  %v5304_v55 = vpop.f32.mrb[220].mxu1 }
 0x642   : > { %v5519_v51 = vadd.f32 %v11316_v2, %v5111_v46  ;;  %v5113_v62 = vpop.f32.mrb[189].mxu0  ;;  %v5521_v24 = vadd.f32 %v11324_v4, %v5304_v55  ;;  %v5306_v25 = vpop.f32.mrb[221].mxu1 }
 0x643   : > { %v5520_v28 = vadd.f32 %v11320_v50, %v5113_v62  ;;  %v5115_v52 = vpop.f32.mrb[190].mxu0  ;;  %6277 = vmatprep.mubr.bf16.mxu0 %v5732_v44  ;;  %v5522_v61 = vadd.f32 %v11330_v8, %v5306_v25  ;;  %v5308_v12 = vpop.f32.mrb[222].mxu1 }
 0x644   : > { %v5523_v9 = vadd.f32 %v11316_v2, %v5115_v52  ;;  %v5117_v49 = vpop.f32.mrb[191].mxu0  ;;  %6278 = vmatmul.mubr.bf16.gmra.mrb[248].mxu0 %v5731_v0  ;;  %v5525_v63 = vadd.f32 %v11324_v4, %v5308_v12  ;;  %v5310_v31 = vpop.f32.mrb[223].mxu1  ;;  %v5647_v29 = vmax.f32 %v5519_v51, 0.0  ;;  %v5649_v5 = vmax.f32 %v5521_v24, 0.0 }
 0x645   : > { %v5524_v22 = vadd.f32 %v11320_v50, %v5117_v49  ;;  %v5526_v17 = vadd.f32 %v11330_v8, %v5310_v31  ;;  %v5648_v30 = vmax.f32 %v5520_v28, 0.0  ;;  %v5650_v57 = vmax.f32 %v5522_v61, 0.0 }
 0x646   : > { %v5651_v27 = vmax.f32 %v5523_v9, 0.0  ;;  %v5653_v14 = vmax.f32 %v5525_v63, 0.0 }
 0x647   : > { %v5652_v19 = vmax.f32 %v5524_v22, 0.0  ;;  %v5654_v41 = vmax.f32 %v5526_v17, 0.0 }
 0x648   : > { %v5735_v34 = vpack.c.bf16 %v5651_v27, %v5647_v29  ;;  %v11366_v3 = vpack.c.bf16 %v5653_v14, %v5649_v5 }
 0x649   : > { %v5736_v38 = vpack.c.bf16 %v5652_v19, %v5648_v30  ;;  %v5121_v58 = vpop.f32.mrb[192].mxu0  ;;  %v11368_v56 = vpack.c.bf16 %v5654_v41, %v5650_v57  ;;  %v5314_v13 = vpop.f32.mrb[224].mxu1 }
 0x64a   : > { %v5527_v60 = vadd.f32 %v11316_v2, %v5121_v58  ;;  %v5123_v6 = vpop.f32.mrb[193].mxu0  ;;  %v5529_v10 = vadd.f32 %v11324_v4, %v5314_v13  ;;  %v5316_v40 = vpop.f32.mrb[225].mxu1 }
 0x64b   : > { %v5528_v45 = vadd.f32 %v11320_v50, %v5123_v6  ;;  %v5125_v0 = vpop.f32.mrb[194].mxu0  ;;  %6287 = vmatprep.mubr.bf16.mxu0 %v5736_v38  ;;  %v5530_v35 = vadd.f32 %v11330_v8, %v5316_v40  ;;  %v5318_v46 = vpop.f32.mrb[226].mxu1 }
 0x64c   : > { %v5531_v44 = vadd.f32 %v11316_v2, %v5125_v0  ;;  %v5127_v51 = vpop.f32.mrb[195].mxu0  ;;  %6288 = vmatmul.mubr.bf16.gmra.mrb[252].mxu0 %v5735_v34  ;;  %v5533_v55 = vadd.f32 %v11324_v4, %v5318_v46  ;;  %v5320_v24 = vpop.f32.mrb[227].mxu1  ;;  %v5655_v28 = vmax.f32 %v5527_v60, 0.0  ;;  %v5657_v61 = vmax.f32 %v5529_v10, 0.0  ;;  %v9420_v0 = vld [vmem:[%s12026_s12 + $0x40] sm:$0xff]  }
 0x64d   : > { %v5532_v62 = vadd.f32 %v11320_v50, %v5127_v51  ;;  %v5534_v52 = vadd.f32 %v11330_v8, %v5320_v24  ;;  %v5656_v9 = vmax.f32 %v5528_v45, 0.0  ;;  %v5658_v63 = vmax.f32 %v5530_v35, 0.0  ;;  %v9421_v35 = vld [vmem:[%s12026_s12] sm:$0xff]   ;;  %8326 = vmatprep.subr.bf16.mxu1 %v9420_v0 }
 0x64e   : > { %v5659_v25 = vmax.f32 %v5531_v44, 0.0  ;;  %v5661_v12 = vmax.f32 %v5533_v55, 0.0  ;;  %8327 = vmatpush3.bf16.msra.mxu1 %v9421_v35 }
 0x64f   : > { %v5660_v49 = vmax.f32 %v5532_v62, 0.0  ;;  %v5662_v31 = vmax.f32 %v5534_v52, 0.0 }
 0x650   : > { %v5739_v22 = vpack.c.bf16 %v5659_v25, %v5655_v28  ;;  %v11378_v29 = vpack.c.bf16 %v5661_v12, %v5657_v61 }
 0x651   : > { %v5740_v27 = vpack.c.bf16 %v5660_v49, %v5656_v9  ;;  %v5131_v17 = vpop.f32.mrb[196].mxu0  ;;  %v11380_v5 = vpack.c.bf16 %v5662_v31, %v5658_v63  ;;  %v5324_v14 = vpop.f32.mrb[228].mxu1 }
 0x652   : > { %v5535_v30 = vadd.f32 %v11316_v2, %v5131_v17  ;;  %v5133_v19 = vpop.f32.mrb[197].mxu0  ;;  %v5537_v57 = vadd.f32 %v11324_v4, %v5324_v14  ;;  %v5326_v41 = vpop.f32.mrb[229].mxu1 }
 0x653   : > { %v5536_v34 = vadd.f32 %v11320_v50, %v5133_v19  ;;  %v5135_v38 = vpop.f32.mrb[198].mxu0  ;;  %6297 = vmatprep.mubr.bf16.mxu0 %v5740_v27  ;;  %v5538_v58 = vadd.f32 %v11330_v8, %v5326_v41  ;;  %v5328_v13 = vpop.f32.mrb[230].mxu1 }
 0x654   : > { %v5539_v60 = vadd.f32 %v11316_v2, %v5135_v38  ;;  %v5137_v6 = vpop.f32.mrb[199].mxu0  ;;  %6298 = vmatmul.mubr.bf16.gmra.mrb[0].mxu0 %v5739_v22  ;;  %v5541_v10 = vadd.f32 %v11324_v4, %v5328_v13  ;;  %v5330_v40 = vpop.f32.mrb[231].mxu1  ;;  %v5663_v44 = vmax.f32 %v5535_v30, 0.0  ;;  %v5665_v55 = vmax.f32 %v5537_v57, 0.0 }
 0x655   : > { %v5540_v45 = vadd.f32 %v11320_v50, %v5137_v6  ;;  %v5542_v51 = vadd.f32 %v11330_v8, %v5330_v40  ;;  %v5664_v62 = vmax.f32 %v5536_v34, 0.0  ;;  %v5666_v25 = vmax.f32 %v5538_v58, 0.0 }
 0x656   : > { %v5667_v46 = vmax.f32 %v5539_v60, 0.0  ;;  %v5669_v24 = vmax.f32 %v5541_v10, 0.0 }
 0x657   : > { %v5668_v28 = vmax.f32 %v5540_v45, 0.0  ;;  %v5670_v61 = vmax.f32 %v5542_v51, 0.0 }
 0x658   : > { %v5743_v52 = vpack.c.bf16 %v5667_v46, %v5663_v44  ;;  %v11396_v9 = vpack.c.bf16 %v5669_v24, %v5665_v55 }
 0x659   : > { %v5744_v12 = vpack.c.bf16 %v5668_v28, %v5664_v62  ;;  %v5141_v49 = vpop.f32.mrb[200].mxu0  ;;  %v11398_v63 = vpack.c.bf16 %v5670_v61, %v5666_v25  ;;  %v5334_v31 = vpop.f32.mrb[232].mxu1 }
 0x65a   : > { %v5543_v22 = vadd.f32 %v11316_v2, %v5141_v49  ;;  %v5143_v27 = vpop.f32.mrb[201].mxu0  ;;  %v5545_v17 = vadd.f32 %v11324_v4, %v5334_v31  ;;  %v5336_v14 = vpop.f32.mrb[233].mxu1 }
 0x65b   : > { %v5544_v30 = vadd.f32 %v11320_v50, %v5143_v27  ;;  %v5145_v19 = vpop.f32.mrb[202].mxu0  ;;  %6307 = vmatprep.mubr.bf16.mxu0 %v5744_v12  ;;  %v5546_v57 = vadd.f32 %v11330_v8, %v5336_v14  ;;  %v5338_v41 = vpop.f32.mrb[234].mxu1 }
 0x65c   : > { %v5547_v34 = vadd.f32 %v11316_v2, %v5145_v19  ;;  %v5147_v38 = vpop.f32.mrb[203].mxu0  ;;  %6308 = vmatmul.mubr.bf16.gmra.mrb[4].mxu0 %v5743_v52  ;;  %v5549_v58 = vadd.f32 %v11324_v4, %v5338_v41  ;;  %v5340_v13 = vpop.f32.mrb[235].mxu1  ;;  %v5671_v6 = vmax.f32 %v5543_v22, 0.0  ;;  %v5673_v40 = vmax.f32 %v5545_v17, 0.0 }
 0x65d   : > { %v5548_v60 = vadd.f32 %v11320_v50, %v5147_v38  ;;  %v5550_v45 = vadd.f32 %v11330_v8, %v5340_v13  ;;  %v5672_v0 = vmax.f32 %v5544_v30, 0.0  ;;  %v5674_v46 = vmax.f32 %v5546_v57, 0.0  ;;  %v9422_v38 = vld [vmem:[%s12026_s12 + $0x48] sm:$0xff]  }
 0x65e   : > { %v5675_v10 = vmax.f32 %v5547_v34, 0.0  ;;  %v5677_v35 = vmax.f32 %v5549_v58, 0.0  ;;  %v9423_v58 = vld [vmem:[%s12026_s12 + $0x8] sm:$0xff]   ;;  %8328 = vmatprep.subr.bf16.mxu1 %v9422_v38 }
 0x65f   : > { %v5676_v44 = vmax.f32 %v5548_v60, 0.0  ;;  %v5678_v55 = vmax.f32 %v5550_v45, 0.0  ;;  %8329 = vmatpush3.bf16.msra.mxu1 %v9423_v58 }
 0x660   : > { %v5747_v51 = vpack.c.bf16 %v5675_v10, %v5671_v6  ;;  %v11408_v62 = vpack.c.bf16 %v5677_v35, %v5673_v40 }
 0x661   : > { %v5748_v24 = vpack.c.bf16 %v5676_v44, %v5672_v0  ;;  %v5151_v28 = vpop.f32.mrb[204].mxu0  ;;  %v11410_v25 = vpack.c.bf16 %v5678_v55, %v5674_v46  ;;  %v5344_v61 = vpop.f32.mrb[236].mxu1 }
 0x662   : > { %v5551_v52 = vadd.f32 %v11316_v2, %v5151_v28  ;;  %v5153_v12 = vpop.f32.mrb[205].mxu0  ;;  %v5553_v49 = vadd.f32 %v11324_v4, %v5344_v61  ;;  %v5346_v31 = vpop.f32.mrb[237].mxu1 }
 0x663   : > { %v5552_v22 = vadd.f32 %v11320_v50, %v5153_v12  ;;  %v5155_v27 = vpop.f32.mrb[206].mxu0  ;;  %6317 = vmatprep.mubr.bf16.mxu0 %v5748_v24  ;;  %v5554_v17 = vadd.f32 %v11330_v8, %v5346_v31  ;;  %v5348_v14 = vpop.f32.mrb[238].mxu1 }
 0x664   : > { %v5555_v30 = vadd.f32 %v11316_v2, %v5155_v27  ;;  %v5157_v19 = vpop.f32.mrb[207].mxu0  ;;  %6318 = vmatmul.mubr.bf16.gmra.mrb[8].mxu0 %v5747_v51  ;;  %v5557_v57 = vadd.f32 %v11324_v4, %v5348_v14  ;;  %v5350_v41 = vpop.f32.mrb[239].mxu1  ;;  %v5679_v60 = vmax.f32 %v5551_v52, 0.0  ;;  %v5681_v10 = vmax.f32 %v5553_v49, 0.0 }
 0x665   : > { %v5556_v34 = vadd.f32 %v11320_v50, %v5157_v19  ;;  %v5558_v6 = vadd.f32 %v11330_v8, %v5350_v41  ;;  %v5680_v45 = vmax.f32 %v5552_v22, 0.0  ;;  %v5682_v35 = vmax.f32 %v5554_v17, 0.0 }
 0x666   : > { %v5683_v13 = vmax.f32 %v5555_v30, 0.0  ;;  %v5685_v40 = vmax.f32 %v5557_v57, 0.0 }
 0x667   : > { %v5684_v0 = vmax.f32 %v5556_v34, 0.0  ;;  %v5686_v46 = vmax.f32 %v5558_v6, 0.0 }
 0x668   : > { %v5751_v44 = vpack.c.bf16 %v5683_v13, %v5679_v60  ;;  %v11426_v51 = vpack.c.bf16 %v5685_v40, %v5681_v10 }
 0x669   : > { %v5752_v55 = vpack.c.bf16 %v5684_v0, %v5680_v45  ;;  %v5161_v24 = vpop.f32.mrb[208].mxu0  ;;  %v11428_v28 = vpack.c.bf16 %v5686_v46, %v5682_v35  ;;  %v5354_v61 = vpop.f32.mrb[240].mxu1 }
 0x66a   : > { %v5559_v52 = vadd.f32 %v11316_v2, %v5161_v24  ;;  %v5163_v12 = vpop.f32.mrb[209].mxu0  ;;  %v5561_v49 = vadd.f32 %v11324_v4, %v5354_v61  ;;  %v5356_v31 = vpop.f32.mrb[241].mxu1  ;;  %v9428_v24 = vld [vmem:[%s12026_s12 + $0x60] sm:$0xff]   ;;  %v9431_v61 = vld [vmem:[%s12026_s12 + $0x28] sm:$0xff]  }
 0x66b   : > { %v5560_v22 = vadd.f32 %v11320_v50, %v5163_v12  ;;  %v5165_v27 = vpop.f32.mrb[210].mxu0  ;;  %6327 = vmatprep.mubr.bf16.mxu0 %v5752_v55  ;;  %v5562_v17 = vadd.f32 %v11330_v8, %v5356_v31  ;;  %v5358_v14 = vpop.f32.mrb[242].mxu1  ;;  %v9432_v12 = vld [vmem:[%s12026_s12 + $0x70] sm:$0xff]  }
 0x66c   : > { %v5563_v30 = vadd.f32 %v11316_v2, %v5165_v27  ;;  %v5167_v19 = vpop.f32.mrb[211].mxu0  ;;  %6328 = vmatmul.mubr.bf16.gmra.mrb[12].mxu0 %v5751_v44  ;;  %v5565_v57 = vadd.f32 %v11324_v4, %v5358_v14  ;;  %v5360_v41 = vpop.f32.mrb[243].mxu1  ;;  %v5687_v38 = vmax.f32 %v5559_v52, 0.0  ;;  %v5689_v13 = vmax.f32 %v5561_v49, 0.0  ;;  %v9425_v4 = vld [vmem:[%s12026_s12 + $0x10] sm:$0xff]   ;;  %v9427_v44 = vld [vmem:[%s12026_s12 + $0x18] sm:$0xff]  }
 0x66d   : > { %v5564_v34 = vadd.f32 %v11320_v50, %v5167_v19  ;;  %v5566_v60 = vadd.f32 %v11330_v8, %v5360_v41  ;;  %v5688_v6 = vmax.f32 %v5560_v22, 0.0  ;;  %v5690_v40 = vmax.f32 %v5562_v17, 0.0  ;;  %v9424_v50 = vld [vmem:[%s12026_s12 + $0x50] sm:$0xff]   ;;  %v9426_v8 = vld [vmem:[%s12026_s12 + $0x58] sm:$0xff]   ;;  %v9429_v52 = vld [vmem:[%s12026_s12 + $0x20] sm:$0xff]  }
 0x66e   : > { %v5691_v58 = vmax.f32 %v5563_v30, 0.0  ;;  %v5693_v10 = vmax.f32 %v5565_v57, 0.0  ;;  %8330 = vmatprep.subr.bf16.mxu1 %v9424_v50  ;;  %v9435_v49 = vld [vmem:[%s12026_s12 + $0x38] sm:$0xff]   ;;  %v9438_v22 = vld [vmem:[%s12028_s14 + $0x10] sm:$0xff]  }
 0x66f   : > { %v5692_v45 = vmax.f32 %v5564_v34, 0.0  ;;  %v5694_v35 = vmax.f32 %v5566_v60, 0.0  ;;  %8331 = vmatpush3.bf16.msra.mxu1 %v9425_v4  ;;  %v9439_v34 = vld [vmem:[%s12028_s14 + $0x18] sm:$0xff]  }
 0x670   : > { %v5755_v0 = vpack.c.bf16 %v5691_v58, %v5687_v38  ;;  %v5757_v2 = vpack.c.bf16 %v5693_v10, %v5689_v13  ;;  %8332 = vmatprep.subr.bf16.mxu1 %v9426_v8 }
 0x671   : > { %v5756_v46 = vpack.c.bf16 %v5692_v45, %v5688_v6  ;;  %v5758_v55 = vpack.c.bf16 %v5694_v35, %v5690_v40 }
 0x673   : > { %6337 = vmatprep.mubr.bf16.mxu0 %v5756_v46  ;;  %8333 = vmatpush3.bf16.msra.mxu1 %v9427_v44 }
 0x674   : > { %6338 = vmatmul.mubr.bf16.gmra.mrb[16].mxu0 %v5755_v0  ;;  %8334 = vmatprep.subr.bf16.mxu1 %v9428_v24 }
 0x675   : > { %6380 = vmatprep.mubr.bf16.mxu0 %v11232_v26  ;;  %v9430_v26 = vld [vmem:[%s12026_s12 + $0x68] sm:$0xff]  }
 0x677   : > { %8335 = vmatpush3.bf16.msra.mxu1 %v9429_v52 }
 0x678   : > { %8336 = vmatprep.subr.bf16.mxu1 %v9430_v26 }
 0x67b   : > { %8337 = vmatpush3.bf16.msra.mxu1 %v9431_v61 }
 0x67c   : > { %6381 = vmatmul.mubr.bf16.vlgmr.msra.gmra.mrb[212].mxu0 %v11230_v7  ;;  %v9433_v7 = vld [vmem:[%s12026_s12 + $0x30] sm:$0xff]   ;;  %8338 = vmatprep.subr.bf16.mxu1 %v9432_v12 }
 0x67d   : > { %6390 = vmatprep.mubr.bf16.mxu0 %v11244_v16  ;;  %v9434_v16 = vld [vmem:[%s12026_s12 + $0x78] sm:$0xff]  }
 0x67f   : > { %8339 = vmatpush3.bf16.msra.mxu1 %v9433_v7 }
 0x680   : > { %8340 = vmatprep.subr.bf16.mxu1 %v9434_v16 }
 0x683   : > { %8341 = vmatpush3.bf16.msra.mxu1 %v9435_v49 }
 0x684   : > { %6391 = vmatmul.mubr.bf16.gmra.mrb[216].mxu0 %v11242_v23  ;;  %v5823_v23 = vld [vmem:[#allocation16] sm:$0x3] }
 0x685   : > { %6400 = vmatprep.mubr.bf16.mxu0 %v11256_v15  ;;  %v11508_v15 = vrot.slane %v5823_v23, %v12088_v32 }
 0x68c   : > { %6401 = vmatmul.mubr.bf16.gmra.mrb[220].mxu0 %v11254_v53  ;;  %v11505_v53 = vrot.slane %v5823_v23, %v10676_v59 }
 0x68d   : > { %6410 = vmatprep.mubr.bf16.mxu0 %v11268_v39 }
 0x694   : > { %6411 = vmatmul.mubr.bf16.gmra.mrb[224].mxu0 %v11266_v36 }
 0x695   : > { %6420 = vmatprep.mubr.bf16.mxu0 %v11280_v37 }
 0x69c   : > { %6421 = vmatmul.mubr.bf16.gmra.mrb[228].mxu0 %v11278_v54 }
 0x69d   : > { %6430 = vmatprep.mubr.bf16.mxu0 %v11292_v42 }
 0x6a4   : > { %6431 = vmatmul.mubr.bf16.gmra.mrb[232].mxu0 %v11290_v18 }
 0x6a5   : > { %6440 = vmatprep.mubr.bf16.mxu0 %v11304_v11  ;;  %v9436_v11 = vld [vmem:[%s12028_s14] sm:$0xff]  }
 0x6a6   : > { %8536 = vmatprep.subr.bf16.mxu1 %v9436_v11 }
 0x6ac   : > { %6441 = vmatmul.mubr.bf16.gmra.mrb[236].mxu0 %v11302_v21 }
 0x6ad   : > { %6450 = vmatprep.mubr.bf16.mxu0 %v11332_v20 }
 0x6b4   : > { %6451 = vmatmul.mubr.bf16.gmra.mrb[240].mxu0 %v11326_v1 }
 0x6b5   : > { %6460 = vmatprep.mubr.bf16.mxu0 %v11344_v43 }
 0x6bc   : > { %6461 = vmatmul.mubr.bf16.gmra.mrb[244].mxu0 %v11342_v33 }
 0x6bd   : > { %6470 = vmatprep.mubr.bf16.mxu0 %v11356_v47 }
 0x6c4   : > { %6471 = vmatmul.mubr.bf16.gmra.mrb[248].mxu0 %v11354_v48 }
 0x6c5   : > { %6480 = vmatprep.mubr.bf16.mxu0 %v11368_v56 }
 0x6cc   : > { %6481 = vmatmul.mubr.bf16.gmra.mrb[252].mxu0 %v11366_v3 }
 0x6cd   : > { %6490 = vmatprep.mubr.bf16.mxu0 %v11380_v5 }
 0x6d4   : > { %6491 = vmatmul.mubr.bf16.gmra.mrb[0].mxu0 %v11378_v29  ;;  %v9437_v29 = vld [vmem:[%s12028_s14 + $0x8] sm:$0xff]  }
 0x6d5   : > { %6500 = vmatprep.mubr.bf16.mxu0 %v11398_v63 }
 0x6dc   : > { %6501 = vmatmul.mubr.bf16.gmra.mrb[4].mxu0 %v11396_v9 }
 0x6dd   : > { %6510 = vmatprep.mubr.bf16.mxu0 %v11410_v25 }
 0x6e4   : > { %6511 = vmatmul.mubr.bf16.gmra.mrb[8].mxu0 %v11408_v62 }
 0x6e5   : > { %6520 = vmatprep.mubr.bf16.mxu0 %v11428_v28 }
 0x6ec   : > { %6521 = vmatmul.mubr.bf16.gmra.mrb[12].mxu0 %v11426_v51 }
 0x6ed   : > { %6530 = vmatprep.mubr.bf16.mxu0 %v5758_v55 }
 0x6f4   : > { %6531 = vmatmul.mubr.bf16.gmra.mrb[16].mxu0 %v5757_v2 }
 0x74f   : > { %v6382_v36 = vpop.f32.mrb[212].mxu0 }
 0x750   : > { %v8590_v39 = vadd.f32 %v6382_v36, %v11505_v53  ;;  %v6384_v54 = vpop.f32.mrb[213].mxu0 }
 0x751   : > { %v8591_v37 = vadd.f32 %v6384_v54, %v11508_v15  ;;  %v6386_v18 = vpop.f32.mrb[214].mxu0 }
 0x752   : > { %v8592_v42 = vadd.f32 %v6386_v18, %v11505_v53  ;;  %v6388_v21 = vpop.f32.mrb[215].mxu0  ;;  %v6541_v1 = vmax.f32 %v8590_v39, 0.0 }
 0x753   : > { %v8593_v59 = vadd.f32 %v6388_v21, %v11508_v15  ;;  %v6542_v32 = vmax.f32 %v8591_v37, 0.0 }
 0x754   : > { %v6543_v20 = vmax.f32 %v8592_v42, 0.0 }
 0x755   : > { %v6544_v33 = vmax.f32 %v8593_v59, 0.0 }
 0x756   : > { %v6605_v43 = vpack.c.bf16 %v6543_v20, %v6541_v1 }
 0x757   : > { %v6606_v48 = vpack.c.bf16 %v6544_v33, %v6542_v32  ;;  %v6392_v47 = vpop.f32.mrb[216].mxu0 }
 0x758   : > { %v8594_v3 = vadd.f32 %v6392_v47, %v11505_v53  ;;  %v6394_v56 = vpop.f32.mrb[217].mxu0 }
 0x759   : > { %v8595_v5 = vadd.f32 %v6394_v56, %v11508_v15  ;;  %v6396_v9 = vpop.f32.mrb[218].mxu0  ;;  %6804 = vmatprep.mubr.bf16.mxu1 %v6606_v48 }
 0x75a   : > { %v8596_v63 = vadd.f32 %v6396_v9, %v11505_v53  ;;  %v6398_v62 = vpop.f32.mrb[219].mxu0  ;;  %6805 = vmatmul.mubr.bf16.vlgmr.msra.gmra.mrb[244].mxu1 %v6605_v43  ;;  %v6545_v51 = vmax.f32 %v8594_v3, 0.0 }
 0x75b   : > { %v8597_v25 = vadd.f32 %v6398_v62, %v11508_v15  ;;  %8537 = vmatpush3.bf16.msra.mxu1 %v9436_v11  ;;  %v6546_v31 = vmax.f32 %v8595_v5, 0.0 }
 0x75c   : > { %v6547_v28 = vmax.f32 %v8596_v63, 0.0  ;;  %8538 = vmatprep.subr.bf16.mxu1 %v9437_v29 }
 0x75d   : > { %v6548_v27 = vmax.f32 %v8597_v25, 0.0 }
 0x75e   : > { %v6607_v17 = vpack.c.bf16 %v6547_v28, %v6545_v51 }
 0x75f   : > { %v6608_v30 = vpack.c.bf16 %v6548_v27, %v6546_v31  ;;  %v6402_v14 = vpop.f32.mrb[220].mxu0  ;;  %8539 = vmatpush3.bf16.msra.mxu1 %v9437_v29 }
 0x760   : > { %v8598_v19 = vadd.f32 %v6402_v14, %v11505_v53  ;;  %v6404_v57 = vpop.f32.mrb[221].mxu0  ;;  %8540 = vmatprep.subr.bf16.mxu1 %v9438_v22 }
 0x761   : > { %v8599_v41 = vadd.f32 %v6404_v57, %v11508_v15  ;;  %v6406_v38 = vpop.f32.mrb[222].mxu0  ;;  %6812 = vmatprep.mubr.bf16.mxu1 %v6608_v30 }
 0x762   : > { %v8600_v58 = vadd.f32 %v6406_v38, %v11505_v53  ;;  %v6408_v60 = vpop.f32.mrb[223].mxu0  ;;  %6813 = vmatmul.mubr.bf16.gmra.mrb[248].mxu1 %v6607_v17  ;;  %v6549_v6 = vmax.f32 %v8598_v19, 0.0 }
 0x763   : > { %v8601_v13 = vadd.f32 %v6408_v60, %v11508_v15  ;;  %8541 = vmatpush3.bf16.msra.mxu1 %v9438_v22  ;;  %v6550_v45 = vmax.f32 %v8599_v41, 0.0 }
 0x764   : > { %v6551_v10 = vmax.f32 %v8600_v58, 0.0  ;;  %8542 = vmatprep.subr.bf16.mxu1 %v9439_v34 }
 0x765   : > { %v6552_v40 = vmax.f32 %v8601_v13, 0.0 }
 0x766   : > { %v6609_v0 = vpack.c.bf16 %v6551_v10, %v6549_v6 }
 0x767   : > { %v6610_v35 = vpack.c.bf16 %v6552_v40, %v6550_v45  ;;  %v6412_v2 = vpop.f32.mrb[224].mxu0  ;;  %8543 = vmatpush3.bf16.msra.mxu1 %v9439_v34 }
 0x768   : > { %v8602_v46 = vadd.f32 %v6412_v2, %v11505_v53  ;;  %v6414_v55 = vpop.f32.mrb[225].mxu0 }
 0x769   : > { %v8603_v50 = vadd.f32 %v6414_v55, %v11508_v15  ;;  %v6416_v4 = vpop.f32.mrb[226].mxu0  ;;  %6820 = vmatprep.mubr.bf16.mxu1 %v6610_v35 }
 0x76a   : > { %v8604_v8 = vadd.f32 %v6416_v4, %v11505_v53  ;;  %v6418_v44 = vpop.f32.mrb[227].mxu0  ;;  %6821 = vmatmul.mubr.bf16.gmra.mrb[252].mxu1 %v6609_v0  ;;  %v6553_v52 = vmax.f32 %v8602_v46, 0.0 }
 0x76b   : > { %v8605_v24 = vadd.f32 %v6418_v44, %v11508_v15  ;;  %v6554_v61 = vmax.f32 %v8603_v50, 0.0 }
 0x76c   : > { %v6555_v26 = vmax.f32 %v8604_v8, 0.0 }
 0x76d   : > { %v6556_v12 = vmax.f32 %v8605_v24, 0.0 }
 0x76e   : > { %v6611_v7 = vpack.c.bf16 %v6555_v26, %v6553_v52 }
 0x76f   : > { %v6612_v16 = vpack.c.bf16 %v6556_v12, %v6554_v61  ;;  %v6422_v49 = vpop.f32.mrb[228].mxu0 }
 0x770   : > { %v8606_v23 = vadd.f32 %v6422_v49, %v11505_v53  ;;  %v6424_v36 = vpop.f32.mrb[229].mxu0 }
 0x771   : > { %v8607_v39 = vadd.f32 %v6424_v36, %v11508_v15  ;;  %v6426_v54 = vpop.f32.mrb[230].mxu0  ;;  %6828 = vmatprep.mubr.bf16.mxu1 %v6612_v16 }
 0x772   : > { %v8608_v37 = vadd.f32 %v6426_v54, %v11505_v53  ;;  %v6428_v18 = vpop.f32.mrb[231].mxu0  ;;  %6829 = vmatmul.mubr.bf16.gmra.mrb[0].mxu1 %v6611_v7  ;;  %v6557_v21 = vmax.f32 %v8606_v23, 0.0 }
 0x773   : > { %v8609_v42 = vadd.f32 %v6428_v18, %v11508_v15  ;;  %v6558_v59 = vmax.f32 %v8607_v39, 0.0 }
 0x774   : > { %v6559_v11 = vmax.f32 %v8608_v37, 0.0 }
 0x775   : > { %v6560_v1 = vmax.f32 %v8609_v42, 0.0 }
 0x776   : > { %v6613_v20 = vpack.c.bf16 %v6559_v11, %v6557_v21 }
 0x777   : > { %v6614_v32 = vpack.c.bf16 %v6560_v1, %v6558_v59  ;;  %v6432_v33 = vpop.f32.mrb[232].mxu0 }
 0x778   : > { %v8610_v43 = vadd.f32 %v6432_v33, %v11505_v53  ;;  %v6434_v48 = vpop.f32.mrb[233].mxu0 }
 0x779   : > { %v8611_v47 = vadd.f32 %v6434_v48, %v11508_v15  ;;  %v6436_v3 = vpop.f32.mrb[234].mxu0  ;;  %6836 = vmatprep.mubr.bf16.mxu1 %v6614_v32 }
 0x77a   : > { %v8612_v56 = vadd.f32 %v6436_v3, %v11505_v53  ;;  %v6438_v29 = vpop.f32.mrb[235].mxu0  ;;  %6837 = vmatmul.mubr.bf16.gmra.mrb[4].mxu1 %v6613_v20  ;;  %v6561_v9 = vmax.f32 %v8610_v43, 0.0 }
 0x77b   : > { %v8613_v5 = vadd.f32 %v6438_v29, %v11508_v15  ;;  %v6562_v62 = vmax.f32 %v8611_v47, 0.0 }
 0x77c   : > { %v6563_v63 = vmax.f32 %v8612_v56, 0.0 }
 0x77d   : > { %v6564_v25 = vmax.f32 %v8613_v5, 0.0 }
 0x77e   : > { %v6615_v51 = vpack.c.bf16 %v6563_v63, %v6561_v9 }
 0x77f   : > { %v6616_v28 = vpack.c.bf16 %v6564_v25, %v6562_v62  ;;  %v6442_v22 = vpop.f32.mrb[236].mxu0 }
 0x780   : > { %v8614_v31 = vadd.f32 %v6442_v22, %v11505_v53  ;;  %v6444_v27 = vpop.f32.mrb[237].mxu0 }
 0x781   : > { %v8615_v17 = vadd.f32 %v6444_v27, %v11508_v15  ;;  %v6446_v30 = vpop.f32.mrb[238].mxu0  ;;  %6844 = vmatprep.mubr.bf16.mxu1 %v6616_v28 }
 0x782   : > { %v8616_v14 = vadd.f32 %v6446_v30, %v11505_v53  ;;  %v6448_v19 = vpop.f32.mrb[239].mxu0  ;;  %6845 = vmatmul.mubr.bf16.gmra.mrb[8].mxu1 %v6615_v51  ;;  %v6565_v34 = vmax.f32 %v8614_v31, 0.0 }
 0x783   : > { %v8617_v57 = vadd.f32 %v6448_v19, %v11508_v15  ;;  %v6566_v38 = vmax.f32 %v8615_v17, 0.0 }
 0x784   : > { %v6567_v41 = vmax.f32 %v8616_v14, 0.0 }
 0x785   : > { %v6568_v58 = vmax.f32 %v8617_v57, 0.0 }
 0x786   : > { %v6617_v60 = vpack.c.bf16 %v6567_v41, %v6565_v34 }
 0x787   : > { %v6618_v13 = vpack.c.bf16 %v6568_v58, %v6566_v38  ;;  %v6452_v6 = vpop.f32.mrb[240].mxu0 }
 0x788   : > { %v8618_v10 = vadd.f32 %v6452_v6, %v11505_v53  ;;  %v6454_v45 = vpop.f32.mrb[241].mxu0 }
 0x789   : > { %v8619_v40 = vadd.f32 %v6454_v45, %v11508_v15  ;;  %v6456_v0 = vpop.f32.mrb[242].mxu0  ;;  %6852 = vmatprep.mubr.bf16.mxu1 %v6618_v13 }
 0x78a   : > { %v8620_v35 = vadd.f32 %v6456_v0, %v11505_v53  ;;  %v6458_v2 = vpop.f32.mrb[243].mxu0  ;;  %6853 = vmatmul.mubr.bf16.gmra.mrb[12].mxu1 %v6617_v60  ;;  %v6569_v55 = vmax.f32 %v8618_v10, 0.0 }
 0x78b   : > { %v8621_v46 = vadd.f32 %v6458_v2, %v11508_v15  ;;  %v6570_v4 = vmax.f32 %v8619_v40, 0.0 }
 0x78c   : > { %v6571_v50 = vmax.f32 %v8620_v35, 0.0 }
 0x78d   : > { %v6572_v8 = vmax.f32 %v8621_v46, 0.0 }
 0x78e   : > { %v6619_v44 = vpack.c.bf16 %v6571_v50, %v6569_v55 }
 0x78f   : > { %v6620_v24 = vpack.c.bf16 %v6572_v8, %v6570_v4  ;;  %v6462_v52 = vpop.f32.mrb[244].mxu0 }
 0x790   : > { %v8622_v26 = vadd.f32 %v6462_v52, %v11505_v53  ;;  %v6464_v61 = vpop.f32.mrb[245].mxu0 }
 0x791   : > { %v8623_v12 = vadd.f32 %v6464_v61, %v11508_v15  ;;  %v6466_v7 = vpop.f32.mrb[246].mxu0  ;;  %6860 = vmatprep.mubr.bf16.mxu1 %v6620_v24  ;;  %v9440_v24 = vld [vmem:[%s12028_s14 + $0x20] sm:$0xff]  }
 0x792   : > { %v8624_v16 = vadd.f32 %v6466_v7, %v11505_v53  ;;  %v6468_v49 = vpop.f32.mrb[247].mxu0  ;;  %6861 = vmatmul.mubr.bf16.gmra.mrb[16].mxu1 %v6619_v44  ;;  %v6573_v36 = vmax.f32 %v8622_v26, 0.0  ;;  %8544 = vmatprep.subr.bf16.mxu1 %v9440_v24 }
 0x793   : > { %v8625_v23 = vadd.f32 %v6468_v49, %v11508_v15  ;;  %v6574_v54 = vmax.f32 %v8623_v12, 0.0  ;;  %8545 = vmatpush3.bf16.msra.mxu1 %v9440_v24 }
 0x794   : > { %v6575_v39 = vmax.f32 %v8624_v16, 0.0 }
 0x795   : > { %v6576_v37 = vmax.f32 %v8625_v23, 0.0  ;;  %v9441_v23 = vld [vmem:[%s12028_s14 + $0x28] sm:$0xff]  }
 0x796   : > { %v6621_v18 = vpack.c.bf16 %v6575_v39, %v6573_v36  ;;  %8546 = vmatprep.subr.bf16.mxu1 %v9441_v23 }
 0x797   : > { %v6622_v42 = vpack.c.bf16 %v6576_v37, %v6574_v54  ;;  %v6472_v21 = vpop.f32.mrb[248].mxu0  ;;  %8547 = vmatpush3.bf16.msra.mxu1 %v9441_v23 }
 0x798   : > { %v8626_v11 = vadd.f32 %v6472_v21, %v11505_v53  ;;  %v6474_v59 = vpop.f32.mrb[249].mxu0 }
 0x799   : > { %v8627_v1 = vadd.f32 %v6474_v59, %v11508_v15  ;;  %v6476_v20 = vpop.f32.mrb[250].mxu0  ;;  %6868 = vmatprep.mubr.bf16.mxu1 %v6622_v42 }
 0x79a   : > { %v8628_v32 = vadd.f32 %v6476_v20, %v11505_v53  ;;  %v6478_v33 = vpop.f32.mrb[251].mxu0  ;;  %6869 = vmatmul.mubr.bf16.gmra.mrb[20].mxu1 %v6621_v18  ;;  %v6577_v48 = vmax.f32 %v8626_v11, 0.0  ;;  %v9442_v11 = vld [vmem:[%s12028_s14 + $0x30] sm:$0xff]  }
 0x79b   : > { %v8629_v43 = vadd.f32 %v6478_v33, %v11508_v15  ;;  %v6578_v3 = vmax.f32 %v8627_v1, 0.0  ;;  %8548 = vmatprep.subr.bf16.mxu1 %v9442_v11 }
 0x79c   : > { %v6579_v47 = vmax.f32 %v8628_v32, 0.0  ;;  %8549 = vmatpush3.bf16.msra.mxu1 %v9442_v11 }
 0x79d   : > { %v6580_v56 = vmax.f32 %v8629_v43, 0.0 }
 0x79e   : > { %v6623_v29 = vpack.c.bf16 %v6579_v47, %v6577_v48  ;;  %v9443_v47 = vld [vmem:[%s12028_s14 + $0x38] sm:$0xff]  }
 0x79f   : > { %v6624_v5 = vpack.c.bf16 %v6580_v56, %v6578_v3  ;;  %v6482_v9 = vpop.f32.mrb[252].mxu0  ;;  %8550 = vmatprep.subr.bf16.mxu1 %v9443_v47 }
 0x7a0   : > { %v8630_v63 = vadd.f32 %v6482_v9, %v11505_v53  ;;  %v6484_v62 = vpop.f32.mrb[253].mxu0  ;;  %8551 = vmatpush3.bf16.msra.mxu1 %v9443_v47 }
 0x7a1   : > { %v8631_v25 = vadd.f32 %v6484_v62, %v11508_v15  ;;  %v6486_v51 = vpop.f32.mrb[254].mxu0  ;;  %6876 = vmatprep.mubr.bf16.mxu1 %v6624_v5 }
 0x7a2   : > { %v8632_v28 = vadd.f32 %v6486_v51, %v11505_v53  ;;  %v6488_v22 = vpop.f32.mrb[255].mxu0  ;;  %6877 = vmatmul.mubr.bf16.gmra.mrb[24].mxu1 %v6623_v29  ;;  %v6581_v27 = vmax.f32 %v8630_v63, 0.0 }
 0x7a3   : > { %v8633_v31 = vadd.f32 %v6488_v22, %v11508_v15  ;;  %v6582_v30 = vmax.f32 %v8631_v25, 0.0 }
 0x7a4   : > { %v6583_v17 = vmax.f32 %v8632_v28, 0.0 }
 0x7a5   : > { %v6584_v14 = vmax.f32 %v8633_v31, 0.0 }
 0x7a6   : > { %v6625_v19 = vpack.c.bf16 %v6583_v17, %v6581_v27 }
 0x7a7   : > { %v6626_v57 = vpack.c.bf16 %v6584_v14, %v6582_v30  ;;  %v6492_v34 = vpop.f32.mrb[0].mxu0 }
 0x7a8   : > { %v8634_v41 = vadd.f32 %v6492_v34, %v11505_v53  ;;  %v6494_v38 = vpop.f32.mrb[1].mxu0 }
 0x7a9   : > { %v8635_v58 = vadd.f32 %v6494_v38, %v11508_v15  ;;  %v6496_v60 = vpop.f32.mrb[2].mxu0  ;;  %6884 = vmatprep.mubr.bf16.mxu1 %v6626_v57 }
 0x7aa   : > { %v8636_v13 = vadd.f32 %v6496_v60, %v11505_v53  ;;  %v6498_v6 = vpop.f32.mrb[3].mxu0  ;;  %6885 = vmatmul.mubr.bf16.gmra.mrb[28].mxu1 %v6625_v19  ;;  %v6585_v45 = vmax.f32 %v8634_v41, 0.0 }
 0x7ab   : > { %v8637_v10 = vadd.f32 %v6498_v6, %v11508_v15  ;;  %v6586_v0 = vmax.f32 %v8635_v58, 0.0 }
 0x7ac   : > { %v6587_v40 = vmax.f32 %v8636_v13, 0.0 }
 0x7ad   : > { %v6588_v35 = vmax.f32 %v8637_v10, 0.0 }
 0x7ae   : > { %v6627_v2 = vpack.c.bf16 %v6587_v40, %v6585_v45 }
 0x7af   : > { %v6628_v46 = vpack.c.bf16 %v6588_v35, %v6586_v0  ;;  %v6502_v55 = vpop.f32.mrb[4].mxu0 }
 0x7b0   : > { %v8638_v50 = vadd.f32 %v6502_v55, %v11505_v53  ;;  %v6504_v4 = vpop.f32.mrb[5].mxu0 }
 0x7b1   : > { %v8639_v8 = vadd.f32 %v6504_v4, %v11508_v15  ;;  %v6506_v44 = vpop.f32.mrb[6].mxu0  ;;  %6892 = vmatprep.mubr.bf16.mxu1 %v6628_v46  ;;  %v11598_v46 = vld [vmem:[#allocation17] ss:$0 sm:$0xff] }
 0x7b2   : > { %v8640_v52 = vadd.f32 %v6506_v44, %v11505_v53  ;;  %v6508_v26 = vpop.f32.mrb[7].mxu0  ;;  %6893 = vmatmul.mubr.bf16.gmra.mrb[32].mxu1 %v6627_v2  ;;  %v6589_v12 = vmax.f32 %v8638_v50, 0.0 }
 0x7b3   : > { %v8641_v61 = vadd.f32 %v6508_v26, %v11508_v15  ;;  %v6590_v16 = vmax.f32 %v8639_v8, 0.0 }
 0x7b4   : > { %v6591_v7 = vmax.f32 %v8640_v52, 0.0 }
 0x7b5   : > { %v6592_v49 = vmax.f32 %v8641_v61, 0.0 }
 0x7b6   : > { %v6629_v36 = vpack.c.bf16 %v6591_v7, %v6589_v12 }
 0x7b7   : > { %v6630_v39 = vpack.c.bf16 %v6592_v49, %v6590_v16  ;;  %v6512_v54 = vpop.f32.mrb[8].mxu0 }
 0x7b8   : > { %v8642_v37 = vadd.f32 %v6512_v54, %v11505_v53  ;;  %v6514_v18 = vpop.f32.mrb[9].mxu0 }
 0x7b9   : > { %v8643_v42 = vadd.f32 %v6514_v18, %v11508_v15  ;;  %v6516_v21 = vpop.f32.mrb[10].mxu0  ;;  %6900 = vmatprep.mubr.bf16.mxu1 %v6630_v39 }
 0x7ba   : > { %v8644_v59 = vadd.f32 %v6516_v21, %v11505_v53  ;;  %v6518_v1 = vpop.f32.mrb[11].mxu0  ;;  %6901 = vmatmul.mubr.bf16.gmra.mrb[36].mxu1 %v6629_v36  ;;  %v6593_v32 = vmax.f32 %v8642_v37, 0.0 }
 0x7bb   : > { %v8645_v20 = vadd.f32 %v6518_v1, %v11508_v15  ;;  %v6594_v43 = vmax.f32 %v8643_v42, 0.0 }
 0x7bc   : > { %v6595_v33 = vmax.f32 %v8644_v59, 0.0 }
 0x7bd   : > { %v6596_v48 = vmax.f32 %v8645_v20, 0.0 }
 0x7be   : > { %v6631_v3 = vpack.c.bf16 %v6595_v33, %v6593_v32 }
 0x7bf   : > { %v6632_v56 = vpack.c.bf16 %v6596_v48, %v6594_v43  ;;  %v6522_v29 = vpop.f32.mrb[12].mxu0 }
 0x7c0   : > { %v8646_v5 = vadd.f32 %v6522_v29, %v11505_v53  ;;  %v6524_v9 = vpop.f32.mrb[13].mxu0 }
 0x7c1   : > { %v8647_v63 = vadd.f32 %v6524_v9, %v11508_v15  ;;  %v6526_v62 = vpop.f32.mrb[14].mxu0  ;;  %6908 = vmatprep.mubr.bf16.mxu1 %v6632_v56 }
 0x7c2   : > { %v8648_v25 = vadd.f32 %v6526_v62, %v11505_v53  ;;  %v6528_v51 = vpop.f32.mrb[15].mxu0  ;;  %6909 = vmatmul.mubr.bf16.gmra.mrb[40].mxu1 %v6631_v3  ;;  %v6597_v22 = vmax.f32 %v8646_v5, 0.0 }
 0x7c3   : > { %v8649_v28 = vadd.f32 %v6528_v51, %v11508_v15  ;;  %v6598_v27 = vmax.f32 %v8647_v63, 0.0 }
 0x7c4   : > { %v6599_v31 = vmax.f32 %v8648_v25, 0.0 }
 0x7c5   : > { %v6600_v17 = vmax.f32 %v8649_v28, 0.0 }
 0x7c6   : > { %v6633_v30 = vpack.c.bf16 %v6599_v31, %v6597_v22 }
 0x7c7   : > { %v6634_v14 = vpack.c.bf16 %v6600_v17, %v6598_v27  ;;  %v6532_v19 = vpop.f32.mrb[16].mxu0 }
 0x7c8   : > { %v8650_v57 = vadd.f32 %v6532_v19, %v11505_v53  ;;  %v6534_v34 = vpop.f32.mrb[17].mxu0 }
 0x7c9   : > { %v8651_v41 = vadd.f32 %v6534_v34, %v11508_v15  ;;  %v6536_v38 = vpop.f32.mrb[18].mxu0  ;;  %6916 = vmatprep.mubr.bf16.mxu1 %v6634_v14 }
 0x7ca   : > { %v8652_v58 = vadd.f32 %v6536_v38, %v11505_v53  ;;  %v6538_v60 = vpop.f32.mrb[19].mxu0  ;;  %6917 = vmatmul.mubr.bf16.gmra.mrb[44].mxu1 %v6633_v30  ;;  %v6601_v6 = vmax.f32 %v8650_v57, 0.0 }
 0x7cb   : > { %v8653_v13 = vadd.f32 %v6538_v60, %v11508_v15  ;;  %v6602_v45 = vmax.f32 %v8651_v41, 0.0 }
 0x7cc   : > { %v6603_v10 = vmax.f32 %v8652_v58, 0.0 }
 0x7cd   : > { %v6604_v40 = vmax.f32 %v8653_v13, 0.0 }
 0x7ce   : > { %v6635_v0 = vpack.c.bf16 %v6603_v10, %v6601_v6 }
 0x7cf   : > { %v6636_v35 = vpack.c.bf16 %v6604_v40, %v6602_v45 }
 0x7d1   : > { %6924 = vmatprep.mubr.bf16.mxu1 %v6636_v35 }
 0x7d2   : > { %6925 = vmatmul.mubr.bf16.gmra.mrb[48].mxu1 %v6635_v0 }
 0x82d   : > { %v8342_v2 = vpop.f32.mrb[244].mxu1 }
 0x82e   : > { %v8343_v55 = vpop.f32.mrb[245].mxu1 }
 0x82f   : > { %v8344_v50 = vadd.f32 %v8343_v55, %v8342_v2  ;;  %v8345_v4 = vpop.f32.mrb[246].mxu1 }
 0x830   : > { %v8346_v8 = vpop.f32.mrb[247].mxu1 }
 0x831   : > { %v6807_v53 = vadd.f32 %v8344_v50, %v11598_v46  ;;  %v8347_v44 = vadd.f32 %v8346_v8, %v8345_v4 }
 0x833   : > { %v6810_v15 = vadd.f32 %v8347_v44, %v11598_v46  ;;  %v6933_v24 = vmax.f32 %v6807_v53, 0.0 }
 0x835   : > { %v6934_v52 = vmax.f32 %v6810_v15, 0.0  ;;  %v8348_v26 = vpop.f32.mrb[248].mxu1 }
 0x836   : > { %v8349_v61 = vpop.f32.mrb[249].mxu1 }
 0x837   : > { %v8350_v12 = vadd.f32 %v8349_v61, %v8348_v26  ;;  %v8351_v7 = vpop.f32.mrb[250].mxu1  ;;  %v6965_v16 = vpack.c.bf16 %v6934_v52, %v6933_v24 }
 0x838   : > { %v8352_v49 = vpop.f32.mrb[251].mxu1 }
 0x839   : > { %v6815_v23 = vadd.f32 %v8350_v12, %v11598_v46  ;;  %v8353_v36 = vadd.f32 %v8352_v49, %v8351_v7  ;;  %8552 = vmatprep.mubr.bf16.mxu1 %v6965_v16 }
 0x83b   : > { %v6818_v39 = vadd.f32 %v8353_v36, %v11598_v46  ;;  %v6935_v54 = vmax.f32 %v6815_v23, 0.0 }
 0x83d   : > { %v6936_v37 = vmax.f32 %v6818_v39, 0.0  ;;  %v8354_v18 = vpop.f32.mrb[252].mxu1 }
 0x83e   : > { %v8355_v42 = vpop.f32.mrb[253].mxu1 }
 0x83f   : > { %v6966_v21 = vpack.c.bf16 %v6936_v37, %v6935_v54  ;;  %v8356_v11 = vadd.f32 %v8355_v42, %v8354_v18  ;;  %v8357_v59 = vpop.f32.mrb[254].mxu1 }
 0x840   : > { %v8358_v1 = vpop.f32.mrb[255].mxu1 }
 0x841   : > { %v6823_v20 = vadd.f32 %v8356_v11, %v11598_v46  ;;  %v8359_v32 = vadd.f32 %v8358_v1, %v8357_v59  ;;  %8553 = vmatmul.mubr.bf16.vlgmr.msra.gmra.mrb[52].mxu1 %v6966_v21 }
 0x843   : > { %v6826_v33 = vadd.f32 %v8359_v32, %v11598_v46  ;;  %v6937_v43 = vmax.f32 %v6823_v20, 0.0 }
 0x845   : > { %v6938_v48 = vmax.f32 %v6826_v33, 0.0  ;;  %v8360_v47 = vpop.f32.mrb[0].mxu1 }
 0x846   : > { %v8361_v3 = vpop.f32.mrb[1].mxu1 }
 0x847   : > { %v8362_v56 = vadd.f32 %v8361_v3, %v8360_v47  ;;  %v8363_v29 = vpop.f32.mrb[2].mxu1  ;;  %v6967_v5 = vpack.c.bf16 %v6938_v48, %v6937_v43 }
 0x848   : > { %v8364_v9 = vpop.f32.mrb[3].mxu1 }
 0x849   : > { %v6831_v63 = vadd.f32 %v8362_v56, %v11598_v46  ;;  %v8365_v62 = vadd.f32 %v8364_v9, %v8363_v29  ;;  %8556 = vmatprep.mubr.bf16.mxu1 %v6967_v5 }
 0x84b   : > { %v6834_v25 = vadd.f32 %v8365_v62, %v11598_v46  ;;  %v6939_v51 = vmax.f32 %v6831_v63, 0.0 }
 0x84d   : > { %v6940_v28 = vmax.f32 %v6834_v25, 0.0  ;;  %v8366_v22 = vpop.f32.mrb[4].mxu1 }
 0x84e   : > { %v8367_v31 = vpop.f32.mrb[5].mxu1 }
 0x84f   : > { %v6968_v27 = vpack.c.bf16 %v6940_v28, %v6939_v51  ;;  %v8368_v17 = vadd.f32 %v8367_v31, %v8366_v22  ;;  %v8369_v30 = vpop.f32.mrb[6].mxu1 }
 0x850   : > { %v8370_v14 = vpop.f32.mrb[7].mxu1 }
 0x851   : > { %v6839_v19 = vadd.f32 %v8368_v17, %v11598_v46  ;;  %v8371_v57 = vadd.f32 %v8370_v14, %v8369_v30  ;;  %8557 = vmatmul.mubr.bf16.gmra.mrb[56].mxu1 %v6968_v27 }
 0x853   : > { %v6842_v34 = vadd.f32 %v8371_v57, %v11598_v46  ;;  %v6941_v41 = vmax.f32 %v6839_v19, 0.0 }
 0x855   : > { %v6942_v38 = vmax.f32 %v6842_v34, 0.0  ;;  %v8372_v58 = vpop.f32.mrb[8].mxu1 }
 0x856   : > { %v8373_v60 = vpop.f32.mrb[9].mxu1 }
 0x857   : > { %v8374_v13 = vadd.f32 %v8373_v60, %v8372_v58  ;;  %v8375_v6 = vpop.f32.mrb[10].mxu1  ;;  %v6969_v10 = vpack.c.bf16 %v6942_v38, %v6941_v41 }
 0x858   : > { %v8376_v45 = vpop.f32.mrb[11].mxu1 }
 0x859   : > { %v6847_v40 = vadd.f32 %v8374_v13, %v11598_v46  ;;  %v8377_v0 = vadd.f32 %v8376_v45, %v8375_v6  ;;  %8560 = vmatprep.mubr.bf16.mxu1 %v6969_v10 }
 0x85b   : > { %v6850_v35 = vadd.f32 %v8377_v0, %v11598_v46  ;;  %v6943_v2 = vmax.f32 %v6847_v40, 0.0 }
 0x85d   : > { %v6944_v55 = vmax.f32 %v6850_v35, 0.0  ;;  %v8378_v50 = vpop.f32.mrb[12].mxu1 }
 0x85e   : > { %v8379_v4 = vpop.f32.mrb[13].mxu1 }
 0x85f   : > { %v6970_v8 = vpack.c.bf16 %v6944_v55, %v6943_v2  ;;  %v8380_v53 = vadd.f32 %v8379_v4, %v8378_v50  ;;  %v8381_v44 = vpop.f32.mrb[14].mxu1 }
 0x860   : > { %v8382_v15 = vpop.f32.mrb[15].mxu1 }
 0x861   : > { %v6855_v24 = vadd.f32 %v8380_v53, %v11598_v46  ;;  %v8383_v52 = vadd.f32 %v8382_v15, %v8381_v44  ;;  %8561 = vmatmul.mubr.bf16.gmra.mrb[60].mxu1 %v6970_v8 }
 0x863   : > { %v6858_v26 = vadd.f32 %v8383_v52, %v11598_v46  ;;  %v6945_v61 = vmax.f32 %v6855_v24, 0.0 }
 0x865   : > { %v6946_v12 = vmax.f32 %v6858_v26, 0.0  ;;  %v8384_v7 = vpop.f32.mrb[16].mxu1 }
 0x866   : > { %v8385_v16 = vpop.f32.mrb[17].mxu1 }
 0x867   : > { %v8386_v49 = vadd.f32 %v8385_v16, %v8384_v7  ;;  %v8387_v23 = vpop.f32.mrb[18].mxu1  ;;  %v6971_v36 = vpack.c.bf16 %v6946_v12, %v6945_v61 }
 0x868   : > { %v8388_v39 = vpop.f32.mrb[19].mxu1 }
 0x869   : > { %v6863_v54 = vadd.f32 %v8386_v49, %v11598_v46  ;;  %v8389_v37 = vadd.f32 %v8388_v39, %v8387_v23  ;;  %8564 = vmatprep.mubr.bf16.mxu1 %v6971_v36 }
 0x86b   : > { %v6866_v18 = vadd.f32 %v8389_v37, %v11598_v46  ;;  %v6947_v42 = vmax.f32 %v6863_v54, 0.0 }
 0x86d   : > { %v6948_v21 = vmax.f32 %v6866_v18, 0.0  ;;  %v8390_v11 = vpop.f32.mrb[20].mxu1 }
 0x86e   : > { %v8391_v59 = vpop.f32.mrb[21].mxu1 }
 0x86f   : > { %v6972_v1 = vpack.c.bf16 %v6948_v21, %v6947_v42  ;;  %v8392_v20 = vadd.f32 %v8391_v59, %v8390_v11  ;;  %v8393_v32 = vpop.f32.mrb[22].mxu1 }
 0x870   : > { %v8394_v33 = vpop.f32.mrb[23].mxu1 }
 0x871   : > { %v6871_v43 = vadd.f32 %v8392_v20, %v11598_v46  ;;  %v8395_v48 = vadd.f32 %v8394_v33, %v8393_v32  ;;  %8565 = vmatmul.mubr.bf16.gmra.mrb[64].mxu1 %v6972_v1 }
 0x873   : > { %v6874_v47 = vadd.f32 %v8395_v48, %v11598_v46  ;;  %v6949_v3 = vmax.f32 %v6871_v43, 0.0 }
 0x875   : > { %v6950_v56 = vmax.f32 %v6874_v47, 0.0  ;;  %v8396_v29 = vpop.f32.mrb[24].mxu1 }
 0x876   : > { %v8397_v5 = vpop.f32.mrb[25].mxu1 }
 0x877   : > { %v8398_v9 = vadd.f32 %v8397_v5, %v8396_v29  ;;  %v8399_v63 = vpop.f32.mrb[26].mxu1  ;;  %v6973_v62 = vpack.c.bf16 %v6950_v56, %v6949_v3 }
 0x878   : > { %v8400_v25 = vpop.f32.mrb[27].mxu1 }
 0x879   : > { %v6879_v51 = vadd.f32 %v8398_v9, %v11598_v46  ;;  %v8401_v28 = vadd.f32 %v8400_v25, %v8399_v63  ;;  %8568 = vmatprep.mubr.bf16.mxu1 %v6973_v62 }
 0x87b   : > { %v6882_v22 = vadd.f32 %v8401_v28, %v11598_v46  ;;  %v6951_v31 = vmax.f32 %v6879_v51, 0.0 }
 0x87d   : > { %v6952_v27 = vmax.f32 %v6882_v22, 0.0  ;;  %v8402_v17 = vpop.f32.mrb[28].mxu1 }
 0x87e   : > { %v8403_v30 = vpop.f32.mrb[29].mxu1 }
 0x87f   : > { %v6974_v14 = vpack.c.bf16 %v6952_v27, %v6951_v31  ;;  %v8404_v19 = vadd.f32 %v8403_v30, %v8402_v17  ;;  %v8405_v57 = vpop.f32.mrb[30].mxu1 }
 0x880   : > { %v8406_v34 = vpop.f32.mrb[31].mxu1 }
 0x881   : > { %v6887_v41 = vadd.f32 %v8404_v19, %v11598_v46  ;;  %v8407_v38 = vadd.f32 %v8406_v34, %v8405_v57  ;;  %8569 = vmatmul.mubr.bf16.gmra.mrb[68].mxu1 %v6974_v14  ;;  %v11635_v57 = vld [vmem:[%s12091_s17] ss:$0 sm:$0xff] }
 0x883   : > { %v6890_v58 = vadd.f32 %v8407_v38, %v11598_v46  ;;  %v6953_v60 = vmax.f32 %v6887_v41, 0.0 }
 0x885   : > { %v6954_v13 = vmax.f32 %v6890_v58, 0.0  ;;  %v8408_v6 = vpop.f32.mrb[32].mxu1 }
 0x886   : > { %v8409_v10 = vpop.f32.mrb[33].mxu1 }
 0x887   : > { %v8410_v45 = vadd.f32 %v8409_v10, %v8408_v6  ;;  %v8411_v40 = vpop.f32.mrb[34].mxu1  ;;  %v6975_v0 = vpack.c.bf16 %v6954_v13, %v6953_v60 }
 0x888   : > { %v8412_v35 = vpop.f32.mrb[35].mxu1 }
 0x889   : > { %v6895_v2 = vadd.f32 %v8410_v45, %v11598_v46  ;;  %v8413_v55 = vadd.f32 %v8412_v35, %v8411_v40  ;;  %8572 = vmatprep.mubr.bf16.mxu1 %v6975_v0 }
 0x88b   : > { %v6898_v50 = vadd.f32 %v8413_v55, %v11598_v46  ;;  %v6955_v4 = vmax.f32 %v6895_v2, 0.0 }
 0x88d   : > { %v6956_v8 = vmax.f32 %v6898_v50, 0.0  ;;  %v8414_v53 = vpop.f32.mrb[36].mxu1 }
 0x88e   : > { %v8415_v44 = vpop.f32.mrb[37].mxu1 }
 0x88f   : > { %v6976_v15 = vpack.c.bf16 %v6956_v8, %v6955_v4  ;;  %v8416_v24 = vadd.f32 %v8415_v44, %v8414_v53  ;;  %v8417_v52 = vpop.f32.mrb[38].mxu1 }
 0x890   : > { %v8418_v26 = vpop.f32.mrb[39].mxu1 }
 0x891   : > { %v6903_v61 = vadd.f32 %v8416_v24, %v11598_v46  ;;  %v8419_v12 = vadd.f32 %v8418_v26, %v8417_v52  ;;  %8573 = vmatmul.mubr.bf16.gmra.mrb[72].mxu1 %v6976_v15 }
 0x893   : > { %v6906_v7 = vadd.f32 %v8419_v12, %v11598_v46  ;;  %v6957_v16 = vmax.f32 %v6903_v61, 0.0 }
 0x895   : > { %v6958_v49 = vmax.f32 %v6906_v7, 0.0  ;;  %v8420_v23 = vpop.f32.mrb[40].mxu1 }
 0x896   : > { %v8421_v36 = vpop.f32.mrb[41].mxu1 }
 0x897   : > { %v8422_v39 = vadd.f32 %v8421_v36, %v8420_v23  ;;  %v8423_v54 = vpop.f32.mrb[42].mxu1  ;;  %v6977_v37 = vpack.c.bf16 %v6958_v49, %v6957_v16 }
 0x898   : > { %v8424_v18 = vpop.f32.mrb[43].mxu1 }
 0x899   : > { %v6911_v42 = vadd.f32 %v8422_v39, %v11598_v46  ;;  %v8425_v21 = vadd.f32 %v8424_v18, %v8423_v54  ;;  %8576 = vmatprep.mubr.bf16.mxu1 %v6977_v37 }
 0x89b   : > { %v6914_v11 = vadd.f32 %v8425_v21, %v11598_v46  ;;  %v6959_v59 = vmax.f32 %v6911_v42, 0.0 }
 0x89d   : > { %v6960_v1 = vmax.f32 %v6914_v11, 0.0  ;;  %v8426_v20 = vpop.f32.mrb[44].mxu1 }
 0x89e   : > { %v8427_v32 = vpop.f32.mrb[45].mxu1 }
 0x89f   : > { %v6978_v33 = vpack.c.bf16 %v6960_v1, %v6959_v59  ;;  %v8428_v43 = vadd.f32 %v8427_v32, %v8426_v20  ;;  %v8429_v48 = vpop.f32.mrb[46].mxu1 }
 0x8a0   : > { %v8430_v47 = vpop.f32.mrb[47].mxu1 }
 0x8a1   : > { %v6919_v3 = vadd.f32 %v8428_v43, %v11598_v46  ;;  %v8431_v56 = vadd.f32 %v8430_v47, %v8429_v48  ;;  %8577 = vmatmul.mubr.bf16.gmra.mrb[76].mxu1 %v6978_v33 }
 0x8a3   : > { %v6922_v29 = vadd.f32 %v8431_v56, %v11598_v46  ;;  %v6961_v5 = vmax.f32 %v6919_v3, 0.0 }
 0x8a5   : > { %v6962_v9 = vmax.f32 %v6922_v29, 0.0  ;;  %v8432_v63 = vpop.f32.mrb[48].mxu1 }
 0x8a6   : > { %v8433_v62 = vpop.f32.mrb[49].mxu1 }
 0x8a7   : > { %v8434_v25 = vadd.f32 %v8433_v62, %v8432_v63  ;;  %v8435_v51 = vpop.f32.mrb[50].mxu1  ;;  %v6979_v28 = vpack.c.bf16 %v6962_v9, %v6961_v5 }
 0x8a8   : > { %v8436_v22 = vpop.f32.mrb[51].mxu1 }
 0x8a9   : > { %v6927_v31 = vadd.f32 %v8434_v25, %v11598_v46  ;;  %v8437_v27 = vadd.f32 %v8436_v22, %v8435_v51  ;;  %8580 = vmatprep.mubr.bf16.mxu1 %v6979_v28 }
 0x8ab   : > { %v6930_v17 = vadd.f32 %v8437_v27, %v11598_v46  ;;  %v6963_v30 = vmax.f32 %v6927_v31, 0.0 }
 0x8ad   : > { %v6964_v14 = vmax.f32 %v6930_v17, 0.0 }
 0x8af   : > { %v6980_v19 = vpack.c.bf16 %v6964_v14, %v6963_v30 }
 0x8b1   : > { %8581 = vmatmul.mubr.bf16.gmra.mrb[80].mxu1 %v6980_v19 }
 0x914   : > { %v8554_v34 = vpop.f32.mrb[52].mxu1 }
 0x915   : > { %v11638_v41 = vadd.f32 %v8554_v34, %v11635_v57  ;;  %v7086_v38 = vpop.f32.mrb[53].mxu1 }
 0x916   : > { %v11641_v58 = vadd.f32 %v11635_v57, %v7086_v38  ;;  %v8555_v60 = vpop.f32.mrb[54].mxu1 }
 0x917   : > { %7217 = vmax.xlane.f32.xlu1 %v11638_v41  ;;  %v7089_v46 = vpop.f32.mrb[55].mxu1  ;;  %v11646_v13 = vadd.f32 %v8555_v60, %v11635_v57 }
 0x918   : > { %7213 = vmax.xlane.f32.xlu0 %v11641_v58  ;;  %v11649_v6 = vadd.f32 %v11635_v57, %v7089_v46 }
 0x91b   : > { %7219 = vmax.xlane.f32.xlu1 %v11646_v13 }
 0x91c   : > { %7215 = vmax.xlane.f32.xlu0 %v11649_v6 }
 0x924   : > { %v8558_v10 = vpop.f32.mrb[56].mxu1 }
 0x925   : > { %v11654_v45 = vadd.f32 %v8558_v10, %v11635_v57  ;;  %v7102_v40 = vpop.f32.mrb[57].mxu1 }
 0x926   : > { %v8559_v0 = vpop.f32.mrb[58].mxu1  ;;  %v11661_v55 = vadd.f32 %v11635_v57, %v7102_v40 }
 0x927   : > { %v11657_v35 = vadd.f32 %v8559_v0, %v11635_v57  ;;  %v7105_v2 = vpop.f32.mrb[59].mxu1  ;;  %7225 = vmax.xlane.f32.xlu0 %v11654_v45 }
 0x928   : > { %v11665_v50 = vadd.f32 %v11635_v57, %v7105_v2 }
 0x929   : > { %7227 = vmax.xlane.f32.xlu1 %v11657_v35 }
 0x92b   : > { %7221 = vmax.xlane.f32.xlu0 %v11661_v55 }
 0x92d   : > { %7223 = vmax.xlane.f32.xlu1 %v11665_v50 }
 0x934   : > { %v8562_v4 = vpop.f32.mrb[60].mxu1 }
 0x935   : > { %v11670_v8 = vadd.f32 %v8562_v4, %v11635_v57  ;;  %v7118_v53 = vpop.f32.mrb[61].mxu1 }
 0x936   : > { %v8563_v44 = vpop.f32.mrb[62].mxu1  ;;  %v11677_v52 = vadd.f32 %v11635_v57, %v7118_v53 }
 0x937   : > { %v11673_v15 = vadd.f32 %v8563_v44, %v11635_v57  ;;  %v7121_v24 = vpop.f32.mrb[63].mxu1  ;;  %7233 = vmax.xlane.f32.xlu0 %v11670_v8 }
 0x938   : > { %v11681_v26 = vadd.f32 %v11635_v57, %v7121_v24 }
 0x939   : > { %7235 = vmax.xlane.f32.xlu1 %v11673_v15 }
 0x93b   : > { %7229 = vmax.xlane.f32.xlu0 %v11677_v52 }
 0x93d   : > { %7231 = vmax.xlane.f32.xlu1 %v11681_v26 }
 0x944   : > { %v8566_v61 = vpop.f32.mrb[64].mxu1 }
 0x945   : > { %v11686_v12 = vadd.f32 %v8566_v61, %v11635_v57  ;;  %v7134_v7 = vpop.f32.mrb[65].mxu1 }
 0x946   : > { %v8567_v16 = vpop.f32.mrb[66].mxu1  ;;  %v11693_v36 = vadd.f32 %v11635_v57, %v7134_v7 }
 0x947   : > { %v11689_v49 = vadd.f32 %v8567_v16, %v11635_v57  ;;  %v7137_v23 = vpop.f32.mrb[67].mxu1  ;;  %7241 = vmax.xlane.f32.xlu0 %v11686_v12 }
 0x948   : > { %v11697_v39 = vadd.f32 %v11635_v57, %v7137_v23 }
 0x949   : > { %7243 = vmax.xlane.f32.xlu1 %v11689_v49 }
 0x94b   : > { %7237 = vmax.xlane.f32.xlu0 %v11693_v36 }
 0x94d   : > { %7239 = vmax.xlane.f32.xlu1 %v11697_v39 }
 0x954   : > { %v8570_v54 = vpop.f32.mrb[68].mxu1 }
 0x955   : > { %v11702_v37 = vadd.f32 %v8570_v54, %v11635_v57  ;;  %v7150_v18 = vpop.f32.mrb[69].mxu1 }
 0x956   : > { %v8571_v42 = vpop.f32.mrb[70].mxu1  ;;  %v11709_v59 = vadd.f32 %v11635_v57, %v7150_v18 }
 0x957   : > { %v11705_v21 = vadd.f32 %v8571_v42, %v11635_v57  ;;  %v7153_v11 = vpop.f32.mrb[71].mxu1  ;;  %7249 = vmax.xlane.f32.xlu0 %v11702_v37 }
 0x958   : > { %v11713_v1 = vadd.f32 %v11635_v57, %v7153_v11 }
 0x959   : > { %7251 = vmax.xlane.f32.xlu1 %v11705_v21 }
 0x95b   : > { %7245 = vmax.xlane.f32.xlu0 %v11709_v59 }
 0x95d   : > { %7247 = vmax.xlane.f32.xlu1 %v11713_v1 }
 0x964   : > { %v8574_v20 = vpop.f32.mrb[72].mxu1 }
 0x965   : > { %v11718_v32 = vadd.f32 %v8574_v20, %v11635_v57  ;;  %v7166_v33 = vpop.f32.mrb[73].mxu1 }
 0x966   : > { %v8575_v43 = vpop.f32.mrb[74].mxu1  ;;  %v11725_v3 = vadd.f32 %v11635_v57, %v7166_v33 }
 0x967   : > { %v11721_v48 = vadd.f32 %v8575_v43, %v11635_v57  ;;  %v7169_v47 = vpop.f32.mrb[75].mxu1  ;;  %7257 = vmax.xlane.f32.xlu0 %v11718_v32 }
 0x968   : > { %v11729_v56 = vadd.f32 %v11635_v57, %v7169_v47 }
 0x969   : > { %7259 = vmax.xlane.f32.xlu1 %v11721_v48 }
 0x96b   : > { %7253 = vmax.xlane.f32.xlu0 %v11725_v3 }
 0x96d   : > { %7255 = vmax.xlane.f32.xlu1 %v11729_v56 }
 0x974   : > { %v8578_v29 = vpop.f32.mrb[76].mxu1 }
 0x975   : > { %v11734_v5 = vadd.f32 %v8578_v29, %v11635_v57  ;;  %v7182_v9 = vpop.f32.mrb[77].mxu1 }
 0x976   : > { %v8579_v63 = vpop.f32.mrb[78].mxu1  ;;  %v11741_v51 = vadd.f32 %v11635_v57, %v7182_v9 }
 0x977   : > { %v11737_v62 = vadd.f32 %v8579_v63, %v11635_v57  ;;  %v7185_v25 = vpop.f32.mrb[79].mxu1  ;;  %7265 = vmax.xlane.f32.xlu0 %v11734_v5 }
 0x978   : > { %v11745_v28 = vadd.f32 %v11635_v57, %v7185_v25 }
 0x979   : > { %7267 = vmax.xlane.f32.xlu1 %v11737_v62 }
 0x97b   : > { %7261 = vmax.xlane.f32.xlu0 %v11741_v51 }
 0x97d   : > { %7263 = vmax.xlane.f32.xlu1 %v11745_v28 }
 0x984   : > { %v8582_v22 = vpop.f32.mrb[80].mxu1 }
 0x985   : > { %v7198_v31 = vpop.f32.mrb[81].mxu1  ;;  %v11757_v19 = vadd.f32 %v8582_v22, %v11635_v57 }
 0x986   : > { %v11750_v27 = vadd.f32 %v11635_v57, %v7198_v31  ;;  %v8583_v17 = vpop.f32.mrb[82].mxu1 }
 0x987   : > { %v7201_v30 = vpop.f32.mrb[83].mxu1  ;;  %v11761_v34 = vadd.f32 %v8583_v17, %v11635_v57 }
 0x988   : > { %v11753_v14 = vadd.f32 %v11635_v57, %v7201_v30  ;;  %7269 = vmax.xlane.f32.xlu0 %v11750_v27 }
 0x98a   : > { %7271 = vmax.xlane.f32.xlu1 %v11753_v14 }
 0x98c   : > { %7273 = vmax.xlane.f32.xlu0 %v11757_v19 }
 0x98e   : > { %7275 = vmax.xlane.f32.xlu1 %v11761_v34 }
 0x9a4   : > { %v7218_v38 = vpop.xlane.xlu1 %7217 }
 0x9a5   : > { %v11766_v60 = vsub.f32 %v11638_v41, %v7218_v38  ;;  %v7214_v46 = vpop.xlane.xlu0 %7213 }
 0x9a6   : > { %v11769_v10 = vsub.f32 %v11641_v58, %v7214_v46 }
 0x9a7   : > { %v7313_v40 = vmul.f32 1.442695, %v11766_v60 }
 0x9a8   : > { %v7309_v0 = vmul.f32 1.442695, %v11769_v10  ;;  %v7220_v2 = vpop.xlane.xlu1 %7219 }
 0x9a9   : > { %9444 = vpow2.f32 %v7313_v40  ;;  %v11774_v57 = vsub.f32 %v11646_v13, %v7220_v2  ;;  %v7216_v4 = vpop.xlane.xlu0 %7215 }
 0x9aa   : > { %v11777_v53 = vsub.f32 %v11649_v6, %v7216_v4  ;;  %9446 = vpow2.f32 %v7309_v0 }
 0x9ab   : > { %v7315_v41 = vmul.f32 1.442695, %v11774_v57 }
 0x9ac   : > { %v7311_v58 = vmul.f32 1.442695, %v11777_v53 }
 0x9ad   : > { %9448 = vpow2.f32 %v7315_v41 }
 0x9ae   : > { %9450 = vpow2.f32 %v7311_v58 }
 0x9b3   : > { %v9445_v44 = vpop.eup %9444 }
 0x9b4   : > { %7377 = vadd.xlane.f32.xlu0 %v9445_v44  ;;  %v7226_v24 = vpop.xlane.xlu0 %7225  ;;  %v9447_v7 = vpop.eup %9446 }
 0x9b5   : > { %v11782_v61 = vsub.f32 %v11654_v45, %v7226_v24 }
 0x9b6   : > { %v7228_v13 = vpop.xlane.xlu1 %7227 }
 0x9b7   : > { %v9449_v16 = vpop.eup %9448  ;;  %v7321_v23 = vmul.f32 1.442695, %v11782_v61  ;;  %v11786_v6 = vsub.f32 %v11657_v35, %v7228_v13 }
 0x9b8   : > { %7379 = vadd.xlane.f32.xlu1 %v9449_v16  ;;  %7373 = vadd.xlane.f32.xlu0 %v9447_v7  ;;  %v7222_v54 = vpop.xlane.xlu0 %7221  ;;  %v9451_v45 = vpop.eup %9450 }
 0x9b9   : > { %9452 = vpow2.f32 %v7321_v23  ;;  %v7323_v18 = vmul.f32 1.442695, %v11786_v6  ;;  %v11790_v42 = vsub.f32 %v11661_v55, %v7222_v54 }
 0x9ba   : > { %v7224_v11 = vpop.xlane.xlu1 %7223 }
 0x9bb   : > { %9454 = vpow2.f32 %v7323_v18  ;;  %v7317_v20 = vmul.f32 1.442695, %v11790_v42  ;;  %v11794_v33 = vsub.f32 %v11665_v50, %v7224_v11 }
 0x9bc   : > { %7375 = vadd.xlane.f32.xlu1 %v9451_v45 }
 0x9bd   : > { %9456 = vpow2.f32 %v7317_v20  ;;  %v7319_v35 = vmul.f32 1.442695, %v11794_v33 }
 0x9bf   : > { %9458 = vpow2.f32 %v7319_v35 }
 0x9c3   : > { %v9453_v43 = vpop.eup %9452 }
 0x9c4   : > { %7385 = vadd.xlane.f32.xlu0 %v9453_v43  ;;  %v7234_v47 = vpop.xlane.xlu0 %7233 }
 0x9c5   : > { %v9455_v29 = vpop.eup %9454  ;;  %v11798_v55 = vsub.f32 %v11670_v8, %v7234_v47 }
 0x9c6   : > { %v7236_v9 = vpop.xlane.xlu1 %7235  ;;  %7387 = vadd.xlane.f32.xlu1 %v9455_v29 }
 0x9c7   : > { %v9457_v63 = vpop.eup %9456  ;;  %v7329_v25 = vmul.f32 1.442695, %v11798_v55  ;;  %v11802_v50 = vsub.f32 %v11673_v15, %v7236_v9 }
 0x9c8   : > { %7381 = vadd.xlane.f32.xlu0 %v9457_v63  ;;  %v7230_v22 = vpop.xlane.xlu0 %7229 }
 0x9c9   : > { %v9459_v31 = vpop.eup %9458  ;;  %9460 = vpow2.f32 %v7329_v25  ;;  %v7331_v17 = vmul.f32 1.442695, %v11802_v50  ;;  %v11806_v30 = vsub.f32 %v11677_v52, %v7230_v22 }
 0x9ca   : > { %v7232_v38 = vpop.xlane.xlu1 %7231  ;;  %7383 = vadd.xlane.f32.xlu1 %v9459_v31 }
 0x9cb   : > { %9462 = vpow2.f32 %v7331_v17  ;;  %v7325_v8 = vmul.f32 1.442695, %v11806_v30  ;;  %v11810_v46 = vsub.f32 %v11681_v26, %v7232_v38 }
 0x9cd   : > { %9464 = vpow2.f32 %v7325_v8  ;;  %v7327_v15 = vmul.f32 1.442695, %v11810_v46 }
 0x9cf   : > { %9466 = vpow2.f32 %v7327_v15 }
 0x9d3   : > { %v9461_v40 = vpop.eup %9460 }
 0x9d4   : > { %7393 = vadd.xlane.f32.xlu0 %v9461_v40  ;;  %v7242_v0 = vpop.xlane.xlu0 %7241 }
 0x9d5   : > { %v9463_v2 = vpop.eup %9462  ;;  %v11814_v4 = vsub.f32 %v11686_v12, %v7242_v0 }
 0x9d6   : > { %v7244_v52 = vpop.xlane.xlu1 %7243  ;;  %7395 = vadd.xlane.f32.xlu1 %v9463_v2 }
 0x9d7   : > { %v9465_v41 = vpop.eup %9464  ;;  %v7337_v58 = vmul.f32 1.442695, %v11814_v4  ;;  %v11818_v44 = vsub.f32 %v11689_v49, %v7244_v52 }
 0x9d8   : > { %7389 = vadd.xlane.f32.xlu0 %v9465_v41  ;;  %v7238_v26 = vpop.xlane.xlu0 %7237 }
 0x9d9   : > { %v9467_v24 = vpop.eup %9466  ;;  %9468 = vpow2.f32 %v7337_v58  ;;  %v7339_v7 = vmul.f32 1.442695, %v11818_v44  ;;  %v11822_v13 = vsub.f32 %v11693_v36, %v7238_v26 }
 0x9da   : > { %v7240_v16 = vpop.xlane.xlu1 %7239  ;;  %7391 = vadd.xlane.f32.xlu1 %v9467_v24 }
 0x9db   : > { %9470 = vpow2.f32 %v7339_v7  ;;  %v7333_v12 = vmul.f32 1.442695, %v11822_v13  ;;  %v11826_v23 = vsub.f32 %v11697_v39, %v7240_v16 }
 0x9dd   : > { %9472 = vpow2.f32 %v7333_v12  ;;  %v7335_v49 = vmul.f32 1.442695, %v11826_v23 }
 0x9df   : > { %9474 = vpow2.f32 %v7335_v49 }
 0x9e3   : > { %v9469_v54 = vpop.eup %9468 }
 0x9e4   : > { %7401 = vadd.xlane.f32.xlu0 %v9469_v54  ;;  %v7250_v18 = vpop.xlane.xlu0 %7249 }
 0x9e5   : > { %v9471_v11 = vpop.eup %9470  ;;  %v11830_v45 = vsub.f32 %v11702_v37, %v7250_v18 }
 0x9e6   : > { %v7252_v36 = vpop.xlane.xlu1 %7251  ;;  %7403 = vadd.xlane.f32.xlu1 %v9471_v11 }
 0x9e7   : > { %v9473_v20 = vpop.eup %9472  ;;  %v7345_v35 = vmul.f32 1.442695, %v11830_v45  ;;  %v11834_v43 = vsub.f32 %v11705_v21, %v7252_v36 }
 0x9e8   : > { %7397 = vadd.xlane.f32.xlu0 %v9473_v20  ;;  %v7246_v39 = vpop.xlane.xlu0 %7245 }
 0x9e9   : > { %v9475_v47 = vpop.eup %9474  ;;  %9476 = vpow2.f32 %v7345_v35  ;;  %v7347_v29 = vmul.f32 1.442695, %v11834_v43  ;;  %v11838_v9 = vsub.f32 %v11709_v59, %v7246_v39 }
 0x9ea   : > { %v7248_v63 = vpop.xlane.xlu1 %7247  ;;  %7399 = vadd.xlane.f32.xlu1 %v9475_v47 }
 0x9eb   : > { %9478 = vpow2.f32 %v7347_v29  ;;  %v7341_v37 = vmul.f32 1.442695, %v11838_v9  ;;  %v11842_v25 = vsub.f32 %v11713_v1, %v7248_v63 }
 0x9ed   : > { %9480 = vpow2.f32 %v7341_v37  ;;  %v7343_v21 = vmul.f32 1.442695, %v11842_v25 }
 0x9ef   : > { %9482 = vpow2.f32 %v7343_v21 }
 0x9f3   : > { %v9477_v22 = vpop.eup %9476 }
 0x9f4   : > { %7409 = vadd.xlane.f32.xlu0 %v9477_v22  ;;  %v7258_v31 = vpop.xlane.xlu0 %7257 }
 0x9f5   : > { %v9479_v17 = vpop.eup %9478  ;;  %v11846_v38 = vsub.f32 %v11718_v32, %v7258_v31 }
 0x9f6   : > { %v7260_v59 = vpop.xlane.xlu1 %7259  ;;  %7411 = vadd.xlane.f32.xlu1 %v9479_v17 }
 0x9f7   : > { %v9481_v8 = vpop.eup %9480  ;;  %v7353_v15 = vmul.f32 1.442695, %v11846_v38  ;;  %v11850_v40 = vsub.f32 %v11721_v48, %v7260_v59 }
 0x9f8   : > { %7405 = vadd.xlane.f32.xlu0 %v9481_v8  ;;  %v7254_v1 = vpop.xlane.xlu0 %7253 }
 0x9f9   : > { %v9483_v0 = vpop.eup %9482  ;;  %9484 = vpow2.f32 %v7353_v15  ;;  %v7355_v2 = vmul.f32 1.442695, %v11850_v40  ;;  %v11854_v52 = vsub.f32 %v11725_v3, %v7254_v1 }
 0x9fa   : > { %v7256_v41 = vpop.xlane.xlu1 %7255  ;;  %7407 = vadd.xlane.f32.xlu1 %v9483_v0 }
 0x9fb   : > { %9486 = vpow2.f32 %v7355_v2  ;;  %v7349_v32 = vmul.f32 1.442695, %v11854_v52  ;;  %v11858_v58 = vsub.f32 %v11729_v56, %v7256_v41 }
 0x9fd   : > { %9488 = vpow2.f32 %v7349_v32  ;;  %v7351_v48 = vmul.f32 1.442695, %v11858_v58 }
 0x9ff   : > { %9490 = vpow2.f32 %v7351_v48 }
 0xa03   : > { %v9485_v26 = vpop.eup %9484 }
 0xa04   : > { %7417 = vadd.xlane.f32.xlu0 %v9485_v26  ;;  %v7266_v24 = vpop.xlane.xlu0 %7265 }
 0xa05   : > { %v9487_v7 = vpop.eup %9486  ;;  %v11862_v16 = vsub.f32 %v11734_v5, %v7266_v24 }
 0xa06   : > { %v7268_v3 = vpop.xlane.xlu1 %7267  ;;  %7419 = vadd.xlane.f32.xlu1 %v9487_v7 }
 0xa07   : > { %v9489_v12 = vpop.eup %9488  ;;  %v7361_v49 = vmul.f32 1.442695, %v11862_v16  ;;  %v11866_v54 = vsub.f32 %v11737_v62, %v7268_v3 }
 0xa08   : > { %7413 = vadd.xlane.f32.xlu0 %v9489_v12  ;;  %v7262_v56 = vpop.xlane.xlu0 %7261 }
 0xa09   : > { %v9491_v18 = vpop.eup %9490  ;;  %9492 = vpow2.f32 %v7361_v49  ;;  %v7363_v11 = vmul.f32 1.442695, %v11866_v54  ;;  %v11870_v36 = vsub.f32 %v11741_v51, %v7262_v56 }
 0xa0a   : > { %v7264_v20 = vpop.xlane.xlu1 %7263  ;;  %7415 = vadd.xlane.f32.xlu1 %v9491_v18 }
 0xa0b   : > { %9494 = vpow2.f32 %v7363_v11  ;;  %v7357_v5 = vmul.f32 1.442695, %v11870_v36  ;;  %v11874_v35 = vsub.f32 %v11745_v28, %v7264_v20 }
 0xa0d   : > { %9496 = vpow2.f32 %v7357_v5  ;;  %v7359_v62 = vmul.f32 1.442695, %v11874_v35 }
 0xa0f   : > { %9498 = vpow2.f32 %v7359_v62 }
 0xa13   : > { %v9493_v39 = vpop.eup %9492 }
 0xa14   : > { %7425 = vadd.xlane.f32.xlu0 %v9493_v39 }
 0xa15   : > { %v9495_v47 = vpop.eup %9494  ;;  %v7270_v29 = vpop.xlane.xlu0 %7269 }
 0xa16   : > { %v11878_v63 = vsub.f32 %v11750_v27, %v7270_v29  ;;  %7427 = vadd.xlane.f32.xlu1 %v9495_v47 }
 0xa17   : > { %v9497_v51 = vpop.eup %9496  ;;  %v7272_v37 = vpop.xlane.xlu1 %7271 }
 0xa18   : > { %v7365_v21 = vmul.f32 1.442695, %v11878_v63  ;;  %v11882_v22 = vsub.f32 %v11753_v14, %v7272_v37  ;;  %7421 = vadd.xlane.f32.xlu0 %v9497_v51 }
 0xa19   : > { %v9499_v28 = vpop.eup %9498  ;;  %v7274_v31 = vpop.xlane.xlu0 %7273 }
 0xa1a   : > { %9500 = vpow2.f32 %v7365_v21  ;;  %v7367_v17 = vmul.f32 1.442695, %v11882_v22  ;;  %v11886_v59 = vsub.f32 %v11757_v19, %v7274_v31  ;;  %7423 = vadd.xlane.f32.xlu1 %v9499_v28 }
 0xa1b   : > { %v7276_v27 = vpop.xlane.xlu1 %7275 }
 0xa1c   : > { %9502 = vpow2.f32 %v7367_v17  ;;  %v7369_v8 = vmul.f32 1.442695, %v11886_v59  ;;  %v11890_v15 = vsub.f32 %v11761_v34, %v7276_v27 }
 0xa1e   : > { %9504 = vpow2.f32 %v7369_v8  ;;  %v7371_v14 = vmul.f32 1.442695, %v11890_v15 }
 0xa20   : > { %9506 = vpow2.f32 %v7371_v14 }
 0xa24   : > { %v9501_v1 = vpop.eup %9500 }
 0xa25   : > { %7429 = vadd.xlane.f32.xlu0 %v9501_v1 }
 0xa26   : > { %v9503_v0 = vpop.eup %9502 }
 0xa27   : > { %7431 = vadd.xlane.f32.xlu1 %v9503_v0 }
 0xa28   : > { %v9505_v19 = vpop.eup %9504 }
 0xa29   : > { %7433 = vadd.xlane.f32.xlu0 %v9505_v19 }
 0xa2a   : > { %v9507_v2 = vpop.eup %9506 }
 0xa2b   : > { %7435 = vadd.xlane.f32.xlu1 %v9507_v2 }
 0xa41   : > { %v7378_v41 = vpop.xlane.xlu0 %7377 }
 0xa42   : > { %9508 = vlog2.f32 %v7378_v41 }
 0xa45   : > { %v7380_v32 = vpop.xlane.xlu1 %7379  ;;  %v7374_v48 = vpop.xlane.xlu0 %7373 }
 0xa46   : > { %9510 = vlog2.f32 %v7380_v32 }
 0xa47   : > { %9512 = vlog2.f32 %v7374_v48 }
 0xa49   : > { %v7376_v34 = vpop.xlane.xlu1 %7375 }
 0xa4a   : > { %9514 = vlog2.f32 %v7376_v34 }
 0xa4c   : > { %v9509_v26 = vpop.eup %9508 }
 0xa4d   : > { %v7442_v24 = vmul.f32 0.6931472, %v9509_v26 }
 0xa4f   : > { %v7503_v7 = vsub.f32 %v11766_v60, %v7442_v24 }
 0xa50   : > { %v9511_v3 = vpop.eup %9510 }
 0xa51   : > { %v9513_v12 = vpop.eup %9512  ;;  %7535 = vst [vmem:[%s11897_s28 + $0x10] sm:$0xff] %v7503_v7  ;;  %v7444_v49 = vmul.f32 0.6931472, %v9511_v3  ;;  %v7386_v56 = vpop.xlane.xlu0 %7385 }
 0xa52   : > { %v7438_v18 = vmul.f32 0.6931472, %v9513_v12  ;;  %9516 = vlog2.f32 %v7386_v56 }
 0xa53   : > { %v7504_v11 = vsub.f32 %v11774_v57, %v7444_v49  ;;  %v7388_v20 = vpop.xlane.xlu1 %7387 }
 0xa54   : > { %v9515_v5 = vpop.eup %9514  ;;  %v7501_v62 = vsub.f32 %v11769_v10, %v7438_v18  ;;  %9518 = vlog2.f32 %v7388_v20 }
 0xa55   : > { %7536 = vst [vmem:[%s11897_s28 + $0x18] sm:$0xff] %v7504_v11  ;;  %v7440_v60 = vmul.f32 0.6931472, %v9515_v5  ;;  %v7382_v39 = vpop.xlane.xlu0 %7381 }
 0xa56   : > { %7533 = vst [vmem:[%s11897_s28] sm:$0xff] %v7501_v62  ;;  %9520 = vlog2.f32 %v7382_v39 }
 0xa57   : > { %v7502_v47 = vsub.f32 %v11777_v53, %v7440_v60  ;;  %v7384_v29 = vpop.xlane.xlu1 %7383 }
 0xa58   : > { %9522 = vlog2.f32 %v7384_v29 }
 0xa59   : > { %7534 = vst [vmem:[%s11897_s28 + $0x8] sm:$0xff] %v7502_v47 }
 0xa5c   : > { %v9517_v51 = vpop.eup %9516 }
 0xa5d   : > { %v7450_v37 = vmul.f32 0.6931472, %v9517_v51 }
 0xa5e   : > { %v9519_v57 = vpop.eup %9518 }
 0xa5f   : > { %v7507_v21 = vsub.f32 %v11782_v61, %v7450_v37  ;;  %v7452_v10 = vmul.f32 0.6931472, %v9519_v57 }
 0xa60   : > { %v9521_v28 = vpop.eup %9520 }
 0xa61   : > { %7539 = vst [vmem:[%s11897_s28 + $0x30] sm:$0xff] %v7507_v21  ;;  %v7508_v31 = vsub.f32 %v11786_v6, %v7452_v10  ;;  %v7446_v17 = vmul.f32 0.6931472, %v9521_v28  ;;  %v7394_v27 = vpop.xlane.xlu0 %7393 }
 0xa62   : > { %v9523_v8 = vpop.eup %9522  ;;  %9524 = vlog2.f32 %v7394_v27 }
 0xa63   : > { %7540 = vst [vmem:[%s11897_s28 + $0x38] sm:$0xff] %v7508_v31  ;;  %v7505_v53 = vsub.f32 %v11790_v42, %v7446_v17  ;;  %v7448_v14 = vmul.f32 0.6931472, %v9523_v8  ;;  %v7396_v1 = vpop.xlane.xlu1 %7395 }
 0xa64   : > { %9526 = vlog2.f32 %v7396_v1 }
 0xa65   : > { %7537 = vst [vmem:[%s11897_s28 + $0x20] sm:$0xff] %v7505_v53  ;;  %v7506_v61 = vsub.f32 %v11794_v33, %v7448_v14  ;;  %v7390_v0 = vpop.xlane.xlu0 %7389 }
 0xa66   : > { %9528 = vlog2.f32 %v7390_v0 }
 0xa67   : > { %7538 = vst [vmem:[%s11897_s28 + $0x28] sm:$0xff] %v7506_v61  ;;  %v7392_v19 = vpop.xlane.xlu1 %7391 }
 0xa68   : > { %9530 = vlog2.f32 %v7392_v19 }
 0xa6c   : > { %v9525_v6 = vpop.eup %9524 }
 0xa6d   : > { %v7458_v2 = vmul.f32 0.6931472, %v9525_v6 }
 0xa6e   : > { %v9527_v41 = vpop.eup %9526 }
 0xa6f   : > { %v7511_v32 = vsub.f32 %v11798_v55, %v7458_v2  ;;  %v7460_v42 = vmul.f32 0.6931472, %v9527_v41 }
 0xa70   : > { %v9529_v48 = vpop.eup %9528 }
 0xa71   : > { %7543 = vst [vmem:[%s11897_s28 + $0x50] sm:$0xff] %v7511_v32  ;;  %v7512_v34 = vsub.f32 %v11802_v50, %v7460_v42  ;;  %v7454_v26 = vmul.f32 0.6931472, %v9529_v48  ;;  %v7402_v33 = vpop.xlane.xlu0 %7401 }
 0xa72   : > { %v9531_v24 = vpop.eup %9530  ;;  %9532 = vlog2.f32 %v7402_v33 }
 0xa73   : > { %7544 = vst [vmem:[%s11897_s28 + $0x58] sm:$0xff] %v7512_v34  ;;  %v7509_v7 = vsub.f32 %v11806_v30, %v7454_v26  ;;  %v7456_v3 = vmul.f32 0.6931472, %v9531_v24  ;;  %v7404_v12 = vpop.xlane.xlu1 %7403 }
 0xa74   : > { %9534 = vlog2.f32 %v7404_v12 }
 0xa75   : > { %7541 = vst [vmem:[%s11897_s28 + $0x40] sm:$0xff] %v7509_v7  ;;  %v7510_v55 = vsub.f32 %v11810_v46, %v7456_v3  ;;  %v7398_v49 = vpop.xlane.xlu0 %7397 }
 0xa76   : > { %9536 = vlog2.f32 %v7398_v49 }
 0xa77   : > { %7542 = vst [vmem:[%s11897_s28 + $0x48] sm:$0xff] %v7510_v55  ;;  %v7400_v56 = vpop.xlane.xlu1 %7399 }
 0xa78   : > { %9538 = vlog2.f32 %v7400_v56 }
 0xa7c   : > { %v9533_v50 = vpop.eup %9532 }
 0xa7d   : > { %v7466_v18 = vmul.f32 0.6931472, %v9533_v50 }
 0xa7e   : > { %v9535_v11 = vpop.eup %9534 }
 0xa7f   : > { %v7515_v20 = vsub.f32 %v11814_v4, %v7466_v18  ;;  %v7468_v30 = vmul.f32 0.6931472, %v9535_v11 }
 0xa80   : > { %v9537_v5 = vpop.eup %9536 }
 0xa81   : > { %7547 = vst [vmem:[%s11897_s28 + $0x70] sm:$0xff] %v7515_v20  ;;  %v7516_v62 = vsub.f32 %v11818_v44, %v7468_v30  ;;  %v7462_v60 = vmul.f32 0.6931472, %v9537_v5  ;;  %v7410_v46 = vpop.xlane.xlu0 %7409 }
 0xa82   : > { %v9539_v39 = vpop.eup %9538  ;;  %9540 = vlog2.f32 %v7410_v46 }
 0xa83   : > { %7548 = vst [vmem:[%s11897_s28 + $0x78] sm:$0xff] %v7516_v62  ;;  %v7513_v47 = vsub.f32 %v11822_v13, %v7462_v60  ;;  %v7464_v29 = vmul.f32 0.6931472, %v9539_v39  ;;  %v7412_v51 = vpop.xlane.xlu1 %7411 }
 0xa84   : > { %9542 = vlog2.f32 %v7412_v51 }
 0xa85   : > { %7545 = vst [vmem:[%s11897_s28 + $0x60] sm:$0xff] %v7513_v47  ;;  %v7514_v4 = vsub.f32 %v11826_v23, %v7464_v29  ;;  %v7406_v37 = vpop.xlane.xlu0 %7405 }
 0xa86   : > { %9544 = vlog2.f32 %v7406_v37 }
 0xa87   : > { %7546 = vst [vmem:[%s11897_s28 + $0x68] sm:$0xff] %v7514_v4  ;;  %v7408_v57 = vpop.xlane.xlu1 %7407 }
 0xa88   : > { %9546 = vlog2.f32 %v7408_v57 }
 0xa8c   : > { %v9541_v44 = vpop.eup %9540 }
 0xa8d   : > { %v7474_v21 = vmul.f32 0.6931472, %v9541_v44 }
 0xa8e   : > { %v9543_v10 = vpop.eup %9542 }
 0xa8f   : > { %v7519_v28 = vsub.f32 %v11830_v45, %v7474_v21  ;;  %v7476_v13 = vmul.f32 0.6931472, %v9543_v10 }
 0xa90   : > { %v9545_v31 = vpop.eup %9544 }
 0xa91   : > { %7551 = vst [vmem:[%s11897_s28 + $0x90] sm:$0xff] %v7519_v28  ;;  %v7520_v17 = vsub.f32 %v11834_v43, %v7476_v13  ;;  %v7470_v27 = vmul.f32 0.6931472, %v9545_v31  ;;  %v7418_v23 = vpop.xlane.xlu0 %7417 }
 0xa92   : > { %v9547_v8 = vpop.eup %9546  ;;  %9548 = vlog2.f32 %v7418_v23 }
 0xa93   : > { %7552 = vst [vmem:[%s11897_s28 + $0x98] sm:$0xff] %v7520_v17  ;;  %v7517_v53 = vsub.f32 %v11838_v9, %v7470_v27  ;;  %v7472_v14 = vmul.f32 0.6931472, %v9547_v8  ;;  %v7420_v1 = vpop.xlane.xlu1 %7419 }
 0xa94   : > { %9550 = vlog2.f32 %v7420_v1 }
 0xa95   : > { %7549 = vst [vmem:[%s11897_s28 + $0x80] sm:$0xff] %v7517_v53  ;;  %v7518_v45 = vsub.f32 %v11842_v25, %v7472_v14  ;;  %v7414_v61 = vpop.xlane.xlu0 %7413 }
 0xa96   : > { %9552 = vlog2.f32 %v7414_v61 }
 0xa97   : > { %7550 = vst [vmem:[%s11897_s28 + $0x88] sm:$0xff] %v7518_v45  ;;  %v7416_v0 = vpop.xlane.xlu1 %7415 }
 0xa98   : > { %9554 = vlog2.f32 %v7416_v0 }
 0xa9c   : > { %v9549_v43 = vpop.eup %9548 }
 0xa9d   : > { %v7482_v19 = vmul.f32 0.6931472, %v9549_v43 }
 0xa9e   : > { %v9551_v6 = vpop.eup %9550 }
 0xa9f   : > { %v7523_v2 = vsub.f32 %v11846_v38, %v7482_v19  ;;  %v7484_v9 = vmul.f32 0.6931472, %v9551_v6 }
 0xaa0   : > { %v9553_v41 = vpop.eup %9552 }
 0xaa1   : > { %7555 = vst [vmem:[%s11897_s28 + $0xb0] sm:$0xff] %v7523_v2  ;;  %v7524_v32 = vsub.f32 %v11850_v40, %v7484_v9  ;;  %v7478_v42 = vmul.f32 0.6931472, %v9553_v41  ;;  %v7426_v25 = vpop.xlane.xlu0 %7425 }
 0xaa2   : > { %v9555_v48 = vpop.eup %9554  ;;  %9556 = vlog2.f32 %v7426_v25 }
 0xaa3   : > { %7556 = vst [vmem:[%s11897_s28 + $0xb8] sm:$0xff] %v7524_v32  ;;  %v7521_v34 = vsub.f32 %v11854_v52, %v7478_v42  ;;  %v7480_v26 = vmul.f32 0.6931472, %v9555_v48  ;;  %v7428_v33 = vpop.xlane.xlu1 %7427 }
 0xaa4   : > { %9558 = vlog2.f32 %v7428_v33 }
 0xaa5   : > { %7553 = vst [vmem:[%s11897_s28 + $0xa0] sm:$0xff] %v7521_v34  ;;  %v7522_v38 = vsub.f32 %v11858_v58, %v7480_v26  ;;  %v7422_v24 = vpop.xlane.xlu0 %7421 }
 0xaa6   : > { %9560 = vlog2.f32 %v7422_v24 }
 0xaa7   : > { %7554 = vst [vmem:[%s11897_s28 + $0xa8] sm:$0xff] %v7522_v38  ;;  %v7424_v7 = vpop.xlane.xlu1 %7423 }
 0xaa8   : > { %9562 = vlog2.f32 %v7424_v7 }
 0xaac   : > { %v9557_v40 = vpop.eup %9556 }
 0xaad   : > { %v7490_v3 = vmul.f32 0.6931472, %v9557_v40 }
 0xaae   : > { %v9559_v12 = vpop.eup %9558 }
 0xaaf   : > { %v7527_v55 = vsub.f32 %v11862_v16, %v7490_v3  ;;  %v7492_v52 = vmul.f32 0.6931472, %v9559_v12 }
 0xab0   : > { %v9561_v49 = vpop.eup %9560 }
 0xab1   : > { %7559 = vst [vmem:[%s11897_s28 + $0xd0] sm:$0xff] %v7527_v55  ;;  %v7528_v56 = vsub.f32 %v11866_v54, %v7492_v52  ;;  %v7486_v50 = vmul.f32 0.6931472, %v9561_v49 }
 0xab2   : > { %v9563_v58 = vpop.eup %9562  ;;  %v7430_v18 = vpop.xlane.xlu0 %7429 }
 0xab3   : > { %7560 = vst [vmem:[%s11897_s28 + $0xd8] sm:$0xff] %v7528_v56  ;;  %v7525_v11 = vsub.f32 %v11870_v36, %v7486_v50  ;;  %v7488_v20 = vmul.f32 0.6931472, %v9563_v58  ;;  %9564 = vlog2.f32 %v7430_v18 }
 0xab4   : > { %v7432_v30 = vpop.xlane.xlu1 %7431 }
 0xab5   : > { %7557 = vst [vmem:[%s11897_s28 + $0xc0] sm:$0xff] %v7525_v11  ;;  %v7526_v5 = vsub.f32 %v11874_v35, %v7488_v20  ;;  %9566 = vlog2.f32 %v7432_v30 }
 0xab6   : > { %v7434_v16 = vpop.xlane.xlu0 %7433 }
 0xab7   : > { %7558 = vst [vmem:[%s11897_s28 + $0xc8] sm:$0xff] %v7526_v5  ;;  %9568 = vlog2.f32 %v7434_v16 }
 0xab8   : > { %v7436_v54 = vpop.xlane.xlu1 %7435 }
 0xab9   : > { %9570 = vlog2.f32 %v7436_v54 }
 0xabd   : > { %v9565_v62 = vpop.eup %9564 }
 0xabe   : > { %v7494_v60 = vmul.f32 0.6931472, %v9565_v62 }
 0xabf   : > { %v9567_v36 = vpop.eup %9566 }
 0xac0   : > { %v7529_v46 = vsub.f32 %v11878_v63, %v7494_v60  ;;  %v7496_v39 = vmul.f32 0.6931472, %v9567_v36 }
 0xac1   : > { %v9569_v47 = vpop.eup %9568 }
 0xac2   : > { %7561 = vst [vmem:[%s11897_s28 + $0xe0] sm:$0xff] %v7529_v46  ;;  %v7530_v35 = vsub.f32 %v11882_v22, %v7496_v39  ;;  %v7498_v29 = vmul.f32 0.6931472, %v9569_v47 }
 0xac3   : > { %v9571_v51 = vpop.eup %9570 }
 0xac4   : > { %7562 = vst [vmem:[%s11897_s28 + $0xe8] sm:$0xff] %v7530_v35  ;;  %v7531_v4 = vsub.f32 %v11886_v59, %v7498_v29  ;;  %v7500_v37 = vmul.f32 0.6931472, %v9571_v51 }
 0xac6   : > { %7563 = vst [vmem:[%s11897_s28 + $0xf0] sm:$0xff] %v7531_v4  ;;  %v7532_v63 = vsub.f32 %v11890_v15, %v7500_v37 }
 0xac8   : > { %7564 = vst [vmem:[%s11897_s28 + $0xf8] sm:$0xff] %v7532_v63 }
 0xac9   : > { %9865 = shalt.err (!%p9862_p1)
}
 0xaca   : > { %s9866_s24 = scalar_lea.hbm %s11964_s16, 4096  ;;  %s9870_s22 = scalar_lea.hbm %s12094_s27, 8192 }
 0xacb   : > { %p9867_p2 = scmp.ne.s32.totalorder %s11964_s16, %s9866_s24  ;;  %p9871_p7 = scmp.lt.u32.totalorder %s11964_s16, %s12094_s27 }
 0xacc   : > { %p9872_p8 = scmp.lt.u32.totalorder %s9870_s22, %s9866_s24  ;;  %p9874_p13 = scmp.lt.u32.totalorder %s9866_s24, %s11964_s16 }
 0xacd   : > { %p9868_p3 = pnand %p9867_p2, %p12095_p0 }
 0xace   : > { %p9873_p11 = por %p9872_p8, %p9871_p7 }
 0xacf   : > { %p9869_p4 = pneg %p9868_p3 }
 0xad0   : > { %p9875_p5 = por %p9874_p13, %p9873_p11 }
 0xad2   : > { %p9876_p6 = pnand %p9875_p5, %p9869_p4 }
 0xad4   : > { %9879 = shalt.err (!%p9876_p6)
}
 0xad5   : > { %s9961_s20 = smov 128   ;;  %s9962_s21 = smov 8  }
 0xad6   : > { %8784 = dma.vmem_to_hbm [thread:$0]  (%p12095_p0), %s11966_s29, 4096, %s11964_s16, %s11973_s25, %s9961_s20, %s9961_s20, %s9962_s21  }
 0xad7 PF: > { %s12096_s30 = sld [smem:[#allocation30_spill]]  ;;  %s12097_s18 = sld [smem:[#allocation27_spill]] }
 0xad8   : > { %s12098_s26 = sld [smem:[#allocation34_spill]] }
 0xadd   : > { %p8841_p9 = scmp.ge.s32.totalorder %s12096_s30, 2  ;;  %s7595_s19 = sand.u32 1, %s12097_s18  }
 0xade   : > { %p12099_p10 = scmp.ne.s32.totalorder %s12098_s26, 0  ;;  %s7596_s15 = scalar_lea.sflag [#allocation4], %s7595_s19 }
 0xae0   : > { %p8818_p12 = pnand %p8841_p9, %p12099_p10 }
 0xae2   : > { %9921 = dma.done.wait (!%p8818_p12), %s7596_s15, 4096  }
 0xae3   : > { %9923 = vsyncadd (!%p8818_p12), %s7596_s15, 4294963200  ;;  %s12100_s24 = sld [smem:[#allocation31_spill]]  ;;  %s12101_s21 = sld [smem:[#allocation28_spill]] }
 0xae4   : > { %s12102_s22 = sld [smem:[#allocation29_spill]]  ;;  %s12103_s23 = sld [smem:[#allocation32_spill]] }
 0xae9   : > { %p32_p1 = scmp.ge.s32.totalorder %s12100_s24, 4  }
 0xaeb   :  { %34 = sbr.rel (!%p32_p1) target bundleno = 14 (0xe), region = 160 }
 0xaf2   :  { %7601 = vsyncpa [#allocation3], 1 }
 0xaf3   :  { %7603 = vsyncpa [#allocation3 + $0x1], 1 }
 0xaf4   :  { %7604 = vsyncpa [#allocation6], 1 }
 0xaf5   :  { %7605 = vsyncpa [#allocation9], 1 }
 0xaf6   :  { %7606 = vsyncpa [#allocation12], 1 }
 0xaf7   :  { %7607 = vsyncpa [#allocation15], 1 }
 0xaf8   :  { %7608 = vsyncpa [#allocation18], 1 }
 0xaf9   :  { %7609 = vsyncpa [#allocation4], 1 }
 0xafa   :  { %7611 = vsyncpa [#allocation4 + $0x1], 1 }

</bundles_post_ra>
